<compile_context>
chip_gen: v5e
topology: v5e:2x2
jax: 0.10.0
libtpu: 0.0.40
codegen_flags: <defaults>
</compile_context>

<pallas_src>
import jax
import jax.numpy as jnp
from jax.experimental import pallas as pl
from jax.experimental.pallas import tpu as pltpu

_LANE = 128


def _round_up(n, m):
    return ((n + m - 1) // m) * m


# ---------------------------------------------------------------------------
# Generation-aware configuration
# ---------------------------------------------------------------------------


def _tpu_generation():
    """(multi_tensorcore, vmem_capacity_bytes), with conservative fallbacks."""
    vmem = None
    try:
        vmem = int(pltpu.get_tpu_info().vmem_capacity_bytes)
    except Exception:
        vmem = None
    kind = ""
    try:
        kind = jax.devices()[0].device_kind.lower()
    except Exception:
        pass
    is_v7 = "7" in kind  # v7x: 2 TensorCores/chip, 64 MiB VMEM per TC
    if vmem is None:
        vmem = (64 << 20) if is_v7 else (128 << 20)
    return is_v7, vmem


_MULTI_TC, _VMEM_BYTES = _tpu_generation()
_SMALL_VMEM = _VMEM_BYTES <= (64 << 20)

# Per-buffer weight-tile *element* budget.  The streamed tile is int8, but the
# in-kernel upcast to bf16 costs another ~2 B/elem and the stream is 2-3-way
# buffered, so ~5 B/elem total.  8M elems ~= 40 MiB of weight-path VMEM on the
# 128 MiB parts (v5e/v6e); 3M elems ~= 15 MiB on v7x's 64 MiB VMEM.
_W_TILE_ELEMS = (3 << 20) if _SMALL_VMEM else (8 << 20)
# Explicit scoped-VMEM cap: leaves headroom for compiler-internal scratch.
_VMEM_LIMIT_CAP = (48 << 20) if _SMALL_VMEM else (100 << 20)


def _largest_tile(dim, upper, multiple=_LANE):
    """Largest multiple of `multiple` that divides `dim` and is <= upper."""
    best = None
    t = multiple
    lim = min(dim, upper)
    while t <= lim:
        if dim % t == 0:
            best = t
        t += multiple
    return best


def _pick_tiles(K, N, elem_budget):
    """Choose (tk, tn) for a (K, N) weight; K and N are multiples of 128."""
    if _MULTI_TC and N % 256 == 0 and (N // 2) * _LANE <= elem_budget:
        tn = N // 2  # keep a 2-wide parallel axis for v7x's two TensorCores
    elif N * _LANE <= elem_budget:
        tn = N       # single lane-dense full-width output slab (1 TC chips)
    else:
        tn = _largest_tile(N, max(_LANE, elem_budget // _LANE)) or _LANE
    # x is fully VMEM-resident, so tk is only budget-limited.
    tk = _largest_tile(K, max(_LANE, elem_budget // tn)) or _LANE
    return tk, tn


# ---------------------------------------------------------------------------
# Fused linear + dequant + bias + sigmoid kernel
# ---------------------------------------------------------------------------


def _make_linear_sigmoid_kernel(tk):
    def kernel(x_ref, w_ref, s_ref, b_ref, o_ref):
        # Grid = (j over output-feature tiles [parallel],
        #         k over reduction tiles      [arbitrary, innermost]).
        k = pl.program_id(1)

        # o_ref's index_map is constant in k, so the f32 output block is
        # VMEM-resident across the whole reduction: accumulate directly in it.
        @pl.when(k == 0)
        def _():
            o_ref[...] = jnp.zeros_like(o_ref)

        # x is fully VMEM-resident; slice out the k-th reduction chunk.
        off = pl.multiple_of(k * tk, tk)
        x_blk = x_ref[:, pl.ds(off, tk)]
        # int8 is a storage/streaming format only: upcast to bf16 for the MXU
        # (|w_q| <= 127 is exact in bf16); no integer matmul path is used.
        w_blk = w_ref[...].astype(jnp.float32).astype(jnp.bfloat16)
        o_ref[...] += jnp.dot(x_blk, w_blk, preferred_element_type=jnp.float32)

        @pl.when(k == pl.num_programs(1) - 1)
        def _():
            # Dequantize the accumulator, add bias, apply sigmoid.
            z = o_ref[...] * s_ref[...] + b_ref[...]
            # Clamp so exp(-z) cannot overflow for strongly negative z (the
            # sigmoid error from clamping at +-40 is < 1e-17).  exp and the
            # approximate reciprocal both run on the EUP slot.
            z = jnp.clip(z, -40.0, 40.0)
            o_ref[...] = pl.reciprocal(1.0 + jnp.exp(-z), approx=True)

    return kernel


def linear_sigmoid(x, w_q, scale, b, n_out, *, tile_elems=None):
    """o = sigmoid(x @ (w_q * scale) + b)[:, :n_out], fused in one Pallas kernel.

    x:     (M, K_real) float   -- cast to bf16, zero-padded to K_pad columns
    w_q:   (K_pad, N_pad) int8 -- per-column symmetric quantized weight
    scale: (1, N_pad)  f32     -- dequantization scale per output column
    b:     (1, N_pad)  f32     -- bias (padded columns are zero)
    """
    M, K_real = x.shape
    K_pad, N_pad = w_q.shape
    assert K_pad % _LANE == 0 and N_pad % _LANE == 0
    assert K_pad >= K_real and scale.shape == (1, N_pad) and b.shape == (1, N_pad)

    if K_pad > K_real:
        # Zero-pad the activation row; the matching weight rows are zero too.
        x = jnp.pad(x, ((0, 0), (0, K_pad - K_real)))
    x16 = x.astype(jnp.bfloat16)

    elem_budget = _W_TILE_ELEMS if tile_elems is None else tile_elems
    tk, tn = _pick_tiles(K_pad, N_pad, elem_budget)
    grid = (N_pad // tn, K_pad // tk)

    # Multi-buffer the weight stream when there is actually a stream to hide.
    w_index = lambda j, k: (k, j)
    n_wbuf = 2
    if grid[1] > 1:
        try:
            w_spec = pl.BlockSpec((tk, tn), w_index, pipeline_mode=pl.Buffered(3))
            n_wbuf = 3
        except Exception:  # older jax without pipeline_mode / Buffered
            w_spec = pl.BlockSpec((tk, tn), w_index)
    else:
        w_spec = pl.BlockSpec((tk, tn), w_index)

    # Rough VMEM footprint -> explicit, generation-safe scoped-VMEM limit.
    est = (
        2 * M * K_pad * 2          # resident bf16 x (worst case double-buffered)
        + n_wbuf * tk * tn         # int8 weight stream buffers
        + 2 * tk * tn              # bf16 upcast of one weight tile
        + 2 * (2 * tn * 4)         # scale + bias tiles (double-buffered)
        + 2 * M * tn * 4           # resident f32 output block
    )
    vmem_limit = int(min(_VMEM_LIMIT_CAP, max(2 * est, 16 << 20)))

    out = pl.pallas_call(
        _make_linear_sigmoid_kernel(tk),
        out_shape=jax.ShapeDtypeStruct((M, N_pad), jnp.float32),
        grid_spec=pltpu.PrefetchScalarGridSpec(
            num_scalar_prefetch=0,
            grid=grid,
            in_specs=[
                # x: fully VMEM-resident (constant block index -> one DMA).
                pl.BlockSpec((M, K_pad), lambda j, k: (0, 0)),
                # int8 weight tile, streamed along k for each output tile j.
                w_spec,
                # per-column dequantization scale and bias tiles.
                pl.BlockSpec((1, tn), lambda j, k: (0, j)),
                pl.BlockSpec((1, tn), lambda j, k: (0, j)),
            ],
            out_specs=pl.BlockSpec((M, tn), lambda j, k: (0, j)),
        ),
        compiler_params=pltpu.CompilerParams(
            dimension_semantics=("parallel", "arbitrary"),
            vmem_limit_bytes=vmem_limit,
        ),
    )(x16, w_q, scale, b)
    return out[:, :n_out]


# ---------------------------------------------------------------------------
# Net
# ---------------------------------------------------------------------------


def init_linear(key, in_features, out_features):
    """PyTorch-style nn.Linear init: U(-1/sqrt(in), 1/sqrt(in)).

    The weight is stored (in, out) -- the transpose of torch's (out, in) --
    zero-padded to lane multiples and quantized to int8 with a per-output-
    column scale, since weight streaming dominates HBM traffic at batch M = 2.
    """
    kw, kb = jax.random.split(key)
    bound = 1.0 / jnp.sqrt(jnp.float32(in_features))
    w = jax.random.uniform(kw, (in_features, out_features), jnp.float32, -bound, bound)
    b = jax.random.uniform(kb, (out_features,), jnp.float32, -bound, bound)

    K_pad = _round_up(in_features, _LANE)
    N_pad = _round_up(out_features, _LANE)
    w_pad = jnp.zeros((K_pad, N_pad), jnp.float32).at[:in_features, :out_features].set(w)
    b_pad = jnp.zeros((1, N_pad), jnp.float32).at[0, :out_features].set(b)

    # Symmetric per-output-column int8 quantization; padded columns get a tiny
    # scale and all-zero codes, so they dequantize to exactly zero.
    amax = jnp.max(jnp.abs(w_pad), axis=0, keepdims=True)
    scale = jnp.maximum(amax, 1e-12) / 127.0
    w_q = jnp.clip(jnp.round(w_pad / scale), -127.0, 127.0).astype(jnp.int8)
    return w_q, scale, b_pad, out_features


def net_forward(x, params):
    """Net.forward: x.view(-1, num_flat_features) then 6x (Linear -> sigmoid)."""
    h = x.reshape(x.shape[0], -1)
    # TODO(synk): fc3+fc4 (the tiny bottleneck layers) could be fused into one
    # pallas_call with both weight matrices VMEM-resident; kept as separate
    # calls for clarity -- the wide fc1/fc6 layers dominate runtime anyway.
    for w_q, scale, b, n_out in params:
        h = linear_sigmoid(h, w_q, scale, b, n_out)
    return h


def net_reference(x, params):
    """Pure-JAX reference with the same int8/bf16/f32 numerics as the kernels."""
    h = x.reshape(x.shape[0], -1)
    for w_q, scale, b, n_out in params:
        K_pad = w_q.shape[0]
        hp = jnp.pad(h, ((0, 0), (0, K_pad - h.shape[1])))
        z = jnp.dot(hp.astype(jnp.bfloat16), w_q.astype(jnp.bfloat16),
                    preferred_element_type=jnp.float32) * scale + b
        h = jax.nn.sigmoid(z)[:, :n_out]
    return h


if __name__ == "__main__":
    # Small synthetic stand-ins for 232302 -> 5686 -> 5686 -> 256 -> 5686 ->
    # 5686 -> 232302.  D_IN / H are deliberately NOT multiples of 128 so the
    # zero-padding path (required for the real, non-lane-aligned dims) is
    # exercised.
    BATCH = 2
    D_IN = 1000   # stands in for 232302 (flattened from 4 x 250 below)
    H = 600       # stands in for 5686
    Z = 256       # bottleneck (same as the original)

    key = jax.random.PRNGKey(0)
    keys = jax.random.split(key, 7)

    layer_dims = [
        (D_IN, H),   # fc1
        (H, H),      # fc2
        (H, Z),      # fc3
        (Z, H),      # fc4
        (H, H),      # fc5
        (H, D_IN),   # fc6
    ]
    params = [
        init_linear(keys[i], din, dout) for i, (din, dout) in enumerate(layer_dims)
    ]

    # Multi-dim input to exercise the view(-1, num_flat_features) flatten.
    x = jax.random.normal(keys[6], (BATCH, 4, 250), jnp.float32)

    fwd = jax.jit(lambda inp: net_forward(inp, params))
    out = jax.block_until_ready(fwd(x))

    # Sanity: reconstruction shape matches the flattened input, values finite
    # and (up to approx-reciprocal error) inside [0, 1].
    assert out.shape == (BATCH, D_IN)
    assert bool(jnp.all(jnp.isfinite(out)))
    assert bool(jnp.all((out >= -1e-3) & (out <= 1.0 + 1e-3)))

    # Cross-check against a pure-JAX reference with the same int8-weight /
    # bf16-activation / f32-accumulate numerics (tolerance covers the EUP
    # approximate reciprocal compounding over 6 layers).
    ref = net_reference(x, params)
    assert bool(jnp.allclose(out, ref, atol=2e-2, rtol=2e-2)), (
        float(jnp.max(jnp.abs(out - ref))))

    # Extra check: force small tiles on one layer so the multi-step (j, k)
    # grid -- accumulation in the grid-resident output block plus the 3-deep
    # weight stream -- is exercised and verified too.
    w_q0, scale0, b0, n_out0 = params[0]
    h0 = x.reshape(BATCH, -1)
    small_fn = jax.jit(
        lambda a: linear_sigmoid(a, w_q0, scale0, b0, n_out0,
                                 tile_elems=_LANE * 256))
    small = jax.block_until_ready(small_fn(h0))
    hp0 = jnp.pad(h0, ((0, 0), (0, w_q0.shape[0] - h0.shape[1])))
    z0 = jnp.dot(hp0.astype(jnp.bfloat16), w_q0.astype(jnp.bfloat16),
                 preferred_element_type=jnp.float32) * scale0 + b0
    ref0 = jax.nn.sigmoid(z0)[:, :n_out0]
    assert bool(jnp.allclose(small, ref0, atol=2e-2, rtol=2e-2)), (
        float(jnp.max(jnp.abs(small - ref0))))

    print("KERNEL_OK")
</pallas_src>

<mosaic_0001>
module attributes {stable_mosaic.version = 11 : i64} {
  func.func @kernel(%arg0: i32, %arg1: i32, %arg2: memref<2x1024xbf16, #tpu.memory_space<vmem>>, %arg3: memref<1024x640xi8, #tpu.memory_space<vmem>>, %arg4: memref<1x640xf32, #tpu.memory_space<vmem>>, %arg5: memref<1x640xf32, #tpu.memory_space<vmem>>, %arg6: memref<2x640xf32, #tpu.memory_space<vmem>>) attributes {dimension_semantics = [#tpu.dimension_semantics<parallel>, #tpu.dimension_semantics<arbitrary>], iteration_bounds = array<i64: 1, 1>, scalar_prefetch = 0 : i64, scratch_operands = 0 : i64, tpu.core_type = #tpu.core_type<tc>, window_params = [{pipeline_mode = #tpu.pipeline_mode<synchronous>, transform_indices = @transform_0, window_bounds = array<i64: 2, 1024>}, {transform_indices = @transform_1, window_bounds = array<i64: 1024, 640>}, {transform_indices = @transform_2, window_bounds = array<i64: 1, 640>}, {transform_indices = @transform_3, window_bounds = array<i64: 1, 640>}, {transform_indices = @transform_4, window_bounds = array<i64: 2, 640>}]} {
    %c0_i32 = arith.constant 0 : i32
    %0 = arith.cmpi eq, %arg1, %c0_i32 : i32
    %1 = arith.extui %0 : i1 to i32
    %c0_i32_0 = arith.constant 0 : i32
    %2 = arith.cmpi ne, %1, %c0_i32_0 : i32
    scf.if %2 {
      %cst_9 = arith.constant 0.000000e+00 : f32
      %17 = vector.broadcast %cst_9 : f32 to vector<2x640xf32>
      %c0_10 = arith.constant 0 : index
      %c0_11 = arith.constant 0 : index
      %18 = vector.load %arg6[%c0_10, %c0_11] : memref<2x640xf32, #tpu.memory_space<vmem>>, vector<2x640xf32>
      tpu.vector_store %arg6[%c0_10, %c0_11], %17 {strides = array<i32>} : memref<2x640xf32, #tpu.memory_space<vmem>>, vector<2x640xf32>,
    } else {
    }
    %c1024_i32 = arith.constant 1024 : i32
    %3 = arith.muli %arg1, %c1024_i32 : i32
    %4 = tpu.assume_multiple %3, 1024 : i32
    %c0 = arith.constant 0 : index
    %5 = arith.index_cast %4 : i32 to index
    %6 = vector.load %arg2[%c0, %5] : memref<2x1024xbf16, #tpu.memory_space<vmem>>, vector<2x1024xbf16>
    %c0_1 = arith.constant 0 : index
    %c0_2 = arith.constant 0 : index
    %7 = vector.load %arg3[%c0_1, %c0_2] : memref<1024x640xi8, #tpu.memory_space<vmem>>, vector<1024x640xi8>
    %8 = arith.sitofp %7 : vector<1024x640xi8> to vector<1024x640xf32>
    %9 = arith.truncf %8 : vector<1024x640xf32> to vector<1024x640xbf16>
    %c0_3 = arith.constant 0 : index
    %c0_4 = arith.constant 0 : index
    %10 = vector.load %arg6[%c0_3, %c0_4] : memref<2x640xf32, #tpu.memory_space<vmem>>, vector<2x640xf32>
    %cst = arith.constant dense<0.000000e+00> : vector<2x640xf32>
    %11 = tpu.matmul %6, %9, %cst {dimension_numbers = #tpu.dot_dimension_numbers<[1], [0], [0], [1], [0, 0, 1, 1], [], []>} : vector<2x1024xbf16>, vector<1024x640xbf16>, vector<2x640xf32> -> vector<2x640xf32>
    %12 = arith.addf %10, %11 : vector<2x640xf32>
    %c0_5 = arith.constant 0 : index
    %c0_6 = arith.constant 0 : index
    %13 = vector.load %arg6[%c0_5, %c0_6] : memref<2x640xf32, #tpu.memory_space<vmem>>, vector<2x640xf32>
    tpu.vector_store %arg6[%c0_5, %c0_6], %12 {strides = array<i32>} : memref<2x640xf32, #tpu.memory_space<vmem>>, vector<2x640xf32>,
    %c0_i32_7 = arith.constant 0 : i32
    %14 = arith.cmpi eq, %arg1, %c0_i32_7 : i32
    %15 = arith.extui %14 : i1 to i32
    %c0_i32_8 = arith.constant 0 : i32
    %16 = arith.cmpi ne, %15, %c0_i32_8 : i32
    scf.if %16 {
      %c0_9 = arith.constant 0 : index
      %c0_10 = arith.constant 0 : index
      %17 = vector.load %arg6[%c0_9, %c0_10] : memref<2x640xf32, #tpu.memory_space<vmem>>, vector<2x640xf32>
      %c0_11 = arith.constant 0 : index
      %c0_12 = arith.constant 0 : index
      %18 = vector.load %arg4[%c0_11, %c0_12] : memref<1x640xf32, #tpu.memory_space<vmem>>, vector<1x640xf32>
      %19 = vector.broadcast %18 : vector<1x640xf32> to vector<2x640xf32>
      %20 = arith.mulf %17, %19 : vector<2x640xf32>
      %c0_13 = arith.constant 0 : index
      %c0_14 = arith.constant 0 : index
      %21 = vector.load %arg5[%c0_13, %c0_14] : memref<1x640xf32, #tpu.memory_space<vmem>>, vector<1x640xf32>
      %22 = vector.broadcast %21 : vector<1x640xf32> to vector<2x640xf32>
      %23 = arith.addf %20, %22 : vector<2x640xf32>
      %cst_15 = arith.constant -4.000000e+01 : f32
      %cst_16 = arith.constant 4.000000e+01 : f32
      %24 = vector.broadcast %cst_15 : f32 to vector<2x640xf32>
      %25 = arith.maximumf %24, %23 : vector<2x640xf32>
      %26 = vector.broadcast %cst_16 : f32 to vector<2x640xf32>
      %27 = arith.minimumf %26, %25 : vector<2x640xf32>
      %cst_17 = arith.constant 0.000000e+00 : f32
      %28 = vector.broadcast %cst_17 : f32 to vector<2x640xf32>
      %29 = arith.subf %28, %27 : vector<2x640xf32>
      %30 = math.exp %29 : vector<2x640xf32>
      %cst_18 = arith.constant 1.000000e+00 : f32
      %31 = vector.broadcast %cst_18 : f32 to vector<2x640xf32>
      %32 = arith.addf %31, %30 : vector<2x640xf32>
      %33 = tpu.reciprocal %32 {approx = true} : vector<2x640xf32> -> vector<2x640xf32>
      %c0_19 = arith.constant 0 : index
      %c0_20 = arith.constant 0 : index
      %34 = vector.load %arg6[%c0_19, %c0_20] : memref<2x640xf32, #tpu.memory_space<vmem>>, vector<2x640xf32>
      tpu.vector_store %arg6[%c0_19, %c0_20], %33 {strides = array<i32>} : memref<2x640xf32, #tpu.memory_space<vmem>>, vector<2x640xf32>,
    } else {
    }
    return
  }
  func.func @transform_0(%arg0: i32, %arg1: i32) -> (i32, i32) {
    %c0_i32 = arith.constant 0 : i32
    %c0_i32_0 = arith.constant 0 : i32
    %c0_i32_1 = arith.constant 0 : i32
    return %c0_i32, %c0_i32_0 : i32, i32
  }
  func.func @transform_1(%arg0: i32, %arg1: i32) -> (i32, i32) {
    %c0_i32 = arith.constant 0 : i32
    return %arg1, %arg0 : i32, i32
  }
  func.func @transform_2(%arg0: i32, %arg1: i32) -> (i32, i32) {
    %c0_i32 = arith.constant 0 : i32
    %c0_i32_0 = arith.constant 0 : i32
    return %c0_i32, %arg0 : i32, i32
  }
  func.func @transform_3(%arg0: i32, %arg1: i32) -> (i32, i32) {
    %c0_i32 = arith.constant 0 : i32
    %c0_i32_0 = arith.constant 0 : i32
    return %c0_i32, %arg0 : i32, i32
  }
  func.func @transform_4(%arg0: i32, %arg1: i32) -> (i32, i32) {
    %c0_i32 = arith.constant 0 : i32
    %c0_i32_0 = arith.constant 0 : i32
    return %c0_i32, %arg0 : i32, i32
  }
}

module attributes {stable_mosaic.version = 11 : i64} {
  func.func @kernel(%arg0: i32, %arg1: i32, %arg2: memref<2x640xbf16, #tpu.memory_space<vmem>>, %arg3: memref<640x256xi8, #tpu.memory_space<vmem>>, %arg4: memref<1x256xf32, #tpu.memory_space<vmem>>, %arg5: memref<1x256xf32, #tpu.memory_space<vmem>>, %arg6: memref<2x256xf32, #tpu.memory_space<vmem>>) attributes {dimension_semantics = [#tpu.dimension_semantics<parallel>, #tpu.dimension_semantics<arbitrary>], iteration_bounds = array<i64: 1, 1>, scalar_prefetch = 0 : i64, scratch_operands = 0 : i64, tpu.core_type = #tpu.core_type<tc>, window_params = [{pipeline_mode = #tpu.pipeline_mode<synchronous>, transform_indices = @transform_0, window_bounds = array<i64: 2, 640>}, {transform_indices = @transform_1, window_bounds = array<i64: 640, 256>}, {transform_indices = @transform_2, window_bounds = array<i64: 1, 256>}, {transform_indices = @transform_3, window_bounds = array<i64: 1, 256>}, {transform_indices = @transform_4, window_bounds = array<i64: 2, 256>}]} {
    %c0_i32 = arith.constant 0 : i32
    %0 = arith.cmpi eq, %arg1, %c0_i32 : i32
    %1 = arith.extui %0 : i1 to i32
    %c0_i32_0 = arith.constant 0 : i32
    %2 = arith.cmpi ne, %1, %c0_i32_0 : i32
    scf.if %2 {
      %cst_9 = arith.constant 0.000000e+00 : f32
      %17 = vector.broadcast %cst_9 : f32 to vector<2x256xf32>
      %c0_10 = arith.constant 0 : index
      %c0_11 = arith.constant 0 : index
      %18 = vector.load %arg6[%c0_10, %c0_11] : memref<2x256xf32, #tpu.memory_space<vmem>>, vector<2x256xf32>
      tpu.vector_store %arg6[%c0_10, %c0_11], %17 {strides = array<i32>} : memref<2x256xf32, #tpu.memory_space<vmem>>, vector<2x256xf32>,
    } else {
    }
    %c640_i32 = arith.constant 640 : i32
    %3 = arith.muli %arg1, %c640_i32 : i32
    %4 = tpu.assume_multiple %3, 640 : i32
    %c0 = arith.constant 0 : index
    %5 = arith.index_cast %4 : i32 to index
    %6 = vector.load %arg2[%c0, %5] : memref<2x640xbf16, #tpu.memory_space<vmem>>, vector<2x640xbf16>
    %c0_1 = arith.constant 0 : index
    %c0_2 = arith.constant 0 : index
    %7 = vector.load %arg3[%c0_1, %c0_2] : memref<640x256xi8, #tpu.memory_space<vmem>>, vector<640x256xi8>
    %8 = arith.sitofp %7 : vector<640x256xi8> to vector<640x256xf32>
    %9 = arith.truncf %8 : vector<640x256xf32> to vector<640x256xbf16>
    %c0_3 = arith.constant 0 : index
    %c0_4 = arith.constant 0 : index
    %10 = vector.load %arg6[%c0_3, %c0_4] : memref<2x256xf32, #tpu.memory_space<vmem>>, vector<2x256xf32>
    %cst = arith.constant dense<0.000000e+00> : vector<2x256xf32>
    %11 = tpu.matmul %6, %9, %cst {dimension_numbers = #tpu.dot_dimension_numbers<[1], [0], [0], [1], [0, 0, 1, 1], [], []>} : vector<2x640xbf16>, vector<640x256xbf16>, vector<2x256xf32> -> vector<2x256xf32>
    %12 = arith.addf %10, %11 : vector<2x256xf32>
    %c0_5 = arith.constant 0 : index
    %c0_6 = arith.constant 0 : index
    %13 = vector.load %arg6[%c0_5, %c0_6] : memref<2x256xf32, #tpu.memory_space<vmem>>, vector<2x256xf32>
    tpu.vector_store %arg6[%c0_5, %c0_6], %12 {strides = array<i32>} : memref<2x256xf32, #tpu.memory_space<vmem>>, vector<2x256xf32>,
    %c0_i32_7 = arith.constant 0 : i32
    %14 = arith.cmpi eq, %arg1, %c0_i32_7 : i32
    %15 = arith.extui %14 : i1 to i32
    %c0_i32_8 = arith.constant 0 : i32
    %16 = arith.cmpi ne, %15, %c0_i32_8 : i32
    scf.if %16 {
      %c0_9 = arith.constant 0 : index
      %c0_10 = arith.constant 0 : index
      %17 = vector.load %arg6[%c0_9, %c0_10] : memref<2x256xf32, #tpu.memory_space<vmem>>, vector<2x256xf32>
      %c0_11 = arith.constant 0 : index
      %c0_12 = arith.constant 0 : index
      %18 = vector.load %arg4[%c0_11, %c0_12] : memref<1x256xf32, #tpu.memory_space<vmem>>, vector<1x256xf32>
      %19 = vector.broadcast %18 : vector<1x256xf32> to vector<2x256xf32>
      %20 = arith.mulf %17, %19 : vector<2x256xf32>
      %c0_13 = arith.constant 0 : index
      %c0_14 = arith.constant 0 : index
      %21 = vector.load %arg5[%c0_13, %c0_14] : memref<1x256xf32, #tpu.memory_space<vmem>>, vector<1x256xf32>
      %22 = vector.broadcast %21 : vector<1x256xf32> to vector<2x256xf32>
      %23 = arith.addf %20, %22 : vector<2x256xf32>
      %cst_15 = arith.constant -4.000000e+01 : f32
      %cst_16 = arith.constant 4.000000e+01 : f32
      %24 = vector.broadcast %cst_15 : f32 to vector<2x256xf32>
      %25 = arith.maximumf %24, %23 : vector<2x256xf32>
      %26 = vector.broadcast %cst_16 : f32 to vector<2x256xf32>
      %27 = arith.minimumf %26, %25 : vector<2x256xf32>
      %cst_17 = arith.constant 0.000000e+00 : f32
      %28 = vector.broadcast %cst_17 : f32 to vector<2x256xf32>
      %29 = arith.subf %28, %27 : vector<2x256xf32>
      %30 = math.exp %29 : vector<2x256xf32>
      %cst_18 = arith.constant 1.000000e+00 : f32
      %31 = vector.broadcast %cst_18 : f32 to vector<2x256xf32>
      %32 = arith.addf %31, %30 : vector<2x256xf32>
      %33 = tpu.reciprocal %32 {approx = true} : vector<2x256xf32> -> vector<2x256xf32>
      %c0_19 = arith.constant 0 : index
      %c0_20 = arith.constant 0 : index
      %34 = vector.load %arg6[%c0_19, %c0_20] : memref<2x256xf32, #tpu.memory_space<vmem>>, vector<2x256xf32>
      tpu.vector_store %arg6[%c0_19, %c0_20], %33 {strides = array<i32>} : memref<2x256xf32, #tpu.memory_space<vmem>>, vector<2x256xf32>,
    } else {
    }
    return
  }
  func.func @transform_0(%arg0: i32, %arg1: i32) -> (i32, i32) {
    %c0_i32 = arith.constant 0 : i32
    %c0_i32_0 = arith.constant 0 : i32
    %c0_i32_1 = arith.constant 0 : i32
    return %c0_i32, %c0_i32_0 : i32, i32
  }
  func.func @transform_1(%arg0: i32, %arg1: i32) -> (i32, i32) {
    %c0_i32 = arith.constant 0 : i32
    return %arg1, %arg0 : i32, i32
  }
  func.func @transform_2(%arg0: i32, %arg1: i32) -> (i32, i32) {
    %c0_i32 = arith.constant 0 : i32
    %c0_i32_0 = arith.constant 0 : i32
    return %c0_i32, %arg0 : i32, i32
  }
  func.func @transform_3(%arg0: i32, %arg1: i32) -> (i32, i32) {
    %c0_i32 = arith.constant 0 : i32
    %c0_i32_0 = arith.constant 0 : i32
    return %c0_i32, %arg0 : i32, i32
  }
  func.func @transform_4(%arg0: i32, %arg1: i32) -> (i32, i32) {
    %c0_i32 = arith.constant 0 : i32
    %c0_i32_0 = arith.constant 0 : i32
    return %c0_i32, %arg0 : i32, i32
  }
}

module attributes {stable_mosaic.version = 11 : i64} {
  func.func @kernel(%arg0: i32, %arg1: i32, %arg2: memref<2x640xbf16, #tpu.memory_space<vmem>>, %arg3: memref<640x640xi8, #tpu.memory_space<vmem>>, %arg4: memref<1x640xf32, #tpu.memory_space<vmem>>, %arg5: memref<1x640xf32, #tpu.memory_space<vmem>>, %arg6: memref<2x640xf32, #tpu.memory_space<vmem>>) attributes {dimension_semantics = [#tpu.dimension_semantics<parallel>, #tpu.dimension_semantics<arbitrary>], iteration_bounds = array<i64: 1, 1>, scalar_prefetch = 0 : i64, scratch_operands = 0 : i64, tpu.core_type = #tpu.core_type<tc>, window_params = [{pipeline_mode = #tpu.pipeline_mode<synchronous>, transform_indices = @transform_0, window_bounds = array<i64: 2, 640>}, {transform_indices = @transform_1, window_bounds = array<i64: 640, 640>}, {transform_indices = @transform_2, window_bounds = array<i64: 1, 640>}, {transform_indices = @transform_3, window_bounds = array<i64: 1, 640>}, {transform_indices = @transform_4, window_bounds = array<i64: 2, 640>}]} {
    %c0_i32 = arith.constant 0 : i32
    %0 = arith.cmpi eq, %arg1, %c0_i32 : i32
    %1 = arith.extui %0 : i1 to i32
    %c0_i32_0 = arith.constant 0 : i32
    %2 = arith.cmpi ne, %1, %c0_i32_0 : i32
    scf.if %2 {
      %cst_9 = arith.constant 0.000000e+00 : f32
      %17 = vector.broadcast %cst_9 : f32 to vector<2x640xf32>
      %c0_10 = arith.constant 0 : index
      %c0_11 = arith.constant 0 : index
      %18 = vector.load %arg6[%c0_10, %c0_11] : memref<2x640xf32, #tpu.memory_space<vmem>>, vector<2x640xf32>
      tpu.vector_store %arg6[%c0_10, %c0_11], %17 {strides = array<i32>} : memref<2x640xf32, #tpu.memory_space<vmem>>, vector<2x640xf32>,
    } else {
    }
    %c640_i32 = arith.constant 640 : i32
    %3 = arith.muli %arg1, %c640_i32 : i32
    %4 = tpu.assume_multiple %3, 640 : i32
    %c0 = arith.constant 0 : index
    %5 = arith.index_cast %4 : i32 to index
    %6 = vector.load %arg2[%c0, %5] : memref<2x640xbf16, #tpu.memory_space<vmem>>, vector<2x640xbf16>
    %c0_1 = arith.constant 0 : index
    %c0_2 = arith.constant 0 : index
    %7 = vector.load %arg3[%c0_1, %c0_2] : memref<640x640xi8, #tpu.memory_space<vmem>>, vector<640x640xi8>
    %8 = arith.sitofp %7 : vector<640x640xi8> to vector<640x640xf32>
    %9 = arith.truncf %8 : vector<640x640xf32> to vector<640x640xbf16>
    %c0_3 = arith.constant 0 : index
    %c0_4 = arith.constant 0 : index
    %10 = vector.load %arg6[%c0_3, %c0_4] : memref<2x640xf32, #tpu.memory_space<vmem>>, vector<2x640xf32>
    %cst = arith.constant dense<0.000000e+00> : vector<2x640xf32>
    %11 = tpu.matmul %6, %9, %cst {dimension_numbers = #tpu.dot_dimension_numbers<[1], [0], [0], [1], [0, 0, 1, 1], [], []>} : vector<2x640xbf16>, vector<640x640xbf16>, vector<2x640xf32> -> vector<2x640xf32>
    %12 = arith.addf %10, %11 : vector<2x640xf32>
    %c0_5 = arith.constant 0 : index
    %c0_6 = arith.constant 0 : index
    %13 = vector.load %arg6[%c0_5, %c0_6] : memref<2x640xf32, #tpu.memory_space<vmem>>, vector<2x640xf32>
    tpu.vector_store %arg6[%c0_5, %c0_6], %12 {strides = array<i32>} : memref<2x640xf32, #tpu.memory_space<vmem>>, vector<2x640xf32>,
    %c0_i32_7 = arith.constant 0 : i32
    %14 = arith.cmpi eq, %arg1, %c0_i32_7 : i32
    %15 = arith.extui %14 : i1 to i32
    %c0_i32_8 = arith.constant 0 : i32
    %16 = arith.cmpi ne, %15, %c0_i32_8 : i32
    scf.if %16 {
      %c0_9 = arith.constant 0 : index
      %c0_10 = arith.constant 0 : index
      %17 = vector.load %arg6[%c0_9, %c0_10] : memref<2x640xf32, #tpu.memory_space<vmem>>, vector<2x640xf32>
      %c0_11 = arith.constant 0 : index
      %c0_12 = arith.constant 0 : index
      %18 = vector.load %arg4[%c0_11, %c0_12] : memref<1x640xf32, #tpu.memory_space<vmem>>, vector<1x640xf32>
      %19 = vector.broadcast %18 : vector<1x640xf32> to vector<2x640xf32>
      %20 = arith.mulf %17, %19 : vector<2x640xf32>
      %c0_13 = arith.constant 0 : index
      %c0_14 = arith.constant 0 : index
      %21 = vector.load %arg5[%c0_13, %c0_14] : memref<1x640xf32, #tpu.memory_space<vmem>>, vector<1x640xf32>
      %22 = vector.broadcast %21 : vector<1x640xf32> to vector<2x640xf32>
      %23 = arith.addf %20, %22 : vector<2x640xf32>
      %cst_15 = arith.constant -4.000000e+01 : f32
      %cst_16 = arith.constant 4.000000e+01 : f32
      %24 = vector.broadcast %cst_15 : f32 to vector<2x640xf32>
      %25 = arith.maximumf %24, %23 : vector<2x640xf32>
      %26 = vector.broadcast %cst_16 : f32 to vector<2x640xf32>
      %27 = arith.minimumf %26, %25 : vector<2x640xf32>
      %cst_17 = arith.constant 0.000000e+00 : f32
      %28 = vector.broadcast %cst_17 : f32 to vector<2x640xf32>
      %29 = arith.subf %28, %27 : vector<2x640xf32>
      %30 = math.exp %29 : vector<2x640xf32>
      %cst_18 = arith.constant 1.000000e+00 : f32
      %31 = vector.broadcast %cst_18 : f32 to vector<2x640xf32>
      %32 = arith.addf %31, %30 : vector<2x640xf32>
      %33 = tpu.reciprocal %32 {approx = true} : vector<2x640xf32> -> vector<2x640xf32>
      %c0_19 = arith.constant 0 : index
      %c0_20 = arith.constant 0 : index
      %34 = vector.load %arg6[%c0_19, %c0_20] : memref<2x640xf32, #tpu.memory_space<vmem>>, vector<2x640xf32>
      tpu.vector_store %arg6[%c0_19, %c0_20], %33 {strides = array<i32>} : memref<2x640xf32, #tpu.memory_space<vmem>>, vector<2x640xf32>,
    } else {
    }
    return
  }
  func.func @transform_0(%arg0: i32, %arg1: i32) -> (i32, i32) {
    %c0_i32 = arith.constant 0 : i32
    %c0_i32_0 = arith.constant 0 : i32
    %c0_i32_1 = arith.constant 0 : i32
    return %c0_i32, %c0_i32_0 : i32, i32
  }
  func.func @transform_1(%arg0: i32, %arg1: i32) -> (i32, i32) {
    %c0_i32 = arith.constant 0 : i32
    return %arg1, %arg0 : i32, i32
  }
  func.func @transform_2(%arg0: i32, %arg1: i32) -> (i32, i32) {
    %c0_i32 = arith.constant 0 : i32
    %c0_i32_0 = arith.constant 0 : i32
    return %c0_i32, %arg0 : i32, i32
  }
  func.func @transform_3(%arg0: i32, %arg1: i32) -> (i32, i32) {
    %c0_i32 = arith.constant 0 : i32
    %c0_i32_0 = arith.constant 0 : i32
    return %c0_i32, %arg0 : i32, i32
  }
  func.func @transform_4(%arg0: i32, %arg1: i32) -> (i32, i32) {
    %c0_i32 = arith.constant 0 : i32
    %c0_i32_0 = arith.constant 0 : i32
    return %c0_i32, %arg0 : i32, i32
  }
}

module attributes {stable_mosaic.version = 11 : i64} {
  func.func @kernel(%arg0: i32, %arg1: i32, %arg2: memref<2x256xbf16, #tpu.memory_space<vmem>>, %arg3: memref<256x640xi8, #tpu.memory_space<vmem>>, %arg4: memref<1x640xf32, #tpu.memory_space<vmem>>, %arg5: memref<1x640xf32, #tpu.memory_space<vmem>>, %arg6: memref<2x640xf32, #tpu.memory_space<vmem>>) attributes {dimension_semantics = [#tpu.dimension_semantics<parallel>, #tpu.dimension_semantics<arbitrary>], iteration_bounds = array<i64: 1, 1>, scalar_prefetch = 0 : i64, scratch_operands = 0 : i64, tpu.core_type = #tpu.core_type<tc>, window_params = [{pipeline_mode = #tpu.pipeline_mode<synchronous>, transform_indices = @transform_0, window_bounds = array<i64: 2, 256>}, {transform_indices = @transform_1, window_bounds = array<i64: 256, 640>}, {transform_indices = @transform_2, window_bounds = array<i64: 1, 640>}, {transform_indices = @transform_3, window_bounds = array<i64: 1, 640>}, {transform_indices = @transform_4, window_bounds = array<i64: 2, 640>}]} {
    %c0_i32 = arith.constant 0 : i32
    %0 = arith.cmpi eq, %arg1, %c0_i32 : i32
    %1 = arith.extui %0 : i1 to i32
    %c0_i32_0 = arith.constant 0 : i32
    %2 = arith.cmpi ne, %1, %c0_i32_0 : i32
    scf.if %2 {
      %cst_9 = arith.constant 0.000000e+00 : f32
      %17 = vector.broadcast %cst_9 : f32 to vector<2x640xf32>
      %c0_10 = arith.constant 0 : index
      %c0_11 = arith.constant 0 : index
      %18 = vector.load %arg6[%c0_10, %c0_11] : memref<2x640xf32, #tpu.memory_space<vmem>>, vector<2x640xf32>
      tpu.vector_store %arg6[%c0_10, %c0_11], %17 {strides = array<i32>} : memref<2x640xf32, #tpu.memory_space<vmem>>, vector<2x640xf32>,
    } else {
    }
    %c256_i32 = arith.constant 256 : i32
    %3 = arith.muli %arg1, %c256_i32 : i32
    %4 = tpu.assume_multiple %3, 256 : i32
    %c0 = arith.constant 0 : index
    %5 = arith.index_cast %4 : i32 to index
    %6 = vector.load %arg2[%c0, %5] : memref<2x256xbf16, #tpu.memory_space<vmem>>, vector<2x256xbf16>
    %c0_1 = arith.constant 0 : index
    %c0_2 = arith.constant 0 : index
    %7 = vector.load %arg3[%c0_1, %c0_2] : memref<256x640xi8, #tpu.memory_space<vmem>>, vector<256x640xi8>
    %8 = arith.sitofp %7 : vector<256x640xi8> to vector<256x640xf32>
    %9 = arith.truncf %8 : vector<256x640xf32> to vector<256x640xbf16>
    %c0_3 = arith.constant 0 : index
    %c0_4 = arith.constant 0 : index
    %10 = vector.load %arg6[%c0_3, %c0_4] : memref<2x640xf32, #tpu.memory_space<vmem>>, vector<2x640xf32>
    %cst = arith.constant dense<0.000000e+00> : vector<2x640xf32>
    %11 = tpu.matmul %6, %9, %cst {dimension_numbers = #tpu.dot_dimension_numbers<[1], [0], [0], [1], [0, 0, 1, 1], [], []>} : vector<2x256xbf16>, vector<256x640xbf16>, vector<2x640xf32> -> vector<2x640xf32>
    %12 = arith.addf %10, %11 : vector<2x640xf32>
    %c0_5 = arith.constant 0 : index
    %c0_6 = arith.constant 0 : index
    %13 = vector.load %arg6[%c0_5, %c0_6] : memref<2x640xf32, #tpu.memory_space<vmem>>, vector<2x640xf32>
    tpu.vector_store %arg6[%c0_5, %c0_6], %12 {strides = array<i32>} : memref<2x640xf32, #tpu.memory_space<vmem>>, vector<2x640xf32>,
    %c0_i32_7 = arith.constant 0 : i32
    %14 = arith.cmpi eq, %arg1, %c0_i32_7 : i32
    %15 = arith.extui %14 : i1 to i32
    %c0_i32_8 = arith.constant 0 : i32
    %16 = arith.cmpi ne, %15, %c0_i32_8 : i32
    scf.if %16 {
      %c0_9 = arith.constant 0 : index
      %c0_10 = arith.constant 0 : index
      %17 = vector.load %arg6[%c0_9, %c0_10] : memref<2x640xf32, #tpu.memory_space<vmem>>, vector<2x640xf32>
      %c0_11 = arith.constant 0 : index
      %c0_12 = arith.constant 0 : index
      %18 = vector.load %arg4[%c0_11, %c0_12] : memref<1x640xf32, #tpu.memory_space<vmem>>, vector<1x640xf32>
      %19 = vector.broadcast %18 : vector<1x640xf32> to vector<2x640xf32>
      %20 = arith.mulf %17, %19 : vector<2x640xf32>
      %c0_13 = arith.constant 0 : index
      %c0_14 = arith.constant 0 : index
      %21 = vector.load %arg5[%c0_13, %c0_14] : memref<1x640xf32, #tpu.memory_space<vmem>>, vector<1x640xf32>
      %22 = vector.broadcast %21 : vector<1x640xf32> to vector<2x640xf32>
      %23 = arith.addf %20, %22 : vector<2x640xf32>
      %cst_15 = arith.constant -4.000000e+01 : f32
      %cst_16 = arith.constant 4.000000e+01 : f32
      %24 = vector.broadcast %cst_15 : f32 to vector<2x640xf32>
      %25 = arith.maximumf %24, %23 : vector<2x640xf32>
      %26 = vector.broadcast %cst_16 : f32 to vector<2x640xf32>
      %27 = arith.minimumf %26, %25 : vector<2x640xf32>
      %cst_17 = arith.constant 0.000000e+00 : f32
      %28 = vector.broadcast %cst_17 : f32 to vector<2x640xf32>
      %29 = arith.subf %28, %27 : vector<2x640xf32>
      %30 = math.exp %29 : vector<2x640xf32>
      %cst_18 = arith.constant 1.000000e+00 : f32
      %31 = vector.broadcast %cst_18 : f32 to vector<2x640xf32>
      %32 = arith.addf %31, %30 : vector<2x640xf32>
      %33 = tpu.reciprocal %32 {approx = true} : vector<2x640xf32> -> vector<2x640xf32>
      %c0_19 = arith.constant 0 : index
      %c0_20 = arith.constant 0 : index
      %34 = vector.load %arg6[%c0_19, %c0_20] : memref<2x640xf32, #tpu.memory_space<vmem>>, vector<2x640xf32>
      tpu.vector_store %arg6[%c0_19, %c0_20], %33 {strides = array<i32>} : memref<2x640xf32, #tpu.memory_space<vmem>>, vector<2x640xf32>,
    } else {
    }
    return
  }
  func.func @transform_0(%arg0: i32, %arg1: i32) -> (i32, i32) {
    %c0_i32 = arith.constant 0 : i32
    %c0_i32_0 = arith.constant 0 : i32
    %c0_i32_1 = arith.constant 0 : i32
    return %c0_i32, %c0_i32_0 : i32, i32
  }
  func.func @transform_1(%arg0: i32, %arg1: i32) -> (i32, i32) {
    %c0_i32 = arith.constant 0 : i32
    return %arg1, %arg0 : i32, i32
  }
  func.func @transform_2(%arg0: i32, %arg1: i32) -> (i32, i32) {
    %c0_i32 = arith.constant 0 : i32
    %c0_i32_0 = arith.constant 0 : i32
    return %c0_i32, %arg0 : i32, i32
  }
  func.func @transform_3(%arg0: i32, %arg1: i32) -> (i32, i32) {
    %c0_i32 = arith.constant 0 : i32
    %c0_i32_0 = arith.constant 0 : i32
    return %c0_i32, %arg0 : i32, i32
  }
  func.func @transform_4(%arg0: i32, %arg1: i32) -> (i32, i32) {
    %c0_i32 = arith.constant 0 : i32
    %c0_i32_0 = arith.constant 0 : i32
    return %c0_i32, %arg0 : i32, i32
  }
}

module attributes {stable_mosaic.version = 11 : i64} {
  func.func @kernel(%arg0: i32, %arg1: i32, %arg2: memref<2x640xbf16, #tpu.memory_space<vmem>>, %arg3: memref<640x1024xi8, #tpu.memory_space<vmem>>, %arg4: memref<1x1024xf32, #tpu.memory_space<vmem>>, %arg5: memref<1x1024xf32, #tpu.memory_space<vmem>>, %arg6: memref<2x1024xf32, #tpu.memory_space<vmem>>) attributes {dimension_semantics = [#tpu.dimension_semantics<parallel>, #tpu.dimension_semantics<arbitrary>], iteration_bounds = array<i64: 1, 1>, scalar_prefetch = 0 : i64, scratch_operands = 0 : i64, tpu.core_type = #tpu.core_type<tc>, window_params = [{pipeline_mode = #tpu.pipeline_mode<synchronous>, transform_indices = @transform_0, window_bounds = array<i64: 2, 640>}, {transform_indices = @transform_1, window_bounds = array<i64: 640, 1024>}, {transform_indices = @transform_2, window_bounds = array<i64: 1, 1024>}, {transform_indices = @transform_3, window_bounds = array<i64: 1, 1024>}, {transform_indices = @transform_4, window_bounds = array<i64: 2, 1024>}]} {
    %c0_i32 = arith.constant 0 : i32
    %0 = arith.cmpi eq, %arg1, %c0_i32 : i32
    %1 = arith.extui %0 : i1 to i32
    %c0_i32_0 = arith.constant 0 : i32
    %2 = arith.cmpi ne, %1, %c0_i32_0 : i32
    scf.if %2 {
      %cst_9 = arith.constant 0.000000e+00 : f32
      %17 = vector.broadcast %cst_9 : f32 to vector<2x1024xf32>
      %c0_10 = arith.constant 0 : index
      %c0_11 = arith.constant 0 : index
      %18 = vector.load %arg6[%c0_10, %c0_11] : memref<2x1024xf32, #tpu.memory_space<vmem>>, vector<2x1024xf32>
      tpu.vector_store %arg6[%c0_10, %c0_11], %17 {strides = array<i32>} : memref<2x1024xf32, #tpu.memory_space<vmem>>, vector<2x1024xf32>,
    } else {
    }
    %c640_i32 = arith.constant 640 : i32
    %3 = arith.muli %arg1, %c640_i32 : i32
    %4 = tpu.assume_multiple %3, 640 : i32
    %c0 = arith.constant 0 : index
    %5 = arith.index_cast %4 : i32 to index
    %6 = vector.load %arg2[%c0, %5] : memref<2x640xbf16, #tpu.memory_space<vmem>>, vector<2x640xbf16>
    %c0_1 = arith.constant 0 : index
    %c0_2 = arith.constant 0 : index
    %7 = vector.load %arg3[%c0_1, %c0_2] : memref<640x1024xi8, #tpu.memory_space<vmem>>, vector<640x1024xi8>
    %8 = arith.sitofp %7 : vector<640x1024xi8> to vector<640x1024xf32>
    %9 = arith.truncf %8 : vector<640x1024xf32> to vector<640x1024xbf16>
    %c0_3 = arith.constant 0 : index
    %c0_4 = arith.constant 0 : index
    %10 = vector.load %arg6[%c0_3, %c0_4] : memref<2x1024xf32, #tpu.memory_space<vmem>>, vector<2x1024xf32>
    %cst = arith.constant dense<0.000000e+00> : vector<2x1024xf32>
    %11 = tpu.matmul %6, %9, %cst {dimension_numbers = #tpu.dot_dimension_numbers<[1], [0], [0], [1], [0, 0, 1, 1], [], []>} : vector<2x640xbf16>, vector<640x1024xbf16>, vector<2x1024xf32> -> vector<2x1024xf32>
    %12 = arith.addf %10, %11 : vector<2x1024xf32>
    %c0_5 = arith.constant 0 : index
    %c0_6 = arith.constant 0 : index
    %13 = vector.load %arg6[%c0_5, %c0_6] : memref<2x1024xf32, #tpu.memory_space<vmem>>, vector<2x1024xf32>
    tpu.vector_store %arg6[%c0_5, %c0_6], %12 {strides = array<i32>} : memref<2x1024xf32, #tpu.memory_space<vmem>>, vector<2x1024xf32>,
    %c0_i32_7 = arith.constant 0 : i32
    %14 = arith.cmpi eq, %arg1, %c0_i32_7 : i32
    %15 = arith.extui %14 : i1 to i32
    %c0_i32_8 = arith.constant 0 : i32
    %16 = arith.cmpi ne, %15, %c0_i32_8 : i32
    scf.if %16 {
      %c0_9 = arith.constant 0 : index
      %c0_10 = arith.constant 0 : index
      %17 = vector.load %arg6[%c0_9, %c0_10] : memref<2x1024xf32, #tpu.memory_space<vmem>>, vector<2x1024xf32>
      %c0_11 = arith.constant 0 : index
      %c0_12 = arith.constant 0 : index
      %18 = vector.load %arg4[%c0_11, %c0_12] : memref<1x1024xf32, #tpu.memory_space<vmem>>, vector<1x1024xf32>
      %19 = vector.broadcast %18 : vector<1x1024xf32> to vector<2x1024xf32>
      %20 = arith.mulf %17, %19 : vector<2x1024xf32>
      %c0_13 = arith.constant 0 : index
      %c0_14 = arith.constant 0 : index
      %21 = vector.load %arg5[%c0_13, %c0_14] : memref<1x1024xf32, #tpu.memory_space<vmem>>, vector<1x1024xf32>
      %22 = vector.broadcast %21 : vector<1x1024xf32> to vector<2x1024xf32>
      %23 = arith.addf %20, %22 : vector<2x1024xf32>
      %cst_15 = arith.constant -4.000000e+01 : f32
      %cst_16 = arith.constant 4.000000e+01 : f32
      %24 = vector.broadcast %cst_15 : f32 to vector<2x1024xf32>
      %25 = arith.maximumf %24, %23 : vector<2x1024xf32>
      %26 = vector.broadcast %cst_16 : f32 to vector<2x1024xf32>
      %27 = arith.minimumf %26, %25 : vector<2x1024xf32>
      %cst_17 = arith.constant 0.000000e+00 : f32
      %28 = vector.broadcast %cst_17 : f32 to vector<2x1024xf32>
      %29 = arith.subf %28, %27 : vector<2x1024xf32>
      %30 = math.exp %29 : vector<2x1024xf32>
      %cst_18 = arith.constant 1.000000e+00 : f32
      %31 = vector.broadcast %cst_18 : f32 to vector<2x1024xf32>
      %32 = arith.addf %31, %30 : vector<2x1024xf32>
      %33 = tpu.reciprocal %32 {approx = true} : vector<2x1024xf32> -> vector<2x1024xf32>
      %c0_19 = arith.constant 0 : index
      %c0_20 = arith.constant 0 : index
      %34 = vector.load %arg6[%c0_19, %c0_20] : memref<2x1024xf32, #tpu.memory_space<vmem>>, vector<2x1024xf32>
      tpu.vector_store %arg6[%c0_19, %c0_20], %33 {strides = array<i32>} : memref<2x1024xf32, #tpu.memory_space<vmem>>, vector<2x1024xf32>,
    } else {
    }
    return
  }
  func.func @transform_0(%arg0: i32, %arg1: i32) -> (i32, i32) {
    %c0_i32 = arith.constant 0 : i32
    %c0_i32_0 = arith.constant 0 : i32
    %c0_i32_1 = arith.constant 0 : i32
    return %c0_i32, %c0_i32_0 : i32, i32
  }
  func.func @transform_1(%arg0: i32, %arg1: i32) -> (i32, i32) {
    %c0_i32 = arith.constant 0 : i32
    return %arg1, %arg0 : i32, i32
  }
  func.func @transform_2(%arg0: i32, %arg1: i32) -> (i32, i32) {
    %c0_i32 = arith.constant 0 : i32
    %c0_i32_0 = arith.constant 0 : i32
    return %c0_i32, %arg0 : i32, i32
  }
  func.func @transform_3(%arg0: i32, %arg1: i32) -> (i32, i32) {
    %c0_i32 = arith.constant 0 : i32
    %c0_i32_0 = arith.constant 0 : i32
    return %c0_i32, %arg0 : i32, i32
  }
  func.func @transform_4(%arg0: i32, %arg1: i32) -> (i32, i32) {
    %c0_i32 = arith.constant 0 : i32
    %c0_i32_0 = arith.constant 0 : i32
    return %c0_i32, %arg0 : i32, i32
  }
}

</mosaic_0001>

<bundles_post_ra>
// kernel: _lambda_.9
= control target key start
LH: loop header
LB: loop body
LE: loop exit
PB: predicated region body
PF: predicated region fallthrough
CT: control target
= control target key end

     0   :  { %9 = vsyncpa [#allocation3], 0  ;;  %s741_s18 = smov [#allocation2]   ;;  %s742_s20 = smov 640   ;;  %s828_s0 = inlined_call_operand.vmem [shape: bf16[2,256], index: 0, kind: input, shape index: {}]   ;;  %s829_s1 = inlined_call_operand.hbm [shape: s8[256,640], index: 1, kind: input, shape index: {}]   ;;  %s830_s2 = inlined_call_operand.vmem [shape: f32[1,640], index: 2, kind: input, shape index: {}]   ;;  %s831_s3 = inlined_call_operand.vmem [shape: f32[1,640], index: 3, kind: input, shape index: {}]   ;;  %s832_s4 = inlined_call_operand.vmem [shape: f32[2,640], index: 4, kind: output, shape index: {}]  }
   0x1   :  { %s16_s17 = sshll.u32 %s829_s1, 4  ;;  %s18_s19 = sshll.u32 %s741_s18, 4  ;;  %s17_s17 = int_to_ptr.hbm [resolvable:$true] %s16_s17  ;;  %s19_s19 = int_to_ptr.vmem [resolvable:$true] %s18_s19 }
   0x2   :  { %s743_s21 = smov 40  }
   0x3   :  { %24 = dma.hbm_to_vmem [thread:$0]  %s17_s17, 5120, %s19_s19, [#allocation3], %s742_s20, %s742_s20, %s743_s21  }
   0x4   :  { %739 = dma.done.wait [#allocation3], 5120  }
   0x5   :  { %740 = vsyncadd [#allocation3], 4294962176  ;;  %v59_v0 = vld [vmem:[#allocation2 + $0x78] sm:$0xff]  ;;  %v60_v2 = vld [vmem:[#allocation2 + $0x80] sm:$0xff]  ;;  %vm629_vm0 = vcmask 1041408   ;;  %vm631_vm1 = vcmask 1045508  }
   0x6   :  { %v79_v1 = vld [vmem:[#allocation2 + $0x118] sm:$0xff]  ;;  %v154_v3 = vunpack.c.2.s8 %v59_v0  ;;  %v159_v4 = vunpack.c.3.s8 %v59_v0  ;;  %v80_v7 = vld [vmem:[#allocation2 + $0x120] sm:$0xff]  ;;  %v155_v8 = vunpack.c.2.s8 %v60_v2  ;;  %v160_v9 = vunpack.c.3.s8 %v60_v2  ;;  %v54_v28 = vld [vmem:[#allocation2 + $0x50] sm:$0xff] }
   0x7   :  { %v234_v5 = vunpack.c.2.s8 %v79_v1  ;;  %v239_v6 = vunpack.c.3.s8 %v79_v1  ;;  %v235_v10 = vunpack.c.2.s8 %v80_v7  ;;  %v240_v11 = vunpack.c.3.s8 %v80_v7  ;;  %v74_v37 = vld [vmem:[#allocation2 + $0xf0] sm:$0xff]  ;;  %v55_v42 = vld [vmem:[#allocation2 + $0x58] sm:$0xff] }
   0x8   :  { %v314_v12 = vcvt.s32.f32 %v154_v3  ;;  %v319_v13 = vcvt.s32.f32 %v159_v4  ;;  %v315_v16 = vcvt.s32.f32 %v155_v8  ;;  %v320_v17 = vcvt.s32.f32 %v160_v9  ;;  %v75_v47 = vld [vmem:[#allocation2 + $0xf8] sm:$0xff]  ;;  %v49_v8 = vld [vmem:[#allocation2 + $0x28] sm:$0xff] }
   0x9   :  { %v394_v14 = vcvt.s32.f32 %v234_v5  ;;  %v399_v15 = vcvt.s32.f32 %v239_v6  ;;  %v395_v18 = vcvt.s32.f32 %v235_v10  ;;  %v400_v19 = vcvt.s32.f32 %v240_v11 }
   0xa   :  { %v439_v20 = vpack.c.bf16 %v319_v13, %v314_v12  ;;  %v144_v22 = vunpack.c.0.s8 %v59_v0  ;;  %v149_v23 = vunpack.c.1.s8 %v59_v0  ;;  %v440_v24 = vpack.c.bf16 %v320_v17, %v315_v16  ;;  %v69_v17 = vld [vmem:[#allocation2 + $0xc8] sm:$0xff] }
   0xb   :  { %v479_v21 = vpack.c.bf16 %v399_v15, %v394_v14  ;;  %v480_v25 = vpack.c.bf16 %v400_v19, %v395_v18  ;;  %v224_v26 = vunpack.c.0.s8 %v79_v1  ;;  %v229_v27 = vunpack.c.1.s8 %v79_v1 }
   0xc   :  { %492 = vmatpush.bf16.msra.mxu0 %v439_v20  ;;  %v304_v29 = vcvt.s32.f32 %v144_v22  ;;  %v309_v30 = vcvt.s32.f32 %v149_v23  ;;  %v145_v31 = vunpack.c.0.s8 %v60_v2  ;;  %v150_v32 = vunpack.c.1.s8 %v60_v2  ;;  %518 = vmatpush.bf16.msra.mxu2 %v440_v24  ;;  %v50_v22 = vld [vmem:[#allocation2 + $0x30] sm:$0xff] }
   0xd   :  { %505 = vmatpush.bf16.msra.mxu1 %v479_v21  ;;  %531 = vmatpush.bf16.msra.mxu3 %v480_v25  ;;  %v384_v33 = vcvt.s32.f32 %v224_v26  ;;  %v389_v34 = vcvt.s32.f32 %v229_v27  ;;  %v225_v35 = vunpack.c.0.s8 %v80_v7  ;;  %v230_v36 = vunpack.c.1.s8 %v80_v7  ;;  %v70_v27 = vld [vmem:[#allocation2 + $0xd0] sm:$0xff] }
   0xe   :  { %v434_v38 = vpack.c.bf16 %v309_v30, %v304_v29  ;;  %v305_v39 = vcvt.s32.f32 %v145_v31  ;;  %v310_v40 = vcvt.s32.f32 %v150_v32  ;;  %v134_v41 = vunpack.c.2.s8 %v54_v28 }
   0xf   :  { %v474_v43 = vpack.c.bf16 %v389_v34, %v384_v33  ;;  %v385_v44 = vcvt.s32.f32 %v225_v35  ;;  %v390_v45 = vcvt.s32.f32 %v230_v36  ;;  %v139_v46 = vunpack.c.3.s8 %v54_v28 }
  0x10   :  { %493 = vmatpush.bf16.msra.mxu0 %v434_v38  ;;  %v435_v48 = vpack.c.bf16 %v310_v40, %v305_v39  ;;  %v294_v49 = vcvt.s32.f32 %v134_v41  ;;  %v214_v50 = vunpack.c.2.s8 %v74_v37  ;;  %v219_v51 = vunpack.c.3.s8 %v74_v37 }
  0x11   :  { %506 = vmatpush.bf16.msra.mxu1 %v474_v43  ;;  %v475_v52 = vpack.c.bf16 %v390_v45, %v385_v44  ;;  %v299_v53 = vcvt.s32.f32 %v139_v46  ;;  %v135_v54 = vunpack.c.2.s8 %v55_v42  ;;  %v140_v55 = vunpack.c.3.s8 %v55_v42 }
  0x12   :  { %519 = vmatpush.bf16.msra.mxu2 %v435_v48  ;;  %v374_v56 = vcvt.s32.f32 %v214_v50  ;;  %v379_v57 = vcvt.s32.f32 %v219_v51  ;;  %v215_v58 = vunpack.c.2.s8 %v75_v47  ;;  %v220_v59 = vunpack.c.3.s8 %v75_v47 }
  0x13   :  { %532 = vmatpush.bf16.msra.mxu3 %v475_v52  ;;  %v429_v60 = vpack.c.bf16 %v299_v53, %v294_v49  ;;  %v295_v61 = vcvt.s32.f32 %v135_v54  ;;  %v300_v62 = vcvt.s32.f32 %v140_v55  ;;  %v124_v63 = vunpack.c.0.s8 %v54_v28  ;;  %v44_v52 = vld [vmem:[#allocation2] sm:$0xff]  ;;  %v43_v53 = vld [vmem:[%s828_s0] sm:$0x3] }
  0x14   :  { %v469_v0 = vpack.c.bf16 %v379_v57, %v374_v56  ;;  %v375_v1 = vcvt.s32.f32 %v215_v58  ;;  %v380_v2 = vcvt.s32.f32 %v220_v59  ;;  %v129_v3 = vunpack.c.1.s8 %v54_v28  ;;  %487 = vst [vmem:[#allocation1] ss:$9 sm:$0xff] %v43_v53 }
  0x15   :  { %494 = vmatpush.bf16.msra.mxu0 %v429_v60  ;;  %v430_v4 = vpack.c.bf16 %v300_v62, %v295_v61  ;;  %v284_v5 = vcvt.s32.f32 %v124_v63  ;;  %v204_v6 = vunpack.c.0.s8 %v74_v37  ;;  %v209_v7 = vunpack.c.1.s8 %v74_v37  ;;  %v64_v62 = vld [vmem:[#allocation2 + $0xa0] sm:$0xff] }
  0x16   :  { %507 = vmatpush.bf16.msra.mxu1 %v469_v0  ;;  %v470_v9 = vpack.c.bf16 %v380_v2, %v375_v1  ;;  %v289_v10 = vcvt.s32.f32 %v129_v3  ;;  %v125_v11 = vunpack.c.0.s8 %v55_v42  ;;  %v130_v12 = vunpack.c.1.s8 %v55_v42  ;;  %v45_v3 = vld [vmem:[#allocation2 + $0x8] sm:$0xff] }
  0x17   :  { %520 = vmatpush.bf16.msra.mxu2 %v430_v4  ;;  %v364_v13 = vcvt.s32.f32 %v204_v6  ;;  %v369_v14 = vcvt.s32.f32 %v209_v7  ;;  %v205_v15 = vunpack.c.0.s8 %v75_v47  ;;  %v210_v16 = vunpack.c.1.s8 %v75_v47 }
  0x18   :  { %533 = vmatpush.bf16.msra.mxu3 %v470_v9  ;;  %v424_v18 = vpack.c.bf16 %v289_v10, %v284_v5  ;;  %v285_v19 = vcvt.s32.f32 %v125_v11  ;;  %v290_v20 = vcvt.s32.f32 %v130_v12  ;;  %v114_v21 = vunpack.c.2.s8 %v49_v8 }
  0x19   :  { %v464_v23 = vpack.c.bf16 %v369_v14, %v364_v13  ;;  %v365_v24 = vcvt.s32.f32 %v205_v15  ;;  %v370_v25 = vcvt.s32.f32 %v210_v16  ;;  %v119_v26 = vunpack.c.3.s8 %v49_v8 }
  0x1a   :  { %495 = vmatpush.bf16.msra.mxu0 %v424_v18  ;;  %v425_v28 = vpack.c.bf16 %v290_v20, %v285_v19  ;;  %v274_v29 = vcvt.s32.f32 %v114_v21  ;;  %v194_v30 = vunpack.c.2.s8 %v69_v17  ;;  %v199_v31 = vunpack.c.3.s8 %v69_v17 }
  0x1b   :  { %508 = vmatpush.bf16.msra.mxu1 %v464_v23  ;;  %v465_v32 = vpack.c.bf16 %v370_v25, %v365_v24  ;;  %v279_v33 = vcvt.s32.f32 %v119_v26  ;;  %v115_v34 = vunpack.c.2.s8 %v50_v22  ;;  %v120_v35 = vunpack.c.3.s8 %v50_v22 }
  0x1c   :  { %521 = vmatpush.bf16.msra.mxu2 %v425_v28  ;;  %v354_v36 = vcvt.s32.f32 %v194_v30  ;;  %v359_v37 = vcvt.s32.f32 %v199_v31  ;;  %v195_v38 = vunpack.c.2.s8 %v70_v27  ;;  %v200_v39 = vunpack.c.3.s8 %v70_v27 }
  0x1d   :  { %534 = vmatpush.bf16.msra.mxu3 %v465_v32  ;;  %v419_v40 = vpack.c.bf16 %v279_v33, %v274_v29  ;;  %v275_v41 = vcvt.s32.f32 %v115_v34  ;;  %v280_v42 = vcvt.s32.f32 %v120_v35  ;;  %v104_v43 = vunpack.c.0.s8 %v49_v8  ;;  %v61_v33 = vld [vmem:[#allocation2 + $0x88] sm:$0xff] }
  0x1e   :  { %v459_v44 = vpack.c.bf16 %v359_v37, %v354_v36  ;;  %v355_v45 = vcvt.s32.f32 %v195_v38  ;;  %v360_v46 = vcvt.s32.f32 %v200_v39  ;;  %v109_v47 = vunpack.c.1.s8 %v49_v8  ;;  %v65_v8 = vld [vmem:[#allocation2 + $0xa8] sm:$0xff] }
  0x1f   :  { %496 = vmatpush.bf16.msra.mxu0 %v419_v40  ;;  %v420_v48 = vpack.c.bf16 %v280_v42, %v275_v41  ;;  %v264_v49 = vcvt.s32.f32 %v104_v43  ;;  %v184_v50 = vunpack.c.0.s8 %v69_v17  ;;  %v189_v51 = vunpack.c.1.s8 %v69_v17  ;;  %v81_v42 = vld [vmem:[#allocation2 + $0x128] sm:$0xff] }
  0x20   :  { %509 = vmatpush.bf16.msra.mxu1 %v459_v44  ;;  %v460_v54 = vpack.c.bf16 %v360_v46, %v355_v45  ;;  %v269_v55 = vcvt.s32.f32 %v109_v47  ;;  %v105_v56 = vunpack.c.0.s8 %v50_v22  ;;  %v110_v57 = vunpack.c.1.s8 %v50_v22  ;;  %v62_v47 = vld [vmem:[#allocation2 + $0x90] sm:$0xff] }
  0x21   :  { %522 = vmatpush.bf16.msra.mxu2 %v420_v48  ;;  %v344_v58 = vcvt.s32.f32 %v184_v50  ;;  %v349_v59 = vcvt.s32.f32 %v189_v51  ;;  %v185_v60 = vunpack.c.0.s8 %v70_v27  ;;  %v190_v61 = vunpack.c.1.s8 %v70_v27 }
  0x22   :  { %535 = vmatpush.bf16.msra.mxu3 %v460_v54  ;;  %v414_v63 = vpack.c.bf16 %v269_v55, %v264_v49  ;;  %v265_v0 = vcvt.s32.f32 %v105_v56  ;;  %v270_v1 = vcvt.s32.f32 %v110_v57  ;;  %v94_v2 = vunpack.c.2.s8 %v44_v52 }
  0x23   :  { %v454_v4 = vpack.c.bf16 %v349_v59, %v344_v58  ;;  %v345_v5 = vcvt.s32.f32 %v185_v60  ;;  %v350_v6 = vcvt.s32.f32 %v190_v61  ;;  %v99_v7 = vunpack.c.3.s8 %v44_v52 }
  0x24   :  { %497 = vmatpush.bf16.msra.mxu0 %v414_v63  ;;  %v415_v9 = vpack.c.bf16 %v270_v1, %v265_v0  ;;  %v254_v10 = vcvt.s32.f32 %v94_v2  ;;  %v174_v11 = vunpack.c.2.s8 %v64_v62  ;;  %v179_v12 = vunpack.c.3.s8 %v64_v62  ;;  %v776_v1 = vld [vmem:[#allocation1] sm:$0xff] }
  0x25   :  { %510 = vmatpush.bf16.msra.mxu1 %v454_v4  ;;  %v455_v13 = vpack.c.bf16 %v350_v6, %v345_v5  ;;  %v259_v14 = vcvt.s32.f32 %v99_v7  ;;  %v95_v15 = vunpack.c.2.s8 %v45_v3  ;;  %v100_v16 = vunpack.c.3.s8 %v45_v3  ;;  %v778_v6 = vld [vmem:[#allocation1 + $0x9] sm:$0xff] }
  0x26   :  { %523 = vmatpush.bf16.msra.mxu2 %v415_v9  ;;  %v334_v17 = vcvt.s32.f32 %v174_v11  ;;  %v339_v18 = vcvt.s32.f32 %v179_v12  ;;  %v175_v19 = vunpack.c.2.s8 %v65_v8  ;;  %v180_v20 = vunpack.c.3.s8 %v65_v8 }
  0x27   :  { %536 = vmatpush.bf16.msra.mxu3 %v455_v13  ;;  %v409_v21 = vpack.c.bf16 %v259_v14, %v254_v10  ;;  %v255_v22 = vcvt.s32.f32 %v95_v15  ;;  %v260_v23 = vcvt.s32.f32 %v100_v16  ;;  %v84_v24 = vunpack.c.0.s8 %v44_v52  ;;  %v56_v15 = vld [vmem:[#allocation2 + $0x60] sm:$0xff] }
  0x28   :  { %v449_v25 = vpack.c.bf16 %v339_v18, %v334_v17  ;;  %v335_v26 = vcvt.s32.f32 %v175_v19  ;;  %v340_v27 = vcvt.s32.f32 %v180_v20  ;;  %v89_v28 = vunpack.c.1.s8 %v44_v52  ;;  %v82_v52 = vld [vmem:[#allocation2 + $0x130] sm:$0xff] }
  0x29   :  { %498 = vmatpush.bf16.msra.mxu0 %v409_v21  ;;  %v410_v29 = vpack.c.bf16 %v260_v23, %v255_v22  ;;  %v244_v30 = vcvt.s32.f32 %v84_v24  ;;  %v164_v31 = vunpack.c.0.s8 %v64_v62  ;;  %v169_v32 = vunpack.c.1.s8 %v64_v62  ;;  %v76_v24 = vld [vmem:[#allocation2 + $0x100] sm:$0xff] }
  0x2a   :  { %511 = vmatpush.bf16.msra.mxu1 %v449_v25  ;;  %v450_v34 = vpack.c.bf16 %v340_v27, %v335_v26  ;;  %v249_v35 = vcvt.s32.f32 %v89_v28  ;;  %v85_v36 = vunpack.c.0.s8 %v45_v3  ;;  %v90_v37 = vunpack.c.1.s8 %v45_v3 }
  0x2b   :  { %524 = vmatpush.bf16.msra.mxu2 %v410_v29  ;;  %v324_v38 = vcvt.s32.f32 %v164_v31  ;;  %v329_v39 = vcvt.s32.f32 %v169_v32  ;;  %v165_v40 = vunpack.c.0.s8 %v65_v8  ;;  %v170_v41 = vunpack.c.1.s8 %v65_v8  ;;  %v57_v29 = vld [vmem:[#allocation2 + $0x68] sm:$0xff] }
  0x2c   :  { %537 = vmatpush.bf16.msra.mxu3 %v450_v34  ;;  %v404_v43 = vpack.c.bf16 %v249_v35, %v244_v30  ;;  %v245_v44 = vcvt.s32.f32 %v85_v36  ;;  %v250_v45 = vcvt.s32.f32 %v90_v37  ;;  %v156_v46 = vunpack.c.2.s8 %v61_v33  ;;  %v77_v34 = vld [vmem:[#allocation2 + $0x108] sm:$0xff] }
  0x2d   :  { %v444_v48 = vpack.c.bf16 %v329_v39, %v324_v38  ;;  %v325_v49 = vcvt.s32.f32 %v165_v40  ;;  %v330_v50 = vcvt.s32.f32 %v170_v41  ;;  %v161_v51 = vunpack.c.3.s8 %v61_v33 }
  0x2e   :  { %499 = vmatpush.bf16.msra.mxu0 %v404_v43  ;;  %v405_v53 = vpack.c.bf16 %v250_v45, %v245_v44  ;;  %v316_v54 = vcvt.s32.f32 %v156_v46  ;;  %v236_v55 = vunpack.c.2.s8 %v81_v42  ;;  %v241_v56 = vunpack.c.3.s8 %v81_v42 }
  0x2f   :  { %512 = vmatpush.bf16.msra.mxu1 %v444_v48  ;;  %v445_v57 = vpack.c.bf16 %v330_v50, %v325_v49  ;;  %v321_v58 = vcvt.s32.f32 %v161_v51  ;;  %v157_v59 = vunpack.c.2.s8 %v62_v47  ;;  %v162_v60 = vunpack.c.3.s8 %v62_v47 }
  0x30   :  { %525 = vmatpush.bf16.msra.mxu2 %v405_v53  ;;  %v396_v61 = vcvt.s32.f32 %v236_v55  ;;  %v401_v62 = vcvt.s32.f32 %v241_v56  ;;  %v237_v63 = vunpack.c.2.s8 %v82_v52  ;;  %v242_v0 = vunpack.c.3.s8 %v82_v52 }
  0x31   :  { %538 = vmatpush.bf16.msra.mxu3 %v445_v57  ;;  %v441_v2 = vpack.c.bf16 %v321_v58, %v316_v54  ;;  %v317_v3 = vcvt.s32.f32 %v157_v59  ;;  %v322_v4 = vcvt.s32.f32 %v162_v60  ;;  %v146_v5 = vunpack.c.0.s8 %v61_v33  ;;  %500 = vmatmul.bf16.vlgmr.msra.gmra.mxu0 %v776_v1  ;;  %v51_v59 = vld [vmem:[#allocation2 + $0x38] sm:$0xff] }
  0x32   :  { %v481_v7 = vpack.c.bf16 %v401_v62, %v396_v61  ;;  %v397_v8 = vcvt.s32.f32 %v237_v63  ;;  %v402_v9 = vcvt.s32.f32 %v242_v0  ;;  %v151_v10 = vunpack.c.1.s8 %v61_v33  ;;  %513 = vmatmul.bf16.vlgmr.msra.gmra.mxu1 %v778_v6 }
  0x33   :  { %544 = vmatpush.bf16.msrb.mxu0 %v441_v2  ;;  %v442_v11 = vpack.c.bf16 %v322_v4, %v317_v3  ;;  %v306_v12 = vcvt.s32.f32 %v146_v5  ;;  %v226_v13 = vunpack.c.0.s8 %v81_v42  ;;  %v231_v14 = vunpack.c.1.s8 %v81_v42  ;;  %526 = vmatmul.bf16.vlgmr.msra.gmra.mxu2 %v776_v1  ;;  %v71_v5 = vld [vmem:[#allocation2 + $0xd8] sm:$0xff] }
  0x34   :  { %557 = vmatpush.bf16.msrb.mxu1 %v481_v7  ;;  %v482_v16 = vpack.c.bf16 %v402_v9, %v397_v8  ;;  %v311_v17 = vcvt.s32.f32 %v151_v10  ;;  %v147_v18 = vunpack.c.0.s8 %v62_v47  ;;  %v152_v19 = vunpack.c.1.s8 %v62_v47  ;;  %539 = vmatmul.bf16.vlgmr.msra.gmra.mxu3 %v778_v6 }
  0x35   :  { %570 = vmatpush.bf16.msrb.mxu2 %v442_v11  ;;  %v386_v20 = vcvt.s32.f32 %v226_v13  ;;  %v391_v21 = vcvt.s32.f32 %v231_v14  ;;  %v227_v22 = vunpack.c.0.s8 %v82_v52  ;;  %v232_v23 = vunpack.c.1.s8 %v82_v52  ;;  %v52_v11 = vld [vmem:[#allocation2 + $0x40] sm:$0xff] }
  0x36   :  { %583 = vmatpush.bf16.msrb.mxu3 %v482_v16  ;;  %v436_v25 = vpack.c.bf16 %v311_v17, %v306_v12  ;;  %v307_v26 = vcvt.s32.f32 %v147_v18  ;;  %v312_v27 = vcvt.s32.f32 %v152_v19  ;;  %v136_v28 = vunpack.c.2.s8 %v56_v15  ;;  %v72_v16 = vld [vmem:[#allocation2 + $0xe0] sm:$0xff] }
  0x37   :  { %v476_v30 = vpack.c.bf16 %v391_v21, %v386_v20  ;;  %v387_v31 = vcvt.s32.f32 %v227_v22  ;;  %v392_v32 = vcvt.s32.f32 %v232_v23  ;;  %v141_v33 = vunpack.c.3.s8 %v56_v15 }
  0x38   :  { %545 = vmatpush.bf16.msrb.mxu0 %v436_v25  ;;  %v437_v35 = vpack.c.bf16 %v312_v27, %v307_v26  ;;  %v296_v36 = vcvt.s32.f32 %v136_v28  ;;  %v216_v37 = vunpack.c.2.s8 %v76_v24  ;;  %v221_v38 = vunpack.c.3.s8 %v76_v24 }
  0x39   :  { %558 = vmatpush.bf16.msrb.mxu1 %v476_v30  ;;  %v477_v39 = vpack.c.bf16 %v392_v32, %v387_v31  ;;  %v301_v40 = vcvt.s32.f32 %v141_v33  ;;  %v137_v41 = vunpack.c.2.s8 %v57_v29  ;;  %v142_v42 = vunpack.c.3.s8 %v57_v29 }
  0x3a   :  { %571 = vmatpush.bf16.msrb.mxu2 %v437_v35  ;;  %v376_v43 = vcvt.s32.f32 %v216_v37  ;;  %v381_v44 = vcvt.s32.f32 %v221_v38  ;;  %v217_v45 = vunpack.c.2.s8 %v77_v34  ;;  %v222_v46 = vunpack.c.3.s8 %v77_v34 }
  0x3b   :  { %584 = vmatpush.bf16.msrb.mxu3 %v477_v39  ;;  %v431_v47 = vpack.c.bf16 %v301_v40, %v296_v36  ;;  %v297_v48 = vcvt.s32.f32 %v137_v41  ;;  %v302_v49 = vcvt.s32.f32 %v142_v42  ;;  %v126_v50 = vunpack.c.0.s8 %v56_v15  ;;  %v46_v41 = vld [vmem:[#allocation2 + $0x10] sm:$0xff] }
  0x3c   :  { %v471_v51 = vpack.c.bf16 %v381_v44, %v376_v43  ;;  %v377_v52 = vcvt.s32.f32 %v217_v45  ;;  %v382_v53 = vcvt.s32.f32 %v222_v46  ;;  %v131_v54 = vunpack.c.1.s8 %v56_v15 }
  0x3d   :  { %546 = vmatpush.bf16.msrb.mxu0 %v431_v47  ;;  %v432_v55 = vpack.c.bf16 %v302_v49, %v297_v48  ;;  %v286_v56 = vcvt.s32.f32 %v126_v50  ;;  %v206_v57 = vunpack.c.0.s8 %v76_v24  ;;  %v211_v58 = vunpack.c.1.s8 %v76_v24  ;;  %v66_v50 = vld [vmem:[#allocation2 + $0xb0] sm:$0xff] }
  0x3e   :  { %559 = vmatpush.bf16.msrb.mxu1 %v471_v51  ;;  %v472_v60 = vpack.c.bf16 %v382_v53, %v377_v52  ;;  %v291_v61 = vcvt.s32.f32 %v131_v54  ;;  %v127_v62 = vunpack.c.0.s8 %v57_v29  ;;  %v132_v63 = vunpack.c.1.s8 %v57_v29 }
  0x3f   :  { %572 = vmatpush.bf16.msrb.mxu2 %v432_v55  ;;  %v366_v0 = vcvt.s32.f32 %v206_v57  ;;  %v371_v2 = vcvt.s32.f32 %v211_v58  ;;  %v207_v3 = vunpack.c.0.s8 %v77_v34  ;;  %v212_v4 = vunpack.c.1.s8 %v77_v34  ;;  %v47_v55 = vld [vmem:[#allocation2 + $0x18] sm:$0xff] }
  0x40   :  { %585 = vmatpush.bf16.msrb.mxu3 %v472_v60  ;;  %v426_v7 = vpack.c.bf16 %v291_v61, %v286_v56  ;;  %v287_v8 = vcvt.s32.f32 %v127_v62  ;;  %v292_v9 = vcvt.s32.f32 %v132_v63  ;;  %v116_v10 = vunpack.c.2.s8 %v51_v59  ;;  %v67_v60 = vld [vmem:[#allocation2 + $0xb8] sm:$0xff] }
  0x41   :  { %v466_v12 = vpack.c.bf16 %v371_v2, %v366_v0  ;;  %v367_v13 = vcvt.s32.f32 %v207_v3  ;;  %v372_v14 = vcvt.s32.f32 %v212_v4  ;;  %v121_v15 = vunpack.c.3.s8 %v51_v59 }
  0x42   :  { %547 = vmatpush.bf16.msrb.mxu0 %v426_v7  ;;  %v427_v17 = vpack.c.bf16 %v292_v9, %v287_v8  ;;  %v276_v18 = vcvt.s32.f32 %v116_v10  ;;  %v196_v19 = vunpack.c.2.s8 %v71_v5  ;;  %v201_v20 = vunpack.c.3.s8 %v71_v5 }
  0x43   :  { %560 = vmatpush.bf16.msrb.mxu1 %v466_v12  ;;  %v467_v21 = vpack.c.bf16 %v372_v14, %v367_v13  ;;  %v281_v22 = vcvt.s32.f32 %v121_v15  ;;  %v117_v23 = vunpack.c.2.s8 %v52_v11  ;;  %v122_v24 = vunpack.c.3.s8 %v52_v11 }
  0x44   :  { %573 = vmatpush.bf16.msrb.mxu2 %v427_v17  ;;  %v356_v25 = vcvt.s32.f32 %v196_v19  ;;  %v361_v26 = vcvt.s32.f32 %v201_v20  ;;  %v197_v27 = vunpack.c.2.s8 %v72_v16  ;;  %v202_v28 = vunpack.c.3.s8 %v72_v16 }
  0x45   :  { %586 = vmatpush.bf16.msrb.mxu3 %v467_v21  ;;  %v421_v29 = vpack.c.bf16 %v281_v22, %v276_v18  ;;  %v277_v30 = vcvt.s32.f32 %v117_v23  ;;  %v282_v31 = vcvt.s32.f32 %v122_v24  ;;  %v106_v32 = vunpack.c.0.s8 %v51_v59  ;;  %v63_v23 = vld [vmem:[#allocation2 + $0x98] sm:$0xff] }
  0x46   :  { %v461_v33 = vpack.c.bf16 %v361_v26, %v356_v25  ;;  %v357_v34 = vcvt.s32.f32 %v197_v27  ;;  %v362_v35 = vcvt.s32.f32 %v202_v28  ;;  %v111_v36 = vunpack.c.1.s8 %v51_v59 }
  0x47   :  { %548 = vmatpush.bf16.msrb.mxu0 %v421_v29  ;;  %v422_v37 = vpack.c.bf16 %v282_v31, %v277_v30  ;;  %v266_v38 = vcvt.s32.f32 %v106_v32  ;;  %v186_v39 = vunpack.c.0.s8 %v71_v5  ;;  %v191_v40 = vunpack.c.1.s8 %v71_v5  ;;  %v83_v32 = vld [vmem:[#allocation2 + $0x138] sm:$0xff] }
  0x48   :  { %561 = vmatpush.bf16.msrb.mxu1 %v461_v33  ;;  %v462_v42 = vpack.c.bf16 %v362_v35, %v357_v34  ;;  %v271_v43 = vcvt.s32.f32 %v111_v36  ;;  %v107_v44 = vunpack.c.0.s8 %v52_v11  ;;  %v112_v45 = vunpack.c.1.s8 %v52_v11 }
  0x49   :  { %574 = vmatpush.bf16.msrb.mxu2 %v422_v37  ;;  %v346_v46 = vcvt.s32.f32 %v186_v39  ;;  %v351_v47 = vcvt.s32.f32 %v191_v40  ;;  %v187_v48 = vunpack.c.0.s8 %v72_v16  ;;  %v192_v49 = vunpack.c.1.s8 %v72_v16 }
  0x4a   :  { %587 = vmatpush.bf16.msrb.mxu3 %v462_v42  ;;  %v416_v51 = vpack.c.bf16 %v271_v43, %v266_v38  ;;  %v267_v52 = vcvt.s32.f32 %v107_v44  ;;  %v272_v53 = vcvt.s32.f32 %v112_v45  ;;  %v96_v54 = vunpack.c.2.s8 %v46_v41  ;;  %v58_v45 = vld [vmem:[#allocation2 + $0x70] sm:$0xff] }
  0x4b   :  { %v456_v56 = vpack.c.bf16 %v351_v47, %v346_v46  ;;  %v347_v57 = vcvt.s32.f32 %v187_v48  ;;  %v352_v58 = vcvt.s32.f32 %v192_v49  ;;  %v101_v59 = vunpack.c.3.s8 %v46_v41 }
  0x4c   :  { %549 = vmatpush.bf16.msrb.mxu0 %v416_v51  ;;  %v417_v61 = vpack.c.bf16 %v272_v53, %v267_v52  ;;  %v256_v62 = vcvt.s32.f32 %v96_v54  ;;  %v176_v63 = vunpack.c.2.s8 %v66_v50  ;;  %v181_v0 = vunpack.c.3.s8 %v66_v50  ;;  %v78_v54 = vld [vmem:[#allocation2 + $0x110] sm:$0xff] }
  0x4d   :  { %562 = vmatpush.bf16.msrb.mxu1 %v456_v56  ;;  %v457_v2 = vpack.c.bf16 %v352_v58, %v347_v57  ;;  %v261_v3 = vcvt.s32.f32 %v101_v59  ;;  %v97_v4 = vunpack.c.2.s8 %v47_v55  ;;  %v102_v5 = vunpack.c.3.s8 %v47_v55 }
  0x4e   :  { %575 = vmatpush.bf16.msrb.mxu2 %v417_v61  ;;  %v336_v7 = vcvt.s32.f32 %v176_v63  ;;  %v341_v8 = vcvt.s32.f32 %v181_v0  ;;  %v177_v9 = vunpack.c.2.s8 %v67_v60  ;;  %v182_v10 = vunpack.c.3.s8 %v67_v60 }
  0x4f   :  { %588 = vmatpush.bf16.msrb.mxu3 %v457_v2  ;;  %v411_v11 = vpack.c.bf16 %v261_v3, %v256_v62  ;;  %v257_v12 = vcvt.s32.f32 %v97_v4  ;;  %v262_v13 = vcvt.s32.f32 %v102_v5  ;;  %v86_v14 = vunpack.c.0.s8 %v46_v41 }
  0x50   :  { %v451_v15 = vpack.c.bf16 %v341_v8, %v336_v7  ;;  %v337_v16 = vcvt.s32.f32 %v177_v9  ;;  %v342_v17 = vcvt.s32.f32 %v182_v10  ;;  %v91_v18 = vunpack.c.1.s8 %v46_v41  ;;  %v53_v9 = vld [vmem:[#allocation2 + $0x48] sm:$0xff] }
  0x51   :  { %550 = vmatpush.bf16.msrb.mxu0 %v411_v11  ;;  %v412_v19 = vpack.c.bf16 %v262_v13, %v257_v12  ;;  %v246_v20 = vcvt.s32.f32 %v86_v14  ;;  %v166_v21 = vunpack.c.0.s8 %v66_v50  ;;  %v171_v22 = vunpack.c.1.s8 %v66_v50  ;;  %v73_v14 = vld [vmem:[#allocation2 + $0xe8] sm:$0xff] }
  0x52   :  { %563 = vmatpush.bf16.msrb.mxu1 %v451_v15  ;;  %v452_v24 = vpack.c.bf16 %v342_v17, %v337_v16  ;;  %v251_v25 = vcvt.s32.f32 %v91_v18  ;;  %v87_v26 = vunpack.c.0.s8 %v47_v55  ;;  %v92_v27 = vunpack.c.1.s8 %v47_v55 }
  0x53   :  { %576 = vmatpush.bf16.msrb.mxu2 %v412_v19  ;;  %v326_v28 = vcvt.s32.f32 %v166_v21  ;;  %v331_v29 = vcvt.s32.f32 %v171_v22  ;;  %v167_v30 = vunpack.c.0.s8 %v67_v60  ;;  %v172_v31 = vunpack.c.1.s8 %v67_v60 }
  0x54   :  { %589 = vmatpush.bf16.msrb.mxu3 %v452_v24  ;;  %v406_v33 = vpack.c.bf16 %v251_v25, %v246_v20  ;;  %v247_v34 = vcvt.s32.f32 %v87_v26  ;;  %v252_v35 = vcvt.s32.f32 %v92_v27  ;;  %v158_v36 = vunpack.c.2.s8 %v63_v23 }
  0x55   :  { %v446_v37 = vpack.c.bf16 %v331_v29, %v326_v28  ;;  %v327_v38 = vcvt.s32.f32 %v167_v30  ;;  %v332_v39 = vcvt.s32.f32 %v172_v31  ;;  %v163_v40 = vunpack.c.3.s8 %v63_v23 }
  0x56   :  { %551 = vmatpush.bf16.msrb.mxu0 %v406_v33  ;;  %v407_v41 = vpack.c.bf16 %v252_v35, %v247_v34  ;;  %v318_v42 = vcvt.s32.f32 %v158_v36  ;;  %v238_v43 = vunpack.c.2.s8 %v83_v32  ;;  %v243_v44 = vunpack.c.3.s8 %v83_v32  ;;  %v68_v36 = vld [vmem:[#allocation2 + $0xc0] sm:$0xff] }
  0x57   :  { %564 = vmatpush.bf16.msrb.mxu1 %v446_v37  ;;  %v447_v46 = vpack.c.bf16 %v332_v39, %v327_v38  ;;  %v323_v47 = vcvt.s32.f32 %v163_v40  ;;  %v148_v48 = vunpack.c.0.s8 %v63_v23  ;;  %v153_v49 = vunpack.c.1.s8 %v63_v23 }
  0x58   :  { %577 = vmatpush.bf16.msrb.mxu2 %v407_v41  ;;  %v398_v50 = vcvt.s32.f32 %v238_v43  ;;  %v403_v51 = vcvt.s32.f32 %v243_v44  ;;  %v228_v52 = vunpack.c.0.s8 %v83_v32  ;;  %v233_v53 = vunpack.c.1.s8 %v83_v32  ;;  %v48_v32 = vld [vmem:[#allocation2 + $0x20] sm:$0xff] }
  0x59   :  { %590 = vmatpush.bf16.msrb.mxu3 %v447_v46  ;;  %v443_v55 = vpack.c.bf16 %v323_v47, %v318_v42  ;;  %v308_v56 = vcvt.s32.f32 %v148_v48  ;;  %v313_v57 = vcvt.s32.f32 %v153_v49  ;;  %552 = vmatmul.bf16.vlgmr.msrb.gmra.mxu0 %v776_v1  ;;  %v138_v58 = vunpack.c.2.s8 %v58_v45 }
  0x5a   :  { %v483_v59 = vpack.c.bf16 %v403_v51, %v398_v50  ;;  %v388_v60 = vcvt.s32.f32 %v228_v52  ;;  %v393_v61 = vcvt.s32.f32 %v233_v53  ;;  %565 = vmatmul.bf16.vlgmr.msrb.gmra.mxu1 %v778_v6  ;;  %v143_v62 = vunpack.c.3.s8 %v58_v45 }
  0x5b   :  { %596 = vmatpush.bf16.msra.mxu0 %v443_v55  ;;  %578 = vmatmul.bf16.vlgmr.msrb.gmra.mxu2 %v776_v1  ;;  %v438_v63 = vpack.c.bf16 %v313_v57, %v308_v56  ;;  %v298_v0 = vcvt.s32.f32 %v138_v58  ;;  %v218_v2 = vunpack.c.2.s8 %v78_v54  ;;  %v223_v3 = vunpack.c.3.s8 %v78_v54 }
  0x5c   :  { %609 = vmatpush.bf16.msra.mxu1 %v483_v59  ;;  %591 = vmatmul.bf16.vlgmr.msrb.gmra.mxu3 %v778_v6  ;;  %v478_v4 = vpack.c.bf16 %v393_v61, %v388_v60  ;;  %v303_v5 = vcvt.s32.f32 %v143_v62  ;;  %v128_v7 = vunpack.c.0.s8 %v58_v45  ;;  %v133_v8 = vunpack.c.1.s8 %v58_v45 }
  0x5d   :  { %v378_v10 = vcvt.s32.f32 %v218_v2  ;;  %v383_v11 = vcvt.s32.f32 %v223_v3  ;;  %v208_v12 = vunpack.c.0.s8 %v78_v54  ;;  %v213_v13 = vunpack.c.1.s8 %v78_v54 }
  0x5e   :  { %v288_v15 = vcvt.s32.f32 %v128_v7  ;;  %v293_v16 = vcvt.s32.f32 %v133_v8  ;;  %v433_v17 = vpack.c.bf16 %v303_v5, %v298_v0  ;;  %v118_v19 = vunpack.c.2.s8 %v53_v9 }
  0x5f   :  { %597 = vmatpush.bf16.msra.mxu0 %v438_v63  ;;  %v473_v18 = vpack.c.bf16 %v383_v11, %v378_v10  ;;  %v123_v20 = vunpack.c.3.s8 %v53_v9  ;;  %v368_v21 = vcvt.s32.f32 %v208_v12  ;;  %v373_v22 = vcvt.s32.f32 %v213_v13  ;;  %v801_v13 = vld [vmem:[%s831_s3] sm:$0x1f] }
  0x60   :  { %610 = vmatpush.bf16.msra.mxu1 %v478_v4  ;;  %v198_v23 = vunpack.c.2.s8 %v73_v14  ;;  %v203_v24 = vunpack.c.3.s8 %v73_v14  ;;  %v428_v25 = vpack.c.bf16 %v293_v16, %v288_v15  ;;  %v108_v26 = vunpack.c.0.s8 %v53_v9 }
  0x61   :  { %v113_v27 = vunpack.c.1.s8 %v53_v9  ;;  %v278_v28 = vcvt.s32.f32 %v118_v19  ;;  %v283_v29 = vcvt.s32.f32 %v123_v20  ;;  %v188_v30 = vunpack.c.0.s8 %v73_v14 }
  0x62   :  { %v193_v31 = vunpack.c.1.s8 %v73_v14  ;;  %v468_v33 = vpack.c.bf16 %v373_v22, %v368_v21  ;;  %v358_v34 = vcvt.s32.f32 %v198_v23  ;;  %v363_v35 = vcvt.s32.f32 %v203_v24 }
  0x63   :  { %598 = vmatpush.bf16.msra.mxu0 %v433_v17  ;;  %v268_v37 = vcvt.s32.f32 %v108_v26  ;;  %v273_v38 = vcvt.s32.f32 %v113_v27  ;;  %v98_v39 = vunpack.c.2.s8 %v48_v32  ;;  %v423_v40 = vpack.c.bf16 %v283_v29, %v278_v28 }
  0x64   :  { %611 = vmatpush.bf16.msra.mxu1 %v473_v18  ;;  %v348_v41 = vcvt.s32.f32 %v188_v30  ;;  %v353_v42 = vcvt.s32.f32 %v193_v31  ;;  %v103_v43 = vunpack.c.3.s8 %v48_v32  ;;  %v463_v44 = vpack.c.bf16 %v363_v35, %v358_v34 }
  0x65   :  { %v178_v45 = vunpack.c.2.s8 %v68_v36  ;;  %v183_v46 = vunpack.c.3.s8 %v68_v36  ;;  %v418_v47 = vpack.c.bf16 %v273_v38, %v268_v37  ;;  %v258_v48 = vcvt.s32.f32 %v98_v39 }
  0x66   :  { %v458_v49 = vpack.c.bf16 %v353_v42, %v348_v41  ;;  %v263_v50 = vcvt.s32.f32 %v103_v43  ;;  %v88_v51 = vunpack.c.0.s8 %v48_v32  ;;  %v93_v52 = vunpack.c.1.s8 %v48_v32 }
  0x67   :  { %599 = vmatpush.bf16.msra.mxu0 %v428_v25  ;;  %v338_v53 = vcvt.s32.f32 %v178_v45  ;;  %v343_v54 = vcvt.s32.f32 %v183_v46  ;;  %v168_v55 = vunpack.c.0.s8 %v68_v36  ;;  %v173_v56 = vunpack.c.1.s8 %v68_v36 }
  0x68   :  { %612 = vmatpush.bf16.msra.mxu1 %v468_v33  ;;  %v413_v57 = vpack.c.bf16 %v263_v50, %v258_v48  ;;  %v248_v58 = vcvt.s32.f32 %v88_v51  ;;  %v253_v59 = vcvt.s32.f32 %v93_v52  ;;  %v744_v11 = vmov 0.0  }
  0x69   :  { %v453_v60 = vpack.c.bf16 %v343_v54, %v338_v53  ;;  %v328_v61 = vcvt.s32.f32 %v168_v55  ;;  %v333_v62 = vcvt.s32.f32 %v173_v56  ;;  %38 = vst [vmem:[%s832_s4 + $0x8] sm:$0x3] %v744_v11  ;;  %v665_v18 = vperm.slane %v801_v13, 1 }
  0x6a   :  { %v408_v63 = vpack.c.bf16 %v253_v59, %v248_v58  ;;  %v666_v20 = vperm.slane %v801_v13, 2  ;;  %v667_v21 = vperm.slane %v801_v13, 3  ;;  %v664_v30 = vperm.slane %v801_v13, 0 }
  0x6b   :  { %600 = vmatpush.bf16.msra.mxu0 %v423_v40  ;;  %v448_v0 = vpack.c.bf16 %v333_v62, %v328_v61  ;;  %v670_v31 = vrot.slane %v665_v18, 6  ;;  %vm633_vm2 = vcmask 1043456  }
  0x6c   :  { %613 = vmatpush.bf16.msra.mxu1 %v463_v44  ;;  %v671_v36 = vrot.slane %v666_v20, 4  ;;  %v672_v37 = vrot.slane %v667_v21, 2 }
  0x6d   :  { %v673_v42 = vsel %vm629_vm0, %v664_v30, %v670_v31 }
  0x6e   :  { %v674_v44 = vsel %vm631_vm1, %v671_v36, %v672_v37 }
  0x6f   :  { %601 = vmatpush.bf16.msra.mxu0 %v418_v47  ;;  %v675_v48 = vsel %vm633_vm2, %v673_v42, %v674_v44 }
  0x70   :  { %614 = vmatpush.bf16.msra.mxu1 %v458_v49 }
  0x73   :  { %602 = vmatpush.bf16.msra.mxu0 %v413_v57  ;;  %v485_v57 = vld [vmem:[%s832_s4 + $0x8] sm:$0x3] }
  0x74   :  { %615 = vmatpush.bf16.msra.mxu1 %v453_v60 }
  0x77   :  { %603 = vmatpush.bf16.msra.mxu0 %v408_v63 }
  0x78   :  { %616 = vmatpush.bf16.msra.mxu1 %v448_v0 }
  0x7a   :  { %604 = vmatmul.bf16.vlgmr.msra.gmra.mxu0 %v776_v1  ;;  %v796_v1 = vld [vmem:[%s830_s2] sm:$0x1f] }
  0x7b   :  { %617 = vmatmul.bf16.vlgmr.msra.gmra.mxu1 %v778_v6  ;;  %v648_v14 = vperm.slane %v796_v1, 1  ;;  %v649_v15 = vperm.slane %v796_v1, 2  ;;  %v650_v16 = vperm.slane %v796_v1, 3  ;;  %v647_v22 = vperm.slane %v796_v1, 0 }
  0x7d   :  { %v653_v23 = vrot.slane %v648_v14, 6  ;;  %v654_v25 = vrot.slane %v649_v15, 4  ;;  %v655_v26 = vrot.slane %v650_v16, 2 }
  0x7f   :  { %v656_v38 = vsel %vm629_vm0, %v647_v22, %v653_v23  ;;  %v657_v40 = vsel %vm631_vm1, %v654_v25, %v655_v26 }
  0x80   :  { %v658_v46 = vsel %vm633_vm2, %v656_v38, %v657_v40 }
  0xae   :  { %v501_v2 = vpop.f32.mrf.mxu0 }
  0xaf   :  { %v514_v3 = vpop.f32.mrf.mxu1 }
  0xb0   :  { %v515_v28 = vadd.f32 %v514_v3, %v501_v2  ;;  %v651_v2 = vperm.slane %v796_v1, 4  ;;  %v668_v3 = vperm.slane %v801_v13, 4 }
  0xb6   :  { %v527_v4 = vpop.f32.mrf.mxu2  ;;  %v503_v5 = vpop.f32.mrf.mxu0 }
  0xb7   :  { %v540_v7 = vpop.f32.mrf.mxu3  ;;  %v516_v8 = vpop.f32.mrf.mxu1 }
  0xb8   :  { %v541_v17 = vadd.f32 %v540_v7, %v527_v4 }
  0xba   :  { %v626_v29 = vrot.slane %v541_v17, 6 }
  0xbc   :  { %v630_v41 = vsel %vm629_vm0, %v515_v28, %v626_v29 }
  0xbe   :  { %v529_v9 = vpop.f32.mrf.mxu2 }
  0xbf   :  { %v542_v10 = vpop.f32.mrf.mxu3 }
  0xd6   :  { %v553_v12 = vpop.f32.mrf.mxu0 }
  0xd7   :  { %v566_v6 = vpop.f32.mrf.mxu1 }
  0xd8   :  { %v567_v19 = vadd.f32 %v566_v6, %v553_v12 }
  0xda   :  { %v627_v34 = vrot.slane %v567_v19, 4 }
  0xde   :  { %v579_v24 = vpop.f32.mrf.mxu2  ;;  %v555_v27 = vpop.f32.mrf.mxu0 }
  0xdf   :  { %v592_v32 = vpop.f32.mrf.mxu3  ;;  %v568_v33 = vpop.f32.mrf.mxu1 }
  0xe0   :  { %v593_v35 = vadd.f32 %v592_v32, %v579_v24 }
  0xe2   :  { %v628_v39 = vrot.slane %v593_v35, 2 }
  0xe4   :  { %v632_v43 = vsel %vm631_vm1, %v627_v34, %v628_v39 }
  0xe5   :  { %v634_v45 = vsel %vm633_vm2, %v630_v41, %v632_v43 }
  0xe6   :  { %v581_v47 = vpop.f32.mrf.mxu2  ;;  %v660_v50 = vmul.f32 %v658_v46, %v634_v45 }
  0xe7   :  { %v594_v49 = vpop.f32.mrf.mxu3 }
  0xe8   :  { %v677_v51 = vadd.f32 %v675_v48, %v660_v50 }
  0xea   :  { %v701_v52 = vclamps-f32 %v677_v51, 40.0 }
  0xec   :  { %v683_v53 = vsub.f32 0.0, %v701_v52 }
  0xee   :  { %v685_v54 = vmul.f32 1.442695, %v683_v53 }
  0xf0   :  { %707 = vpow2.f32 %v685_v54 }
  0xf6   :  { %v708_v56 = vpop.eup %707 }
  0xf7   :  { %v605_v55 = vpop.f32.mrf.mxu0  ;;  %v689_v59 = vadd.f32 1.0, %v708_v56 }
  0xf8   :  { %v618_v58 = vpop.f32.mrf.mxu1 }
  0xf9   :  { %v619_v60 = vadd.f32 %v618_v58, %v605_v55  ;;  %709 = vrcp.f32 %v689_v59 }
  0xfb   :  { %v637_v61 = vadd.f32 %v619_v60, %v485_v57 }
  0xfd   :  { %639 = vst [vmem:[%s832_s4 + $0x8] sm:$0x3] %v637_v61 }
  0xff   :  { %v607_v62 = vpop.f32.mrf.mxu0  ;;  %v710_v0 = vpop.eup %709 }
 0x100   :  { %v620_v63 = vpop.f32.mrf.mxu1  ;;  %693 = vst [vmem:[%s832_s4] sm:$0xff] %v710_v0 }
 0x104   :  { %v644_v4 = vld [vmem:[%s832_s4 + $0x8] sm:$0x3] }
 0x105   :  { %v661_v5 = vmul.f32 %v651_v2, %v644_v4 }
 0x107   :  { %v678_v7 = vadd.f32 %v668_v3, %v661_v5 }
 0x109   :  { %v702_v8 = vclamps-f32 %v678_v7, 40.0 }
 0x10b   :  { %v684_v9 = vsub.f32 0.0, %v702_v8 }
 0x10d   :  { %v687_v10 = vmul.f32 1.442695, %v684_v9 }
 0x10f   :  { %711 = vpow2.f32 %v687_v10 }
 0x115   :  { %v712_v11 = vpop.eup %711 }
 0x116   :  { %v690_v12 = vadd.f32 1.0, %v712_v11 }
 0x118   :  { %713 = vrcp.f32 %v690_v12 }
 0x11e   :  { %v714_v1 = vpop.eup %713 }
 0x11f   :  { %694 = vst [vmem:[%s832_s4 + $0x8] sm:$0x3] %v714_v1 }
 0x120   :  { %699 = vsyncpa [#allocation3], 1 }

// kernel: _lambda_.8
= control target key start
LH: loop header
LB: loop body
LE: loop exit
PB: predicated region body
PF: predicated region fallthrough
CT: control target
= control target key end

     0   :  { %9 = vsyncpa [#allocation3], 0  ;;  %s703_s18 = smov [#allocation2]   ;;  %s704_s20 = smov 256   ;;  %s800_s0 = inlined_call_operand.vmem [shape: bf16[2,640], index: 0, kind: input, shape index: {}]   ;;  %s801_s1 = inlined_call_operand.hbm [shape: s8[640,256], index: 1, kind: input, shape index: {}]   ;;  %s802_s2 = inlined_call_operand.vmem [shape: f32[1,256], index: 2, kind: input, shape index: {}]   ;;  %s803_s3 = inlined_call_operand.vmem [shape: f32[1,256], index: 3, kind: input, shape index: {}]   ;;  %s804_s4 = inlined_call_operand.vmem [shape: f32[2,256], index: 4, kind: output, shape index: {}]  }
   0x1   :  { %s16_s17 = sshll.u32 %s801_s1, 4  ;;  %s18_s19 = sshll.u32 %s703_s18, 4  ;;  %s17_s17 = int_to_ptr.hbm [resolvable:$true] %s16_s17  ;;  %s19_s19 = int_to_ptr.vmem [resolvable:$true] %s18_s19 }
   0x2   :  { %s705_s21 = smov 16  }
   0x3   :  { %24 = dma.hbm_to_vmem [thread:$0]  %s17_s17, 5120, %s19_s19, [#allocation3], %s704_s20, %s704_s20, %s705_s21  }
   0x4   :  { %701 = dma.done.wait [#allocation3], 5120  }
   0x5   :  { %702 = vsyncadd [#allocation3], 4294962176  ;;  %v49_v0 = vld [vmem:[#allocation2 + $0x30] sm:$0xff]  ;;  %v47_v10 = vld [vmem:[#allocation2 + $0x20] sm:$0xff]  ;;  %vm629_vm0 = vcmask 1041408  }
   0x6   :  { %v57_v1 = vld [vmem:[#allocation2 + $0x70] sm:$0xff]  ;;  %v111_v2 = vunpack.c.2.s8 %v49_v0  ;;  %v113_v3 = vunpack.c.3.s8 %v49_v0  ;;  %v107_v6 = vunpack.c.0.s8 %v49_v0  ;;  %v109_v7 = vunpack.c.1.s8 %v49_v0  ;;  %v55_v15 = vld [vmem:[#allocation2 + $0x60] sm:$0xff] }
   0x7   :  { %v143_v4 = vunpack.c.2.s8 %v57_v1  ;;  %v145_v5 = vunpack.c.3.s8 %v57_v1  ;;  %v139_v8 = vunpack.c.0.s8 %v57_v1  ;;  %v141_v9 = vunpack.c.1.s8 %v57_v1  ;;  %v65_v20 = vld [vmem:[#allocation2 + $0xb0] sm:$0xff]  ;;  %v63_v0 = vld [vmem:[#allocation2 + $0xa0] sm:$0xff] }
   0x8   :  { %v271_v11 = vcvt.s32.f32 %v111_v2  ;;  %v273_v12 = vcvt.s32.f32 %v113_v3  ;;  %v267_v16 = vcvt.s32.f32 %v107_v6  ;;  %v269_v17 = vcvt.s32.f32 %v109_v7  ;;  %v73_v25 = vld [vmem:[#allocation2 + $0xf0] sm:$0xff] }
   0x9   :  { %v303_v13 = vcvt.s32.f32 %v143_v4  ;;  %v305_v14 = vcvt.s32.f32 %v145_v5  ;;  %v299_v18 = vcvt.s32.f32 %v139_v8  ;;  %v301_v19 = vcvt.s32.f32 %v141_v9  ;;  %v45_v50 = vld [vmem:[#allocation2 + $0x10] sm:$0xff]  ;;  %v71_v5 = vld [vmem:[#allocation2 + $0xe0] sm:$0xff] }
   0xa   :  { %v417_v21 = vpack.c.bf16 %v273_v12, %v271_v11  ;;  %v103_v23 = vunpack.c.2.s8 %v47_v10  ;;  %v105_v24 = vunpack.c.3.s8 %v47_v10  ;;  %v415_v26 = vpack.c.bf16 %v269_v17, %v267_v16  ;;  %v53_v59 = vld [vmem:[#allocation2 + $0x50] sm:$0xff] }
   0xb   :  { %v433_v22 = vpack.c.bf16 %v305_v14, %v303_v13  ;;  %v431_v27 = vpack.c.bf16 %v301_v19, %v299_v18  ;;  %v135_v28 = vunpack.c.2.s8 %v55_v15  ;;  %v137_v29 = vunpack.c.3.s8 %v55_v15 }
   0xc   :  { %496 = vmatpush.bf16.msra.mxu0 %v417_v21  ;;  %v263_v30 = vcvt.s32.f32 %v103_v23  ;;  %v265_v31 = vcvt.s32.f32 %v105_v24  ;;  %v175_v32 = vunpack.c.2.s8 %v65_v20  ;;  %v177_v33 = vunpack.c.3.s8 %v65_v20 }
   0xd   :  { %509 = vmatpush.bf16.msra.mxu1 %v433_v22  ;;  %v295_v34 = vcvt.s32.f32 %v135_v28  ;;  %v297_v35 = vcvt.s32.f32 %v137_v29  ;;  %v207_v36 = vunpack.c.2.s8 %v73_v25  ;;  %v209_v37 = vunpack.c.3.s8 %v73_v25 }
   0xe   :  { %v413_v38 = vpack.c.bf16 %v265_v31, %v263_v30  ;;  %v335_v39 = vcvt.s32.f32 %v175_v32  ;;  %v337_v40 = vcvt.s32.f32 %v177_v33  ;;  %v99_v41 = vunpack.c.0.s8 %v47_v10  ;;  %v43_v30 = vld [vmem:[#allocation2] sm:$0xff] }
   0xf   :  { %v429_v42 = vpack.c.bf16 %v297_v35, %v295_v34  ;;  %v367_v43 = vcvt.s32.f32 %v207_v36  ;;  %v369_v44 = vcvt.s32.f32 %v209_v37  ;;  %v101_v45 = vunpack.c.1.s8 %v47_v10 }
  0x10   :  { %497 = vmatpush.bf16.msra.mxu0 %v415_v26  ;;  %v449_v46 = vpack.c.bf16 %v337_v40, %v335_v39  ;;  %v259_v47 = vcvt.s32.f32 %v99_v41  ;;  %v131_v48 = vunpack.c.0.s8 %v55_v15  ;;  %v133_v49 = vunpack.c.1.s8 %v55_v15  ;;  %v51_v39 = vld [vmem:[#allocation2 + $0x40] sm:$0xff]  ;;  %v42_v40 = vld [vmem:[%s800_s0] sm:$0x1f] }
  0x11   :  { %510 = vmatpush.bf16.msra.mxu1 %v431_v27  ;;  %v465_v51 = vpack.c.bf16 %v369_v44, %v367_v43  ;;  %v261_v52 = vcvt.s32.f32 %v101_v45  ;;  %v171_v53 = vunpack.c.0.s8 %v65_v20  ;;  %v173_v54 = vunpack.c.1.s8 %v65_v20  ;;  %v61_v45 = vld [vmem:[#allocation2 + $0x90] sm:$0xff]  ;;  %485 = vst [vmem:[#allocation1] ss:$9 sm:$0xff] %v42_v40 }
  0x12   :  { %522 = vmatpush.bf16.msra.mxu2 %v449_v46  ;;  %v291_v55 = vcvt.s32.f32 %v131_v48  ;;  %v293_v56 = vcvt.s32.f32 %v133_v49  ;;  %v203_v57 = vunpack.c.0.s8 %v73_v25  ;;  %v205_v58 = vunpack.c.1.s8 %v73_v25 }
  0x13   :  { %535 = vmatpush.bf16.msra.mxu3 %v465_v51  ;;  %v411_v60 = vpack.c.bf16 %v261_v52, %v259_v47  ;;  %v331_v61 = vcvt.s32.f32 %v171_v53  ;;  %v333_v62 = vcvt.s32.f32 %v173_v54  ;;  %v95_v63 = vunpack.c.2.s8 %v45_v50 }
  0x14   :  { %498 = vmatpush.bf16.msra.mxu0 %v413_v38  ;;  %v427_v1 = vpack.c.bf16 %v293_v56, %v291_v55  ;;  %v363_v2 = vcvt.s32.f32 %v203_v57  ;;  %v365_v3 = vcvt.s32.f32 %v205_v58  ;;  %v97_v4 = vunpack.c.3.s8 %v45_v50 }
  0x15   :  { %511 = vmatpush.bf16.msra.mxu1 %v429_v42  ;;  %v447_v6 = vpack.c.bf16 %v333_v62, %v331_v61  ;;  %v255_v7 = vcvt.s32.f32 %v95_v63  ;;  %v127_v8 = vunpack.c.2.s8 %v53_v59  ;;  %v129_v9 = vunpack.c.3.s8 %v53_v59 }
  0x16   :  { %v463_v10 = vpack.c.bf16 %v365_v3, %v363_v2  ;;  %v257_v11 = vcvt.s32.f32 %v97_v4  ;;  %v167_v12 = vunpack.c.2.s8 %v63_v0  ;;  %v169_v13 = vunpack.c.3.s8 %v63_v0 }
  0x17   :  { %523 = vmatpush.bf16.msra.mxu2 %v447_v6  ;;  %v287_v14 = vcvt.s32.f32 %v127_v8  ;;  %v289_v15 = vcvt.s32.f32 %v129_v9  ;;  %v199_v16 = vunpack.c.2.s8 %v71_v5  ;;  %v201_v17 = vunpack.c.3.s8 %v71_v5 }
  0x18   :  { %499 = vmatpush.bf16.msra.mxu0 %v411_v60  ;;  %v409_v18 = vpack.c.bf16 %v257_v11, %v255_v7  ;;  %v327_v19 = vcvt.s32.f32 %v167_v12  ;;  %v329_v20 = vcvt.s32.f32 %v169_v13  ;;  %v91_v21 = vunpack.c.0.s8 %v45_v50  ;;  %536 = vmatpush.bf16.msra.mxu3 %v463_v10  ;;  %v81_v7 = vld [vmem:[#allocation2 + $0x130] sm:$0xff]  ;;  %v50_v12 = vld [vmem:[#allocation2 + $0x38] sm:$0xff] }
  0x19   :  { %512 = vmatpush.bf16.msra.mxu1 %v427_v1  ;;  %v425_v22 = vpack.c.bf16 %v289_v15, %v287_v14  ;;  %v359_v23 = vcvt.s32.f32 %v199_v16  ;;  %v361_v24 = vcvt.s32.f32 %v201_v17  ;;  %v93_v25 = vunpack.c.1.s8 %v45_v50  ;;  %v738_v50 = vld [vmem:[#allocation2 + $0xd0] sm:$0xff] }
  0x1a   :  { %v445_v26 = vpack.c.bf16 %v329_v20, %v327_v19  ;;  %v251_v27 = vcvt.s32.f32 %v91_v21  ;;  %v123_v28 = vunpack.c.0.s8 %v53_v59  ;;  %v125_v29 = vunpack.c.1.s8 %v53_v59 }
  0x1b   :  { %v461_v31 = vpack.c.bf16 %v361_v24, %v359_v23  ;;  %v253_v32 = vcvt.s32.f32 %v93_v25  ;;  %v163_v33 = vunpack.c.0.s8 %v63_v0  ;;  %v165_v34 = vunpack.c.1.s8 %v63_v0  ;;  %v59_v25 = vld [vmem:[#allocation2 + $0x80] sm:$0xff] }
  0x1c   :  { %500 = vmatpush.bf16.msra.mxu0 %v409_v18  ;;  %v283_v35 = vcvt.s32.f32 %v123_v28  ;;  %v285_v36 = vcvt.s32.f32 %v125_v29  ;;  %v195_v37 = vunpack.c.0.s8 %v71_v5  ;;  %v197_v38 = vunpack.c.1.s8 %v71_v5  ;;  %524 = vmatpush.bf16.msra.mxu2 %v445_v26 }
  0x1d   :  { %513 = vmatpush.bf16.msra.mxu1 %v425_v22  ;;  %537 = vmatpush.bf16.msra.mxu3 %v461_v31  ;;  %v407_v41 = vpack.c.bf16 %v253_v32, %v251_v27  ;;  %v323_v42 = vcvt.s32.f32 %v163_v33  ;;  %v325_v43 = vcvt.s32.f32 %v165_v34  ;;  %v87_v44 = vunpack.c.2.s8 %v43_v30 }
  0x1e   :  { %v423_v46 = vpack.c.bf16 %v285_v36, %v283_v35  ;;  %v355_v47 = vcvt.s32.f32 %v195_v37  ;;  %v357_v48 = vcvt.s32.f32 %v197_v38  ;;  %v89_v49 = vunpack.c.3.s8 %v43_v30  ;;  %v744_v38 = vld [vmem:[#allocation1] sm:$0xff] }
  0x1f   :  { %v443_v51 = vpack.c.bf16 %v325_v43, %v323_v42  ;;  %v247_v52 = vcvt.s32.f32 %v87_v44  ;;  %v119_v53 = vunpack.c.2.s8 %v51_v39  ;;  %v121_v54 = vunpack.c.3.s8 %v51_v39  ;;  %v67_v44 = vld [vmem:[#allocation2 + $0xc0] sm:$0xff] }
  0x20   :  { %501 = vmatpush.bf16.msra.mxu0 %v407_v41  ;;  %v459_v55 = vpack.c.bf16 %v357_v48, %v355_v47  ;;  %v249_v56 = vcvt.s32.f32 %v89_v49  ;;  %v159_v57 = vunpack.c.2.s8 %v61_v45  ;;  %v161_v58 = vunpack.c.3.s8 %v61_v45 }
  0x21   :  { %514 = vmatpush.bf16.msra.mxu1 %v423_v46  ;;  %525 = vmatpush.bf16.msra.mxu2 %v443_v51  ;;  %v279_v59 = vcvt.s32.f32 %v119_v53  ;;  %v281_v60 = vcvt.s32.f32 %v121_v54  ;;  %v191_v61 = vunpack.c.2.s8 %v738_v50  ;;  %v193_v62 = vunpack.c.3.s8 %v738_v50  ;;  %v748_v53 = vld [vmem:[#allocation2 + $0x120] sm:$0xff] }
  0x22   :  { %538 = vmatpush.bf16.msra.mxu3 %v459_v55  ;;  %v405_v63 = vpack.c.bf16 %v249_v56, %v247_v52  ;;  %v319_v0 = vcvt.s32.f32 %v159_v57  ;;  %v321_v1 = vcvt.s32.f32 %v161_v58  ;;  %v83_v2 = vunpack.c.0.s8 %v43_v30  ;;  %v48_v58 = vld [vmem:[#allocation2 + $0x28] sm:$0xff] }
  0x23   :  { %v421_v3 = vpack.c.bf16 %v281_v60, %v279_v59  ;;  %v351_v4 = vcvt.s32.f32 %v191_v61  ;;  %v353_v5 = vcvt.s32.f32 %v193_v62  ;;  %v85_v6 = vunpack.c.1.s8 %v43_v30 }
  0x24   :  { %502 = vmatpush.bf16.msra.mxu0 %v405_v63  ;;  %v441_v8 = vpack.c.bf16 %v321_v1, %v319_v0  ;;  %v243_v9 = vcvt.s32.f32 %v83_v2  ;;  %v115_v10 = vunpack.c.0.s8 %v51_v39  ;;  %v117_v11 = vunpack.c.1.s8 %v51_v39  ;;  %v746_v39 = vld [vmem:[#allocation1 + $0x9] sm:$0xff] }
  0x25   :  { %515 = vmatpush.bf16.msra.mxu1 %v421_v3  ;;  %v457_v13 = vpack.c.bf16 %v353_v5, %v351_v4  ;;  %v245_v14 = vcvt.s32.f32 %v85_v6  ;;  %v155_v15 = vunpack.c.0.s8 %v61_v45  ;;  %v157_v16 = vunpack.c.1.s8 %v61_v45  ;;  %v58_v3 = vld [vmem:[#allocation2 + $0x78] sm:$0xff] }
  0x26   :  { %526 = vmatpush.bf16.msra.mxu2 %v441_v8  ;;  %v275_v17 = vcvt.s32.f32 %v115_v10  ;;  %v277_v18 = vcvt.s32.f32 %v117_v11  ;;  %v239_v19 = vunpack.c.2.s8 %v81_v7  ;;  %v241_v20 = vunpack.c.3.s8 %v81_v7 }
  0x27   :  { %539 = vmatpush.bf16.msra.mxu3 %v457_v13  ;;  %v403_v21 = vpack.c.bf16 %v245_v14, %v243_v9  ;;  %v315_v22 = vcvt.s32.f32 %v155_v15  ;;  %v317_v23 = vcvt.s32.f32 %v157_v16  ;;  %v112_v24 = vunpack.c.2.s8 %v50_v12 }
  0x28   :  { %v419_v26 = vpack.c.bf16 %v277_v18, %v275_v17  ;;  %v399_v27 = vcvt.s32.f32 %v239_v19  ;;  %v401_v28 = vcvt.s32.f32 %v241_v20  ;;  %v114_v29 = vunpack.c.3.s8 %v50_v12 }
  0x29   :  { %503 = vmatpush.bf16.msra.mxu0 %v403_v21  ;;  %v439_v30 = vpack.c.bf16 %v317_v23, %v315_v22  ;;  %v272_v31 = vcvt.s32.f32 %v112_v24  ;;  %v187_v32 = vunpack.c.0.s8 %v738_v50  ;;  %v189_v33 = vunpack.c.1.s8 %v738_v50 }
  0x2a   :  { %516 = vmatpush.bf16.msra.mxu1 %v419_v26  ;;  %v481_v34 = vpack.c.bf16 %v401_v28, %v399_v27  ;;  %v274_v35 = vcvt.s32.f32 %v114_v29  ;;  %v151_v36 = vunpack.c.2.s8 %v59_v25  ;;  %v153_v37 = vunpack.c.3.s8 %v59_v25 }
  0x2b   :  { %527 = vmatpush.bf16.msra.mxu2 %v439_v30  ;;  %v347_v40 = vcvt.s32.f32 %v187_v32  ;;  %v349_v41 = vcvt.s32.f32 %v189_v33  ;;  %v235_v42 = vunpack.c.0.s8 %v81_v7  ;;  %v237_v43 = vunpack.c.1.s8 %v81_v7 }
  0x2c   :  { %v418_v45 = vpack.c.bf16 %v274_v35, %v272_v31  ;;  %v311_v46 = vcvt.s32.f32 %v151_v36  ;;  %v313_v47 = vcvt.s32.f32 %v153_v37  ;;  %v108_v48 = vunpack.c.0.s8 %v50_v12  ;;  %504 = vmatmul.bf16.vlgmr.msra.gmra.mxu0 %v744_v38 }
  0x2d   :  { %548 = vmatpush.bf16.msrb.mxu0 %v481_v34  ;;  %v455_v49 = vpack.c.bf16 %v349_v41, %v347_v40  ;;  %v395_v50 = vcvt.s32.f32 %v235_v42  ;;  %v397_v51 = vcvt.s32.f32 %v237_v43  ;;  %v110_v52 = vunpack.c.1.s8 %v50_v12  ;;  %517 = vmatmul.bf16.vlgmr.msra.gmra.mxu1 %v746_v39  ;;  %v66_v12 = vld [vmem:[#allocation2 + $0xb8] sm:$0xff]  ;;  %v77_v40 = vld [vmem:[#allocation2 + $0x110] sm:$0xff] }
  0x2e   :  { %561 = vmatpush.bf16.msrb.mxu1 %v418_v45  ;;  %v437_v54 = vpack.c.bf16 %v313_v47, %v311_v46  ;;  %v268_v55 = vcvt.s32.f32 %v108_v48  ;;  %v183_v56 = vunpack.c.2.s8 %v67_v44  ;;  %v185_v57 = vunpack.c.3.s8 %v67_v44 }
  0x2f   :  { %540 = vmatpush.bf16.msra.mxu3 %v455_v49  ;;  %v479_v59 = vpack.c.bf16 %v397_v51, %v395_v50  ;;  %v270_v60 = vcvt.s32.f32 %v110_v52  ;;  %v147_v61 = vunpack.c.0.s8 %v59_v25  ;;  %v149_v62 = vunpack.c.1.s8 %v59_v25  ;;  %v754_v25 = vld [vmem:[#allocation1 + $0x12] sm:$0xff]  ;;  %v46_v49 = vld [vmem:[#allocation2 + $0x18] sm:$0xff] }
  0x30   :  { %528 = vmatpush.bf16.msra.mxu2 %v437_v54  ;;  %v343_v63 = vcvt.s32.f32 %v183_v56  ;;  %v345_v0 = vcvt.s32.f32 %v185_v57  ;;  %v231_v1 = vunpack.c.2.s8 %v748_v53  ;;  %v233_v2 = vunpack.c.3.s8 %v748_v53  ;;  %v759_v50 = vld [vmem:[#allocation1 + $0x1b] sm:$0xff] }
  0x31   :  { %549 = vmatpush.bf16.msrb.mxu0 %v479_v59  ;;  %v416_v4 = vpack.c.bf16 %v270_v60, %v268_v55  ;;  %v307_v5 = vcvt.s32.f32 %v147_v61  ;;  %v309_v6 = vcvt.s32.f32 %v149_v62  ;;  %v104_v7 = vunpack.c.2.s8 %v48_v58  ;;  %v56_v55 = vld [vmem:[#allocation2 + $0x68] sm:$0xff] }
  0x32   :  { %v453_v8 = vpack.c.bf16 %v345_v0, %v343_v63  ;;  %v391_v9 = vcvt.s32.f32 %v231_v1  ;;  %v393_v10 = vcvt.s32.f32 %v233_v2  ;;  %v106_v11 = vunpack.c.3.s8 %v48_v58  ;;  %v64_v60 = vld [vmem:[#allocation2 + $0xa8] sm:$0xff] }
  0x33   :  { %562 = vmatpush.bf16.msrb.mxu1 %v416_v4  ;;  %v435_v13 = vpack.c.bf16 %v309_v6, %v307_v5  ;;  %v264_v14 = vcvt.s32.f32 %v104_v7  ;;  %v144_v15 = vunpack.c.2.s8 %v58_v3  ;;  %v146_v16 = vunpack.c.3.s8 %v58_v3 }
  0x34   :  { %541 = vmatpush.bf16.msra.mxu3 %v453_v8  ;;  %v477_v17 = vpack.c.bf16 %v393_v10, %v391_v9  ;;  %v266_v18 = vcvt.s32.f32 %v106_v11  ;;  %v179_v19 = vunpack.c.0.s8 %v67_v44  ;;  %v181_v20 = vunpack.c.1.s8 %v67_v44 }
  0x35   :  { %529 = vmatpush.bf16.msra.mxu2 %v435_v13  ;;  %v304_v21 = vcvt.s32.f32 %v144_v15  ;;  %v306_v22 = vcvt.s32.f32 %v146_v16  ;;  %v176_v23 = vunpack.c.2.s8 %v66_v12  ;;  %v178_v24 = vunpack.c.3.s8 %v66_v12 }
  0x36   :  { %550 = vmatpush.bf16.msrb.mxu0 %v477_v17  ;;  %v414_v26 = vpack.c.bf16 %v266_v18, %v264_v14  ;;  %v339_v27 = vcvt.s32.f32 %v179_v19  ;;  %v341_v28 = vcvt.s32.f32 %v181_v20  ;;  %v227_v29 = vunpack.c.0.s8 %v748_v53 }
  0x37   :  { %v434_v30 = vpack.c.bf16 %v306_v22, %v304_v21  ;;  %v336_v31 = vcvt.s32.f32 %v176_v23  ;;  %v338_v32 = vcvt.s32.f32 %v178_v24  ;;  %v229_v33 = vunpack.c.1.s8 %v748_v53  ;;  %v75_v21 = vld [vmem:[#allocation2 + $0x100] sm:$0xff] }
  0x38   :  { %563 = vmatpush.bf16.msrb.mxu1 %v414_v26  ;;  %v451_v34 = vpack.c.bf16 %v341_v28, %v339_v27  ;;  %v387_v35 = vcvt.s32.f32 %v227_v29  ;;  %v100_v36 = vunpack.c.0.s8 %v48_v58  ;;  %v102_v37 = vunpack.c.1.s8 %v48_v58  ;;  %530 = vmatmul.bf16.vlgmr.msra.gmra.mxu2 %v754_v25 }
  0x39   :  { %574 = vmatpush.bf16.msrb.mxu2 %v434_v30  ;;  %v450_v41 = vpack.c.bf16 %v338_v32, %v336_v31  ;;  %v389_v42 = vcvt.s32.f32 %v229_v33  ;;  %v140_v43 = vunpack.c.0.s8 %v58_v3  ;;  %v142_v44 = vunpack.c.1.s8 %v58_v3  ;;  %v44_v31 = vld [vmem:[#allocation2 + $0x8] sm:$0xff] }
  0x3a   :  { %542 = vmatpush.bf16.msra.mxu3 %v451_v34  ;;  %v260_v45 = vcvt.s32.f32 %v100_v36  ;;  %v262_v46 = vcvt.s32.f32 %v102_v37  ;;  %v172_v47 = vunpack.c.0.s8 %v66_v12  ;;  %v174_v48 = vunpack.c.1.s8 %v66_v12  ;;  %v54_v36 = vld [vmem:[#allocation2 + $0x58] sm:$0xff] }
  0x3b   :  { %v475_v51 = vpack.c.bf16 %v389_v42, %v387_v35  ;;  %v300_v52 = vcvt.s32.f32 %v140_v43  ;;  %v302_v53 = vcvt.s32.f32 %v142_v44  ;;  %v223_v54 = vunpack.c.2.s8 %v77_v40  ;;  %v762_v43 = vld [vmem:[#allocation2 + $0x98] sm:$0xff] }
  0x3c   :  { %v412_v56 = vpack.c.bf16 %v262_v46, %v260_v45  ;;  %v332_v57 = vcvt.s32.f32 %v172_v47  ;;  %v334_v58 = vcvt.s32.f32 %v174_v48  ;;  %v225_v59 = vunpack.c.3.s8 %v77_v40 }
  0x3d   :  { %551 = vmatpush.bf16.msrb.mxu0 %v475_v51  ;;  %v432_v61 = vpack.c.bf16 %v302_v53, %v300_v52  ;;  %v383_v62 = vcvt.s32.f32 %v223_v54  ;;  %v96_v63 = vunpack.c.2.s8 %v46_v49  ;;  %v98_v0 = vunpack.c.3.s8 %v46_v49  ;;  %543 = vmatmul.bf16.vlgmr.msra.gmra.mxu3 %v759_v50 }
  0x3e   :  { %587 = vmatpush.bf16.msrb.mxu3 %v450_v41  ;;  %564 = vmatpush.bf16.msrb.mxu1 %v412_v56  ;;  %v448_v1 = vpack.c.bf16 %v334_v58, %v332_v57  ;;  %v385_v2 = vcvt.s32.f32 %v225_v59  ;;  %v136_v3 = vunpack.c.2.s8 %v56_v55  ;;  %v138_v4 = vunpack.c.3.s8 %v56_v55 }
  0x3f   :  { %575 = vmatpush.bf16.msrb.mxu2 %v432_v61  ;;  %v256_v5 = vcvt.s32.f32 %v96_v63  ;;  %v258_v6 = vcvt.s32.f32 %v98_v0  ;;  %v168_v7 = vunpack.c.2.s8 %v64_v60  ;;  %v170_v8 = vunpack.c.3.s8 %v64_v60 }
  0x40   :  { %v473_v9 = vpack.c.bf16 %v385_v2, %v383_v62  ;;  %v296_v10 = vcvt.s32.f32 %v136_v3  ;;  %v298_v11 = vcvt.s32.f32 %v138_v4  ;;  %v219_v12 = vunpack.c.0.s8 %v77_v40 }
  0x41   :  { %v410_v13 = vpack.c.bf16 %v258_v6, %v256_v5  ;;  %v328_v14 = vcvt.s32.f32 %v168_v7  ;;  %v330_v15 = vcvt.s32.f32 %v170_v8  ;;  %v221_v16 = vunpack.c.1.s8 %v77_v40  ;;  %v82_v6 = vld [vmem:[#allocation2 + $0x138] sm:$0xff] }
  0x42   :  { %588 = vmatpush.bf16.msrb.mxu3 %v448_v1  ;;  %552 = vmatpush.bf16.msrb.mxu0 %v473_v9  ;;  %v430_v17 = vpack.c.bf16 %v298_v11, %v296_v10  ;;  %v379_v18 = vcvt.s32.f32 %v219_v12  ;;  %v92_v19 = vunpack.c.0.s8 %v46_v49  ;;  %v94_v20 = vunpack.c.1.s8 %v46_v49  ;;  %v74_v1 = vld [vmem:[#allocation2 + $0xf8] sm:$0xff] }
  0x43   :  { %565 = vmatpush.bf16.msrb.mxu1 %v410_v13  ;;  %v446_v22 = vpack.c.bf16 %v330_v15, %v328_v14  ;;  %v381_v23 = vcvt.s32.f32 %v221_v16  ;;  %v132_v24 = vunpack.c.0.s8 %v56_v55  ;;  %v134_v26 = vunpack.c.1.s8 %v56_v55 }
  0x44   :  { %576 = vmatpush.bf16.msrb.mxu2 %v430_v17  ;;  %v252_v27 = vcvt.s32.f32 %v92_v19  ;;  %v254_v28 = vcvt.s32.f32 %v94_v20  ;;  %v164_v29 = vunpack.c.0.s8 %v64_v60  ;;  %v166_v30 = vunpack.c.1.s8 %v64_v60  ;;  %v52_v19 = vld [vmem:[#allocation2 + $0x48] sm:$0xff] }
  0x45   :  { %v471_v32 = vpack.c.bf16 %v381_v23, %v379_v18  ;;  %v292_v33 = vcvt.s32.f32 %v132_v24  ;;  %v294_v34 = vcvt.s32.f32 %v134_v26  ;;  %v215_v35 = vunpack.c.2.s8 %v75_v21 }
  0x46   :  { %589 = vmatpush.bf16.msrb.mxu3 %v446_v22  ;;  %v408_v37 = vpack.c.bf16 %v254_v28, %v252_v27  ;;  %v324_v40 = vcvt.s32.f32 %v164_v29  ;;  %v326_v41 = vcvt.s32.f32 %v166_v30  ;;  %v217_v42 = vunpack.c.3.s8 %v75_v21 }
  0x47   :  { %553 = vmatpush.bf16.msrb.mxu0 %v471_v32  ;;  %v428_v44 = vpack.c.bf16 %v294_v34, %v292_v33  ;;  %v375_v45 = vcvt.s32.f32 %v215_v35  ;;  %v88_v46 = vunpack.c.2.s8 %v44_v31  ;;  %v90_v47 = vunpack.c.3.s8 %v44_v31  ;;  %v768_v33 = vld [vmem:[#allocation1 + $0x24] sm:$0xff] }
  0x48   :  { %566 = vmatpush.bf16.msrb.mxu1 %v408_v37  ;;  %v444_v48 = vpack.c.bf16 %v326_v41, %v324_v40  ;;  %v377_v49 = vcvt.s32.f32 %v217_v42  ;;  %v128_v51 = vunpack.c.2.s8 %v54_v36  ;;  %v130_v52 = vunpack.c.3.s8 %v54_v36  ;;  %v60_v40 = vld [vmem:[#allocation2 + $0x88] sm:$0xff] }
  0x49   :  { %577 = vmatpush.bf16.msrb.mxu2 %v428_v44  ;;  %v248_v53 = vcvt.s32.f32 %v88_v46  ;;  %v250_v54 = vcvt.s32.f32 %v90_v47  ;;  %v160_v55 = vunpack.c.2.s8 %v762_v43  ;;  %v162_v56 = vunpack.c.3.s8 %v762_v43 }
  0x4a   :  { %590 = vmatpush.bf16.msrb.mxu3 %v444_v48  ;;  %v469_v57 = vpack.c.bf16 %v377_v49, %v375_v45  ;;  %v288_v58 = vcvt.s32.f32 %v128_v51  ;;  %v290_v59 = vcvt.s32.f32 %v130_v52  ;;  %v211_v60 = vunpack.c.0.s8 %v75_v21  ;;  %v72_v49 = vld [vmem:[#allocation2 + $0xe8] sm:$0xff] }
  0x4b   :  { %v406_v61 = vpack.c.bf16 %v250_v54, %v248_v53  ;;  %v320_v62 = vcvt.s32.f32 %v160_v55  ;;  %v322_v63 = vcvt.s32.f32 %v162_v56  ;;  %v213_v0 = vunpack.c.1.s8 %v75_v21  ;;  %v80_v55 = vld [vmem:[#allocation2 + $0x128] sm:$0xff] }
  0x4c   :  { %554 = vmatpush.bf16.msrb.mxu0 %v469_v57  ;;  %v426_v2 = vpack.c.bf16 %v290_v59, %v288_v58  ;;  %v371_v3 = vcvt.s32.f32 %v211_v60  ;;  %v84_v4 = vunpack.c.0.s8 %v44_v31  ;;  %v86_v5 = vunpack.c.1.s8 %v44_v31 }
  0x4d   :  { %567 = vmatpush.bf16.msrb.mxu1 %v406_v61  ;;  %v442_v7 = vpack.c.bf16 %v322_v63, %v320_v62  ;;  %v373_v8 = vcvt.s32.f32 %v213_v0  ;;  %v124_v9 = vunpack.c.0.s8 %v54_v36  ;;  %v126_v10 = vunpack.c.1.s8 %v54_v36 }
  0x4e   :  { %578 = vmatpush.bf16.msrb.mxu2 %v426_v2  ;;  %v244_v11 = vcvt.s32.f32 %v84_v4  ;;  %v246_v12 = vcvt.s32.f32 %v86_v5  ;;  %v208_v13 = vunpack.c.2.s8 %v74_v1  ;;  %v210_v14 = vunpack.c.3.s8 %v74_v1 }
  0x4f   :  { %591 = vmatpush.bf16.msrb.mxu3 %v442_v7  ;;  %v467_v15 = vpack.c.bf16 %v373_v8, %v371_v3  ;;  %v284_v16 = vcvt.s32.f32 %v124_v9  ;;  %v286_v17 = vcvt.s32.f32 %v126_v10  ;;  %v240_v18 = vunpack.c.2.s8 %v82_v6 }
  0x50   :  { %v404_v20 = vpack.c.bf16 %v246_v12, %v244_v11  ;;  %v368_v21 = vcvt.s32.f32 %v208_v13  ;;  %v370_v22 = vcvt.s32.f32 %v210_v14  ;;  %v242_v23 = vunpack.c.3.s8 %v82_v6  ;;  %v70_v11 = vld [vmem:[#allocation2 + $0xd8] sm:$0xff] }
  0x51   :  { %555 = vmatpush.bf16.msrb.mxu0 %v467_v15  ;;  %v424_v24 = vpack.c.bf16 %v286_v17, %v284_v16  ;;  %v400_v26 = vcvt.s32.f32 %v240_v18  ;;  %v156_v27 = vunpack.c.0.s8 %v762_v43  ;;  %v158_v28 = vunpack.c.1.s8 %v762_v43 }
  0x52   :  { %568 = vmatpush.bf16.msrb.mxu1 %v404_v20  ;;  %v466_v29 = vpack.c.bf16 %v370_v22, %v368_v21  ;;  %v402_v30 = vcvt.s32.f32 %v242_v23  ;;  %v120_v31 = vunpack.c.2.s8 %v52_v19  ;;  %v122_v32 = vunpack.c.3.s8 %v52_v19  ;;  %v78_v20 = vld [vmem:[#allocation2 + $0x118] sm:$0xff] }
  0x53   :  { %579 = vmatpush.bf16.msrb.mxu2 %v424_v24  ;;  %v316_v34 = vcvt.s32.f32 %v156_v27  ;;  %v318_v35 = vcvt.s32.f32 %v158_v28  ;;  %v204_v36 = vunpack.c.0.s8 %v74_v1  ;;  %v206_v37 = vunpack.c.1.s8 %v74_v1 }
  0x54   :  { %v482_v41 = vpack.c.bf16 %v402_v30, %v400_v26  ;;  %v280_v42 = vcvt.s32.f32 %v120_v31  ;;  %v282_v44 = vcvt.s32.f32 %v122_v32  ;;  %v236_v45 = vunpack.c.0.s8 %v82_v6  ;;  %556 = vmatmul.bf16.vlgmr.msrb.gmra.mxu0 %v768_v33 }
  0x55   :  { %600 = vmatpush.bf16.msra.mxu0 %v466_v29  ;;  %v440_v46 = vpack.c.bf16 %v318_v35, %v316_v34  ;;  %v364_v43 = vcvt.s32.f32 %v204_v36  ;;  %v366_v47 = vcvt.s32.f32 %v206_v37  ;;  %v238_v48 = vunpack.c.1.s8 %v82_v6  ;;  %569 = vmatmul.bf16.vlgmr.msrb.gmra.mxu1 %v744_v38  ;;  %v68_v35 = vld [vmem:[#allocation2 + $0xc8] sm:$0xff] }
  0x56   :  { %613 = vmatpush.bf16.msra.mxu1 %v482_v41  ;;  %v422_v51 = vpack.c.bf16 %v282_v44, %v280_v42  ;;  %v396_v52 = vcvt.s32.f32 %v236_v45  ;;  %v152_v53 = vunpack.c.2.s8 %v60_v40  ;;  %v154_v54 = vunpack.c.3.s8 %v60_v40 }
  0x57   :  { %592 = vmatpush.bf16.msrb.mxu3 %v440_v46  ;;  %v464_v56 = vpack.c.bf16 %v366_v47, %v364_v43  ;;  %v398_v57 = vcvt.s32.f32 %v238_v48  ;;  %v116_v58 = vunpack.c.0.s8 %v52_v19  ;;  %v118_v59 = vunpack.c.1.s8 %v52_v19  ;;  %v76_v43 = vld [vmem:[#allocation2 + $0x108] sm:$0xff] }
  0x58   :  { %580 = vmatpush.bf16.msrb.mxu2 %v422_v51  ;;  %v312_v60 = vcvt.s32.f32 %v152_v53  ;;  %v314_v61 = vcvt.s32.f32 %v154_v54  ;;  %v200_v62 = vunpack.c.2.s8 %v72_v49  ;;  %v202_v63 = vunpack.c.3.s8 %v72_v49 }
  0x59   :  { %601 = vmatpush.bf16.msra.mxu0 %v464_v56  ;;  %v480_v0 = vpack.c.bf16 %v398_v57, %v396_v52  ;;  %v276_v1 = vcvt.s32.f32 %v116_v58  ;;  %v278_v38 = vcvt.s32.f32 %v118_v59  ;;  %v232_v2 = vunpack.c.2.s8 %v80_v55 }
  0x5a   :  { %v438_v3 = vpack.c.bf16 %v314_v61, %v312_v60  ;;  %v360_v4 = vcvt.s32.f32 %v200_v62  ;;  %v362_v5 = vcvt.s32.f32 %v202_v63  ;;  %v234_v6 = vunpack.c.3.s8 %v80_v55 }
  0x5b   :  { %614 = vmatpush.bf16.msra.mxu1 %v480_v0  ;;  %v420_v7 = vpack.c.bf16 %v278_v38, %v276_v1  ;;  %v392_v8 = vcvt.s32.f32 %v232_v2  ;;  %v148_v9 = vunpack.c.0.s8 %v60_v40  ;;  %v150_v10 = vunpack.c.1.s8 %v60_v40 }
  0x5c   :  { %593 = vmatpush.bf16.msrb.mxu3 %v438_v3  ;;  %v462_v12 = vpack.c.bf16 %v362_v5, %v360_v4  ;;  %v394_v13 = vcvt.s32.f32 %v234_v6  ;;  %v196_v14 = vunpack.c.0.s8 %v72_v49  ;;  %v198_v15 = vunpack.c.1.s8 %v72_v49 }
  0x5d   :  { %581 = vmatpush.bf16.msrb.mxu2 %v420_v7  ;;  %v308_v16 = vcvt.s32.f32 %v148_v9  ;;  %v310_v17 = vcvt.s32.f32 %v150_v10  ;;  %v228_v18 = vunpack.c.0.s8 %v80_v55  ;;  %v230_v19 = vunpack.c.1.s8 %v80_v55 }
  0x5e   :  { %602 = vmatpush.bf16.msra.mxu0 %v462_v12  ;;  %v478_v21 = vpack.c.bf16 %v394_v13, %v392_v8  ;;  %v356_v22 = vcvt.s32.f32 %v196_v14  ;;  %v358_v23 = vcvt.s32.f32 %v198_v15  ;;  %v192_v24 = vunpack.c.2.s8 %v70_v11 }
  0x5f   :  { %v436_v26 = vpack.c.bf16 %v310_v17, %v308_v16  ;;  %v388_v27 = vcvt.s32.f32 %v228_v18  ;;  %v390_v28 = vcvt.s32.f32 %v230_v19  ;;  %v194_v29 = vunpack.c.3.s8 %v70_v11 }
  0x60   :  { %615 = vmatpush.bf16.msra.mxu1 %v478_v21  ;;  %582 = vmatmul.bf16.vlgmr.msrb.gmra.mxu2 %v746_v39  ;;  %v460_v30 = vpack.c.bf16 %v358_v23, %v356_v22  ;;  %v352_v31 = vcvt.s32.f32 %v192_v24  ;;  %v224_v32 = vunpack.c.2.s8 %v78_v20  ;;  %v226_v34 = vunpack.c.3.s8 %v78_v20 }
  0x61   :  { %594 = vmatpush.bf16.msrb.mxu3 %v436_v26  ;;  %v476_v36 = vpack.c.bf16 %v390_v28, %v388_v27  ;;  %v354_v37 = vcvt.s32.f32 %v194_v29  ;;  %v188_v40 = vunpack.c.0.s8 %v70_v11  ;;  %v190_v41 = vunpack.c.1.s8 %v70_v11 }
  0x62   :  { %603 = vmatpush.bf16.msra.mxu0 %v460_v30  ;;  %v384_v42 = vcvt.s32.f32 %v224_v32  ;;  %v386_v44 = vcvt.s32.f32 %v226_v34  ;;  %v220_v45 = vunpack.c.0.s8 %v78_v20  ;;  %v222_v46 = vunpack.c.1.s8 %v78_v20 }
  0x63   :  { %v458_v47 = vpack.c.bf16 %v354_v37, %v352_v31  ;;  %v348_v48 = vcvt.s32.f32 %v188_v40  ;;  %v350_v49 = vcvt.s32.f32 %v190_v41  ;;  %v184_v39 = vunpack.c.2.s8 %v68_v35  ;;  %v646_v41 = vld [vmem:[%s803_s3] sm:$0x3] }
  0x64   :  { %616 = vmatpush.bf16.msra.mxu1 %v476_v36  ;;  %595 = vmatmul.bf16.vlgmr.msrb.gmra.mxu3 %v754_v25  ;;  %v474_v51 = vpack.c.bf16 %v386_v44, %v384_v42  ;;  %v380_v52 = vcvt.s32.f32 %v220_v45  ;;  %v382_v53 = vcvt.s32.f32 %v222_v46  ;;  %v186_v54 = vunpack.c.3.s8 %v68_v35 }
  0x65   :  { %v456_v55 = vpack.c.bf16 %v350_v49, %v348_v48  ;;  %v216_v56 = vunpack.c.2.s8 %v76_v43  ;;  %v218_v57 = vunpack.c.3.s8 %v76_v43  ;;  %v344_v58 = vcvt.s32.f32 %v184_v39 }
  0x66   :  { %604 = vmatpush.bf16.msra.mxu0 %v458_v47  ;;  %v346_v59 = vcvt.s32.f32 %v186_v54  ;;  %v180_v60 = vunpack.c.0.s8 %v68_v35  ;;  %v182_v61 = vunpack.c.1.s8 %v68_v35  ;;  %v472_v62 = vpack.c.bf16 %v382_v53, %v380_v52  ;;  %v638_v35 = vld [vmem:[%s802_s2] sm:$0x3] }
  0x67   :  { %v376_v63 = vcvt.s32.f32 %v216_v56  ;;  %v378_v0 = vcvt.s32.f32 %v218_v57  ;;  %v212_v1 = vunpack.c.0.s8 %v76_v43  ;;  %v214_v38 = vunpack.c.1.s8 %v76_v43 }
  0x68   :  { %617 = vmatpush.bf16.msra.mxu1 %v474_v51  ;;  %v454_v25 = vpack.c.bf16 %v346_v59, %v344_v58  ;;  %v340_v2 = vcvt.s32.f32 %v180_v60  ;;  %v342_v3 = vcvt.s32.f32 %v182_v61  ;;  %v706_v20 = vmov 0.0  }
  0x69   :  { %v470_v4 = vpack.c.bf16 %v378_v0, %v376_v63  ;;  %v372_v5 = vcvt.s32.f32 %v212_v1  ;;  %v374_v6 = vcvt.s32.f32 %v214_v38  ;;  %37 = vst [vmem:[%s804_s4] sm:$0xf] %v706_v20  ;;  %v641_v44 = vperm.slane %v638_v35, 1 }
  0x6a   :  { %605 = vmatpush.bf16.msra.mxu0 %v456_v55  ;;  %v452_v7 = vpack.c.bf16 %v342_v3, %v340_v2  ;;  %v649_v43 = vperm.slane %v646_v41, 1  ;;  %v640_v48 = vperm.slane %v638_v35, 0  ;;  %v648_v39 = vperm.slane %v646_v41, 0 }
  0x6b   :  { %v468_v8 = vpack.c.bf16 %v374_v6, %v372_v5  ;;  %v642_v49 = vrot.slane %v641_v44, 6 }
  0x6c   :  { %618 = vmatpush.bf16.msra.mxu1 %v472_v62  ;;  %v650_v51 = vrot.slane %v649_v43, 6 }
  0x6d   :  { %v643_v52 = vsel %vm629_vm0, %v640_v48, %v642_v49 }
  0x6e   :  { %606 = vmatpush.bf16.msra.mxu0 %v454_v25  ;;  %v651_v54 = vsel %vm629_vm0, %v648_v39, %v650_v51 }
  0x70   :  { %619 = vmatpush.bf16.msra.mxu1 %v470_v4  ;;  %v483_v37 = vld [vmem:[%s804_s4] sm:$0xf] }
  0x72   :  { %607 = vmatpush.bf16.msra.mxu0 %v452_v7 }
  0x74   :  { %620 = vmatpush.bf16.msra.mxu1 %v468_v8 }
  0x75   :  { %608 = vmatmul.bf16.vlgmr.msra.gmra.mxu0 %v759_v50 }
  0x77   :  { %621 = vmatmul.bf16.vlgmr.msra.gmra.mxu1 %v768_v33 }
  0xa9   :  { %v505_v9 = vpop.f32.mrf.mxu0 }
  0xaa   :  { %v518_v10 = vpop.f32.mrf.mxu1 }
  0xab   :  { %v519_v11 = vadd.f32 %v518_v10, %v505_v9 }
  0xb1   :  { %v507_v12 = vpop.f32.mrf.mxu0 }
  0xb2   :  { %v520_v13 = vpop.f32.mrf.mxu1 }
  0xbb   :  { %v531_v14 = vpop.f32.mrf.mxu2 }
  0xbc   :  { %v532_v26 = vadd.f32 %v531_v14, %v519_v11 }
  0xc0   :  { %v544_v15 = vpop.f32.mrf.mxu3 }
  0xc1   :  { %v545_v30 = vadd.f32 %v544_v15, %v532_v26 }
  0xc3   :  { %v533_v16 = vpop.f32.mrf.mxu2 }
  0xc8   :  { %v546_v17 = vpop.f32.mrf.mxu3 }
  0xd1   :  { %v557_v18 = vpop.f32.mrf.mxu0 }
  0xd2   :  { %v570_v19 = vpop.f32.mrf.mxu1  ;;  %v558_v36 = vadd.f32 %v557_v18, %v545_v30 }
  0xd9   :  { %v559_v21 = vpop.f32.mrf.mxu0 }
  0xda   :  { %v572_v50 = vpop.f32.mrf.mxu1 }
  0xe3   :  { %v583_v22 = vpop.f32.mrf.mxu2 }
  0xe4   :  { %v584_v24 = vadd.f32 %v583_v22, %v570_v19 }
  0xe7   :  { %v596_v33 = vpop.f32.mrf.mxu3 }
  0xe8   :  { %v597_v28 = vadd.f32 %v596_v33, %v584_v24 }
  0xeb   :  { %v585_v23 = vpop.f32.mrf.mxu2 }
  0xef   :  { %v598_v27 = vpop.f32.mrf.mxu3 }
  0xf2   :  { %v609_v29 = vpop.f32.mrf.mxu0 }
  0xf3   :  { %v610_v31 = vadd.f32 %v609_v29, %v597_v28 }
  0xf4   :  { %v622_v32 = vpop.f32.mrf.mxu1 }
  0xf5   :  { %v623_v34 = vadd.f32 %v622_v32, %v610_v31 }
  0xf7   :  { %v628_v40 = vrot.slane %v623_v34, 6 }
  0xf9   :  { %v630_v42 = vsel %vm629_vm0, %v558_v36, %v628_v40 }
  0xfa   :  { %v632_v45 = vadd.f32 %v630_v42, %v483_v37  ;;  %v611_v46 = vpop.f32.mrf.mxu0 }
  0xfc   :  { %633 = vst [vmem:[%s804_s4] sm:$0xf] %v632_v45  ;;  %v624_v47 = vpop.f32.mrf.mxu1 }
 0x103   :  { %v637_v53 = vld [vmem:[%s804_s4] sm:$0xf] }
 0x104   :  { %v645_v55 = vmul.f32 %v643_v52, %v637_v53 }
 0x106   :  { %v653_v56 = vadd.f32 %v651_v54, %v645_v55 }
 0x108   :  { %v668_v57 = vclamps-f32 %v653_v56, 40.0 }
 0x10a   :  { %v656_v58 = vsub.f32 0.0, %v668_v57 }
 0x10c   :  { %v657_v59 = vmul.f32 1.442695, %v656_v58 }
 0x10e   :  { %673 = vpow2.f32 %v657_v59 }
 0x114   :  { %v674_v60 = vpop.eup %673 }
 0x115   :  { %v659_v61 = vadd.f32 1.0, %v674_v60 }
 0x117   :  { %675 = vrcp.f32 %v659_v61 }
 0x11d   :  { %v676_v62 = vpop.eup %675 }
 0x11e   :  { %661 = vst [vmem:[%s804_s4] sm:$0xf] %v676_v62 }
 0x11f   :  { %666 = vsyncpa [#allocation3], 1 }

// kernel: _lambda_.7
= control target key start
LH: loop header
LB: loop body
LE: loop exit
PB: predicated region body
PF: predicated region fallthrough
CT: control target
= control target key end

     0   :  { %9 = vsyncpa [#allocation3], 0  ;;  %s1607_s18 = smov [#allocation2]   ;;  %s1608_s20 = smov 640   ;;  %s1842_s0 = inlined_call_operand.vmem [shape: bf16[2,640], index: 0, kind: input, shape index: {}]   ;;  %s1843_s1 = inlined_call_operand.hbm [shape: s8[640,640], index: 1, kind: input, shape index: {}]   ;;  %s1844_s2 = inlined_call_operand.vmem [shape: f32[1,640], index: 2, kind: input, shape index: {}]   ;;  %s1845_s3 = inlined_call_operand.vmem [shape: f32[1,640], index: 3, kind: input, shape index: {}]   ;;  %s1846_s4 = inlined_call_operand.vmem [shape: f32[2,640], index: 4, kind: output, shape index: {}]  }
   0x1   :  { %s16_s17 = sshll.u32 %s1843_s1, 4  ;;  %s18_s19 = sshll.u32 %s1607_s18, 4  ;;  %s17_s17 = int_to_ptr.hbm [resolvable:$true] %s16_s17  ;;  %s19_s19 = int_to_ptr.vmem [resolvable:$true] %s18_s19 }
   0x2   :  { %s1609_s21 = smov 40  }
   0x3   :  { %24 = dma.hbm_to_vmem [thread:$0]  %s17_s17, 12800, %s19_s19, [#allocation3], %s1608_s20, %s1608_s20, %s1609_s21  }
   0x4   :  { %1605 = dma.done.wait [#allocation3], 12800  }
   0x5   :  { %1606 = vsyncadd [#allocation3], 4294954496  ;;  %v59_v0 = vld [vmem:[#allocation2 + $0x78] sm:$0xff]  ;;  %v54_v28 = vld [vmem:[#allocation2 + $0x50] sm:$0xff]  ;;  %vm1490_vm0 = vcmask 1041408   ;;  %vm1492_vm1 = vcmask 1045508  }
   0x6   :  { %v99_v1 = vld [vmem:[#allocation2 + $0x1b8] sm:$0xff]  ;;  %v214_v3 = vunpack.c.2.s8 %v59_v0  ;;  %v219_v4 = vunpack.c.3.s8 %v59_v0  ;;  %v204_v22 = vunpack.c.0.s8 %v59_v0  ;;  %v209_v23 = vunpack.c.1.s8 %v59_v0  ;;  %v94_v37 = vld [vmem:[#allocation2 + $0x190] sm:$0xff] }
   0x7   :  { %v79_v2 = vld [vmem:[#allocation2 + $0x118] sm:$0xff]  ;;  %v374_v5 = vunpack.c.2.s8 %v99_v1  ;;  %v379_v6 = vunpack.c.3.s8 %v99_v1  ;;  %v364_v26 = vunpack.c.0.s8 %v99_v1  ;;  %v369_v27 = vunpack.c.1.s8 %v99_v1  ;;  %v74_v42 = vld [vmem:[#allocation2 + $0xf0] sm:$0xff] }
   0x8   :  { %v119_v7 = vld [vmem:[#allocation2 + $0x258] sm:$0xff]  ;;  %v294_v8 = vunpack.c.2.s8 %v79_v2  ;;  %v299_v9 = vunpack.c.3.s8 %v79_v2  ;;  %v614_v12 = vcvt.s32.f32 %v214_v3  ;;  %v619_v13 = vcvt.s32.f32 %v219_v4  ;;  %v114_v47 = vld [vmem:[#allocation2 + $0x230] sm:$0xff] }
   0x9   :  { %v454_v10 = vunpack.c.2.s8 %v119_v7  ;;  %v459_v11 = vunpack.c.3.s8 %v119_v7  ;;  %v774_v14 = vcvt.s32.f32 %v374_v5  ;;  %v779_v15 = vcvt.s32.f32 %v379_v6 }
   0xa   :  { %v694_v16 = vcvt.s32.f32 %v294_v8  ;;  %v699_v17 = vcvt.s32.f32 %v299_v9  ;;  %v979_v20 = vpack.c.bf16 %v619_v13, %v614_v12  ;;  %v604_v29 = vcvt.s32.f32 %v204_v22  ;;  %v49_v8 = vld [vmem:[#allocation2 + $0x28] sm:$0xff] }
   0xb   :  { %v854_v18 = vcvt.s32.f32 %v454_v10  ;;  %v859_v19 = vcvt.s32.f32 %v459_v11  ;;  %v1059_v21 = vpack.c.bf16 %v779_v15, %v774_v14  ;;  %v609_v30 = vcvt.s32.f32 %v209_v23  ;;  %v69_v22 = vld [vmem:[#allocation2 + $0xc8] sm:$0xff] }
   0xc   :  { %v1019_v24 = vpack.c.bf16 %v699_v17, %v694_v16  ;;  %1158 = vmatpush.bf16.msra.mxu0 %v979_v20  ;;  %v284_v31 = vunpack.c.0.s8 %v79_v2  ;;  %v289_v32 = vunpack.c.1.s8 %v79_v2  ;;  %v764_v33 = vcvt.s32.f32 %v364_v26  ;;  %v89_v17 = vld [vmem:[#allocation2 + $0x168] sm:$0xff] }
   0xd   :  { %v1099_v25 = vpack.c.bf16 %v859_v19, %v854_v18  ;;  %1184 = vmatpush.bf16.msra.mxu2 %v1059_v21  ;;  %v769_v34 = vcvt.s32.f32 %v369_v27  ;;  %v444_v35 = vunpack.c.0.s8 %v119_v7  ;;  %v449_v36 = vunpack.c.1.s8 %v119_v7  ;;  %v109_v27 = vld [vmem:[#allocation2 + $0x208] sm:$0xff] }
   0xe   :  { %1171 = vmatpush.bf16.msra.mxu1 %v1019_v24  ;;  %v974_v38 = vpack.c.bf16 %v609_v30, %v604_v29  ;;  %v684_v39 = vcvt.s32.f32 %v284_v31  ;;  %v689_v40 = vcvt.s32.f32 %v289_v32  ;;  %v194_v41 = vunpack.c.2.s8 %v54_v28 }
   0xf   :  { %1197 = vmatpush.bf16.msra.mxu3 %v1099_v25  ;;  %v1054_v43 = vpack.c.bf16 %v769_v34, %v764_v33  ;;  %v844_v44 = vcvt.s32.f32 %v444_v35  ;;  %v849_v45 = vcvt.s32.f32 %v449_v36  ;;  %v199_v46 = vunpack.c.3.s8 %v54_v28 }
  0x10   :  { %1159 = vmatpush.bf16.msra.mxu0 %v974_v38  ;;  %v1014_v48 = vpack.c.bf16 %v689_v40, %v684_v39  ;;  %v594_v49 = vcvt.s32.f32 %v194_v41  ;;  %v354_v50 = vunpack.c.2.s8 %v94_v37  ;;  %v359_v51 = vunpack.c.3.s8 %v94_v37 }
  0x11   :  { %1185 = vmatpush.bf16.msra.mxu2 %v1054_v43  ;;  %v1094_v52 = vpack.c.bf16 %v849_v45, %v844_v44  ;;  %v599_v53 = vcvt.s32.f32 %v199_v46  ;;  %v274_v54 = vunpack.c.2.s8 %v74_v42  ;;  %v279_v55 = vunpack.c.3.s8 %v74_v42 }
  0x12   :  { %1172 = vmatpush.bf16.msra.mxu1 %v1014_v48  ;;  %v754_v56 = vcvt.s32.f32 %v354_v50  ;;  %v759_v57 = vcvt.s32.f32 %v359_v51  ;;  %v434_v58 = vunpack.c.2.s8 %v114_v47  ;;  %v439_v59 = vunpack.c.3.s8 %v114_v47 }
  0x13   :  { %1198 = vmatpush.bf16.msra.mxu3 %v1094_v52  ;;  %v969_v60 = vpack.c.bf16 %v599_v53, %v594_v49  ;;  %v674_v61 = vcvt.s32.f32 %v274_v54  ;;  %v679_v62 = vcvt.s32.f32 %v279_v55  ;;  %v184_v63 = vunpack.c.0.s8 %v54_v28  ;;  %v44_v52 = vld [vmem:[#allocation2] sm:$0xff] }
  0x14   :  { %v1049_v0 = vpack.c.bf16 %v759_v57, %v754_v56  ;;  %v834_v1 = vcvt.s32.f32 %v434_v58  ;;  %v839_v2 = vcvt.s32.f32 %v439_v59  ;;  %v189_v3 = vunpack.c.1.s8 %v54_v28 }
  0x15   :  { %1160 = vmatpush.bf16.msra.mxu0 %v969_v60  ;;  %v1009_v4 = vpack.c.bf16 %v679_v62, %v674_v61  ;;  %v584_v5 = vcvt.s32.f32 %v184_v63  ;;  %v344_v6 = vunpack.c.0.s8 %v94_v37  ;;  %v349_v7 = vunpack.c.1.s8 %v94_v37  ;;  %v84_v61 = vld [vmem:[#allocation2 + $0x140] sm:$0xff] }
  0x16   :  { %1186 = vmatpush.bf16.msra.mxu2 %v1049_v0  ;;  %v1089_v9 = vpack.c.bf16 %v839_v2, %v834_v1  ;;  %v589_v10 = vcvt.s32.f32 %v189_v3  ;;  %v264_v11 = vunpack.c.0.s8 %v74_v42  ;;  %v269_v12 = vunpack.c.1.s8 %v74_v42  ;;  %v1639_v2 = vld [vmem:[#allocation2 + $0xa0] sm:$0xff]  ;;  %v43_v3 = vld [vmem:[%s1842_s0] sm:$0x1f] }
  0x17   :  { %1173 = vmatpush.bf16.msra.mxu1 %v1009_v4  ;;  %v744_v13 = vcvt.s32.f32 %v344_v6  ;;  %v749_v14 = vcvt.s32.f32 %v349_v7  ;;  %v424_v15 = vunpack.c.0.s8 %v114_v47  ;;  %v429_v16 = vunpack.c.1.s8 %v114_v47  ;;  %1147 = vst [vmem:[#allocation1] ss:$9 sm:$0xff] %v43_v3 }
  0x18   :  { %1199 = vmatpush.bf16.msra.mxu3 %v1089_v9  ;;  %v964_v18 = vpack.c.bf16 %v589_v10, %v584_v5  ;;  %v664_v19 = vcvt.s32.f32 %v264_v11  ;;  %v669_v20 = vcvt.s32.f32 %v269_v12  ;;  %v174_v21 = vunpack.c.2.s8 %v49_v8 }
  0x19   :  { %v1044_v23 = vpack.c.bf16 %v749_v14, %v744_v13  ;;  %v824_v24 = vcvt.s32.f32 %v424_v15  ;;  %v829_v25 = vcvt.s32.f32 %v429_v16  ;;  %v179_v26 = vunpack.c.3.s8 %v49_v8 }
  0x1a   :  { %1161 = vmatpush.bf16.msra.mxu0 %v964_v18  ;;  %v1004_v28 = vpack.c.bf16 %v669_v20, %v664_v19  ;;  %v574_v29 = vcvt.s32.f32 %v174_v21  ;;  %v334_v30 = vunpack.c.2.s8 %v89_v17  ;;  %v339_v31 = vunpack.c.3.s8 %v89_v17 }
  0x1b   :  { %1187 = vmatpush.bf16.msra.mxu2 %v1044_v23  ;;  %v1084_v32 = vpack.c.bf16 %v829_v25, %v824_v24  ;;  %v579_v33 = vcvt.s32.f32 %v179_v26  ;;  %v254_v34 = vunpack.c.2.s8 %v69_v22  ;;  %v259_v35 = vunpack.c.3.s8 %v69_v22  ;;  %v1650_v25 = vld [vmem:[#allocation2 + $0x2f8] sm:$0xff] }
  0x1c   :  { %1174 = vmatpush.bf16.msra.mxu1 %v1004_v28  ;;  %v734_v36 = vcvt.s32.f32 %v334_v30  ;;  %v739_v37 = vcvt.s32.f32 %v339_v31  ;;  %v414_v38 = vunpack.c.2.s8 %v109_v27  ;;  %v419_v39 = vunpack.c.3.s8 %v109_v27  ;;  %v1652_v30 = vld [vmem:[#allocation2 + $0x120] sm:$0xff] }
  0x1d   :  { %1200 = vmatpush.bf16.msra.mxu3 %v1084_v32  ;;  %v959_v40 = vpack.c.bf16 %v579_v33, %v574_v29  ;;  %v654_v41 = vcvt.s32.f32 %v254_v34  ;;  %v659_v42 = vcvt.s32.f32 %v259_v35  ;;  %v164_v43 = vunpack.c.0.s8 %v49_v8 }
  0x1e   :  { %v1039_v44 = vpack.c.bf16 %v739_v37, %v734_v36  ;;  %v814_v45 = vcvt.s32.f32 %v414_v38  ;;  %v819_v46 = vcvt.s32.f32 %v419_v39  ;;  %v169_v47 = vunpack.c.1.s8 %v49_v8  ;;  %v1644_v8 = vld [vmem:[#allocation2 + $0x1e0] sm:$0xff] }
  0x1f   :  { %1162 = vmatpush.bf16.msra.mxu0 %v959_v40  ;;  %v999_v48 = vpack.c.bf16 %v659_v42, %v654_v41  ;;  %v564_v49 = vcvt.s32.f32 %v164_v43  ;;  %v324_v50 = vunpack.c.0.s8 %v89_v17  ;;  %v329_v51 = vunpack.c.1.s8 %v89_v17 }
  0x20   :  { %1188 = vmatpush.bf16.msra.mxu2 %v1039_v44  ;;  %v1079_v53 = vpack.c.bf16 %v819_v46, %v814_v45  ;;  %v569_v54 = vcvt.s32.f32 %v169_v47  ;;  %v244_v55 = vunpack.c.0.s8 %v69_v22  ;;  %v249_v56 = vunpack.c.1.s8 %v69_v22  ;;  %v60_v47 = vld [vmem:[#allocation2 + $0x80] sm:$0xff] }
  0x21   :  { %1175 = vmatpush.bf16.msra.mxu1 %v999_v48  ;;  %v724_v57 = vcvt.s32.f32 %v324_v50  ;;  %v729_v58 = vcvt.s32.f32 %v329_v51  ;;  %v404_v59 = vunpack.c.0.s8 %v109_v27  ;;  %v409_v60 = vunpack.c.1.s8 %v109_v27 }
  0x22   :  { %1201 = vmatpush.bf16.msra.mxu3 %v1079_v53  ;;  %v954_v62 = vpack.c.bf16 %v569_v54, %v564_v49  ;;  %v644_v63 = vcvt.s32.f32 %v244_v55  ;;  %v649_v0 = vcvt.s32.f32 %v249_v56  ;;  %v154_v1 = vunpack.c.2.s8 %v44_v52 }
  0x23   :  { %v1034_v4 = vpack.c.bf16 %v729_v58, %v724_v57  ;;  %v804_v5 = vcvt.s32.f32 %v404_v59  ;;  %v809_v6 = vcvt.s32.f32 %v409_v60  ;;  %v159_v7 = vunpack.c.3.s8 %v44_v52  ;;  %v1662_v57 = vld [vmem:[#allocation1] sm:$0xff] }
  0x24   :  { %1163 = vmatpush.bf16.msra.mxu0 %v954_v62  ;;  %v994_v9 = vpack.c.bf16 %v649_v0, %v644_v63  ;;  %v554_v10 = vcvt.s32.f32 %v154_v1  ;;  %v314_v11 = vunpack.c.2.s8 %v84_v61  ;;  %v319_v12 = vunpack.c.3.s8 %v84_v61 }
  0x25   :  { %1189 = vmatpush.bf16.msra.mxu2 %v1034_v4  ;;  %v1074_v13 = vpack.c.bf16 %v809_v6, %v804_v5  ;;  %v559_v14 = vcvt.s32.f32 %v159_v7  ;;  %v234_v15 = vunpack.c.2.s8 %v1639_v2  ;;  %v239_v16 = vunpack.c.3.s8 %v1639_v2 }
  0x26   :  { %1176 = vmatpush.bf16.msra.mxu1 %v994_v9  ;;  %v714_v17 = vcvt.s32.f32 %v314_v11  ;;  %v719_v18 = vcvt.s32.f32 %v319_v12  ;;  %v394_v19 = vunpack.c.2.s8 %v1644_v8  ;;  %v399_v20 = vunpack.c.3.s8 %v1644_v8 }
  0x27   :  { %1202 = vmatpush.bf16.msra.mxu3 %v1074_v13  ;;  %v949_v21 = vpack.c.bf16 %v559_v14, %v554_v10  ;;  %v634_v22 = vcvt.s32.f32 %v234_v15  ;;  %v639_v23 = vcvt.s32.f32 %v239_v16  ;;  %v144_v24 = vunpack.c.0.s8 %v44_v52  ;;  %v1667_v10 = vld [vmem:[#allocation1 + $0x12] sm:$0xff] }
  0x28   :  { %v1029_v26 = vpack.c.bf16 %v719_v18, %v714_v17  ;;  %v794_v27 = vcvt.s32.f32 %v394_v19  ;;  %v799_v28 = vcvt.s32.f32 %v399_v20  ;;  %v149_v29 = vunpack.c.1.s8 %v44_v52  ;;  %v100_v52 = vld [vmem:[#allocation2 + $0x1c0] sm:$0xff]  ;;  %v134_v15 = vld [vmem:[#allocation2 + $0x2d0] sm:$0xff] }
  0x29   :  { %1164 = vmatpush.bf16.msra.mxu0 %v949_v21  ;;  %v989_v31 = vpack.c.bf16 %v639_v23, %v634_v22  ;;  %v544_v32 = vcvt.s32.f32 %v144_v24  ;;  %v304_v33 = vunpack.c.0.s8 %v84_v61  ;;  %v309_v34 = vunpack.c.1.s8 %v84_v61  ;;  %v1672_v20 = vld [vmem:[#allocation1 + $0x1b] sm:$0xff] }
  0x2a   :  { %1190 = vmatpush.bf16.msra.mxu2 %v1029_v26  ;;  %v1069_v35 = vpack.c.bf16 %v799_v28, %v794_v27  ;;  %v549_v36 = vcvt.s32.f32 %v149_v29  ;;  %v534_v37 = vunpack.c.2.s8 %v1650_v25  ;;  %v539_v38 = vunpack.c.3.s8 %v1650_v25 }
  0x2b   :  { %1177 = vmatpush.bf16.msra.mxu1 %v989_v31  ;;  %v704_v39 = vcvt.s32.f32 %v304_v33  ;;  %v709_v40 = vcvt.s32.f32 %v309_v34  ;;  %v295_v41 = vunpack.c.2.s8 %v1652_v30  ;;  %v300_v42 = vunpack.c.3.s8 %v1652_v30 }
  0x2c   :  { %1203 = vmatpush.bf16.msra.mxu3 %v1069_v35  ;;  %v944_v43 = vpack.c.bf16 %v549_v36, %v544_v32  ;;  %v934_v44 = vcvt.s32.f32 %v534_v37  ;;  %v939_v45 = vcvt.s32.f32 %v539_v38  ;;  %v224_v46 = vunpack.c.0.s8 %v1639_v2  ;;  %v95_v35 = vld [vmem:[#allocation2 + $0x198] sm:$0xff]  ;;  %v1675_v36 = vld [vmem:[#allocation1 + $0x9] sm:$0xff] }
  0x2d   :  { %v1024_v48 = vpack.c.bf16 %v709_v40, %v704_v39  ;;  %v695_v49 = vcvt.s32.f32 %v295_v41  ;;  %v700_v50 = vcvt.s32.f32 %v300_v42  ;;  %v229_v51 = vunpack.c.1.s8 %v1639_v2 }
  0x2e   :  { %1165 = vmatpush.bf16.msra.mxu0 %v944_v43  ;;  %v1139_v53 = vpack.c.bf16 %v939_v45, %v934_v44  ;;  %v624_v54 = vcvt.s32.f32 %v224_v46  ;;  %v384_v55 = vunpack.c.0.s8 %v1644_v8  ;;  %v389_v56 = vunpack.c.1.s8 %v1644_v8 }
  0x2f   :  { %1191 = vmatpush.bf16.msra.mxu2 %v1024_v48  ;;  %v1020_v58 = vpack.c.bf16 %v700_v50, %v695_v49  ;;  %v629_v59 = vcvt.s32.f32 %v229_v51  ;;  %v215_v60 = vunpack.c.2.s8 %v60_v47  ;;  %v220_v61 = vunpack.c.3.s8 %v60_v47 }
  0x30   :  { %v784_v62 = vcvt.s32.f32 %v384_v55  ;;  %v789_v63 = vcvt.s32.f32 %v389_v56  ;;  %v375_v0 = vunpack.c.2.s8 %v100_v52  ;;  %v380_v1 = vunpack.c.3.s8 %v100_v52 }
  0x31   :  { %v984_v2 = vpack.c.bf16 %v629_v59, %v624_v54  ;;  %v615_v3 = vcvt.s32.f32 %v215_v60  ;;  %v620_v4 = vcvt.s32.f32 %v220_v61  ;;  %v524_v5 = vunpack.c.0.s8 %v1650_v25  ;;  %1166 = vmatmul.bf16.vlgmr.msra.gmra.mxu0 %v1662_v57 }
  0x32   :  { %1210 = vmatpush.bf16.msrb.mxu0 %v1139_v53  ;;  %v1064_v6 = vpack.c.bf16 %v789_v63, %v784_v62  ;;  %v775_v7 = vcvt.s32.f32 %v375_v0  ;;  %v780_v8 = vcvt.s32.f32 %v380_v1  ;;  %v529_v9 = vunpack.c.1.s8 %v1650_v25  ;;  %1192 = vmatmul.bf16.vlgmr.msra.gmra.mxu2 %v1667_v10  ;;  %v75_v25 = vld [vmem:[#allocation2 + $0xf8] sm:$0xff]  ;;  %v129_v62 = vld [vmem:[#allocation2 + $0x2a8] sm:$0xff] }
  0x33   :  { %1236 = vmatpush.bf16.msrb.mxu2 %v1020_v58  ;;  %1178 = vmatpush.bf16.msra.mxu1 %v984_v2  ;;  %v980_v11 = vpack.c.bf16 %v620_v4, %v615_v3  ;;  %v924_v12 = vcvt.s32.f32 %v524_v5  ;;  %v285_v13 = vunpack.c.0.s8 %v1652_v30  ;;  %v290_v14 = vunpack.c.1.s8 %v1652_v30  ;;  %v55_v30 = vld [vmem:[#allocation2 + $0x58] sm:$0xff] }
  0x34   :  { %1204 = vmatpush.bf16.msra.mxu3 %v1064_v6  ;;  %v1060_v16 = vpack.c.bf16 %v780_v8, %v775_v7  ;;  %v929_v17 = vcvt.s32.f32 %v529_v9  ;;  %v205_v18 = vunpack.c.0.s8 %v60_v47  ;;  %v210_v19 = vunpack.c.1.s8 %v60_v47  ;;  %v70_v7 = vld [vmem:[#allocation2 + $0xd0] sm:$0xff] }
  0x35   :  { %v685_v21 = vcvt.s32.f32 %v285_v13  ;;  %v690_v22 = vcvt.s32.f32 %v290_v14  ;;  %v365_v23 = vunpack.c.0.s8 %v100_v52  ;;  %v370_v24 = vunpack.c.1.s8 %v100_v52  ;;  %v50_v13 = vld [vmem:[#allocation2 + $0x30] sm:$0xff] }
  0x36   :  { %v1134_v26 = vpack.c.bf16 %v929_v17, %v924_v12  ;;  %v605_v27 = vcvt.s32.f32 %v205_v18  ;;  %v610_v28 = vcvt.s32.f32 %v210_v19  ;;  %v514_v29 = vunpack.c.2.s8 %v134_v15  ;;  %1179 = vmatmul.bf16.vlgmr.msra.gmra.mxu1 %v1675_v36  ;;  %v90_v18 = vld [vmem:[#allocation2 + $0x170] sm:$0xff] }
  0x37   :  { %1223 = vmatpush.bf16.msrb.mxu1 %v980_v11  ;;  %v1015_v31 = vpack.c.bf16 %v690_v22, %v685_v21  ;;  %v765_v32 = vcvt.s32.f32 %v365_v23  ;;  %v770_v33 = vcvt.s32.f32 %v370_v24  ;;  %v519_v34 = vunpack.c.3.s8 %v134_v15  ;;  %1205 = vmatmul.bf16.vlgmr.msra.gmra.mxu3 %v1672_v20 }
  0x38   :  { %1249 = vmatpush.bf16.msrb.mxu3 %v1060_v16  ;;  %1211 = vmatpush.bf16.msrb.mxu0 %v1134_v26  ;;  %v975_v37 = vpack.c.bf16 %v610_v28, %v605_v27  ;;  %v914_v38 = vcvt.s32.f32 %v514_v29  ;;  %v275_v39 = vunpack.c.2.s8 %v75_v25  ;;  %v280_v40 = vunpack.c.3.s8 %v75_v25 }
  0x39   :  { %1237 = vmatpush.bf16.msrb.mxu2 %v1015_v31  ;;  %v1055_v41 = vpack.c.bf16 %v770_v33, %v765_v32  ;;  %v919_v42 = vcvt.s32.f32 %v519_v34  ;;  %v195_v43 = vunpack.c.2.s8 %v55_v30  ;;  %v200_v44 = vunpack.c.3.s8 %v55_v30 }
  0x3a   :  { %v675_v45 = vcvt.s32.f32 %v275_v39  ;;  %v680_v46 = vcvt.s32.f32 %v280_v40  ;;  %v355_v47 = vunpack.c.2.s8 %v95_v35  ;;  %v360_v48 = vunpack.c.3.s8 %v95_v35 }
  0x3b   :  { %1224 = vmatpush.bf16.msrb.mxu1 %v975_v37  ;;  %v1129_v49 = vpack.c.bf16 %v919_v42, %v914_v38  ;;  %v595_v50 = vcvt.s32.f32 %v195_v43  ;;  %v600_v51 = vcvt.s32.f32 %v200_v44  ;;  %v504_v52 = vunpack.c.0.s8 %v134_v15 }
  0x3c   :  { %1250 = vmatpush.bf16.msrb.mxu3 %v1055_v41  ;;  %v1010_v53 = vpack.c.bf16 %v680_v46, %v675_v45  ;;  %v755_v54 = vcvt.s32.f32 %v355_v47  ;;  %v760_v55 = vcvt.s32.f32 %v360_v48  ;;  %v509_v56 = vunpack.c.1.s8 %v134_v15  ;;  %v124_v45 = vld [vmem:[#allocation2 + $0x280] sm:$0xff] }
  0x3d   :  { %1212 = vmatpush.bf16.msrb.mxu0 %v1129_v49  ;;  %v970_v58 = vpack.c.bf16 %v600_v51, %v595_v50  ;;  %v904_v59 = vcvt.s32.f32 %v504_v52  ;;  %v265_v60 = vunpack.c.0.s8 %v75_v25  ;;  %v270_v61 = vunpack.c.1.s8 %v75_v25 }
  0x3e   :  { %1238 = vmatpush.bf16.msrb.mxu2 %v1010_v53  ;;  %v1050_v63 = vpack.c.bf16 %v760_v55, %v755_v54  ;;  %v909_v0 = vcvt.s32.f32 %v509_v56  ;;  %v185_v1 = vunpack.c.0.s8 %v55_v30  ;;  %v190_v2 = vunpack.c.1.s8 %v55_v30  ;;  %v65_v54 = vld [vmem:[#allocation2 + $0xa8] sm:$0xff] }
  0x3f   :  { %1225 = vmatpush.bf16.msrb.mxu1 %v970_v58  ;;  %v665_v3 = vcvt.s32.f32 %v265_v60  ;;  %v670_v4 = vcvt.s32.f32 %v270_v61  ;;  %v345_v5 = vunpack.c.0.s8 %v95_v35  ;;  %v350_v6 = vunpack.c.1.s8 %v95_v35  ;;  %v1678_v60 = vld [vmem:[#allocation2 + $0x8] sm:$0xff] }
  0x40   :  { %1251 = vmatpush.bf16.msrb.mxu3 %v1050_v63  ;;  %v1124_v8 = vpack.c.bf16 %v909_v0, %v904_v59  ;;  %v585_v9 = vcvt.s32.f32 %v185_v1  ;;  %v590_v11 = vcvt.s32.f32 %v190_v2  ;;  %v494_v12 = vunpack.c.2.s8 %v129_v62  ;;  %v1680_v1 = vld [vmem:[#allocation2 + $0x148] sm:$0xff] }
  0x41   :  { %v1005_v14 = vpack.c.bf16 %v670_v4, %v665_v3  ;;  %v745_v15 = vcvt.s32.f32 %v345_v5  ;;  %v750_v16 = vcvt.s32.f32 %v350_v6  ;;  %v499_v17 = vunpack.c.3.s8 %v129_v62 }
  0x42   :  { %1213 = vmatpush.bf16.msrb.mxu0 %v1124_v8  ;;  %v965_v19 = vpack.c.bf16 %v590_v11, %v585_v9  ;;  %v894_v21 = vcvt.s32.f32 %v494_v12  ;;  %v255_v22 = vunpack.c.2.s8 %v70_v7  ;;  %v260_v23 = vunpack.c.3.s8 %v70_v7 }
  0x43   :  { %1239 = vmatpush.bf16.msrb.mxu2 %v1005_v14  ;;  %v1045_v24 = vpack.c.bf16 %v750_v16, %v745_v15  ;;  %v899_v25 = vcvt.s32.f32 %v499_v17  ;;  %v175_v26 = vunpack.c.2.s8 %v50_v13  ;;  %v180_v27 = vunpack.c.3.s8 %v50_v13 }
  0x44   :  { %1226 = vmatpush.bf16.msrb.mxu1 %v965_v19  ;;  %v655_v28 = vcvt.s32.f32 %v255_v22  ;;  %v660_v29 = vcvt.s32.f32 %v260_v23  ;;  %v335_v30 = vunpack.c.2.s8 %v90_v18  ;;  %v340_v31 = vunpack.c.3.s8 %v90_v18  ;;  %v1686_v19 = vld [vmem:[#allocation2 + $0x260] sm:$0xff] }
  0x45   :  { %1252 = vmatpush.bf16.msrb.mxu3 %v1045_v24  ;;  %v1119_v32 = vpack.c.bf16 %v899_v25, %v894_v21  ;;  %v575_v33 = vcvt.s32.f32 %v175_v26  ;;  %v580_v34 = vcvt.s32.f32 %v180_v27  ;;  %v484_v35 = vunpack.c.0.s8 %v129_v62  ;;  %v1688_v25 = vld [vmem:[#allocation2 + $0x88] sm:$0xff] }
  0x46   :  { %v1000_v37 = vpack.c.bf16 %v660_v29, %v655_v28  ;;  %v735_v38 = vcvt.s32.f32 %v335_v30  ;;  %v740_v39 = vcvt.s32.f32 %v340_v31  ;;  %v489_v40 = vunpack.c.1.s8 %v129_v62 }
  0x47   :  { %1214 = vmatpush.bf16.msrb.mxu0 %v1119_v32  ;;  %v960_v41 = vpack.c.bf16 %v580_v34, %v575_v33  ;;  %v884_v42 = vcvt.s32.f32 %v484_v35  ;;  %v245_v43 = vunpack.c.0.s8 %v70_v7  ;;  %v250_v44 = vunpack.c.1.s8 %v70_v7 }
  0x48   :  { %1240 = vmatpush.bf16.msrb.mxu2 %v1000_v37  ;;  %v1040_v46 = vpack.c.bf16 %v740_v39, %v735_v38  ;;  %v889_v47 = vcvt.s32.f32 %v489_v40  ;;  %v165_v48 = vunpack.c.0.s8 %v50_v13  ;;  %v170_v49 = vunpack.c.1.s8 %v50_v13 }
  0x49   :  { %1227 = vmatpush.bf16.msrb.mxu1 %v960_v41  ;;  %v645_v50 = vcvt.s32.f32 %v245_v43  ;;  %v650_v51 = vcvt.s32.f32 %v250_v44  ;;  %v325_v52 = vunpack.c.0.s8 %v90_v18  ;;  %v330_v53 = vunpack.c.1.s8 %v90_v18  ;;  %v140_v43 = vld [vmem:[#allocation2 + $0x300] sm:$0xff] }
  0x4a   :  { %1253 = vmatpush.bf16.msrb.mxu3 %v1040_v46  ;;  %v1114_v55 = vpack.c.bf16 %v889_v47, %v884_v42  ;;  %v565_v56 = vcvt.s32.f32 %v165_v48  ;;  %v570_v58 = vcvt.s32.f32 %v170_v49  ;;  %v474_v59 = vunpack.c.2.s8 %v124_v45  ;;  %v81_v48 = vld [vmem:[#allocation2 + $0x128] sm:$0xff] }
  0x4b   :  { %v995_v61 = vpack.c.bf16 %v650_v51, %v645_v50  ;;  %v725_v62 = vcvt.s32.f32 %v325_v52  ;;  %v730_v63 = vcvt.s32.f32 %v330_v53  ;;  %v479_v0 = vunpack.c.3.s8 %v124_v45  ;;  %v1698_v53 = vld [vmem:[#allocation1 + $0x24] sm:$0xff] }
  0x4c   :  { %1215 = vmatpush.bf16.msrb.mxu0 %v1114_v55  ;;  %v955_v2 = vpack.c.bf16 %v570_v58, %v565_v56  ;;  %v874_v3 = vcvt.s32.f32 %v474_v59  ;;  %v235_v4 = vunpack.c.2.s8 %v65_v54  ;;  %v240_v5 = vunpack.c.3.s8 %v65_v54 }
  0x4d   :  { %1241 = vmatpush.bf16.msrb.mxu2 %v995_v61  ;;  %v1035_v6 = vpack.c.bf16 %v730_v63, %v725_v62  ;;  %v879_v7 = vcvt.s32.f32 %v479_v0  ;;  %v155_v8 = vunpack.c.2.s8 %v1678_v60  ;;  %v160_v9 = vunpack.c.3.s8 %v1678_v60 }
  0x4e   :  { %1228 = vmatpush.bf16.msrb.mxu1 %v955_v2  ;;  %v635_v11 = vcvt.s32.f32 %v235_v4  ;;  %v640_v12 = vcvt.s32.f32 %v240_v5  ;;  %v315_v13 = vunpack.c.2.s8 %v1680_v1  ;;  %v320_v14 = vunpack.c.3.s8 %v1680_v1 }
  0x4f   :  { %1254 = vmatpush.bf16.msrb.mxu3 %v1035_v6  ;;  %v1109_v15 = vpack.c.bf16 %v879_v7, %v874_v3  ;;  %v555_v16 = vcvt.s32.f32 %v155_v8  ;;  %v560_v17 = vcvt.s32.f32 %v160_v9  ;;  %v464_v18 = vunpack.c.0.s8 %v124_v45 }
  0x50   :  { %v990_v21 = vpack.c.bf16 %v640_v12, %v635_v11  ;;  %v715_v22 = vcvt.s32.f32 %v315_v13  ;;  %v720_v23 = vcvt.s32.f32 %v320_v14  ;;  %v469_v24 = vunpack.c.1.s8 %v124_v45  ;;  %v115_v12 = vld [vmem:[#allocation2 + $0x238] sm:$0xff] }
  0x51   :  { %1216 = vmatpush.bf16.msrb.mxu0 %v1109_v15  ;;  %v950_v26 = vpack.c.bf16 %v560_v17, %v555_v16  ;;  %v864_v27 = vcvt.s32.f32 %v464_v18  ;;  %v225_v28 = vunpack.c.0.s8 %v65_v54  ;;  %v230_v29 = vunpack.c.1.s8 %v65_v54 }
  0x52   :  { %1242 = vmatpush.bf16.msrb.mxu2 %v990_v21  ;;  %v1030_v30 = vpack.c.bf16 %v720_v23, %v715_v22  ;;  %v869_v31 = vcvt.s32.f32 %v469_v24  ;;  %v455_v32 = vunpack.c.2.s8 %v1686_v19  ;;  %v460_v33 = vunpack.c.3.s8 %v1686_v19  ;;  %v56_v22 = vld [vmem:[#allocation2 + $0x60] sm:$0xff] }
  0x53   :  { %1229 = vmatpush.bf16.msrb.mxu1 %v950_v26  ;;  %v625_v34 = vcvt.s32.f32 %v225_v28  ;;  %v630_v35 = vcvt.s32.f32 %v230_v29  ;;  %v216_v37 = vunpack.c.2.s8 %v1688_v25  ;;  %v221_v38 = vunpack.c.3.s8 %v1688_v25  ;;  %v135_v28 = vld [vmem:[#allocation2 + $0x2d8] sm:$0xff] }
  0x54   :  { %1255 = vmatpush.bf16.msrb.mxu3 %v1030_v30  ;;  %v1104_v39 = vpack.c.bf16 %v869_v31, %v864_v27  ;;  %v855_v40 = vcvt.s32.f32 %v455_v32  ;;  %v860_v41 = vcvt.s32.f32 %v460_v33  ;;  %v145_v42 = vunpack.c.0.s8 %v1678_v60  ;;  %v76_v32 = vld [vmem:[#allocation2 + $0x100] sm:$0xff] }
  0x55   :  { %v985_v44 = vpack.c.bf16 %v630_v35, %v625_v34  ;;  %v616_v45 = vcvt.s32.f32 %v216_v37  ;;  %v621_v46 = vcvt.s32.f32 %v221_v38  ;;  %v150_v47 = vunpack.c.1.s8 %v1678_v60 }
  0x56   :  { %1217 = vmatpush.bf16.msrb.mxu0 %v1104_v39  ;;  %v1100_v49 = vpack.c.bf16 %v860_v41, %v855_v40  ;;  %v545_v50 = vcvt.s32.f32 %v145_v42  ;;  %v305_v51 = vunpack.c.0.s8 %v1680_v1  ;;  %v310_v52 = vunpack.c.1.s8 %v1680_v1 }
  0x57   :  { %1243 = vmatpush.bf16.msrb.mxu2 %v985_v44  ;;  %v981_v54 = vpack.c.bf16 %v621_v46, %v616_v45  ;;  %v550_v55 = vcvt.s32.f32 %v150_v47  ;;  %v535_v56 = vunpack.c.2.s8 %v140_v43  ;;  %v540_v58 = vunpack.c.3.s8 %v140_v43 }
  0x58   :  { %v705_v59 = vcvt.s32.f32 %v305_v51  ;;  %v710_v61 = vcvt.s32.f32 %v310_v52  ;;  %v296_v62 = vunpack.c.2.s8 %v81_v48  ;;  %v301_v60 = vunpack.c.3.s8 %v81_v48 }
  0x59   :  { %v945_v63 = vpack.c.bf16 %v550_v55, %v545_v50  ;;  %v935_v0 = vcvt.s32.f32 %v535_v56  ;;  %v940_v2 = vcvt.s32.f32 %v540_v58  ;;  %v445_v3 = vunpack.c.0.s8 %v1686_v19  ;;  %1218 = vmatmul.bf16.vlgmr.msrb.gmra.mxu0 %v1698_v53 }
  0x5a   :  { %1262 = vmatpush.bf16.msra.mxu0 %v1100_v49  ;;  %v1025_v1 = vpack.c.bf16 %v710_v61, %v705_v59  ;;  %v696_v4 = vcvt.s32.f32 %v296_v62  ;;  %v701_v5 = vcvt.s32.f32 %v301_v60  ;;  %v450_v6 = vunpack.c.1.s8 %v1686_v19  ;;  %1244 = vmatmul.bf16.vlgmr.msrb.gmra.mxu2 %v1675_v36  ;;  %v110_v59 = vld [vmem:[#allocation2 + $0x210] sm:$0xff] }
  0x5b   :  { %1288 = vmatpush.bf16.msra.mxu2 %v981_v54  ;;  %1230 = vmatpush.bf16.msrb.mxu1 %v945_v63  ;;  %v1140_v7 = vpack.c.bf16 %v940_v2, %v935_v0  ;;  %v845_v8 = vcvt.s32.f32 %v445_v3  ;;  %v206_v9 = vunpack.c.0.s8 %v1688_v25  ;;  %v211_v11 = vunpack.c.1.s8 %v1688_v25 }
  0x5c   :  { %1256 = vmatpush.bf16.msrb.mxu3 %v1025_v1  ;;  %v1021_v13 = vpack.c.bf16 %v701_v5, %v696_v4  ;;  %v850_v14 = vcvt.s32.f32 %v450_v6  ;;  %v525_v15 = vunpack.c.0.s8 %v140_v43  ;;  %v530_v16 = vunpack.c.1.s8 %v140_v43  ;;  %v51_v4 = vld [vmem:[#allocation2 + $0x38] sm:$0xff] }
  0x5d   :  { %v606_v17 = vcvt.s32.f32 %v206_v9  ;;  %v611_v18 = vcvt.s32.f32 %v211_v11  ;;  %v286_v21 = vunpack.c.0.s8 %v81_v48  ;;  %v291_v19 = vunpack.c.1.s8 %v81_v48  ;;  %v130_v9 = vld [vmem:[#allocation2 + $0x2b0] sm:$0xff] }
  0x5e   :  { %v1095_v23 = vpack.c.bf16 %v850_v14, %v845_v8  ;;  %v925_v24 = vcvt.s32.f32 %v525_v15  ;;  %v930_v26 = vcvt.s32.f32 %v530_v16  ;;  %v435_v27 = vunpack.c.2.s8 %v115_v12  ;;  %1231 = vmatmul.bf16.vlgmr.msrb.gmra.mxu1 %v1662_v57  ;;  %v71_v15 = vld [vmem:[#allocation2 + $0xd8] sm:$0xff] }
  0x5f   :  { %1275 = vmatpush.bf16.msra.mxu1 %v1140_v7  ;;  %v976_v25 = vpack.c.bf16 %v611_v18, %v606_v17  ;;  %v686_v29 = vcvt.s32.f32 %v286_v21  ;;  %v691_v30 = vcvt.s32.f32 %v291_v19  ;;  %v440_v31 = vunpack.c.3.s8 %v115_v12  ;;  %1257 = vmatmul.bf16.vlgmr.msrb.gmra.mxu3 %v1667_v10 }
  0x60   :  { %1301 = vmatpush.bf16.msra.mxu3 %v1021_v13  ;;  %1263 = vmatpush.bf16.msra.mxu0 %v1095_v23  ;;  %v1135_v33 = vpack.c.bf16 %v930_v26, %v925_v24  ;;  %v835_v34 = vcvt.s32.f32 %v435_v27  ;;  %v196_v35 = vunpack.c.2.s8 %v56_v22  ;;  %v201_v37 = vunpack.c.3.s8 %v56_v22 }
  0x61   :  { %1289 = vmatpush.bf16.msra.mxu2 %v976_v25  ;;  %v1016_v38 = vpack.c.bf16 %v691_v30, %v686_v29  ;;  %v840_v39 = vcvt.s32.f32 %v440_v31  ;;  %v515_v40 = vunpack.c.2.s8 %v135_v28  ;;  %v520_v41 = vunpack.c.3.s8 %v135_v28 }
  0x62   :  { %v596_v42 = vcvt.s32.f32 %v196_v35  ;;  %v601_v43 = vcvt.s32.f32 %v201_v37  ;;  %v276_v44 = vunpack.c.2.s8 %v76_v32  ;;  %v281_v45 = vunpack.c.3.s8 %v76_v32 }
  0x63   :  { %1276 = vmatpush.bf16.msra.mxu1 %v1135_v33  ;;  %v1090_v46 = vpack.c.bf16 %v840_v39, %v835_v34  ;;  %v915_v47 = vcvt.s32.f32 %v515_v40  ;;  %v920_v48 = vcvt.s32.f32 %v520_v41  ;;  %v425_v10 = vunpack.c.0.s8 %v115_v12 }
  0x64   :  { %1302 = vmatpush.bf16.msra.mxu3 %v1016_v38  ;;  %v971_v49 = vpack.c.bf16 %v601_v43, %v596_v42  ;;  %v676_v50 = vcvt.s32.f32 %v276_v44  ;;  %v681_v51 = vcvt.s32.f32 %v281_v45  ;;  %v430_v52 = vunpack.c.1.s8 %v115_v12  ;;  %v105_v42 = vld [vmem:[#allocation2 + $0x1e8] sm:$0xff] }
  0x65   :  { %1264 = vmatpush.bf16.msra.mxu0 %v1090_v46  ;;  %v1130_v54 = vpack.c.bf16 %v920_v48, %v915_v47  ;;  %v825_v55 = vcvt.s32.f32 %v425_v10  ;;  %v186_v56 = vunpack.c.0.s8 %v56_v22  ;;  %v191_v58 = vunpack.c.1.s8 %v56_v22 }
  0x66   :  { %1290 = vmatpush.bf16.msra.mxu2 %v971_v49  ;;  %v1011_v61 = vpack.c.bf16 %v681_v51, %v676_v50  ;;  %v830_v62 = vcvt.s32.f32 %v430_v52  ;;  %v505_v60 = vunpack.c.0.s8 %v135_v28  ;;  %v510_v63 = vunpack.c.1.s8 %v135_v28  ;;  %v46_v50 = vld [vmem:[#allocation2 + $0x10] sm:$0xff] }
  0x67   :  { %1277 = vmatpush.bf16.msra.mxu1 %v1130_v54  ;;  %v586_v0 = vcvt.s32.f32 %v186_v56  ;;  %v591_v2 = vcvt.s32.f32 %v191_v58  ;;  %v266_v3 = vunpack.c.0.s8 %v76_v32  ;;  %v271_v1 = vunpack.c.1.s8 %v76_v32  ;;  %v1708_v56 = vld [vmem:[#allocation2 + $0x288] sm:$0xff] }
  0x68   :  { %1303 = vmatpush.bf16.msra.mxu3 %v1011_v61  ;;  %v1085_v5 = vpack.c.bf16 %v830_v62, %v825_v55  ;;  %v905_v6 = vcvt.s32.f32 %v505_v60  ;;  %v910_v7 = vcvt.s32.f32 %v510_v63  ;;  %v415_v8 = vunpack.c.2.s8 %v110_v59  ;;  %v1710_v60 = vld [vmem:[#allocation2 + $0xb0] sm:$0xff] }
  0x69   :  { %v966_v11 = vpack.c.bf16 %v591_v2, %v586_v0  ;;  %v666_v12 = vcvt.s32.f32 %v266_v3  ;;  %v671_v13 = vcvt.s32.f32 %v271_v1  ;;  %v420_v14 = vunpack.c.3.s8 %v110_v59 }
  0x6a   :  { %1265 = vmatpush.bf16.msra.mxu0 %v1085_v5  ;;  %v1125_v16 = vpack.c.bf16 %v910_v7, %v905_v6  ;;  %v815_v17 = vcvt.s32.f32 %v415_v8  ;;  %v176_v18 = vunpack.c.2.s8 %v51_v4  ;;  %v181_v21 = vunpack.c.3.s8 %v51_v4 }
  0x6b   :  { %1291 = vmatpush.bf16.msra.mxu2 %v966_v11  ;;  %v1006_v19 = vpack.c.bf16 %v671_v13, %v666_v12  ;;  %v820_v22 = vcvt.s32.f32 %v420_v14  ;;  %v495_v23 = vunpack.c.2.s8 %v130_v9  ;;  %v500_v24 = vunpack.c.3.s8 %v130_v9 }
  0x6c   :  { %1278 = vmatpush.bf16.msra.mxu1 %v1125_v16  ;;  %v576_v26 = vcvt.s32.f32 %v176_v18  ;;  %v581_v27 = vcvt.s32.f32 %v181_v21  ;;  %v256_v28 = vunpack.c.2.s8 %v71_v15  ;;  %v261_v25 = vunpack.c.3.s8 %v71_v15  ;;  %v101_v16 = vld [vmem:[#allocation2 + $0x1c8] sm:$0xff] }
  0x6d   :  { %1304 = vmatpush.bf16.msra.mxu3 %v1006_v19  ;;  %v1080_v29 = vpack.c.bf16 %v820_v22, %v815_v17  ;;  %v895_v30 = vcvt.s32.f32 %v495_v23  ;;  %v900_v31 = vcvt.s32.f32 %v500_v24  ;;  %v405_v32 = vunpack.c.0.s8 %v110_v59  ;;  %v1716_v22 = vld [vmem:[#allocation2 + $0x308] sm:$0xff] }
  0x6e   :  { %v961_v33 = vpack.c.bf16 %v581_v27, %v576_v26  ;;  %v656_v34 = vcvt.s32.f32 %v256_v28  ;;  %v661_v35 = vcvt.s32.f32 %v261_v25  ;;  %v410_v37 = vunpack.c.1.s8 %v110_v59 }
  0x6f   :  { %1266 = vmatpush.bf16.msra.mxu0 %v1080_v29  ;;  %v1120_v38 = vpack.c.bf16 %v900_v31, %v895_v30  ;;  %v805_v39 = vcvt.s32.f32 %v405_v32  ;;  %v166_v40 = vunpack.c.0.s8 %v51_v4  ;;  %v171_v41 = vunpack.c.1.s8 %v51_v4 }
  0x70   :  { %1292 = vmatpush.bf16.msra.mxu2 %v961_v33  ;;  %v1001_v43 = vpack.c.bf16 %v661_v35, %v656_v34  ;;  %v810_v44 = vcvt.s32.f32 %v410_v37  ;;  %v485_v45 = vunpack.c.0.s8 %v130_v9  ;;  %v490_v46 = vunpack.c.1.s8 %v130_v9 }
  0x71   :  { %1279 = vmatpush.bf16.msra.mxu1 %v1120_v38  ;;  %v566_v47 = vcvt.s32.f32 %v166_v40  ;;  %v571_v48 = vcvt.s32.f32 %v171_v41  ;;  %v246_v10 = vunpack.c.0.s8 %v71_v15  ;;  %v251_v49 = vunpack.c.1.s8 %v71_v15  ;;  %v62_v40 = vld [vmem:[#allocation2 + $0x90] sm:$0xff] }
  0x72   :  { %1305 = vmatpush.bf16.msra.mxu3 %v1001_v43  ;;  %v1075_v51 = vpack.c.bf16 %v810_v44, %v805_v39  ;;  %v885_v52 = vcvt.s32.f32 %v485_v45  ;;  %v890_v54 = vcvt.s32.f32 %v490_v46  ;;  %v395_v55 = vunpack.c.2.s8 %v105_v42 }
  0x73   :  { %v956_v58 = vpack.c.bf16 %v571_v48, %v566_v47  ;;  %v646_v59 = vcvt.s32.f32 %v246_v10  ;;  %v651_v61 = vcvt.s32.f32 %v251_v49  ;;  %v400_v62 = vunpack.c.3.s8 %v105_v42  ;;  %v121_v10 = vld [vmem:[#allocation2 + $0x268] sm:$0xff] }
  0x74   :  { %1267 = vmatpush.bf16.msra.mxu0 %v1075_v51  ;;  %v1115_v63 = vpack.c.bf16 %v890_v54, %v885_v52  ;;  %v795_v0 = vcvt.s32.f32 %v395_v55  ;;  %v156_v2 = vunpack.c.2.s8 %v46_v50  ;;  %v161_v3 = vunpack.c.3.s8 %v46_v50 }
  0x75   :  { %1293 = vmatpush.bf16.msra.mxu2 %v956_v58  ;;  %v996_v1 = vpack.c.bf16 %v651_v61, %v646_v59  ;;  %v800_v4 = vcvt.s32.f32 %v400_v62  ;;  %v475_v5 = vunpack.c.2.s8 %v1708_v56  ;;  %v480_v6 = vunpack.c.3.s8 %v1708_v56 }
  0x76   :  { %1280 = vmatpush.bf16.msra.mxu1 %v1115_v63  ;;  %v556_v7 = vcvt.s32.f32 %v156_v2  ;;  %v561_v8 = vcvt.s32.f32 %v161_v3  ;;  %v236_v9 = vunpack.c.2.s8 %v1710_v60  ;;  %v241_v11 = vunpack.c.3.s8 %v1710_v60 }
  0x77   :  { %1306 = vmatpush.bf16.msra.mxu3 %v996_v1  ;;  %v1070_v12 = vpack.c.bf16 %v800_v4, %v795_v0  ;;  %v875_v13 = vcvt.s32.f32 %v475_v5  ;;  %v880_v14 = vcvt.s32.f32 %v480_v6  ;;  %v385_v15 = vunpack.c.0.s8 %v105_v42  ;;  %v96_v1 = vld [vmem:[#allocation2 + $0x1a0] sm:$0xff] }
  0x78   :  { %v951_v17 = vpack.c.bf16 %v561_v8, %v556_v7  ;;  %v636_v18 = vcvt.s32.f32 %v236_v9  ;;  %v641_v21 = vcvt.s32.f32 %v241_v11  ;;  %v390_v19 = vunpack.c.1.s8 %v105_v42 }
  0x79   :  { %1268 = vmatpush.bf16.msra.mxu0 %v1070_v12  ;;  %v1110_v23 = vpack.c.bf16 %v880_v14, %v875_v13  ;;  %v785_v24 = vcvt.s32.f32 %v385_v15  ;;  %v146_v26 = vunpack.c.0.s8 %v46_v50  ;;  %v151_v27 = vunpack.c.1.s8 %v46_v50 }
  0x7a   :  { %1294 = vmatpush.bf16.msra.mxu2 %v951_v17  ;;  %v991_v28 = vpack.c.bf16 %v641_v21, %v636_v18  ;;  %v790_v25 = vcvt.s32.f32 %v390_v19  ;;  %v376_v29 = vunpack.c.2.s8 %v101_v16  ;;  %v381_v30 = vunpack.c.3.s8 %v101_v16  ;;  %v57_v19 = vld [vmem:[#allocation2 + $0x68] sm:$0xff] }
  0x7b   :  { %1281 = vmatpush.bf16.msra.mxu1 %v1110_v23  ;;  %v546_v31 = vcvt.s32.f32 %v146_v26  ;;  %v551_v32 = vcvt.s32.f32 %v151_v27  ;;  %v536_v33 = vunpack.c.2.s8 %v1716_v22  ;;  %v541_v34 = vunpack.c.3.s8 %v1716_v22 }
  0x7c   :  { %1307 = vmatpush.bf16.msra.mxu3 %v991_v28  ;;  %v1065_v35 = vpack.c.bf16 %v790_v25, %v785_v24  ;;  %v776_v37 = vcvt.s32.f32 %v376_v29  ;;  %v781_v38 = vcvt.s32.f32 %v381_v30  ;;  %v465_v39 = vunpack.c.0.s8 %v1708_v56  ;;  %v116_v30 = vld [vmem:[#allocation2 + $0x240] sm:$0xff] }
  0x7d   :  { %v946_v41 = vpack.c.bf16 %v551_v32, %v546_v31  ;;  %v936_v42 = vcvt.s32.f32 %v536_v33  ;;  %v941_v43 = vcvt.s32.f32 %v541_v34  ;;  %v470_v44 = vunpack.c.1.s8 %v1708_v56 }
  0x7e   :  { %1269 = vmatpush.bf16.msra.mxu0 %v1065_v35  ;;  %v1061_v45 = vpack.c.bf16 %v781_v38, %v776_v37  ;;  %v865_v46 = vcvt.s32.f32 %v465_v39  ;;  %v226_v47 = vunpack.c.0.s8 %v1710_v60  ;;  %v231_v48 = vunpack.c.1.s8 %v1710_v60 }
  0x7f   :  { %1295 = vmatpush.bf16.msra.mxu2 %v946_v41  ;;  %v1141_v49 = vpack.c.bf16 %v941_v43, %v936_v42  ;;  %v870_v50 = vcvt.s32.f32 %v470_v44  ;;  %v217_v51 = vunpack.c.2.s8 %v62_v40  ;;  %v222_v52 = vunpack.c.3.s8 %v62_v40 }
  0x80   :  { %v626_v54 = vcvt.s32.f32 %v226_v47  ;;  %v631_v55 = vcvt.s32.f32 %v231_v48  ;;  %v366_v58 = vunpack.c.0.s8 %v101_v16  ;;  %v371_v59 = vunpack.c.1.s8 %v101_v16  ;;  %v136_v16 = vld [vmem:[#allocation2 + $0x2e0] sm:$0xff]  ;;  %v91_v47 = vld [vmem:[#allocation2 + $0x178] sm:$0xff] }
  0x81   :  { %v1105_v56 = vpack.c.bf16 %v870_v50, %v865_v46  ;;  %1270 = vmatmul.bf16.vlgmr.msra.gmra.mxu0 %v1672_v20  ;;  %v617_v61 = vcvt.s32.f32 %v217_v51  ;;  %v622_v62 = vcvt.s32.f32 %v222_v52  ;;  %v456_v63 = vunpack.c.2.s8 %v121_v10 }
  0x82   :  { %1314 = vmatpush.bf16.msrb.mxu0 %v1061_v45  ;;  %v986_v0 = vpack.c.bf16 %v631_v55, %v626_v54  ;;  %v766_v60 = vcvt.s32.f32 %v366_v58  ;;  %v771_v2 = vcvt.s32.f32 %v371_v59  ;;  %v461_v3 = vunpack.c.3.s8 %v121_v10  ;;  %1296 = vmatmul.bf16.vlgmr.msra.gmra.mxu2 %v1662_v57 }
  0x83   :  { %1340 = vmatpush.bf16.msrb.mxu2 %v1141_v49  ;;  %1282 = vmatpush.bf16.msra.mxu1 %v1105_v56  ;;  %v982_v4 = vpack.c.bf16 %v622_v62, %v617_v61  ;;  %v856_v5 = vcvt.s32.f32 %v456_v63  ;;  %v526_v6 = vunpack.c.0.s8 %v1716_v22  ;;  %v531_v7 = vunpack.c.1.s8 %v1716_v22  ;;  %v131_v62 = vld [vmem:[#allocation2 + $0x2b8] sm:$0xff] }
  0x84   :  { %1308 = vmatpush.bf16.msra.mxu3 %v986_v0  ;;  %v1056_v8 = vpack.c.bf16 %v771_v2, %v766_v60  ;;  %v861_v20 = vcvt.s32.f32 %v461_v3  ;;  %v207_v9 = vunpack.c.0.s8 %v62_v40  ;;  %v212_v11 = vunpack.c.1.s8 %v62_v40  ;;  %v52_v3 = vld [vmem:[#allocation2 + $0x40] sm:$0xff] }
  0x85   :  { %v926_v12 = vcvt.s32.f32 %v526_v6  ;;  %v931_v13 = vcvt.s32.f32 %v531_v7  ;;  %v356_v14 = vunpack.c.2.s8 %v96_v1  ;;  %v361_v15 = vunpack.c.3.s8 %v96_v1 }
  0x86   :  { %1283 = vmatmul.bf16.vlgmr.msra.gmra.mxu1 %v1698_v53  ;;  %1315 = vmatpush.bf16.msrb.mxu0 %v1056_v8  ;;  %v1101_v57 = vpack.c.bf16 %v861_v20, %v856_v5  ;;  %v607_v17 = vcvt.s32.f32 %v207_v9  ;;  %v612_v18 = vcvt.s32.f32 %v212_v11  ;;  %v446_v21 = vunpack.c.0.s8 %v121_v10  ;;  %v111_v11 = vld [vmem:[#allocation2 + $0x218] sm:$0xff] }
  0x87   :  { %v1136_v22 = vpack.c.bf16 %v931_v13, %v926_v12  ;;  %v756_v23 = vcvt.s32.f32 %v356_v14  ;;  %v761_v24 = vcvt.s32.f32 %v361_v15  ;;  %v451_v26 = vunpack.c.1.s8 %v121_v10  ;;  %1309 = vmatmul.bf16.vlgmr.msra.gmra.mxu3 %v1675_v36 }
  0x88   :  { %1353 = vmatpush.bf16.msrb.mxu3 %v982_v4  ;;  %1327 = vmatpush.bf16.msrb.mxu1 %v1101_v57  ;;  %v977_v27 = vpack.c.bf16 %v612_v18, %v607_v17  ;;  %v846_v28 = vcvt.s32.f32 %v446_v21  ;;  %v516_v25 = vunpack.c.2.s8 %v136_v16  ;;  %v521_v29 = vunpack.c.3.s8 %v136_v16 }
  0x89   :  { %1341 = vmatpush.bf16.msrb.mxu2 %v1136_v22  ;;  %v1051_v31 = vpack.c.bf16 %v761_v24, %v756_v23  ;;  %v851_v32 = vcvt.s32.f32 %v451_v26  ;;  %v197_v33 = vunpack.c.2.s8 %v57_v19  ;;  %v202_v34 = vunpack.c.3.s8 %v57_v19 }
  0x8a   :  { %v916_v35 = vcvt.s32.f32 %v516_v25  ;;  %v921_v37 = vcvt.s32.f32 %v521_v29  ;;  %v346_v38 = vunpack.c.0.s8 %v96_v1  ;;  %v351_v39 = vunpack.c.1.s8 %v96_v1  ;;  %v86_v25 = vld [vmem:[#allocation2 + $0x150] sm:$0xff] }
  0x8b   :  { %1316 = vmatpush.bf16.msrb.mxu0 %v1051_v31  ;;  %v1096_v40 = vpack.c.bf16 %v851_v32, %v846_v28  ;;  %v597_v41 = vcvt.s32.f32 %v197_v33  ;;  %v602_v36 = vcvt.s32.f32 %v202_v34  ;;  %v436_v42 = vunpack.c.2.s8 %v116_v30 }
  0x8c   :  { %1354 = vmatpush.bf16.msrb.mxu3 %v977_v27  ;;  %v1131_v43 = vpack.c.bf16 %v921_v37, %v916_v35  ;;  %v746_v44 = vcvt.s32.f32 %v346_v38  ;;  %v751_v45 = vcvt.s32.f32 %v351_v39  ;;  %v441_v46 = vunpack.c.3.s8 %v116_v30 }
  0x8d   :  { %1328 = vmatpush.bf16.msrb.mxu1 %v1096_v40  ;;  %v972_v48 = vpack.c.bf16 %v602_v36, %v597_v41  ;;  %v836_v10 = vcvt.s32.f32 %v436_v42  ;;  %v506_v49 = vunpack.c.0.s8 %v136_v16  ;;  %v511_v50 = vunpack.c.1.s8 %v136_v16  ;;  %v126_v36 = vld [vmem:[#allocation2 + $0x290] sm:$0xff] }
  0x8e   :  { %1342 = vmatpush.bf16.msrb.mxu2 %v1131_v43  ;;  %v1046_v51 = vpack.c.bf16 %v751_v45, %v746_v44  ;;  %v841_v52 = vcvt.s32.f32 %v441_v46  ;;  %v187_v54 = vunpack.c.0.s8 %v57_v19  ;;  %v192_v55 = vunpack.c.1.s8 %v57_v19  ;;  %v1730_v46 = vld [vmem:[#allocation2 + $0x18] sm:$0xff] }
  0x8f   :  { %v906_v58 = vcvt.s32.f32 %v506_v49  ;;  %v911_v59 = vcvt.s32.f32 %v511_v50  ;;  %v336_v56 = vunpack.c.2.s8 %v91_v47  ;;  %v341_v61 = vunpack.c.3.s8 %v91_v47 }
  0x90   :  { %1355 = vmatpush.bf16.msrb.mxu3 %v972_v48  ;;  %1317 = vmatpush.bf16.msrb.mxu0 %v1046_v51  ;;  %v1091_v63 = vpack.c.bf16 %v841_v52, %v836_v10  ;;  %v587_v0 = vcvt.s32.f32 %v187_v54  ;;  %v592_v60 = vcvt.s32.f32 %v192_v55  ;;  %v426_v2 = vunpack.c.0.s8 %v116_v30  ;;  %v1732_v55 = vld [vmem:[#allocation2 + $0x1f0] sm:$0xff] }
  0x91   :  { %v1126_v1 = vpack.c.bf16 %v911_v59, %v906_v58  ;;  %v736_v4 = vcvt.s32.f32 %v336_v56  ;;  %v741_v5 = vcvt.s32.f32 %v341_v61  ;;  %v431_v6 = vunpack.c.1.s8 %v116_v30 }
  0x92   :  { %1329 = vmatpush.bf16.msrb.mxu1 %v1091_v63  ;;  %v967_v7 = vpack.c.bf16 %v592_v60, %v587_v0  ;;  %v826_v8 = vcvt.s32.f32 %v426_v2  ;;  %v496_v20 = vunpack.c.2.s8 %v131_v62  ;;  %v501_v9 = vunpack.c.3.s8 %v131_v62 }
  0x93   :  { %1343 = vmatpush.bf16.msrb.mxu2 %v1126_v1  ;;  %v1041_v12 = vpack.c.bf16 %v741_v5, %v736_v4  ;;  %v831_v13 = vcvt.s32.f32 %v431_v6  ;;  %v177_v14 = vunpack.c.2.s8 %v52_v3  ;;  %v182_v15 = vunpack.c.3.s8 %v52_v3  ;;  %v82_v5 = vld [vmem:[#allocation2 + $0x130] sm:$0xff] }
  0x94   :  { %1356 = vmatpush.bf16.msrb.mxu3 %v967_v7  ;;  %v896_v16 = vcvt.s32.f32 %v496_v20  ;;  %v901_v57 = vcvt.s32.f32 %v501_v9  ;;  %v326_v17 = vunpack.c.0.s8 %v91_v47  ;;  %v331_v18 = vunpack.c.1.s8 %v91_v47  ;;  %v1738_v9 = vld [vmem:[#allocation2 + $0x270] sm:$0xff] }
  0x95   :  { %1318 = vmatpush.bf16.msrb.mxu0 %v1041_v12  ;;  %v1086_v21 = vpack.c.bf16 %v831_v13, %v826_v8  ;;  %v577_v19 = vcvt.s32.f32 %v177_v14  ;;  %v582_v22 = vcvt.s32.f32 %v182_v15  ;;  %v416_v23 = vunpack.c.2.s8 %v111_v11 }
  0x96   :  { %v1121_v24 = vpack.c.bf16 %v901_v57, %v896_v16  ;;  %v726_v26 = vcvt.s32.f32 %v326_v17  ;;  %v731_v27 = vcvt.s32.f32 %v331_v18  ;;  %v421_v28 = vunpack.c.3.s8 %v111_v11 }
  0x97   :  { %1330 = vmatpush.bf16.msrb.mxu1 %v1086_v21  ;;  %v962_v29 = vpack.c.bf16 %v582_v22, %v577_v19  ;;  %v816_v30 = vcvt.s32.f32 %v416_v23  ;;  %v486_v31 = vunpack.c.0.s8 %v131_v62  ;;  %v491_v32 = vunpack.c.1.s8 %v131_v62  ;;  %v142_v23 = vld [vmem:[#allocation2 + $0x310] sm:$0xff] }
  0x98   :  { %1344 = vmatpush.bf16.msrb.mxu2 %v1121_v24  ;;  %v1036_v33 = vpack.c.bf16 %v731_v27, %v726_v26  ;;  %v821_v34 = vcvt.s32.f32 %v421_v28  ;;  %v167_v35 = vunpack.c.0.s8 %v52_v3  ;;  %v172_v37 = vunpack.c.1.s8 %v52_v3 }
  0x99   :  { %1357 = vmatpush.bf16.msrb.mxu3 %v962_v29  ;;  %v886_v38 = vcvt.s32.f32 %v486_v31  ;;  %v891_v39 = vcvt.s32.f32 %v491_v32  ;;  %v316_v40 = vunpack.c.2.s8 %v86_v25  ;;  %v321_v41 = vunpack.c.3.s8 %v86_v25 }
  0x9a   :  { %1319 = vmatpush.bf16.msrb.mxu0 %v1036_v33  ;;  %v1081_v42 = vpack.c.bf16 %v821_v34, %v816_v30  ;;  %v567_v43 = vcvt.s32.f32 %v167_v35  ;;  %v572_v44 = vcvt.s32.f32 %v172_v37  ;;  %v406_v45 = vunpack.c.0.s8 %v111_v11  ;;  %v102_v37 = vld [vmem:[#allocation2 + $0x1d0] sm:$0xff] }
  0x9b   :  { %v1116_v47 = vpack.c.bf16 %v891_v39, %v886_v38  ;;  %v716_v48 = vcvt.s32.f32 %v316_v40  ;;  %v721_v10 = vcvt.s32.f32 %v321_v41  ;;  %v411_v49 = vunpack.c.1.s8 %v111_v11 }
  0x9c   :  { %1331 = vmatpush.bf16.msrb.mxu1 %v1081_v42  ;;  %v957_v50 = vpack.c.bf16 %v572_v44, %v567_v43  ;;  %v806_v51 = vcvt.s32.f32 %v406_v45  ;;  %v476_v52 = vunpack.c.2.s8 %v126_v36  ;;  %v481_v54 = vunpack.c.3.s8 %v126_v36 }
  0x9d   :  { %1345 = vmatpush.bf16.msrb.mxu2 %v1116_v47  ;;  %v1031_v58 = vpack.c.bf16 %v721_v10, %v716_v48  ;;  %v811_v59 = vcvt.s32.f32 %v411_v49  ;;  %v157_v56 = vunpack.c.2.s8 %v1730_v46  ;;  %v162_v61 = vunpack.c.3.s8 %v1730_v46 }
  0x9e   :  { %1358 = vmatpush.bf16.msrb.mxu3 %v957_v50  ;;  %v876_v62 = vcvt.s32.f32 %v476_v52  ;;  %v881_v63 = vcvt.s32.f32 %v481_v54  ;;  %v306_v0 = vunpack.c.0.s8 %v86_v25  ;;  %v311_v60 = vunpack.c.1.s8 %v86_v25  ;;  %v77_v54 = vld [vmem:[#allocation2 + $0x108] sm:$0xff] }
  0x9f   :  { %1320 = vmatpush.bf16.msrb.mxu0 %v1031_v58  ;;  %v1076_v2 = vpack.c.bf16 %v811_v59, %v806_v51  ;;  %v557_v3 = vcvt.s32.f32 %v157_v56  ;;  %v562_v1 = vcvt.s32.f32 %v162_v61  ;;  %v396_v4 = vunpack.c.2.s8 %v1732_v55 }
  0xa0   :  { %v1111_v6 = vpack.c.bf16 %v881_v63, %v876_v62  ;;  %v706_v7 = vcvt.s32.f32 %v306_v0  ;;  %v711_v8 = vcvt.s32.f32 %v311_v60  ;;  %v401_v20 = vunpack.c.3.s8 %v1732_v55 }
  0xa1   :  { %1332 = vmatpush.bf16.msrb.mxu1 %v1076_v2  ;;  %v952_v11 = vpack.c.bf16 %v562_v1, %v557_v3  ;;  %v796_v12 = vcvt.s32.f32 %v396_v4  ;;  %v466_v13 = vunpack.c.0.s8 %v126_v36  ;;  %v471_v14 = vunpack.c.1.s8 %v126_v36  ;;  %v1746_v36 = vld [vmem:[#allocation1 + $0x12] sm:$0xff] }
  0xa2   :  { %1346 = vmatpush.bf16.msrb.mxu2 %v1111_v6  ;;  %v1026_v15 = vpack.c.bf16 %v711_v8, %v706_v7  ;;  %v801_v16 = vcvt.s32.f32 %v401_v20  ;;  %v297_v57 = vunpack.c.2.s8 %v82_v5  ;;  %v302_v17 = vunpack.c.3.s8 %v82_v5  ;;  %v117_v4 = vld [vmem:[#allocation2 + $0x248] sm:$0xff]  ;;  %v1752_v20 = vld [vmem:[#allocation1] sm:$0xff] }
  0xa3   :  { %1359 = vmatpush.bf16.msrb.mxu3 %v952_v11  ;;  %v866_v18 = vcvt.s32.f32 %v466_v13  ;;  %v871_v21 = vcvt.s32.f32 %v471_v14  ;;  %v457_v19 = vunpack.c.2.s8 %v1738_v9  ;;  %v462_v22 = vunpack.c.3.s8 %v1738_v9  ;;  %v137_v8 = vld [vmem:[#allocation2 + $0x2e8] sm:$0xff] }
  0xa4   :  { %1321 = vmatpush.bf16.msrb.mxu0 %v1026_v15  ;;  %v1071_v24 = vpack.c.bf16 %v801_v16, %v796_v12  ;;  %v697_v26 = vcvt.s32.f32 %v297_v57  ;;  %v702_v27 = vcvt.s32.f32 %v302_v17  ;;  %v147_v28 = vunpack.c.0.s8 %v1730_v46  ;;  %v97_v17 = vld [vmem:[#allocation2 + $0x1a8] sm:$0xff] }
  0xa5   :  { %v1106_v25 = vpack.c.bf16 %v871_v21, %v866_v18  ;;  %v857_v29 = vcvt.s32.f32 %v457_v19  ;;  %v862_v30 = vcvt.s32.f32 %v462_v22  ;;  %v152_v31 = vunpack.c.1.s8 %v1730_v46 }
  0xa6   :  { %1333 = vmatpush.bf16.msrb.mxu1 %v1071_v24  ;;  %v1022_v32 = vpack.c.bf16 %v702_v27, %v697_v26  ;;  %v547_v33 = vcvt.s32.f32 %v147_v28  ;;  %v537_v34 = vunpack.c.2.s8 %v142_v23  ;;  %v542_v35 = vunpack.c.3.s8 %v142_v23 }
  0xa7   :  { %1347 = vmatpush.bf16.msrb.mxu2 %v1106_v25  ;;  %v1102_v38 = vpack.c.bf16 %v862_v30, %v857_v29  ;;  %v552_v39 = vcvt.s32.f32 %v152_v31  ;;  %v386_v40 = vunpack.c.0.s8 %v1732_v55  ;;  %v391_v41 = vunpack.c.1.s8 %v1732_v55  ;;  %1322 = vmatmul.bf16.vlgmr.msrb.gmra.mxu0 %v1746_v36 }
  0xa8   :  { %1366 = vmatpush.bf16.msra.mxu0 %v1022_v32  ;;  %v937_v42 = vcvt.s32.f32 %v537_v34  ;;  %v942_v43 = vcvt.s32.f32 %v542_v35  ;;  %v287_v44 = vunpack.c.0.s8 %v82_v5  ;;  %v292_v45 = vunpack.c.1.s8 %v82_v5 }
  0xa9   :  { %v947_v46 = vpack.c.bf16 %v552_v39, %v547_v33  ;;  %v786_v47 = vcvt.s32.f32 %v386_v40  ;;  %v791_v48 = vcvt.s32.f32 %v391_v41  ;;  %v377_v10 = vunpack.c.2.s8 %v102_v37 }
  0xaa   :  { %v1142_v49 = vpack.c.bf16 %v942_v43, %v937_v42  ;;  %v687_v50 = vcvt.s32.f32 %v287_v44  ;;  %v692_v51 = vcvt.s32.f32 %v292_v45  ;;  %v382_v52 = vunpack.c.3.s8 %v102_v37  ;;  %1348 = vmatmul.bf16.vlgmr.msrb.gmra.mxu2 %v1698_v53 }
  0xab   :  { %1392 = vmatpush.bf16.msra.mxu2 %v1102_v38  ;;  %1360 = vmatpush.bf16.msrb.mxu3 %v947_v46  ;;  %v1066_v55 = vpack.c.bf16 %v791_v48, %v786_v47  ;;  %v777_v58 = vcvt.s32.f32 %v377_v10  ;;  %v447_v59 = vunpack.c.0.s8 %v1738_v9  ;;  %v452_v56 = vunpack.c.1.s8 %v1738_v9 }
  0xac   :  { %v1017_v61 = vpack.c.bf16 %v692_v51, %v687_v50  ;;  %v782_v62 = vcvt.s32.f32 %v382_v52  ;;  %v527_v63 = vunpack.c.0.s8 %v142_v23  ;;  %v532_v0 = vunpack.c.1.s8 %v142_v23  ;;  %v1755_v23 = vld [vmem:[#allocation1 + $0x1b] sm:$0xff] }
  0xad   :  { %1334 = vmatpush.bf16.msrb.mxu1 %v1066_v55  ;;  %v847_v60 = vcvt.s32.f32 %v447_v59  ;;  %v852_v2 = vcvt.s32.f32 %v452_v56  ;;  %v277_v3 = vunpack.c.2.s8 %v77_v54  ;;  %v282_v1 = vunpack.c.3.s8 %v77_v54  ;;  %v132_v55 = vld [vmem:[#allocation2 + $0x2c0] sm:$0xff] }
  0xae   :  { %1367 = vmatpush.bf16.msra.mxu0 %v1017_v61  ;;  %v1062_v53 = vpack.c.bf16 %v782_v62, %v777_v58  ;;  %v927_v5 = vcvt.s32.f32 %v527_v63  ;;  %v932_v6 = vcvt.s32.f32 %v532_v0  ;;  %v367_v7 = vunpack.c.0.s8 %v102_v37  ;;  %1361 = vmatmul.bf16.vlgmr.msrb.gmra.mxu3 %v1752_v20 }
  0xaf   :  { %1405 = vmatpush.bf16.msra.mxu3 %v1142_v49  ;;  %v1097_v9 = vpack.c.bf16 %v852_v2, %v847_v60  ;;  %v677_v11 = vcvt.s32.f32 %v277_v3  ;;  %v682_v12 = vcvt.s32.f32 %v282_v1  ;;  %v372_v13 = vunpack.c.1.s8 %v102_v37  ;;  %v72_v37 = vld [vmem:[#allocation2 + $0xe0] sm:$0xff] }
  0xb0   :  { %v1137_v14 = vpack.c.bf16 %v932_v6, %v927_v5  ;;  %v767_v15 = vcvt.s32.f32 %v367_v7  ;;  %v437_v16 = vunpack.c.2.s8 %v117_v4  ;;  %v442_v57 = vunpack.c.3.s8 %v117_v4  ;;  %1335 = vmatmul.bf16.vlgmr.msrb.gmra.mxu1 %v1755_v23  ;;  %v112_v49 = vld [vmem:[#allocation2 + $0x220] sm:$0xff] }
  0xb1   :  { %1379 = vmatpush.bf16.msra.mxu1 %v1062_v53  ;;  %1393 = vmatpush.bf16.msra.mxu2 %v1097_v9  ;;  %v1012_v18 = vpack.c.bf16 %v682_v12, %v677_v11  ;;  %v772_v21 = vcvt.s32.f32 %v372_v13  ;;  %v517_v19 = vunpack.c.2.s8 %v137_v8  ;;  %v522_v22 = vunpack.c.3.s8 %v137_v8  ;;  %v92_v2 = vld [vmem:[#allocation2 + $0x180] sm:$0xff] }
  0xb2   :  { %v837_v24 = vcvt.s32.f32 %v437_v16  ;;  %v842_v26 = vcvt.s32.f32 %v442_v57  ;;  %v267_v27 = vunpack.c.0.s8 %v77_v54  ;;  %v272_v28 = vunpack.c.1.s8 %v77_v54 }
  0xb3   :  { %1406 = vmatpush.bf16.msra.mxu3 %v1137_v14  ;;  %1368 = vmatpush.bf16.msra.mxu0 %v1012_v18  ;;  %v1057_v25 = vpack.c.bf16 %v772_v21, %v767_v15  ;;  %v917_v29 = vcvt.s32.f32 %v517_v19  ;;  %v922_v30 = vcvt.s32.f32 %v522_v22  ;;  %v357_v31 = vunpack.c.2.s8 %v97_v17 }
  0xb4   :  { %v1092_v32 = vpack.c.bf16 %v842_v26, %v837_v24  ;;  %v667_v33 = vcvt.s32.f32 %v267_v27  ;;  %v672_v34 = vcvt.s32.f32 %v272_v28  ;;  %v362_v35 = vunpack.c.3.s8 %v97_v17 }
  0xb5   :  { %1380 = vmatpush.bf16.msra.mxu1 %v1057_v25  ;;  %v1132_v38 = vpack.c.bf16 %v922_v30, %v917_v29  ;;  %v757_v39 = vcvt.s32.f32 %v357_v31  ;;  %v427_v40 = vunpack.c.0.s8 %v117_v4  ;;  %v432_v41 = vunpack.c.1.s8 %v117_v4 }
  0xb6   :  { %1394 = vmatpush.bf16.msra.mxu2 %v1092_v32  ;;  %v1007_v42 = vpack.c.bf16 %v672_v34, %v667_v33  ;;  %v762_v43 = vcvt.s32.f32 %v362_v35  ;;  %v507_v44 = vunpack.c.0.s8 %v137_v8  ;;  %v512_v45 = vunpack.c.1.s8 %v137_v8  ;;  %v107_v32 = vld [vmem:[#allocation2 + $0x1f8] sm:$0xff] }
  0xb7   :  { %1407 = vmatpush.bf16.msra.mxu3 %v1132_v38  ;;  %v827_v46 = vcvt.s32.f32 %v427_v40  ;;  %v832_v47 = vcvt.s32.f32 %v432_v41  ;;  %v257_v48 = vunpack.c.2.s8 %v72_v37  ;;  %v262_v10 = vunpack.c.3.s8 %v72_v37  ;;  %v127_v38 = vld [vmem:[#allocation2 + $0x298] sm:$0xff] }
  0xb8   :  { %1369 = vmatpush.bf16.msra.mxu0 %v1007_v42  ;;  %v1052_v50 = vpack.c.bf16 %v762_v43, %v757_v39  ;;  %v907_v51 = vcvt.s32.f32 %v507_v44  ;;  %v912_v52 = vcvt.s32.f32 %v512_v45  ;;  %v347_v54 = vunpack.c.0.s8 %v97_v17 }
  0xb9   :  { %v1087_v58 = vpack.c.bf16 %v832_v47, %v827_v46  ;;  %v657_v59 = vcvt.s32.f32 %v257_v48  ;;  %v662_v56 = vcvt.s32.f32 %v262_v10  ;;  %v352_v61 = vunpack.c.1.s8 %v97_v17  ;;  %v67_v17 = vld [vmem:[#allocation2 + $0xb8] sm:$0xff] }
  0xba   :  { %1381 = vmatpush.bf16.msra.mxu1 %v1052_v50  ;;  %v1127_v62 = vpack.c.bf16 %v912_v52, %v907_v51  ;;  %v747_v63 = vcvt.s32.f32 %v347_v54  ;;  %v417_v0 = vunpack.c.2.s8 %v112_v49  ;;  %v422_v60 = vunpack.c.3.s8 %v112_v49  ;;  %v87_v47 = vld [vmem:[#allocation2 + $0x158] sm:$0xff] }
  0xbb   :  { %1395 = vmatpush.bf16.msra.mxu2 %v1087_v58  ;;  %v1002_v3 = vpack.c.bf16 %v662_v56, %v657_v59  ;;  %v752_v1 = vcvt.s32.f32 %v352_v61  ;;  %v497_v4 = vunpack.c.2.s8 %v132_v55  ;;  %v502_v53 = vunpack.c.3.s8 %v132_v55 }
  0xbc   :  { %1408 = vmatpush.bf16.msra.mxu3 %v1127_v62  ;;  %v817_v5 = vcvt.s32.f32 %v417_v0  ;;  %v822_v6 = vcvt.s32.f32 %v422_v60  ;;  %v247_v7 = vunpack.c.0.s8 %v72_v37  ;;  %v252_v8 = vunpack.c.1.s8 %v72_v37  ;;  %v63_v62 = vld [vmem:[#allocation2 + $0x98] sm:$0xff] }
  0xbd   :  { %1370 = vmatpush.bf16.msra.mxu0 %v1002_v3  ;;  %v1047_v9 = vpack.c.bf16 %v752_v1, %v747_v63  ;;  %v897_v11 = vcvt.s32.f32 %v497_v4  ;;  %v902_v12 = vcvt.s32.f32 %v502_v53  ;;  %v337_v13 = vunpack.c.2.s8 %v92_v2 }
  0xbe   :  { %v1082_v14 = vpack.c.bf16 %v822_v6, %v817_v5  ;;  %v647_v15 = vcvt.s32.f32 %v247_v7  ;;  %v652_v16 = vcvt.s32.f32 %v252_v8  ;;  %v342_v57 = vunpack.c.3.s8 %v92_v2 }
  0xbf   :  { %1382 = vmatpush.bf16.msra.mxu1 %v1047_v9  ;;  %v1122_v18 = vpack.c.bf16 %v902_v12, %v897_v11  ;;  %v737_v21 = vcvt.s32.f32 %v337_v13  ;;  %v407_v19 = vunpack.c.0.s8 %v112_v49  ;;  %v412_v22 = vunpack.c.1.s8 %v112_v49 }
  0xc0   :  { %1396 = vmatpush.bf16.msra.mxu2 %v1082_v14  ;;  %v997_v24 = vpack.c.bf16 %v652_v16, %v647_v15  ;;  %v742_v26 = vcvt.s32.f32 %v342_v57  ;;  %v487_v27 = vunpack.c.0.s8 %v132_v55  ;;  %v492_v28 = vunpack.c.1.s8 %v132_v55 }
  0xc1   :  { %1409 = vmatpush.bf16.msra.mxu3 %v1122_v18  ;;  %v807_v25 = vcvt.s32.f32 %v407_v19  ;;  %v812_v29 = vcvt.s32.f32 %v412_v22  ;;  %v237_v30 = vunpack.c.2.s8 %v67_v17  ;;  %v242_v31 = vunpack.c.3.s8 %v67_v17  ;;  %v1758_v18 = vpop.f32.mrf.mxu0 }
  0xc2   :  { %1371 = vmatpush.bf16.msra.mxu0 %v997_v24  ;;  %v1042_v33 = vpack.c.bf16 %v742_v26, %v737_v21  ;;  %v887_v34 = vcvt.s32.f32 %v487_v27  ;;  %v892_v35 = vcvt.s32.f32 %v492_v28  ;;  %v327_v37 = vunpack.c.0.s8 %v92_v2  ;;  %v103_v26 = vld [vmem:[#allocation2 + $0x1d8] sm:$0xff] }
  0xc3   :  { %v1077_v39 = vpack.c.bf16 %v812_v29, %v807_v25  ;;  %v637_v40 = vcvt.s32.f32 %v237_v30  ;;  %v642_v41 = vcvt.s32.f32 %v242_v31  ;;  %v332_v42 = vunpack.c.1.s8 %v92_v2  ;;  %v123_v30 = vld [vmem:[#allocation2 + $0x278] sm:$0xff] }
  0xc4   :  { %1383 = vmatpush.bf16.msra.mxu1 %v1042_v33  ;;  %v1117_v43 = vpack.c.bf16 %v892_v35, %v887_v34  ;;  %v727_v44 = vcvt.s32.f32 %v327_v37  ;;  %v397_v45 = vunpack.c.2.s8 %v107_v32  ;;  %v402_v46 = vunpack.c.3.s8 %v107_v32  ;;  %v1760_v33 = vld [vmem:[#allocation1 + $0x9] sm:$0xff] }
  0xc5   :  { %1397 = vmatpush.bf16.msra.mxu2 %v1077_v39  ;;  %v992_v48 = vpack.c.bf16 %v642_v41, %v637_v40  ;;  %v732_v10 = vcvt.s32.f32 %v332_v42  ;;  %v477_v49 = vunpack.c.2.s8 %v127_v38  ;;  %v482_v50 = vunpack.c.3.s8 %v127_v38 }
  0xc6   :  { %1410 = vmatpush.bf16.msra.mxu3 %v1117_v43  ;;  %v797_v51 = vcvt.s32.f32 %v397_v45  ;;  %v802_v52 = vcvt.s32.f32 %v402_v46  ;;  %v227_v54 = vunpack.c.0.s8 %v67_v17  ;;  %v232_v55 = vunpack.c.1.s8 %v67_v17  ;;  %v58_v17 = vld [vmem:[#allocation2 + $0x70] sm:$0xff]  ;;  %v83_v45 = vld [vmem:[#allocation2 + $0x138] sm:$0xff] }
  0xc7   :  { %1372 = vmatpush.bf16.msra.mxu0 %v992_v48  ;;  %v1037_v58 = vpack.c.bf16 %v732_v10, %v727_v44  ;;  %v877_v59 = vcvt.s32.f32 %v477_v49  ;;  %v882_v56 = vcvt.s32.f32 %v482_v50  ;;  %v317_v61 = vunpack.c.2.s8 %v87_v47 }
  0xc8   :  { %v1072_v63 = vpack.c.bf16 %v802_v52, %v797_v51  ;;  %v627_v0 = vcvt.s32.f32 %v227_v54  ;;  %v632_v60 = vcvt.s32.f32 %v232_v55  ;;  %v322_v2 = vunpack.c.3.s8 %v87_v47  ;;  %v1764_v54 = vld [vmem:[#allocation1 + $0x24] sm:$0xff] }
  0xc9   :  { %1384 = vmatpush.bf16.msra.mxu1 %v1037_v58  ;;  %v1112_v3 = vpack.c.bf16 %v882_v56, %v877_v59  ;;  %v717_v1 = vcvt.s32.f32 %v317_v61  ;;  %v387_v4 = vunpack.c.0.s8 %v107_v32  ;;  %v392_v53 = vunpack.c.1.s8 %v107_v32  ;;  %v1169_v61 = vpop.f32.mrf.mxu0 }
  0xca   :  { %1398 = vmatpush.bf16.msra.mxu2 %v1072_v63  ;;  %v987_v5 = vpack.c.bf16 %v632_v60, %v627_v0  ;;  %v722_v6 = vcvt.s32.f32 %v322_v2  ;;  %v218_v7 = vunpack.c.2.s8 %v63_v62  ;;  %v223_v8 = vunpack.c.3.s8 %v63_v62  ;;  %v53_v2 = vld [vmem:[#allocation2 + $0x48] sm:$0xff] }
  0xcb   :  { %1411 = vmatpush.bf16.msra.mxu3 %v1112_v3  ;;  %v787_v9 = vcvt.s32.f32 %v387_v4  ;;  %v792_v11 = vcvt.s32.f32 %v392_v53  ;;  %v467_v12 = vunpack.c.0.s8 %v127_v38  ;;  %v472_v13 = vunpack.c.1.s8 %v127_v38 }
  0xcc   :  { %1373 = vmatpush.bf16.msra.mxu0 %v987_v5  ;;  %v1032_v14 = vpack.c.bf16 %v722_v6, %v717_v1  ;;  %v618_v15 = vcvt.s32.f32 %v218_v7  ;;  %v623_v16 = vcvt.s32.f32 %v223_v8  ;;  %v307_v57 = vunpack.c.0.s8 %v87_v47 }
  0xcd   :  { %v1067_v21 = vpack.c.bf16 %v792_v11, %v787_v9  ;;  %v867_v19 = vcvt.s32.f32 %v467_v12  ;;  %v872_v22 = vcvt.s32.f32 %v472_v13  ;;  %v312_v24 = vunpack.c.1.s8 %v87_v47  ;;  %v98_v9 = vld [vmem:[#allocation2 + $0x1b0] sm:$0xff] }
  0xce   :  { %1385 = vmatpush.bf16.msra.mxu1 %v1032_v14  ;;  %v983_v27 = vpack.c.bf16 %v623_v16, %v618_v15  ;;  %v707_v28 = vcvt.s32.f32 %v307_v57  ;;  %v208_v25 = vunpack.c.0.s8 %v63_v62  ;;  %v213_v29 = vunpack.c.1.s8 %v63_v62  ;;  %v118_v15 = vld [vmem:[#allocation2 + $0x250] sm:$0xff] }
  0xcf   :  { %1399 = vmatpush.bf16.msra.mxu2 %v1067_v21  ;;  %v1107_v31 = vpack.c.bf16 %v872_v22, %v867_v19  ;;  %v712_v32 = vcvt.s32.f32 %v312_v24  ;;  %1374 = vmatmul.bf16.vlgmr.msra.gmra.mxu0 %v1760_v33  ;;  %v198_v34 = vunpack.c.2.s8 %v58_v17  ;;  %v203_v35 = vunpack.c.3.s8 %v58_v17 }
  0xd0   :  { %1418 = vmatpush.bf16.msrb.mxu0 %v983_v27  ;;  %v608_v37 = vcvt.s32.f32 %v208_v25  ;;  %v613_v38 = vcvt.s32.f32 %v213_v29  ;;  %v378_v39 = vunpack.c.2.s8 %v103_v26  ;;  %v383_v40 = vunpack.c.3.s8 %v103_v26 }
  0xd1   :  { %1412 = vmatpush.bf16.msra.mxu3 %v1107_v31  ;;  %v1027_v41 = vpack.c.bf16 %v712_v32, %v707_v28  ;;  %v598_v42 = vcvt.s32.f32 %v198_v34  ;;  %v603_v43 = vcvt.s32.f32 %v203_v35  ;;  %v458_v44 = vunpack.c.2.s8 %v123_v30  ;;  %v1768_v31 = vpop.f32.mrf.mxu1 }
  0xd2   :  { %1400 = vmatmul.bf16.vlgmr.msra.gmra.mxu2 %v1755_v23  ;;  %v978_v46 = vpack.c.bf16 %v613_v38, %v608_v37  ;;  %v778_v47 = vcvt.s32.f32 %v378_v39  ;;  %v783_v48 = vcvt.s32.f32 %v383_v40  ;;  %v463_v10 = vunpack.c.3.s8 %v123_v30 }
  0xd3   :  { %1386 = vmatpush.bf16.msra.mxu1 %v1027_v41  ;;  %v973_v49 = vpack.c.bf16 %v603_v43, %v598_v42  ;;  %v858_v50 = vcvt.s32.f32 %v458_v44  ;;  %v188_v51 = vunpack.c.0.s8 %v58_v17  ;;  %v193_v52 = vunpack.c.1.s8 %v58_v17  ;;  %v1770_v42 = vpop.f32.mrf.mxu2 }
  0xd4   :  { %1413 = vmatmul.bf16.vlgmr.msra.gmra.mxu3 %v1764_v54  ;;  %1419 = vmatpush.bf16.msrb.mxu0 %v978_v46  ;;  %v1063_v55 = vpack.c.bf16 %v783_v48, %v778_v47  ;;  %v863_v58 = vcvt.s32.f32 %v463_v10  ;;  %v298_v59 = vunpack.c.2.s8 %v83_v45  ;;  %v303_v56 = vunpack.c.3.s8 %v83_v45 }
  0xd5   :  { %v588_v62 = vcvt.s32.f32 %v188_v51  ;;  %v593_v63 = vcvt.s32.f32 %v193_v52  ;;  %v368_v0 = vunpack.c.0.s8 %v103_v26  ;;  %v373_v60 = vunpack.c.1.s8 %v103_v26  ;;  %v1772_v51 = vpop.f32.mrf.mxu3 }
  0xd6   :  { %1387 = vmatmul.bf16.vlgmr.msra.gmra.mxu1 %v1746_v36  ;;  %1444 = vmatpush.bf16.msrb.mxu2 %v1063_v55  ;;  %v1103_v3 = vpack.c.bf16 %v863_v58, %v858_v50  ;;  %v698_v1 = vcvt.s32.f32 %v298_v59  ;;  %v703_v4 = vcvt.s32.f32 %v303_v56  ;;  %v448_v53 = vunpack.c.0.s8 %v123_v30  ;;  %v48_v50 = vld [vmem:[#allocation2 + $0x20] sm:$0xff]  ;;  %v1774_v56 = vpop.f32.mrf.mxu0 }
  0xd7   :  { %v968_v5 = vpack.c.bf16 %v593_v63, %v588_v62  ;;  %v768_v6 = vcvt.s32.f32 %v368_v0  ;;  %v773_v7 = vcvt.s32.f32 %v373_v60  ;;  %v453_v8 = vunpack.c.1.s8 %v123_v30  ;;  %v78_v30 = vld [vmem:[#allocation2 + $0x110] sm:$0xff]  ;;  %v93_v60 = vld [vmem:[#allocation2 + $0x188] sm:$0xff] }
  0xd8   :  { %1420 = vmatpush.bf16.msrb.mxu0 %v973_v49  ;;  %1457 = vmatpush.bf16.msrb.mxu3 %v1103_v3  ;;  %v1023_v11 = vpack.c.bf16 %v703_v4, %v698_v1  ;;  %v848_v12 = vcvt.s32.f32 %v448_v53  ;;  %v178_v13 = vunpack.c.2.s8 %v53_v2  ;;  %v183_v14 = vunpack.c.3.s8 %v53_v2  ;;  %v1776_v53 = vld [vmem:[#allocation2 + $0x228] sm:$0xff] }
  0xd9   :  { %v1058_v16 = vpack.c.bf16 %v773_v7, %v768_v6  ;;  %v853_v57 = vcvt.s32.f32 %v453_v8  ;;  %v288_v17 = vunpack.c.0.s8 %v83_v45  ;;  %v293_v21 = vunpack.c.1.s8 %v83_v45 }
  0xda   :  { %1431 = vmatpush.bf16.msrb.mxu1 %v1023_v11  ;;  %v578_v19 = vcvt.s32.f32 %v178_v13  ;;  %v583_v22 = vcvt.s32.f32 %v183_v14  ;;  %v358_v24 = vunpack.c.2.s8 %v98_v9  ;;  %v363_v26 = vunpack.c.3.s8 %v98_v9 }
  0xdb   :  { %1445 = vmatpush.bf16.msrb.mxu2 %v1058_v16  ;;  %v1098_v27 = vpack.c.bf16 %v853_v57, %v848_v12  ;;  %v688_v28 = vcvt.s32.f32 %v288_v17  ;;  %v693_v25 = vcvt.s32.f32 %v293_v21  ;;  %v438_v29 = vunpack.c.2.s8 %v118_v15  ;;  %v73_v21 = vld [vmem:[#allocation2 + $0xe8] sm:$0xff] }
  0xdc   :  { %1421 = vmatpush.bf16.msrb.mxu0 %v968_v5  ;;  %v963_v32 = vpack.c.bf16 %v583_v22, %v578_v19  ;;  %v758_v34 = vcvt.s32.f32 %v358_v24  ;;  %v763_v35 = vcvt.s32.f32 %v363_v26  ;;  %v443_v37 = vunpack.c.3.s8 %v118_v15  ;;  %v1195_v19 = vpop.f32.mrf.mxu2 }
  0xdd   :  { %1458 = vmatpush.bf16.msrb.mxu3 %v1098_v27  ;;  %v1018_v38 = vpack.c.bf16 %v693_v25, %v688_v28  ;;  %v838_v39 = vcvt.s32.f32 %v438_v29  ;;  %v168_v40 = vunpack.c.0.s8 %v53_v2  ;;  %v173_v41 = vunpack.c.1.s8 %v53_v2 }
  0xde   :  { %v1053_v43 = vpack.c.bf16 %v763_v35, %v758_v34  ;;  %v843_v44 = vcvt.s32.f32 %v443_v37  ;;  %v278_v45 = vunpack.c.2.s8 %v78_v30  ;;  %v283_v46 = vunpack.c.3.s8 %v78_v30  ;;  %v1208_v34 = vpop.f32.mrf.mxu3 }
  0xdf   :  { %1432 = vmatpush.bf16.msrb.mxu1 %v1018_v38  ;;  %v568_v47 = vcvt.s32.f32 %v168_v40  ;;  %v573_v48 = vcvt.s32.f32 %v173_v41  ;;  %v348_v10 = vunpack.c.0.s8 %v98_v9  ;;  %v353_v49 = vunpack.c.1.s8 %v98_v9  ;;  %v1182_v9 = vpop.f32.mrf.mxu1  ;;  %v1221_v40 = vpop.f32.mrf.mxu0 }
  0xe0   :  { %1422 = vmatpush.bf16.msrb.mxu0 %v963_v32  ;;  %1446 = vmatpush.bf16.msrb.mxu2 %v1053_v43  ;;  %v1093_v52 = vpack.c.bf16 %v843_v44, %v838_v39  ;;  %v678_v55 = vcvt.s32.f32 %v278_v45  ;;  %v683_v58 = vcvt.s32.f32 %v283_v46  ;;  %v428_v59 = vunpack.c.0.s8 %v118_v15  ;;  %v143_v32 = vld [vmem:[#allocation2 + $0x318] sm:$0xff] }
  0xe1   :  { %v958_v61 = vpack.c.bf16 %v573_v48, %v568_v47  ;;  %v748_v62 = vcvt.s32.f32 %v348_v10  ;;  %v753_v63 = vcvt.s32.f32 %v353_v49  ;;  %v433_v0 = vunpack.c.1.s8 %v118_v15 }
  0xe2   :  { %1459 = vmatpush.bf16.msrb.mxu3 %v1093_v52  ;;  %v1013_v2 = vpack.c.bf16 %v683_v58, %v678_v55  ;;  %v828_v3 = vcvt.s32.f32 %v428_v59  ;;  %v158_v1 = vunpack.c.2.s8 %v48_v50  ;;  %v163_v4 = vunpack.c.3.s8 %v48_v50  ;;  %v88_v58 = vld [vmem:[#allocation2 + $0x160] sm:$0xff] }
  0xe3   :  { %v1048_v5 = vpack.c.bf16 %v753_v63, %v748_v62  ;;  %v833_v6 = vcvt.s32.f32 %v433_v0  ;;  %v268_v7 = vunpack.c.0.s8 %v78_v30  ;;  %v273_v8 = vunpack.c.1.s8 %v78_v30 }
  0xe4   :  { %1423 = vmatpush.bf16.msrb.mxu0 %v958_v61  ;;  %1433 = vmatpush.bf16.msrb.mxu1 %v1013_v2  ;;  %v558_v11 = vcvt.s32.f32 %v158_v1  ;;  %v563_v12 = vcvt.s32.f32 %v163_v4  ;;  %v338_v13 = vunpack.c.2.s8 %v93_v60  ;;  %v343_v14 = vunpack.c.3.s8 %v93_v60 }
  0xe5   :  { %1447 = vmatpush.bf16.msrb.mxu2 %v1048_v5  ;;  %v1088_v15 = vpack.c.bf16 %v833_v6, %v828_v3  ;;  %v668_v16 = vcvt.s32.f32 %v268_v7  ;;  %v673_v57 = vcvt.s32.f32 %v273_v8  ;;  %v418_v17 = vunpack.c.2.s8 %v1776_v53  ;;  %v108_v8 = vld [vmem:[#allocation2 + $0x200] sm:$0xff] }
  0xe6   :  { %v953_v22 = vpack.c.bf16 %v563_v12, %v558_v11  ;;  %v738_v24 = vcvt.s32.f32 %v338_v13  ;;  %v743_v26 = vcvt.s32.f32 %v343_v14  ;;  %v423_v27 = vunpack.c.3.s8 %v1776_v53  ;;  %v68_v14 = vld [vmem:[#allocation2 + $0xc0] sm:$0xff] }
  0xe7   :  { %1460 = vmatpush.bf16.msrb.mxu3 %v1088_v15  ;;  %v1008_v28 = vpack.c.bf16 %v673_v57, %v668_v16  ;;  %v818_v25 = vcvt.s32.f32 %v418_v17  ;;  %v148_v29 = vunpack.c.0.s8 %v48_v50  ;;  %v153_v30 = vunpack.c.1.s8 %v48_v50  ;;  %v1780_v59 = vpop.f32.mrf.mxu1 }
  0xe8   :  { %1424 = vmatpush.bf16.msrb.mxu0 %v953_v22  ;;  %v1043_v35 = vpack.c.bf16 %v743_v26, %v738_v24  ;;  %v823_v37 = vcvt.s32.f32 %v423_v27  ;;  %v258_v38 = vunpack.c.2.s8 %v73_v21  ;;  %v263_v39 = vunpack.c.3.s8 %v73_v21  ;;  %v138_v24 = vld [vmem:[#allocation2 + $0x2f0] sm:$0xff] }
  0xe9   :  { %1434 = vmatpush.bf16.msrb.mxu1 %v1008_v28  ;;  %v548_v41 = vcvt.s32.f32 %v148_v29  ;;  %v553_v43 = vcvt.s32.f32 %v153_v30  ;;  %v328_v44 = vunpack.c.0.s8 %v93_v60  ;;  %v333_v45 = vunpack.c.1.s8 %v93_v60  ;;  %v1785_v29 = vpop.f32.mrf.mxu2  ;;  %v1787_v30 = vpop.f32.mrf.mxu3 }
  0xea   :  { %1448 = vmatpush.bf16.msrb.mxu2 %v1043_v35  ;;  %v1083_v46 = vpack.c.bf16 %v823_v37, %v818_v25  ;;  %v658_v47 = vcvt.s32.f32 %v258_v38  ;;  %v663_v48 = vcvt.s32.f32 %v263_v39  ;;  %v538_v10 = vunpack.c.2.s8 %v143_v32 }
  0xeb   :  { %v948_v49 = vpack.c.bf16 %v553_v43, %v548_v41  ;;  %v728_v50 = vcvt.s32.f32 %v328_v44  ;;  %v733_v52 = vcvt.s32.f32 %v333_v45  ;;  %v543_v55 = vunpack.c.3.s8 %v143_v32 }
  0xec   :  { %1461 = vmatpush.bf16.msrb.mxu3 %v1083_v46  ;;  %v1003_v61 = vpack.c.bf16 %v663_v48, %v658_v47  ;;  %v938_v62 = vcvt.s32.f32 %v538_v10  ;;  %v408_v63 = vunpack.c.0.s8 %v1776_v53  ;;  %v413_v0 = vunpack.c.1.s8 %v1776_v53 }
  0xed   :  { %1425 = vmatpush.bf16.msrb.mxu0 %v948_v49  ;;  %v1038_v60 = vpack.c.bf16 %v733_v52, %v728_v50  ;;  %v943_v2 = vcvt.s32.f32 %v543_v55  ;;  %v248_v3 = vunpack.c.0.s8 %v73_v21  ;;  %v253_v1 = vunpack.c.1.s8 %v73_v21 }
  0xee   :  { %1435 = vmatpush.bf16.msrb.mxu1 %v1003_v61  ;;  %v808_v4 = vcvt.s32.f32 %v408_v63  ;;  %v813_v5 = vcvt.s32.f32 %v413_v0  ;;  %v318_v6 = vunpack.c.2.s8 %v88_v58  ;;  %v323_v7 = vunpack.c.3.s8 %v88_v58  ;;  %v133_v61 = vld [vmem:[#allocation2 + $0x2c8] sm:$0xff] }
  0xef   :  { %1449 = vmatpush.bf16.msrb.mxu2 %v1038_v60  ;;  %v1143_v9 = vpack.c.bf16 %v943_v2, %v938_v62  ;;  %v648_v11 = vcvt.s32.f32 %v248_v3  ;;  %v653_v12 = vcvt.s32.f32 %v253_v1  ;;  %v528_v13 = vunpack.c.0.s8 %v143_v32  ;;  %v1234_v37 = vpop.f32.mrf.mxu1 }
  0xf0   :  { %v1078_v15 = vpack.c.bf16 %v813_v5, %v808_v4  ;;  %v718_v16 = vcvt.s32.f32 %v318_v6  ;;  %v723_v53 = vcvt.s32.f32 %v323_v7  ;;  %v533_v57 = vunpack.c.1.s8 %v143_v32  ;;  %1426 = vmatmul.bf16.vlgmr.msrb.gmra.mxu0 %v1752_v20 }
  0xf1   :  { %1470 = vmatpush.bf16.msra.mxu0 %v1143_v9  ;;  %v998_v17 = vpack.c.bf16 %v653_v12, %v648_v11  ;;  %v928_v21 = vcvt.s32.f32 %v528_v13  ;;  %v398_v19 = vunpack.c.2.s8 %v108_v8  ;;  %v403_v22 = vunpack.c.3.s8 %v108_v8  ;;  %v1247_v7 = vpop.f32.mrf.mxu2 }
  0xf2   :  { %1462 = vmatpush.bf16.msrb.mxu3 %v1078_v15  ;;  %v1033_v26 = vpack.c.bf16 %v723_v53, %v718_v16  ;;  %v933_v27 = vcvt.s32.f32 %v533_v57  ;;  %v238_v28 = vunpack.c.2.s8 %v68_v14  ;;  %v243_v25 = vunpack.c.3.s8 %v68_v14 }
  0xf3   :  { %1436 = vmatpush.bf16.msrb.mxu1 %v998_v17  ;;  %v798_v34 = vcvt.s32.f32 %v398_v19  ;;  %v803_v32 = vcvt.s32.f32 %v403_v22  ;;  %v308_v35 = vunpack.c.0.s8 %v88_v58  ;;  %v313_v20 = vunpack.c.1.s8 %v88_v58 }
  0xf4   :  { %1450 = vmatpush.bf16.msrb.mxu2 %v1033_v26  ;;  %v1138_v38 = vpack.c.bf16 %v933_v27, %v928_v21  ;;  %v638_v39 = vcvt.s32.f32 %v238_v28  ;;  %v643_v40 = vcvt.s32.f32 %v243_v25  ;;  %v518_v41 = vunpack.c.2.s8 %v138_v24 }
  0xf5   :  { %v1073_v43 = vpack.c.bf16 %v803_v32, %v798_v34  ;;  %v708_v44 = vcvt.s32.f32 %v308_v35  ;;  %v713_v45 = vcvt.s32.f32 %v313_v20  ;;  %v523_v46 = vunpack.c.3.s8 %v138_v24 }
  0xf6   :  { %1471 = vmatpush.bf16.msra.mxu0 %v1138_v38  ;;  %v993_v47 = vpack.c.bf16 %v643_v40, %v638_v39  ;;  %v918_v48 = vcvt.s32.f32 %v518_v41  ;;  %v1181_v10 = vadd.f32 %v1768_v31, %v1758_v18  ;;  %v388_v49 = vunpack.c.0.s8 %v108_v8 }
  0xf7   :  { %1463 = vmatpush.bf16.msrb.mxu3 %v1073_v43  ;;  %v1028_v50 = vpack.c.bf16 %v713_v45, %v708_v44  ;;  %v923_v52 = vcvt.s32.f32 %v523_v46  ;;  %v393_v55 = vunpack.c.1.s8 %v108_v8  ;;  %v228_v58 = vunpack.c.0.s8 %v68_v14  ;;  %v1260_v8 = vpop.f32.mrf.mxu3 }
  0xf8   :  { %1437 = vmatpush.bf16.msrb.mxu1 %v993_v47  ;;  %v788_v62 = vcvt.s32.f32 %v388_v49  ;;  %v1194_v63 = vadd.f32 %v1770_v42, %v1181_v10  ;;  %v233_v0 = vunpack.c.1.s8 %v68_v14  ;;  %v508_v60 = vunpack.c.0.s8 %v138_v24  ;;  %v128_v42 = vld [vmem:[#allocation2 + $0x2a0] sm:$0xff] }
  0xf9   :  { %1451 = vmatpush.bf16.msrb.mxu2 %v1028_v50  ;;  %v1133_v2 = vpack.c.bf16 %v923_v52, %v918_v48  ;;  %v793_v3 = vcvt.s32.f32 %v393_v55  ;;  %v628_v1 = vcvt.s32.f32 %v228_v58  ;;  %v513_v4 = vunpack.c.1.s8 %v138_v24 }
  0xfa   :  { %v633_v5 = vcvt.s32.f32 %v233_v0  ;;  %v908_v18 = vcvt.s32.f32 %v508_v60  ;;  %v1207_v31 = vadd.f32 %v1772_v51, %v1194_v63  ;;  %v498_v6 = vunpack.c.2.s8 %v133_v61  ;;  %v1808_v63 = vld [vmem:[%s1844_s2] sm:$0x1f] }
  0xfb   :  { %1472 = vmatpush.bf16.msra.mxu0 %v1133_v2  ;;  %v1068_v9 = vpack.c.bf16 %v793_v3, %v788_v62  ;;  %v913_v11 = vcvt.s32.f32 %v513_v4  ;;  %v503_v12 = vunpack.c.3.s8 %v133_v61  ;;  %v488_v13 = vunpack.c.0.s8 %v133_v61  ;;  %v1814_v2 = vld [vmem:[%s1845_s3] sm:$0x1f] }
  0xfc   :  { %1452 = vmatmul.bf16.vlgmr.msrb.gmra.mxu2 %v1746_v36  ;;  %v988_v14 = vpack.c.bf16 %v633_v5, %v628_v1  ;;  %v1220_v15 = vadd.f32 %v1774_v56, %v1207_v31  ;;  %v898_v16 = vcvt.s32.f32 %v498_v6  ;;  %v493_v53 = vunpack.c.1.s8 %v133_v61 }
  0xfd   :  { %1464 = vmatpush.bf16.msrb.mxu3 %v1068_v9  ;;  %v1128_v57 = vpack.c.bf16 %v913_v11, %v908_v18  ;;  %v903_v17 = vcvt.s32.f32 %v503_v12  ;;  %v888_v51 = vcvt.s32.f32 %v488_v13  ;;  %v478_v21 = vunpack.c.2.s8 %v128_v42 }
  0xfe   :  { %1438 = vmatpush.bf16.msrb.mxu1 %v988_v14  ;;  %v1271_v19 = vpop.f32.mrf.mxu0  ;;  %v893_v24 = vcvt.s32.f32 %v493_v53  ;;  %v483_v26 = vunpack.c.3.s8 %v128_v42  ;;  %v1246_v27 = vadd.f32 %v1785_v29, %v1780_v59  ;;  %v468_v56 = vunpack.c.0.s8 %v128_v42 }
  0xff   :  { %1473 = vmatpush.bf16.msra.mxu0 %v1128_v57  ;;  %v1123_v22 = vpack.c.bf16 %v903_v17, %v898_v16  ;;  %v473_v28 = vunpack.c.1.s8 %v128_v42  ;;  %v878_v34 = vcvt.s32.f32 %v478_v21  ;;  %v1610_v58 = vmov 0.0  }
 0x100   :  { %1465 = vmatmul.bf16.vlgmr.msrb.gmra.mxu3 %v1755_v23  ;;  %v1259_v36 = vadd.f32 %v1787_v30, %v1246_v27  ;;  %v1118_v25 = vpack.c.bf16 %v893_v24, %v888_v51  ;;  %v883_v32 = vcvt.s32.f32 %v483_v26  ;;  %v868_v29 = vcvt.s32.f32 %v468_v56  ;;  %38 = vst [vmem:[%s1846_s4 + $0x8] sm:$0x3] %v1610_v58 }
 0x101   :  { %1439 = vmatmul.bf16.vlgmr.msrb.gmra.mxu1 %v1760_v33  ;;  %v873_v23 = vcvt.s32.f32 %v473_v28  ;;  %v1509_v60 = vperm.slane %v1808_v63, 1  ;;  %v1510_v1 = vperm.slane %v1808_v63, 2  ;;  %v1511_v4 = vperm.slane %v1808_v63, 3 }
 0x102   :  { %v1272_v35 = vadd.f32 %v1271_v19, %v1259_v36  ;;  %v1113_v59 = vpack.c.bf16 %v883_v32, %v878_v34  ;;  %v1526_v18 = vperm.slane %v1814_v2, 1  ;;  %v1527_v6 = vperm.slane %v1814_v2, 2 }
 0x103   :  { %1474 = vmatpush.bf16.msra.mxu0 %v1123_v22  ;;  %v1284_v20 = vpop.f32.mrf.mxu1  ;;  %v1108_v41 = vpack.c.bf16 %v873_v23, %v868_v29  ;;  %v1528_v7 = vperm.slane %v1814_v2, 3  ;;  %v1508_v9 = vperm.slane %v1808_v63, 0  ;;  %v1514_v11 = vrot.slane %v1509_v60, 6 }
 0x104   :  { %v1285_v37 = vadd.f32 %v1284_v20, %v1272_v35  ;;  %v1515_v14 = vrot.slane %v1510_v1, 4  ;;  %v1525_v16 = vperm.slane %v1814_v2, 0  ;;  %v1531_v57 = vrot.slane %v1526_v18, 6 }
 0x105   :  { %v1297_v38 = vpop.f32.mrf.mxu2  ;;  %v1532_v51 = vrot.slane %v1527_v6, 4  ;;  %v1533_v21 = vrot.slane %v1528_v7, 2  ;;  %v1517_v19 = vsel %vm1490_vm0, %v1508_v9, %v1514_v11  ;;  %vm1494_vm2 = vcmask 1043456  }
 0x106   :  { %v1273_v39 = vpop.f32.mrf.mxu0  ;;  %v1487_v40 = vrot.slane %v1285_v37, 6  ;;  %v1534_v36 = vsel %vm1490_vm0, %v1525_v16, %v1531_v57 }
 0x107   :  { %1475 = vmatpush.bf16.msra.mxu0 %v1118_v25  ;;  %v1535_v28 = vsel %vm1492_vm1, %v1532_v51, %v1533_v21 }
 0x108   :  { %v1491_v33 = vsel %vm1490_vm0, %v1220_v15, %v1487_v40  ;;  %v1516_v15 = vrot.slane %v1511_v4, 2  ;;  %v1536_v35 = vsel %vm1494_vm2, %v1534_v36, %v1535_v28 }
 0x10a   :  { %v1310_v30 = vpop.f32.mrf.mxu3  ;;  %v1518_v26 = vsel %vm1492_vm1, %v1515_v14, %v1516_v15 }
 0x10b   :  { %1476 = vmatpush.bf16.msra.mxu0 %v1113_v59  ;;  %v1311_v43 = vadd.f32 %v1310_v30, %v1297_v38  ;;  %v1286_v44 = vpop.f32.mrf.mxu1  ;;  %v1519_v34 = vsel %vm1494_vm2, %v1517_v19, %v1518_v26 }
 0x10d   :  { %v1299_v45 = vpop.f32.mrf.mxu2 }
 0x10f   :  { %1477 = vmatpush.bf16.msra.mxu0 %v1108_v41 }
 0x112   :  { %1478 = vmatmul.bf16.vlgmr.msra.gmra.mxu0 %v1764_v54  ;;  %v1312_v46 = vpop.f32.mrf.mxu3 }
 0x124   :  { %v1323_v47 = vpop.f32.mrf.mxu0 }
 0x125   :  { %v1324_v54 = vadd.f32 %v1323_v47, %v1311_v43 }
 0x12c   :  { %v1325_v48 = vpop.f32.mrf.mxu0 }
 0x12d   :  { %v1349_v10 = vpop.f32.mrf.mxu2  ;;  %v1336_v49 = vpop.f32.mrf.mxu1 }
 0x12e   :  { %v1337_v3 = vadd.f32 %v1336_v49, %v1324_v54  ;;  %v1512_v54 = vperm.slane %v1808_v63, 4 }
 0x130   :  { %v1350_v13 = vadd.f32 %v1349_v10, %v1337_v3 }
 0x131   :  { %v1362_v50 = vpop.f32.mrf.mxu3 }
 0x132   :  { %v1488_v22 = vrot.slane %v1350_v13, 4 }
 0x135   :  { %v1351_v52 = vpop.f32.mrf.mxu2  ;;  %v1338_v55 = vpop.f32.mrf.mxu1 }
 0x136   :  { %v1145_v52 = vld [vmem:[%s1846_s4 + $0x8] sm:$0x3] }
 0x139   :  { %v1364_v61 = vpop.f32.mrf.mxu3 }
 0x14c   :  { %v1375_v62 = vpop.f32.mrf.mxu0 }
 0x14d   :  { %v1376_v0 = vadd.f32 %v1375_v62, %v1362_v50 }
 0x153   :  { %v1388_v5 = vpop.f32.mrf.mxu1 }
 0x154   :  { %v1389_v31 = vadd.f32 %v1388_v5, %v1376_v0  ;;  %v1377_v8 = vpop.f32.mrf.mxu0  ;;  %v1529_v0 = vperm.slane %v1814_v2, 4 }
 0x155   :  { %v1401_v12 = vpop.f32.mrf.mxu2 }
 0x156   :  { %v1402_v42 = vadd.f32 %v1401_v12, %v1389_v31 }
 0x157   :  { %v1414_v53 = vpop.f32.mrf.mxu3 }
 0x158   :  { %v1415_v17 = vadd.f32 %v1414_v53, %v1402_v42 }
 0x15a   :  { %v1489_v24 = vrot.slane %v1415_v17, 2 }
 0x15b   :  { %v1390_v27 = vpop.f32.mrf.mxu1 }
 0x15c   :  { %v1493_v56 = vsel %vm1492_vm1, %v1488_v22, %v1489_v24 }
 0x15d   :  { %v1495_v25 = vsel %vm1494_vm2, %v1491_v33, %v1493_v56  ;;  %v1403_v32 = vpop.f32.mrf.mxu2 }
 0x15e   :  { %v1521_v37 = vmul.f32 %v1519_v34, %v1495_v25 }
 0x15f   :  { %v1416_v20 = vpop.f32.mrf.mxu3 }
 0x160   :  { %v1538_v38 = vadd.f32 %v1536_v35, %v1521_v37 }
 0x162   :  { %v1562_v39 = vclamps-f32 %v1538_v38, 40.0 }
 0x164   :  { %v1544_v59 = vsub.f32 0.0, %v1562_v39 }
 0x166   :  { %v1546_v29 = vmul.f32 1.442695, %v1544_v59 }
 0x168   :  { %1568 = vpow2.f32 %v1546_v29 }
 0x16d   :  { %v1427_v23 = vpop.f32.mrf.mxu0 }
 0x16e   :  { %v1569_v40 = vpop.eup %1568 }
 0x16f   :  { %v1550_v30 = vadd.f32 1.0, %v1569_v40 }
 0x171   :  { %1570 = vrcp.f32 %v1550_v30 }
 0x175   :  { %v1429_v41 = vpop.f32.mrf.mxu0 }
 0x177   :  { %v1571_v43 = vpop.eup %1570 }
 0x178   :  { %1554 = vst [vmem:[%s1846_s4] sm:$0xff] %v1571_v43 }
 0x17e   :  { %v1440_v33 = vpop.f32.mrf.mxu1 }
 0x17f   :  { %v1453_v44 = vpop.f32.mrf.mxu2  ;;  %v1441_v46 = vadd.f32 %v1440_v33, %v1427_v23 }
 0x181   :  { %v1454_v10 = vadd.f32 %v1453_v44, %v1441_v46 }
 0x183   :  { %v1466_v45 = vpop.f32.mrf.mxu3 }
 0x184   :  { %v1467_v50 = vadd.f32 %v1466_v45, %v1454_v10 }
 0x186   :  { %v1442_v47 = vpop.f32.mrf.mxu1 }
 0x187   :  { %v1455_v48 = vpop.f32.mrf.mxu2 }
 0x18b   :  { %v1468_v49 = vpop.f32.mrf.mxu3 }
 0x18f   :  { %v1479_v55 = vpop.f32.mrf.mxu0 }
 0x190   :  { %v1480_v58 = vadd.f32 %v1479_v55, %v1467_v50 }
 0x192   :  { %v1498_v61 = vadd.f32 %v1480_v58, %v1145_v52 }
 0x194   :  { %1500 = vst [vmem:[%s1846_s4 + $0x8] sm:$0x3] %v1498_v61 }
 0x197   :  { %v1481_v62 = vpop.f32.mrf.mxu0 }
 0x19b   :  { %v1505_v60 = vld [vmem:[%s1846_s4 + $0x8] sm:$0x3] }
 0x19c   :  { %v1522_v3 = vmul.f32 %v1512_v54, %v1505_v60 }
 0x19e   :  { %v1539_v1 = vadd.f32 %v1529_v0, %v1522_v3 }
 0x1a0   :  { %v1563_v4 = vclamps-f32 %v1539_v1, 40.0 }
 0x1a2   :  { %v1545_v5 = vsub.f32 0.0, %v1563_v4 }
 0x1a4   :  { %v1548_v18 = vmul.f32 1.442695, %v1545_v5 }
 0x1a6   :  { %1572 = vpow2.f32 %v1548_v18 }
 0x1ac   :  { %v1573_v31 = vpop.eup %1572 }
 0x1ad   :  { %v1551_v6 = vadd.f32 1.0, %v1573_v31 }
 0x1af   :  { %1574 = vrcp.f32 %v1551_v6 }
 0x1b5   :  { %v1575_v7 = vpop.eup %1574 }
 0x1b6   :  { %1555 = vst [vmem:[%s1846_s4 + $0x8] sm:$0x3] %v1575_v7 }
 0x1b7   :  { %1560 = vsyncpa [#allocation3], 1 }

// kernel: _lambda_.6
= control target key start
LH: loop header
LB: loop body
LE: loop exit
PB: predicated region body
PF: predicated region fallthrough
CT: control target
= control target key end

     0   :  { %9 = vsyncpa [#allocation3], 0  ;;  %s2479_s18 = smov [#allocation2]   ;;  %s2480_s20 = smov 640   ;;  %s2745_s0 = inlined_call_operand.vmem [shape: bf16[2,1024], index: 0, kind: input, shape index: {}]   ;;  %s2746_s1 = inlined_call_operand.hbm [shape: s8[1024,640], index: 1, kind: input, shape index: {}]   ;;  %s2747_s2 = inlined_call_operand.vmem [shape: f32[1,640], index: 2, kind: input, shape index: {}]   ;;  %s2748_s3 = inlined_call_operand.vmem [shape: f32[1,640], index: 3, kind: input, shape index: {}]   ;;  %s2749_s4 = inlined_call_operand.vmem [shape: f32[2,640], index: 4, kind: output, shape index: {}]  }
   0x1   :  { %s16_s17 = sshll.u32 %s2746_s1, 4  ;;  %s18_s19 = sshll.u32 %s2479_s18, 4  ;;  %s17_s17 = int_to_ptr.hbm [resolvable:$true] %s16_s17  ;;  %s19_s19 = int_to_ptr.vmem [resolvable:$true] %s18_s19 }
   0x2   :  { %s2481_s21 = smov 40  }
   0x3   :  { %24 = dma.hbm_to_vmem [thread:$0]  %s17_s17, 20480, %s19_s19, [#allocation3], %s2480_s20, %s2480_s20, %s2481_s21  }
   0x4   :  { %2477 = dma.done.wait [#allocation3], 20480  }
   0x5   :  { %2478 = vsyncadd [#allocation3], 4294946816  ;;  %v59_v0 = vld [vmem:[#allocation2 + $0x78] sm:$0xff]  ;;  %v54_v28 = vld [vmem:[#allocation2 + $0x50] sm:$0xff]  ;;  %vm2351_vm0 = vcmask 1041408   ;;  %vm2353_vm1 = vcmask 1045508  }
   0x6   :  { %v79_v1 = vld [vmem:[#allocation2 + $0x118] sm:$0xff]  ;;  %v274_v3 = vunpack.c.2.s8 %v59_v0  ;;  %v279_v4 = vunpack.c.3.s8 %v59_v0  ;;  %v264_v22 = vunpack.c.0.s8 %v59_v0  ;;  %v269_v23 = vunpack.c.1.s8 %v59_v0  ;;  %v74_v37 = vld [vmem:[#allocation2 + $0xf0] sm:$0xff] }
   0x7   :  { %v99_v2 = vld [vmem:[#allocation2 + $0x1b8] sm:$0xff]  ;;  %v354_v5 = vunpack.c.2.s8 %v79_v1  ;;  %v359_v6 = vunpack.c.3.s8 %v79_v1  ;;  %v344_v26 = vunpack.c.0.s8 %v79_v1  ;;  %v349_v27 = vunpack.c.1.s8 %v79_v1  ;;  %v94_v42 = vld [vmem:[#allocation2 + $0x190] sm:$0xff] }
   0x8   :  { %v119_v7 = vld [vmem:[#allocation2 + $0x258] sm:$0xff]  ;;  %v434_v8 = vunpack.c.2.s8 %v99_v2  ;;  %v439_v9 = vunpack.c.3.s8 %v99_v2  ;;  %v914_v12 = vcvt.s32.f32 %v274_v3  ;;  %v919_v13 = vcvt.s32.f32 %v279_v4  ;;  %v114_v47 = vld [vmem:[#allocation2 + $0x230] sm:$0xff] }
   0x9   :  { %v514_v10 = vunpack.c.2.s8 %v119_v7  ;;  %v519_v11 = vunpack.c.3.s8 %v119_v7  ;;  %v994_v14 = vcvt.s32.f32 %v354_v5  ;;  %v999_v15 = vcvt.s32.f32 %v359_v6 }
   0xa   :  { %v1074_v16 = vcvt.s32.f32 %v434_v8  ;;  %v1079_v17 = vcvt.s32.f32 %v439_v9  ;;  %v1519_v20 = vpack.c.bf16 %v919_v13, %v914_v12  ;;  %v904_v29 = vcvt.s32.f32 %v264_v22  ;;  %v49_v8 = vld [vmem:[#allocation2 + $0x28] sm:$0xff] }
   0xb   :  { %v1154_v18 = vcvt.s32.f32 %v514_v10  ;;  %v1159_v19 = vcvt.s32.f32 %v519_v11  ;;  %v1559_v21 = vpack.c.bf16 %v999_v15, %v994_v14  ;;  %v909_v30 = vcvt.s32.f32 %v269_v23  ;;  %v89_v22 = vld [vmem:[#allocation2 + $0x168] sm:$0xff] }
   0xc   :  { %v1599_v24 = vpack.c.bf16 %v1079_v17, %v1074_v16  ;;  %1824 = vmatpush.bf16.msra.mxu0 %v1519_v20  ;;  %v424_v31 = vunpack.c.0.s8 %v99_v2  ;;  %v429_v32 = vunpack.c.1.s8 %v99_v2  ;;  %v984_v33 = vcvt.s32.f32 %v344_v26  ;;  %v69_v17 = vld [vmem:[#allocation2 + $0xc8] sm:$0xff] }
   0xd   :  { %v1639_v25 = vpack.c.bf16 %v1159_v19, %v1154_v18  ;;  %1837 = vmatpush.bf16.msra.mxu1 %v1559_v21  ;;  %v989_v34 = vcvt.s32.f32 %v349_v27  ;;  %v504_v35 = vunpack.c.0.s8 %v119_v7  ;;  %v509_v36 = vunpack.c.1.s8 %v119_v7  ;;  %v109_v27 = vld [vmem:[#allocation2 + $0x208] sm:$0xff] }
   0xe   :  { %1850 = vmatpush.bf16.msra.mxu2 %v1599_v24  ;;  %v1514_v38 = vpack.c.bf16 %v909_v30, %v904_v29  ;;  %v1064_v39 = vcvt.s32.f32 %v424_v31  ;;  %v1069_v40 = vcvt.s32.f32 %v429_v32  ;;  %v254_v41 = vunpack.c.2.s8 %v54_v28 }
   0xf   :  { %1863 = vmatpush.bf16.msra.mxu3 %v1639_v25  ;;  %v1554_v43 = vpack.c.bf16 %v989_v34, %v984_v33  ;;  %v1144_v44 = vcvt.s32.f32 %v504_v35  ;;  %v1149_v45 = vcvt.s32.f32 %v509_v36  ;;  %v259_v46 = vunpack.c.3.s8 %v54_v28 }
  0x10   :  { %1825 = vmatpush.bf16.msra.mxu0 %v1514_v38  ;;  %v1594_v48 = vpack.c.bf16 %v1069_v40, %v1064_v39  ;;  %v894_v49 = vcvt.s32.f32 %v254_v41  ;;  %v334_v50 = vunpack.c.2.s8 %v74_v37  ;;  %v339_v51 = vunpack.c.3.s8 %v74_v37 }
  0x11   :  { %1838 = vmatpush.bf16.msra.mxu1 %v1554_v43  ;;  %v1634_v52 = vpack.c.bf16 %v1149_v45, %v1144_v44  ;;  %v899_v53 = vcvt.s32.f32 %v259_v46  ;;  %v414_v54 = vunpack.c.2.s8 %v94_v42  ;;  %v419_v55 = vunpack.c.3.s8 %v94_v42 }
  0x12   :  { %1851 = vmatpush.bf16.msra.mxu2 %v1594_v48  ;;  %v974_v56 = vcvt.s32.f32 %v334_v50  ;;  %v979_v57 = vcvt.s32.f32 %v339_v51  ;;  %v494_v58 = vunpack.c.2.s8 %v114_v47  ;;  %v499_v59 = vunpack.c.3.s8 %v114_v47 }
  0x13   :  { %1864 = vmatpush.bf16.msra.mxu3 %v1634_v52  ;;  %v1509_v60 = vpack.c.bf16 %v899_v53, %v894_v49  ;;  %v1054_v61 = vcvt.s32.f32 %v414_v54  ;;  %v1059_v62 = vcvt.s32.f32 %v419_v55  ;;  %v244_v63 = vunpack.c.0.s8 %v54_v28  ;;  %v44_v52 = vld [vmem:[#allocation2] sm:$0xff] }
  0x14   :  { %v1549_v0 = vpack.c.bf16 %v979_v57, %v974_v56  ;;  %v1134_v1 = vcvt.s32.f32 %v494_v58  ;;  %v1139_v2 = vcvt.s32.f32 %v499_v59  ;;  %v249_v3 = vunpack.c.1.s8 %v54_v28 }
  0x15   :  { %1826 = vmatpush.bf16.msra.mxu0 %v1509_v60  ;;  %v1589_v4 = vpack.c.bf16 %v1059_v62, %v1054_v61  ;;  %v884_v5 = vcvt.s32.f32 %v244_v63  ;;  %v324_v6 = vunpack.c.0.s8 %v74_v37  ;;  %v329_v7 = vunpack.c.1.s8 %v74_v37  ;;  %v64_v61 = vld [vmem:[#allocation2 + $0xa0] sm:$0xff] }
  0x16   :  { %1839 = vmatpush.bf16.msra.mxu1 %v1549_v0  ;;  %v1629_v9 = vpack.c.bf16 %v1139_v2, %v1134_v1  ;;  %v889_v10 = vcvt.s32.f32 %v249_v3  ;;  %v404_v11 = vunpack.c.0.s8 %v94_v42  ;;  %v409_v12 = vunpack.c.1.s8 %v94_v42  ;;  %v84_v2 = vld [vmem:[#allocation2 + $0x140] sm:$0xff] }
  0x17   :  { %1852 = vmatpush.bf16.msra.mxu2 %v1589_v4  ;;  %v964_v13 = vcvt.s32.f32 %v324_v6  ;;  %v969_v14 = vcvt.s32.f32 %v329_v7  ;;  %v484_v15 = vunpack.c.0.s8 %v114_v47  ;;  %v489_v16 = vunpack.c.1.s8 %v114_v47  ;;  %v104_v7 = vld [vmem:[#allocation2 + $0x1e0] sm:$0xff] }
  0x18   :  { %1865 = vmatpush.bf16.msra.mxu3 %v1629_v9  ;;  %v1504_v18 = vpack.c.bf16 %v889_v10, %v884_v5  ;;  %v1044_v19 = vcvt.s32.f32 %v404_v11  ;;  %v1049_v20 = vcvt.s32.f32 %v409_v12  ;;  %v234_v21 = vunpack.c.2.s8 %v49_v8  ;;  %v43_v12 = vld [vmem:[%s2745_s0] sm:$0xff] }
  0x19   :  { %v1544_v23 = vpack.c.bf16 %v969_v14, %v964_v13  ;;  %v1124_v24 = vcvt.s32.f32 %v484_v15  ;;  %v1129_v25 = vcvt.s32.f32 %v489_v16  ;;  %v239_v26 = vunpack.c.3.s8 %v49_v8  ;;  %1807 = vst [vmem:[#allocation1] ss:$9 sm:$0xff] %v43_v12 }
  0x1a   :  { %1827 = vmatpush.bf16.msra.mxu0 %v1504_v18  ;;  %v1584_v28 = vpack.c.bf16 %v1049_v20, %v1044_v19  ;;  %v874_v29 = vcvt.s32.f32 %v234_v21  ;;  %v314_v30 = vunpack.c.2.s8 %v69_v17  ;;  %v319_v31 = vunpack.c.3.s8 %v69_v17 }
  0x1b   :  { %1840 = vmatpush.bf16.msra.mxu1 %v1544_v23  ;;  %v1624_v32 = vpack.c.bf16 %v1129_v25, %v1124_v24  ;;  %v879_v33 = vcvt.s32.f32 %v239_v26  ;;  %v394_v34 = vunpack.c.2.s8 %v89_v22  ;;  %v399_v35 = vunpack.c.3.s8 %v89_v22 }
  0x1c   :  { %1853 = vmatpush.bf16.msra.mxu2 %v1584_v28  ;;  %v954_v36 = vcvt.s32.f32 %v314_v30  ;;  %v959_v37 = vcvt.s32.f32 %v319_v31  ;;  %v474_v38 = vunpack.c.2.s8 %v109_v27  ;;  %v479_v39 = vunpack.c.3.s8 %v109_v27 }
  0x1d   :  { %1866 = vmatpush.bf16.msra.mxu3 %v1624_v32  ;;  %v1499_v40 = vpack.c.bf16 %v879_v33, %v874_v29  ;;  %v1034_v41 = vcvt.s32.f32 %v394_v34  ;;  %v1039_v42 = vcvt.s32.f32 %v399_v35  ;;  %v224_v43 = vunpack.c.0.s8 %v49_v8  ;;  %v139_v33 = vld [vmem:[#allocation2 + $0x2f8] sm:$0xff] }
  0x1e   :  { %v1539_v44 = vpack.c.bf16 %v959_v37, %v954_v36  ;;  %v1114_v45 = vcvt.s32.f32 %v474_v38  ;;  %v1119_v46 = vcvt.s32.f32 %v479_v39  ;;  %v229_v47 = vunpack.c.1.s8 %v49_v8 }
  0x1f   :  { %1828 = vmatpush.bf16.msra.mxu0 %v1499_v40  ;;  %v1579_v48 = vpack.c.bf16 %v1039_v42, %v1034_v41  ;;  %v864_v49 = vcvt.s32.f32 %v224_v43  ;;  %v304_v50 = vunpack.c.0.s8 %v69_v17  ;;  %v309_v51 = vunpack.c.1.s8 %v69_v17  ;;  %v159_v42 = vld [vmem:[#allocation2 + $0x398] sm:$0xff] }
  0x20   :  { %1841 = vmatpush.bf16.msra.mxu1 %v1539_v44  ;;  %v1619_v53 = vpack.c.bf16 %v1119_v46, %v1114_v45  ;;  %v869_v54 = vcvt.s32.f32 %v229_v47  ;;  %v384_v55 = vunpack.c.0.s8 %v89_v22  ;;  %v389_v56 = vunpack.c.1.s8 %v89_v22  ;;  %v179_v47 = vld [vmem:[#allocation2 + $0x438] sm:$0xff] }
  0x21   :  { %1854 = vmatpush.bf16.msra.mxu2 %v1579_v48  ;;  %v944_v57 = vcvt.s32.f32 %v304_v50  ;;  %v949_v58 = vcvt.s32.f32 %v309_v51  ;;  %v464_v59 = vunpack.c.0.s8 %v109_v27  ;;  %v469_v60 = vunpack.c.1.s8 %v109_v27 }
  0x22   :  { %1867 = vmatpush.bf16.msra.mxu3 %v1619_v53  ;;  %v1494_v62 = vpack.c.bf16 %v869_v54, %v864_v49  ;;  %v1024_v63 = vcvt.s32.f32 %v384_v55  ;;  %v1029_v0 = vcvt.s32.f32 %v389_v56  ;;  %v214_v1 = vunpack.c.2.s8 %v44_v52 }
  0x23   :  { %v1534_v3 = vpack.c.bf16 %v949_v58, %v944_v57  ;;  %v1104_v4 = vcvt.s32.f32 %v464_v59  ;;  %v1109_v5 = vcvt.s32.f32 %v469_v60  ;;  %v219_v6 = vunpack.c.3.s8 %v44_v52 }
  0x24   :  { %1829 = vmatpush.bf16.msra.mxu0 %v1494_v62  ;;  %v1574_v8 = vpack.c.bf16 %v1029_v0, %v1024_v63  ;;  %v854_v9 = vcvt.s32.f32 %v214_v1  ;;  %v294_v10 = vunpack.c.2.s8 %v64_v61  ;;  %v299_v11 = vunpack.c.3.s8 %v64_v61  ;;  %v2516_v62 = vld [vmem:[#allocation1 + $0x9] sm:$0xff] }
  0x25   :  { %1842 = vmatpush.bf16.msra.mxu1 %v1534_v3  ;;  %v1614_v13 = vpack.c.bf16 %v1109_v5, %v1104_v4  ;;  %v859_v14 = vcvt.s32.f32 %v219_v6  ;;  %v374_v15 = vunpack.c.2.s8 %v84_v2  ;;  %v379_v16 = vunpack.c.3.s8 %v84_v2  ;;  %v2518_v3 = vld [vmem:[#allocation1 + $0x12] sm:$0xff] }
  0x26   :  { %1855 = vmatpush.bf16.msra.mxu2 %v1574_v8  ;;  %v934_v17 = vcvt.s32.f32 %v294_v10  ;;  %v939_v18 = vcvt.s32.f32 %v299_v11  ;;  %v454_v19 = vunpack.c.2.s8 %v104_v7  ;;  %v459_v20 = vunpack.c.3.s8 %v104_v7  ;;  %v2521_v8 = vld [vmem:[#allocation1 + $0x1b] sm:$0xff] }
  0x27   :  { %1868 = vmatpush.bf16.msra.mxu3 %v1614_v13  ;;  %v1489_v21 = vpack.c.bf16 %v859_v14, %v854_v9  ;;  %v1014_v22 = vcvt.s32.f32 %v374_v15  ;;  %v1019_v23 = vcvt.s32.f32 %v379_v16  ;;  %v204_v24 = vunpack.c.0.s8 %v44_v52 }
  0x28   :  { %v1529_v25 = vpack.c.bf16 %v939_v18, %v934_v17  ;;  %v1094_v26 = vcvt.s32.f32 %v454_v19  ;;  %v1099_v27 = vcvt.s32.f32 %v459_v20  ;;  %v209_v28 = vunpack.c.1.s8 %v44_v52  ;;  %v199_v52 = vld [vmem:[#allocation2 + $0x4d8] sm:$0xff]  ;;  %v134_v17 = vld [vmem:[#allocation2 + $0x2d0] sm:$0xff] }
  0x29   :  { %1830 = vmatpush.bf16.msra.mxu0 %v1489_v21  ;;  %v1569_v29 = vpack.c.bf16 %v1019_v23, %v1014_v22  ;;  %v844_v30 = vcvt.s32.f32 %v204_v24  ;;  %v284_v31 = vunpack.c.0.s8 %v64_v61  ;;  %v289_v32 = vunpack.c.1.s8 %v64_v61  ;;  %v2514_v61 = vld [vmem:[#allocation1] sm:$0xff] }
  0x2a   :  { %1843 = vmatpush.bf16.msra.mxu1 %v1529_v25  ;;  %v1609_v34 = vpack.c.bf16 %v1099_v27, %v1094_v26  ;;  %v849_v35 = vcvt.s32.f32 %v209_v28  ;;  %v364_v36 = vunpack.c.0.s8 %v84_v2  ;;  %v369_v37 = vunpack.c.1.s8 %v84_v2  ;;  %v154_v26 = vld [vmem:[#allocation2 + $0x370] sm:$0xff] }
  0x2b   :  { %1856 = vmatpush.bf16.msra.mxu2 %v1569_v29  ;;  %v924_v38 = vcvt.s32.f32 %v284_v31  ;;  %v929_v39 = vcvt.s32.f32 %v289_v32  ;;  %v444_v40 = vunpack.c.0.s8 %v104_v7  ;;  %v449_v41 = vunpack.c.1.s8 %v104_v7  ;;  %v174_v31 = vld [vmem:[#allocation2 + $0x410] sm:$0xff] }
  0x2c   :  { %1869 = vmatpush.bf16.msra.mxu3 %v1609_v34  ;;  %v1484_v43 = vpack.c.bf16 %v849_v35, %v844_v30  ;;  %v1004_v44 = vcvt.s32.f32 %v364_v36  ;;  %v1009_v45 = vcvt.s32.f32 %v369_v37  ;;  %v594_v46 = vunpack.c.2.s8 %v139_v33  ;;  %v194_v36 = vld [vmem:[#allocation2 + $0x4b0] sm:$0xff] }
  0x2d   :  { %v1524_v48 = vpack.c.bf16 %v929_v39, %v924_v38  ;;  %v1084_v49 = vcvt.s32.f32 %v444_v40  ;;  %v1089_v50 = vcvt.s32.f32 %v449_v41  ;;  %v599_v51 = vunpack.c.3.s8 %v139_v33 }
  0x2e   :  { %1831 = vmatpush.bf16.msra.mxu0 %v1484_v43  ;;  %v1564_v53 = vpack.c.bf16 %v1009_v45, %v1004_v44  ;;  %v1234_v54 = vcvt.s32.f32 %v594_v46  ;;  %v674_v55 = vunpack.c.2.s8 %v159_v42  ;;  %v679_v56 = vunpack.c.3.s8 %v159_v42 }
  0x2f   :  { %1844 = vmatpush.bf16.msra.mxu1 %v1524_v48  ;;  %v1604_v57 = vpack.c.bf16 %v1089_v50, %v1084_v49  ;;  %v1239_v58 = vcvt.s32.f32 %v599_v51  ;;  %v754_v59 = vunpack.c.2.s8 %v179_v47  ;;  %v759_v60 = vunpack.c.3.s8 %v179_v47 }
  0x30   :  { %1857 = vmatpush.bf16.msra.mxu2 %v1564_v53  ;;  %v1314_v63 = vcvt.s32.f32 %v674_v55  ;;  %v1319_v0 = vcvt.s32.f32 %v679_v56  ;;  %v834_v1 = vunpack.c.2.s8 %v199_v52  ;;  %v839_v2 = vunpack.c.3.s8 %v199_v52 }
  0x31   :  { %1870 = vmatpush.bf16.msra.mxu3 %v1604_v57  ;;  %v1679_v4 = vpack.c.bf16 %v1239_v58, %v1234_v54  ;;  %v1394_v5 = vcvt.s32.f32 %v754_v59  ;;  %v1399_v6 = vcvt.s32.f32 %v759_v60  ;;  %v584_v7 = vunpack.c.0.s8 %v139_v33  ;;  %1832 = vmatmul.bf16.vlgmr.msra.gmra.mxu0 %v2514_v61 }
  0x32   :  { %v1719_v9 = vpack.c.bf16 %v1319_v0, %v1314_v63  ;;  %v1474_v10 = vcvt.s32.f32 %v834_v1  ;;  %v1479_v11 = vcvt.s32.f32 %v839_v2  ;;  %v589_v12 = vunpack.c.1.s8 %v139_v33  ;;  %1845 = vmatmul.bf16.vlgmr.msra.gmra.mxu1 %v2516_v62  ;;  %v129_v63 = vld [vmem:[#allocation2 + $0x2a8] sm:$0xff] }
  0x33   :  { %1876 = vmatpush.bf16.msrb.mxu0 %v1679_v4  ;;  %v1759_v13 = vpack.c.bf16 %v1399_v6, %v1394_v5  ;;  %v1224_v14 = vcvt.s32.f32 %v584_v7  ;;  %v664_v15 = vunpack.c.0.s8 %v159_v42  ;;  %v669_v16 = vunpack.c.1.s8 %v159_v42  ;;  %1858 = vmatmul.bf16.vlgmr.msra.gmra.mxu2 %v2518_v3 }
  0x34   :  { %1889 = vmatpush.bf16.msrb.mxu1 %v1719_v9  ;;  %v1799_v18 = vpack.c.bf16 %v1479_v11, %v1474_v10  ;;  %v1229_v19 = vcvt.s32.f32 %v589_v12  ;;  %v744_v20 = vunpack.c.0.s8 %v179_v47  ;;  %v749_v21 = vunpack.c.1.s8 %v179_v47  ;;  %1871 = vmatmul.bf16.vlgmr.msra.gmra.mxu3 %v2521_v8  ;;  %v149_v10 = vld [vmem:[#allocation2 + $0x348] sm:$0xff] }
  0x35   :  { %1902 = vmatpush.bf16.msrb.mxu2 %v1759_v13  ;;  %v1304_v22 = vcvt.s32.f32 %v664_v15  ;;  %v1309_v23 = vcvt.s32.f32 %v669_v16  ;;  %v824_v24 = vunpack.c.0.s8 %v199_v52  ;;  %v829_v25 = vunpack.c.1.s8 %v199_v52  ;;  %v169_v15 = vld [vmem:[#allocation2 + $0x3e8] sm:$0xff] }
  0x36   :  { %1915 = vmatpush.bf16.msrb.mxu3 %v1799_v18  ;;  %v1674_v27 = vpack.c.bf16 %v1229_v19, %v1224_v14  ;;  %v1384_v28 = vcvt.s32.f32 %v744_v20  ;;  %v1389_v29 = vcvt.s32.f32 %v749_v21  ;;  %v574_v30 = vunpack.c.2.s8 %v134_v17  ;;  %v189_v20 = vld [vmem:[#allocation2 + $0x488] sm:$0xff] }
  0x37   :  { %v1714_v32 = vpack.c.bf16 %v1309_v23, %v1304_v22  ;;  %v1464_v33 = vcvt.s32.f32 %v824_v24  ;;  %v1469_v34 = vcvt.s32.f32 %v829_v25  ;;  %v579_v35 = vunpack.c.3.s8 %v134_v17 }
  0x38   :  { %1877 = vmatpush.bf16.msrb.mxu0 %v1674_v27  ;;  %v1754_v37 = vpack.c.bf16 %v1389_v29, %v1384_v28  ;;  %v1214_v38 = vcvt.s32.f32 %v574_v30  ;;  %v654_v39 = vunpack.c.2.s8 %v154_v26  ;;  %v659_v40 = vunpack.c.3.s8 %v154_v26 }
  0x39   :  { %1890 = vmatpush.bf16.msrb.mxu1 %v1714_v32  ;;  %v1794_v41 = vpack.c.bf16 %v1469_v34, %v1464_v33  ;;  %v1219_v42 = vcvt.s32.f32 %v579_v35  ;;  %v734_v43 = vunpack.c.2.s8 %v174_v31  ;;  %v739_v44 = vunpack.c.3.s8 %v174_v31 }
  0x3a   :  { %1903 = vmatpush.bf16.msrb.mxu2 %v1754_v37  ;;  %v1294_v45 = vcvt.s32.f32 %v654_v39  ;;  %v1299_v46 = vcvt.s32.f32 %v659_v40  ;;  %v814_v47 = vunpack.c.2.s8 %v194_v36  ;;  %v819_v48 = vunpack.c.3.s8 %v194_v36 }
  0x3b   :  { %1916 = vmatpush.bf16.msrb.mxu3 %v1794_v41  ;;  %v1669_v49 = vpack.c.bf16 %v1219_v42, %v1214_v38  ;;  %v1374_v50 = vcvt.s32.f32 %v734_v43  ;;  %v1379_v51 = vcvt.s32.f32 %v739_v44  ;;  %v564_v52 = vunpack.c.0.s8 %v134_v17 }
  0x3c   :  { %v1709_v53 = vpack.c.bf16 %v1299_v46, %v1294_v45  ;;  %v1454_v54 = vcvt.s32.f32 %v814_v47  ;;  %v1459_v55 = vcvt.s32.f32 %v819_v48  ;;  %v569_v56 = vunpack.c.1.s8 %v134_v17  ;;  %v124_v45 = vld [vmem:[#allocation2 + $0x280] sm:$0xff] }
  0x3d   :  { %1878 = vmatpush.bf16.msrb.mxu0 %v1669_v49  ;;  %v1749_v57 = vpack.c.bf16 %v1379_v51, %v1374_v50  ;;  %v1204_v58 = vcvt.s32.f32 %v564_v52  ;;  %v644_v59 = vunpack.c.0.s8 %v154_v26  ;;  %v649_v60 = vunpack.c.1.s8 %v154_v26 }
  0x3e   :  { %1891 = vmatpush.bf16.msrb.mxu1 %v1709_v53  ;;  %v1789_v0 = vpack.c.bf16 %v1459_v55, %v1454_v54  ;;  %v1209_v1 = vcvt.s32.f32 %v569_v56  ;;  %v724_v2 = vunpack.c.0.s8 %v174_v31  ;;  %v729_v4 = vunpack.c.1.s8 %v174_v31  ;;  %v144_v54 = vld [vmem:[#allocation2 + $0x320] sm:$0xff] }
  0x3f   :  { %1904 = vmatpush.bf16.msrb.mxu2 %v1749_v57  ;;  %v1284_v5 = vcvt.s32.f32 %v644_v59  ;;  %v1289_v6 = vcvt.s32.f32 %v649_v60  ;;  %v804_v7 = vunpack.c.0.s8 %v194_v36  ;;  %v809_v9 = vunpack.c.1.s8 %v194_v36  ;;  %v164_v59 = vld [vmem:[#allocation2 + $0x3c0] sm:$0xff] }
  0x40   :  { %1917 = vmatpush.bf16.msrb.mxu3 %v1789_v0  ;;  %v1664_v11 = vpack.c.bf16 %v1209_v1, %v1204_v58  ;;  %v1364_v12 = vcvt.s32.f32 %v724_v2  ;;  %v1369_v13 = vcvt.s32.f32 %v729_v4  ;;  %v554_v14 = vunpack.c.2.s8 %v129_v63  ;;  %v184_v2 = vld [vmem:[#allocation2 + $0x460] sm:$0xff] }
  0x41   :  { %v1704_v16 = vpack.c.bf16 %v1289_v6, %v1284_v5  ;;  %v1444_v17 = vcvt.s32.f32 %v804_v7  ;;  %v1449_v18 = vcvt.s32.f32 %v809_v9  ;;  %v559_v19 = vunpack.c.3.s8 %v129_v63 }
  0x42   :  { %1879 = vmatpush.bf16.msrb.mxu0 %v1664_v11  ;;  %v1744_v21 = vpack.c.bf16 %v1369_v13, %v1364_v12  ;;  %v1194_v22 = vcvt.s32.f32 %v554_v14  ;;  %v634_v23 = vunpack.c.2.s8 %v149_v10  ;;  %v639_v24 = vunpack.c.3.s8 %v149_v10 }
  0x43   :  { %1892 = vmatpush.bf16.msrb.mxu1 %v1704_v16  ;;  %v1784_v25 = vpack.c.bf16 %v1449_v18, %v1444_v17  ;;  %v1199_v26 = vcvt.s32.f32 %v559_v19  ;;  %v714_v27 = vunpack.c.2.s8 %v169_v15  ;;  %v719_v28 = vunpack.c.3.s8 %v169_v15 }
  0x44   :  { %1905 = vmatpush.bf16.msrb.mxu2 %v1744_v21  ;;  %v1274_v29 = vcvt.s32.f32 %v634_v23  ;;  %v1279_v30 = vcvt.s32.f32 %v639_v24  ;;  %v794_v31 = vunpack.c.2.s8 %v189_v20  ;;  %v799_v32 = vunpack.c.3.s8 %v189_v20 }
  0x45   :  { %1918 = vmatpush.bf16.msrb.mxu3 %v1784_v25  ;;  %v1659_v33 = vpack.c.bf16 %v1199_v26, %v1194_v22  ;;  %v1354_v34 = vcvt.s32.f32 %v714_v27  ;;  %v1359_v35 = vcvt.s32.f32 %v719_v28  ;;  %v544_v36 = vunpack.c.0.s8 %v129_v63 }
  0x46   :  { %v1699_v37 = vpack.c.bf16 %v1279_v30, %v1274_v29  ;;  %v1434_v38 = vcvt.s32.f32 %v794_v31  ;;  %v1439_v39 = vcvt.s32.f32 %v799_v32  ;;  %v549_v40 = vunpack.c.1.s8 %v129_v63  ;;  %v60_v29 = vld [vmem:[#allocation2 + $0x80] sm:$0xff] }
  0x47   :  { %1880 = vmatpush.bf16.msrb.mxu0 %v1659_v33  ;;  %v1739_v41 = vpack.c.bf16 %v1359_v35, %v1354_v34  ;;  %v1184_v42 = vcvt.s32.f32 %v544_v36  ;;  %v624_v43 = vunpack.c.0.s8 %v149_v10  ;;  %v629_v44 = vunpack.c.1.s8 %v149_v10 }
  0x48   :  { %1893 = vmatpush.bf16.msrb.mxu1 %v1699_v37  ;;  %v1779_v46 = vpack.c.bf16 %v1439_v39, %v1434_v38  ;;  %v1189_v47 = vcvt.s32.f32 %v549_v40  ;;  %v704_v48 = vunpack.c.0.s8 %v169_v15  ;;  %v709_v49 = vunpack.c.1.s8 %v169_v15  ;;  %v80_v38 = vld [vmem:[#allocation2 + $0x120] sm:$0xff] }
  0x49   :  { %1906 = vmatpush.bf16.msrb.mxu2 %v1739_v41  ;;  %v1264_v50 = vcvt.s32.f32 %v624_v43  ;;  %v1269_v51 = vcvt.s32.f32 %v629_v44  ;;  %v784_v52 = vunpack.c.0.s8 %v189_v20  ;;  %v789_v53 = vunpack.c.1.s8 %v189_v20  ;;  %v100_v43 = vld [vmem:[#allocation2 + $0x1c0] sm:$0xff] }
  0x4a   :  { %1919 = vmatpush.bf16.msrb.mxu3 %v1779_v46  ;;  %v1654_v55 = vpack.c.bf16 %v1189_v47, %v1184_v42  ;;  %v1344_v56 = vcvt.s32.f32 %v704_v48  ;;  %v1349_v57 = vcvt.s32.f32 %v709_v49  ;;  %v534_v58 = vunpack.c.2.s8 %v124_v45  ;;  %v120_v48 = vld [vmem:[#allocation2 + $0x260] sm:$0xff] }
  0x4b   :  { %v1694_v60 = vpack.c.bf16 %v1269_v51, %v1264_v50  ;;  %v1424_v63 = vcvt.s32.f32 %v784_v52  ;;  %v1429_v0 = vcvt.s32.f32 %v789_v53  ;;  %v539_v1 = vunpack.c.3.s8 %v124_v45  ;;  %v2526_v53 = vld [vmem:[#allocation1 + $0x24] sm:$0xff] }
  0x4c   :  { %1881 = vmatpush.bf16.msrb.mxu0 %v1654_v55  ;;  %v1734_v4 = vpack.c.bf16 %v1349_v57, %v1344_v56  ;;  %v1174_v5 = vcvt.s32.f32 %v534_v58  ;;  %v614_v6 = vunpack.c.2.s8 %v144_v54  ;;  %v619_v7 = vunpack.c.3.s8 %v144_v54  ;;  %v2528_v58 = vld [vmem:[#allocation1 + $0x2d] sm:$0xff] }
  0x4d   :  { %1894 = vmatpush.bf16.msrb.mxu1 %v1694_v60  ;;  %v1774_v9 = vpack.c.bf16 %v1429_v0, %v1424_v63  ;;  %v1179_v10 = vcvt.s32.f32 %v539_v1  ;;  %v694_v11 = vunpack.c.2.s8 %v164_v59  ;;  %v699_v12 = vunpack.c.3.s8 %v164_v59  ;;  %v2530_v1 = vld [vmem:[#allocation1 + $0x36] sm:$0xff] }
  0x4e   :  { %1907 = vmatpush.bf16.msrb.mxu2 %v1734_v4  ;;  %v1254_v13 = vcvt.s32.f32 %v614_v6  ;;  %v1259_v14 = vcvt.s32.f32 %v619_v7  ;;  %v774_v15 = vunpack.c.2.s8 %v184_v2  ;;  %v779_v16 = vunpack.c.3.s8 %v184_v2  ;;  %v2533_v7 = vld [vmem:[#allocation1 + $0x3f] sm:$0xff] }
  0x4f   :  { %1920 = vmatpush.bf16.msrb.mxu3 %v1774_v9  ;;  %v1649_v17 = vpack.c.bf16 %v1179_v10, %v1174_v5  ;;  %v1334_v18 = vcvt.s32.f32 %v694_v11  ;;  %v1339_v19 = vcvt.s32.f32 %v699_v12  ;;  %v524_v20 = vunpack.c.0.s8 %v124_v45 }
  0x50   :  { %v1689_v21 = vpack.c.bf16 %v1259_v14, %v1254_v13  ;;  %v1414_v22 = vcvt.s32.f32 %v774_v15  ;;  %v1419_v23 = vcvt.s32.f32 %v779_v16  ;;  %v529_v24 = vunpack.c.1.s8 %v124_v45 }
  0x51   :  { %1882 = vmatpush.bf16.msrb.mxu0 %v1649_v17  ;;  %v1729_v25 = vpack.c.bf16 %v1339_v19, %v1334_v18  ;;  %v1164_v26 = vcvt.s32.f32 %v524_v20  ;;  %v604_v27 = vunpack.c.0.s8 %v144_v54  ;;  %v609_v28 = vunpack.c.1.s8 %v144_v54  ;;  %v55_v17 = vld [vmem:[#allocation2 + $0x58] sm:$0xff] }
  0x52   :  { %1895 = vmatpush.bf16.msrb.mxu1 %v1689_v21  ;;  %v1769_v30 = vpack.c.bf16 %v1419_v23, %v1414_v22  ;;  %v1169_v31 = vcvt.s32.f32 %v529_v24  ;;  %v684_v32 = vunpack.c.0.s8 %v164_v59  ;;  %v689_v33 = vunpack.c.1.s8 %v164_v59 }
  0x53   :  { %1908 = vmatpush.bf16.msrb.mxu2 %v1729_v25  ;;  %v1244_v34 = vcvt.s32.f32 %v604_v27  ;;  %v1249_v35 = vcvt.s32.f32 %v609_v28  ;;  %v764_v36 = vunpack.c.0.s8 %v184_v2  ;;  %v769_v37 = vunpack.c.1.s8 %v184_v2 }
  0x54   :  { %1921 = vmatpush.bf16.msrb.mxu3 %v1769_v30  ;;  %v1644_v39 = vpack.c.bf16 %v1169_v31, %v1164_v26  ;;  %v1324_v40 = vcvt.s32.f32 %v684_v32  ;;  %v1329_v41 = vcvt.s32.f32 %v689_v33  ;;  %v275_v42 = vunpack.c.2.s8 %v60_v29  ;;  %v75_v26 = vld [vmem:[#allocation2 + $0xf8] sm:$0xff] }
  0x55   :  { %v1684_v44 = vpack.c.bf16 %v1249_v35, %v1244_v34  ;;  %v1404_v45 = vcvt.s32.f32 %v764_v36  ;;  %v1409_v46 = vcvt.s32.f32 %v769_v37  ;;  %v280_v47 = vunpack.c.3.s8 %v60_v29  ;;  %v95_v31 = vld [vmem:[#allocation2 + $0x198] sm:$0xff] }
  0x56   :  { %1883 = vmatpush.bf16.msrb.mxu0 %v1644_v39  ;;  %v1724_v49 = vpack.c.bf16 %v1329_v41, %v1324_v40  ;;  %v915_v50 = vcvt.s32.f32 %v275_v42  ;;  %v355_v51 = vunpack.c.2.s8 %v80_v38  ;;  %v360_v52 = vunpack.c.3.s8 %v80_v38  ;;  %v115_v36 = vld [vmem:[#allocation2 + $0x238] sm:$0xff] }
  0x57   :  { %1896 = vmatpush.bf16.msrb.mxu1 %v1684_v44  ;;  %v1764_v54 = vpack.c.bf16 %v1409_v46, %v1404_v45  ;;  %v920_v55 = vcvt.s32.f32 %v280_v47  ;;  %v435_v56 = vunpack.c.2.s8 %v100_v43  ;;  %v440_v57 = vunpack.c.3.s8 %v100_v43 }
  0x58   :  { %1909 = vmatpush.bf16.msrb.mxu2 %v1724_v49  ;;  %v995_v59 = vcvt.s32.f32 %v355_v51  ;;  %v1000_v60 = vcvt.s32.f32 %v360_v52  ;;  %v515_v63 = vunpack.c.2.s8 %v120_v48  ;;  %v520_v0 = vunpack.c.3.s8 %v120_v48 }
  0x59   :  { %1922 = vmatpush.bf16.msrb.mxu3 %v1764_v54  ;;  %v1520_v2 = vpack.c.bf16 %v920_v55, %v915_v50  ;;  %v1075_v4 = vcvt.s32.f32 %v435_v56  ;;  %v1080_v5 = vcvt.s32.f32 %v440_v57  ;;  %v265_v6 = vunpack.c.0.s8 %v60_v29  ;;  %1884 = vmatmul.bf16.vlgmr.msrb.gmra.mxu0 %v2526_v53 }
  0x5a   :  { %v1560_v9 = vpack.c.bf16 %v1000_v60, %v995_v59  ;;  %v1155_v10 = vcvt.s32.f32 %v515_v63  ;;  %v1160_v11 = vcvt.s32.f32 %v520_v0  ;;  %v270_v12 = vunpack.c.1.s8 %v60_v29  ;;  %1897 = vmatmul.bf16.vlgmr.msrb.gmra.mxu1 %v2528_v58 }
  0x5b   :  { %1928 = vmatpush.bf16.msra.mxu0 %v1520_v2  ;;  %v1600_v13 = vpack.c.bf16 %v1080_v5, %v1075_v4  ;;  %v905_v14 = vcvt.s32.f32 %v265_v6  ;;  %v345_v15 = vunpack.c.0.s8 %v80_v38  ;;  %v350_v16 = vunpack.c.1.s8 %v80_v38  ;;  %1910 = vmatmul.bf16.vlgmr.msrb.gmra.mxu2 %v2530_v1  ;;  %v50_v2 = vld [vmem:[#allocation2 + $0x30] sm:$0xff] }
  0x5c   :  { %1941 = vmatpush.bf16.msra.mxu1 %v1560_v9  ;;  %v1640_v18 = vpack.c.bf16 %v1160_v11, %v1155_v10  ;;  %v910_v19 = vcvt.s32.f32 %v270_v12  ;;  %v425_v20 = vunpack.c.0.s8 %v100_v43  ;;  %v430_v21 = vunpack.c.1.s8 %v100_v43  ;;  %1923 = vmatmul.bf16.vlgmr.msrb.gmra.mxu3 %v2533_v7 }
  0x5d   :  { %1954 = vmatpush.bf16.msra.mxu2 %v1600_v13  ;;  %v985_v22 = vcvt.s32.f32 %v345_v15  ;;  %v990_v23 = vcvt.s32.f32 %v350_v16  ;;  %v505_v24 = vunpack.c.0.s8 %v120_v48  ;;  %v510_v25 = vunpack.c.1.s8 %v120_v48 }
  0x5e   :  { %1967 = vmatpush.bf16.msra.mxu3 %v1640_v18  ;;  %v1515_v27 = vpack.c.bf16 %v910_v19, %v905_v14  ;;  %v1065_v28 = vcvt.s32.f32 %v425_v20  ;;  %v1070_v29 = vcvt.s32.f32 %v430_v21  ;;  %v255_v30 = vunpack.c.2.s8 %v55_v17  ;;  %v70_v14 = vld [vmem:[#allocation2 + $0xd0] sm:$0xff] }
  0x5f   :  { %v1555_v32 = vpack.c.bf16 %v990_v23, %v985_v22  ;;  %v1145_v33 = vcvt.s32.f32 %v505_v24  ;;  %v1150_v34 = vcvt.s32.f32 %v510_v25  ;;  %v260_v35 = vunpack.c.3.s8 %v55_v17  ;;  %v90_v19 = vld [vmem:[#allocation2 + $0x170] sm:$0xff] }
  0x60   :  { %1929 = vmatpush.bf16.msra.mxu0 %v1515_v27  ;;  %v1595_v37 = vpack.c.bf16 %v1070_v29, %v1065_v28  ;;  %v895_v38 = vcvt.s32.f32 %v255_v30  ;;  %v335_v39 = vunpack.c.2.s8 %v75_v26  ;;  %v340_v40 = vunpack.c.3.s8 %v75_v26  ;;  %v110_v24 = vld [vmem:[#allocation2 + $0x210] sm:$0xff] }
  0x61   :  { %1942 = vmatpush.bf16.msra.mxu1 %v1555_v32  ;;  %v1635_v41 = vpack.c.bf16 %v1150_v34, %v1145_v33  ;;  %v900_v42 = vcvt.s32.f32 %v260_v35  ;;  %v415_v43 = vunpack.c.2.s8 %v95_v31  ;;  %v420_v44 = vunpack.c.3.s8 %v95_v31 }
  0x62   :  { %1955 = vmatpush.bf16.msra.mxu2 %v1595_v37  ;;  %v975_v45 = vcvt.s32.f32 %v335_v39  ;;  %v980_v46 = vcvt.s32.f32 %v340_v40  ;;  %v495_v47 = vunpack.c.2.s8 %v115_v36  ;;  %v500_v48 = vunpack.c.3.s8 %v115_v36 }
  0x63   :  { %1968 = vmatpush.bf16.msra.mxu3 %v1635_v41  ;;  %v1510_v49 = vpack.c.bf16 %v900_v42, %v895_v38  ;;  %v1055_v50 = vcvt.s32.f32 %v415_v43  ;;  %v1060_v51 = vcvt.s32.f32 %v420_v44  ;;  %v245_v52 = vunpack.c.0.s8 %v55_v17 }
  0x64   :  { %v1550_v54 = vpack.c.bf16 %v980_v46, %v975_v45  ;;  %v1135_v55 = vcvt.s32.f32 %v495_v47  ;;  %v1140_v56 = vcvt.s32.f32 %v500_v48  ;;  %v250_v57 = vunpack.c.1.s8 %v55_v17 }
  0x65   :  { %1930 = vmatpush.bf16.msra.mxu0 %v1510_v49  ;;  %v1590_v59 = vpack.c.bf16 %v1060_v51, %v1055_v50  ;;  %v885_v60 = vcvt.s32.f32 %v245_v52  ;;  %v325_v63 = vunpack.c.0.s8 %v75_v26  ;;  %v330_v0 = vunpack.c.1.s8 %v75_v26  ;;  %v45_v49 = vld [vmem:[#allocation2 + $0x8] sm:$0xff] }
  0x66   :  { %1943 = vmatpush.bf16.msra.mxu1 %v1550_v54  ;;  %v1630_v4 = vpack.c.bf16 %v1140_v56, %v1135_v55  ;;  %v890_v5 = vcvt.s32.f32 %v250_v57  ;;  %v405_v6 = vunpack.c.0.s8 %v95_v31  ;;  %v410_v9 = vunpack.c.1.s8 %v95_v31 }
  0x67   :  { %1956 = vmatpush.bf16.msra.mxu2 %v1590_v59  ;;  %v965_v10 = vcvt.s32.f32 %v325_v63  ;;  %v970_v11 = vcvt.s32.f32 %v330_v0  ;;  %v485_v12 = vunpack.c.0.s8 %v115_v36  ;;  %v490_v13 = vunpack.c.1.s8 %v115_v36 }
  0x68   :  { %1969 = vmatpush.bf16.msra.mxu3 %v1630_v4  ;;  %v1505_v15 = vpack.c.bf16 %v890_v5, %v885_v60  ;;  %v1045_v16 = vcvt.s32.f32 %v405_v6  ;;  %v1050_v17 = vcvt.s32.f32 %v410_v9  ;;  %v235_v18 = vunpack.c.2.s8 %v50_v2  ;;  %v65_v60 = vld [vmem:[#allocation2 + $0xa8] sm:$0xff] }
  0x69   :  { %v1545_v20 = vpack.c.bf16 %v970_v11, %v965_v10  ;;  %v1125_v21 = vcvt.s32.f32 %v485_v12  ;;  %v1130_v22 = vcvt.s32.f32 %v490_v13  ;;  %v240_v23 = vunpack.c.3.s8 %v50_v2  ;;  %v85_v5 = vld [vmem:[#allocation2 + $0x148] sm:$0xff] }
  0x6a   :  { %1931 = vmatpush.bf16.msra.mxu0 %v1505_v15  ;;  %v1585_v25 = vpack.c.bf16 %v1050_v17, %v1045_v16  ;;  %v875_v26 = vcvt.s32.f32 %v235_v18  ;;  %v315_v27 = vunpack.c.2.s8 %v70_v14  ;;  %v320_v28 = vunpack.c.3.s8 %v70_v14  ;;  %v105_v12 = vld [vmem:[#allocation2 + $0x1e8] sm:$0xff] }
  0x6b   :  { %1944 = vmatpush.bf16.msra.mxu1 %v1545_v20  ;;  %v1625_v29 = vpack.c.bf16 %v1130_v22, %v1125_v21  ;;  %v880_v30 = vcvt.s32.f32 %v240_v23  ;;  %v395_v31 = vunpack.c.2.s8 %v90_v19  ;;  %v400_v32 = vunpack.c.3.s8 %v90_v19 }
  0x6c   :  { %1957 = vmatpush.bf16.msra.mxu2 %v1585_v25  ;;  %v955_v33 = vcvt.s32.f32 %v315_v27  ;;  %v960_v34 = vcvt.s32.f32 %v320_v28  ;;  %v475_v35 = vunpack.c.2.s8 %v110_v24  ;;  %v480_v36 = vunpack.c.3.s8 %v110_v24 }
  0x6d   :  { %1970 = vmatpush.bf16.msra.mxu3 %v1625_v29  ;;  %v1500_v37 = vpack.c.bf16 %v880_v30, %v875_v26  ;;  %v1035_v38 = vcvt.s32.f32 %v395_v31  ;;  %v1040_v39 = vcvt.s32.f32 %v400_v32  ;;  %v225_v40 = vunpack.c.0.s8 %v50_v2 }
  0x6e   :  { %v1540_v41 = vpack.c.bf16 %v960_v34, %v955_v33  ;;  %v1115_v42 = vcvt.s32.f32 %v475_v35  ;;  %v1120_v43 = vcvt.s32.f32 %v480_v36  ;;  %v230_v44 = vunpack.c.1.s8 %v50_v2 }
  0x6f   :  { %1932 = vmatpush.bf16.msra.mxu0 %v1500_v37  ;;  %v1580_v45 = vpack.c.bf16 %v1040_v39, %v1035_v38  ;;  %v865_v46 = vcvt.s32.f32 %v225_v40  ;;  %v305_v47 = vunpack.c.0.s8 %v70_v14  ;;  %v310_v48 = vunpack.c.1.s8 %v70_v14  ;;  %v140_v37 = vld [vmem:[#allocation2 + $0x300] sm:$0xff] }
  0x70   :  { %1945 = vmatpush.bf16.msra.mxu1 %v1540_v41  ;;  %v1620_v50 = vpack.c.bf16 %v1120_v43, %v1115_v42  ;;  %v870_v51 = vcvt.s32.f32 %v230_v44  ;;  %v385_v52 = vunpack.c.0.s8 %v90_v19  ;;  %v390_v54 = vunpack.c.1.s8 %v90_v19 }
  0x71   :  { %1958 = vmatpush.bf16.msra.mxu2 %v1580_v45  ;;  %v945_v55 = vcvt.s32.f32 %v305_v47  ;;  %v950_v56 = vcvt.s32.f32 %v310_v48  ;;  %v465_v57 = vunpack.c.0.s8 %v110_v24  ;;  %v470_v59 = vunpack.c.1.s8 %v110_v24 }
  0x72   :  { %1971 = vmatpush.bf16.msra.mxu3 %v1620_v50  ;;  %v1495_v63 = vpack.c.bf16 %v870_v51, %v865_v46  ;;  %v1025_v0 = vcvt.s32.f32 %v385_v52  ;;  %v1030_v2 = vcvt.s32.f32 %v390_v54  ;;  %v215_v4 = vunpack.c.2.s8 %v45_v49  ;;  %v160_v46 = vld [vmem:[#allocation2 + $0x3a0] sm:$0xff] }
  0x73   :  { %v1535_v6 = vpack.c.bf16 %v950_v56, %v945_v55  ;;  %v1105_v9 = vcvt.s32.f32 %v465_v57  ;;  %v1110_v10 = vcvt.s32.f32 %v470_v59  ;;  %v220_v11 = vunpack.c.3.s8 %v45_v49  ;;  %v180_v51 = vld [vmem:[#allocation2 + $0x440] sm:$0xff] }
  0x74   :  { %1933 = vmatpush.bf16.msra.mxu0 %v1495_v63  ;;  %v1575_v13 = vpack.c.bf16 %v1030_v2, %v1025_v0  ;;  %v855_v14 = vcvt.s32.f32 %v215_v4  ;;  %v295_v15 = vunpack.c.2.s8 %v65_v60  ;;  %v300_v16 = vunpack.c.3.s8 %v65_v60  ;;  %v200_v57 = vld [vmem:[#allocation2 + $0x4e0] sm:$0xff] }
  0x75   :  { %1946 = vmatpush.bf16.msra.mxu1 %v1535_v6  ;;  %v1615_v17 = vpack.c.bf16 %v1110_v10, %v1105_v9  ;;  %v860_v18 = vcvt.s32.f32 %v220_v11  ;;  %v375_v19 = vunpack.c.2.s8 %v85_v5  ;;  %v380_v20 = vunpack.c.3.s8 %v85_v5 }
  0x76   :  { %1959 = vmatpush.bf16.msra.mxu2 %v1575_v13  ;;  %v935_v21 = vcvt.s32.f32 %v295_v15  ;;  %v940_v22 = vcvt.s32.f32 %v300_v16  ;;  %v455_v23 = vunpack.c.2.s8 %v105_v12  ;;  %v460_v24 = vunpack.c.3.s8 %v105_v12 }
  0x77   :  { %1972 = vmatpush.bf16.msra.mxu3 %v1615_v17  ;;  %v1490_v25 = vpack.c.bf16 %v860_v18, %v855_v14  ;;  %v1015_v26 = vcvt.s32.f32 %v375_v19  ;;  %v1020_v27 = vcvt.s32.f32 %v380_v20  ;;  %v205_v28 = vunpack.c.0.s8 %v45_v49 }
  0x78   :  { %v1530_v29 = vpack.c.bf16 %v940_v22, %v935_v21  ;;  %v1095_v30 = vcvt.s32.f32 %v455_v23  ;;  %v1100_v31 = vcvt.s32.f32 %v460_v24  ;;  %v210_v32 = vunpack.c.1.s8 %v45_v49 }
  0x79   :  { %1934 = vmatpush.bf16.msra.mxu0 %v1490_v25  ;;  %v1570_v33 = vpack.c.bf16 %v1020_v27, %v1015_v26  ;;  %v845_v34 = vcvt.s32.f32 %v205_v28  ;;  %v285_v35 = vunpack.c.0.s8 %v65_v60  ;;  %v290_v36 = vunpack.c.1.s8 %v65_v60  ;;  %v135_v25 = vld [vmem:[#allocation2 + $0x2d8] sm:$0xff] }
  0x7a   :  { %1947 = vmatpush.bf16.msra.mxu1 %v1530_v29  ;;  %v1610_v38 = vpack.c.bf16 %v1100_v31, %v1095_v30  ;;  %v850_v39 = vcvt.s32.f32 %v210_v32  ;;  %v365_v40 = vunpack.c.0.s8 %v85_v5  ;;  %v370_v41 = vunpack.c.1.s8 %v85_v5  ;;  %v155_v32 = vld [vmem:[#allocation2 + $0x378] sm:$0xff] }
  0x7b   :  { %1960 = vmatpush.bf16.msra.mxu2 %v1570_v33  ;;  %v925_v42 = vcvt.s32.f32 %v285_v35  ;;  %v930_v43 = vcvt.s32.f32 %v290_v36  ;;  %v445_v44 = vunpack.c.0.s8 %v105_v12  ;;  %v450_v45 = vunpack.c.1.s8 %v105_v12 }
  0x7c   :  { %1973 = vmatpush.bf16.msra.mxu3 %v1610_v38  ;;  %v1485_v47 = vpack.c.bf16 %v850_v39, %v845_v34  ;;  %v1005_v48 = vcvt.s32.f32 %v365_v40  ;;  %v1010_v49 = vcvt.s32.f32 %v370_v41  ;;  %v595_v50 = vunpack.c.2.s8 %v140_v37  ;;  %v195_v41 = vld [vmem:[#allocation2 + $0x4b8] sm:$0xff] }
  0x7d   :  { %v1525_v52 = vpack.c.bf16 %v930_v43, %v925_v42  ;;  %v1085_v54 = vcvt.s32.f32 %v445_v44  ;;  %v1090_v55 = vcvt.s32.f32 %v450_v45  ;;  %v600_v56 = vunpack.c.3.s8 %v140_v37 }
  0x7e   :  { %1935 = vmatpush.bf16.msra.mxu0 %v1485_v47  ;;  %v1565_v59 = vpack.c.bf16 %v1010_v49, %v1005_v48  ;;  %v1235_v60 = vcvt.s32.f32 %v595_v50  ;;  %v675_v63 = vunpack.c.2.s8 %v160_v46  ;;  %v680_v0 = vunpack.c.3.s8 %v160_v46 }
  0x7f   :  { %1948 = vmatpush.bf16.msra.mxu1 %v1525_v52  ;;  %v1605_v2 = vpack.c.bf16 %v1090_v55, %v1085_v54  ;;  %v1240_v4 = vcvt.s32.f32 %v600_v56  ;;  %v755_v5 = vunpack.c.2.s8 %v180_v51  ;;  %v760_v6 = vunpack.c.3.s8 %v180_v51 }
  0x80   :  { %1961 = vmatpush.bf16.msra.mxu2 %v1565_v59  ;;  %v1315_v9 = vcvt.s32.f32 %v675_v63  ;;  %v1320_v10 = vcvt.s32.f32 %v680_v0  ;;  %v835_v11 = vunpack.c.2.s8 %v200_v57  ;;  %v840_v12 = vunpack.c.3.s8 %v200_v57 }
  0x81   :  { %1974 = vmatpush.bf16.msra.mxu3 %v1605_v2  ;;  %v1680_v13 = vpack.c.bf16 %v1240_v4, %v1235_v60  ;;  %v1395_v14 = vcvt.s32.f32 %v755_v5  ;;  %v1400_v15 = vcvt.s32.f32 %v760_v6  ;;  %v585_v16 = vunpack.c.0.s8 %v140_v37  ;;  %1936 = vmatmul.bf16.vlgmr.msra.gmra.mxu0 %v2514_v61 }
  0x82   :  { %v1720_v17 = vpack.c.bf16 %v1320_v10, %v1315_v9  ;;  %v1475_v18 = vcvt.s32.f32 %v835_v11  ;;  %v1480_v19 = vcvt.s32.f32 %v840_v12  ;;  %v590_v20 = vunpack.c.1.s8 %v140_v37  ;;  %1949 = vmatmul.bf16.vlgmr.msra.gmra.mxu1 %v2516_v62  ;;  %v175_v37 = vld [vmem:[#allocation2 + $0x418] sm:$0xff]  ;;  %v130_v9 = vld [vmem:[#allocation2 + $0x2b0] sm:$0xff] }
  0x83   :  { %1980 = vmatpush.bf16.msrb.mxu0 %v1680_v13  ;;  %v1760_v21 = vpack.c.bf16 %v1400_v15, %v1395_v14  ;;  %v1225_v22 = vcvt.s32.f32 %v585_v16  ;;  %v665_v23 = vunpack.c.0.s8 %v160_v46  ;;  %v670_v24 = vunpack.c.1.s8 %v160_v46  ;;  %1962 = vmatmul.bf16.vlgmr.msra.gmra.mxu2 %v2518_v3 }
  0x84   :  { %1993 = vmatpush.bf16.msrb.mxu1 %v1720_v17  ;;  %v1800_v26 = vpack.c.bf16 %v1480_v19, %v1475_v18  ;;  %v1230_v27 = vcvt.s32.f32 %v590_v20  ;;  %v745_v28 = vunpack.c.0.s8 %v180_v51  ;;  %v750_v29 = vunpack.c.1.s8 %v180_v51  ;;  %1975 = vmatmul.bf16.vlgmr.msra.gmra.mxu3 %v2521_v8  ;;  %v150_v18 = vld [vmem:[#allocation2 + $0x350] sm:$0xff] }
  0x85   :  { %2006 = vmatpush.bf16.msrb.mxu2 %v1760_v21  ;;  %v1305_v61 = vcvt.s32.f32 %v665_v23  ;;  %v1310_v30 = vcvt.s32.f32 %v670_v24  ;;  %v825_v31 = vunpack.c.0.s8 %v200_v57  ;;  %v830_v62 = vunpack.c.1.s8 %v200_v57  ;;  %v170_v23 = vld [vmem:[#allocation2 + $0x3f0] sm:$0xff] }
  0x86   :  { %2019 = vmatpush.bf16.msrb.mxu3 %v1800_v26  ;;  %v1675_v33 = vpack.c.bf16 %v1230_v27, %v1225_v22  ;;  %v1385_v34 = vcvt.s32.f32 %v745_v28  ;;  %v1390_v35 = vcvt.s32.f32 %v750_v29  ;;  %v575_v36 = vunpack.c.2.s8 %v135_v25  ;;  %v190_v28 = vld [vmem:[#allocation2 + $0x490] sm:$0xff] }
  0x87   :  { %v1715_v3 = vpack.c.bf16 %v1310_v30, %v1305_v61  ;;  %v1465_v38 = vcvt.s32.f32 %v825_v31  ;;  %v1470_v39 = vcvt.s32.f32 %v830_v62  ;;  %v580_v40 = vunpack.c.3.s8 %v135_v25 }
  0x88   :  { %1981 = vmatpush.bf16.msrb.mxu0 %v1675_v33  ;;  %v1755_v42 = vpack.c.bf16 %v1390_v35, %v1385_v34  ;;  %v1215_v8 = vcvt.s32.f32 %v575_v36  ;;  %v655_v43 = vunpack.c.2.s8 %v155_v32  ;;  %v660_v44 = vunpack.c.3.s8 %v155_v32 }
  0x89   :  { %1994 = vmatpush.bf16.msrb.mxu1 %v1715_v3  ;;  %v1795_v45 = vpack.c.bf16 %v1470_v39, %v1465_v38  ;;  %v1220_v46 = vcvt.s32.f32 %v580_v40  ;;  %v735_v47 = vunpack.c.2.s8 %v175_v37  ;;  %v740_v48 = vunpack.c.3.s8 %v175_v37 }
  0x8a   :  { %2007 = vmatpush.bf16.msrb.mxu2 %v1755_v42  ;;  %v1295_v49 = vcvt.s32.f32 %v655_v43  ;;  %v1300_v50 = vcvt.s32.f32 %v660_v44  ;;  %v815_v51 = vunpack.c.2.s8 %v195_v41  ;;  %v820_v52 = vunpack.c.3.s8 %v195_v41 }
  0x8b   :  { %2020 = vmatpush.bf16.msrb.mxu3 %v1795_v45  ;;  %v1670_v54 = vpack.c.bf16 %v1220_v46, %v1215_v8  ;;  %v1375_v55 = vcvt.s32.f32 %v735_v47  ;;  %v1380_v56 = vcvt.s32.f32 %v740_v48  ;;  %v565_v57 = vunpack.c.0.s8 %v135_v25 }
  0x8c   :  { %v1710_v59 = vpack.c.bf16 %v1300_v50, %v1295_v49  ;;  %v1455_v60 = vcvt.s32.f32 %v815_v51  ;;  %v1460_v63 = vcvt.s32.f32 %v820_v52  ;;  %v570_v0 = vunpack.c.1.s8 %v135_v25  ;;  %v125_v49 = vld [vmem:[#allocation2 + $0x288] sm:$0xff] }
  0x8d   :  { %1982 = vmatpush.bf16.msrb.mxu0 %v1670_v54  ;;  %v1750_v2 = vpack.c.bf16 %v1380_v56, %v1375_v55  ;;  %v1205_v4 = vcvt.s32.f32 %v565_v57  ;;  %v645_v5 = vunpack.c.0.s8 %v155_v32  ;;  %v650_v6 = vunpack.c.1.s8 %v155_v32 }
  0x8e   :  { %1995 = vmatpush.bf16.msrb.mxu1 %v1710_v59  ;;  %v1790_v10 = vpack.c.bf16 %v1460_v63, %v1455_v60  ;;  %v1210_v11 = vcvt.s32.f32 %v570_v0  ;;  %v725_v12 = vunpack.c.0.s8 %v175_v37  ;;  %v730_v13 = vunpack.c.1.s8 %v175_v37  ;;  %v145_v60 = vld [vmem:[#allocation2 + $0x328] sm:$0xff] }
  0x8f   :  { %2008 = vmatpush.bf16.msrb.mxu2 %v1750_v2  ;;  %v1285_v14 = vcvt.s32.f32 %v645_v5  ;;  %v1290_v15 = vcvt.s32.f32 %v650_v6  ;;  %v805_v16 = vunpack.c.0.s8 %v195_v41  ;;  %v810_v17 = vunpack.c.1.s8 %v195_v41  ;;  %v165_v5 = vld [vmem:[#allocation2 + $0x3c8] sm:$0xff] }
  0x90   :  { %2021 = vmatpush.bf16.msrb.mxu3 %v1790_v10  ;;  %v1665_v19 = vpack.c.bf16 %v1210_v11, %v1205_v4  ;;  %v1365_v20 = vcvt.s32.f32 %v725_v12  ;;  %v1370_v21 = vcvt.s32.f32 %v730_v13  ;;  %v555_v22 = vunpack.c.2.s8 %v130_v9  ;;  %v185_v12 = vld [vmem:[#allocation2 + $0x468] sm:$0xff] }
  0x91   :  { %v1705_v24 = vpack.c.bf16 %v1290_v15, %v1285_v14  ;;  %v1445_v25 = vcvt.s32.f32 %v805_v16  ;;  %v1450_v26 = vcvt.s32.f32 %v810_v17  ;;  %v560_v27 = vunpack.c.3.s8 %v130_v9 }
  0x92   :  { %1983 = vmatpush.bf16.msrb.mxu0 %v1665_v19  ;;  %v1745_v29 = vpack.c.bf16 %v1370_v21, %v1365_v20  ;;  %v1195_v61 = vcvt.s32.f32 %v555_v22  ;;  %v635_v30 = vunpack.c.2.s8 %v150_v18  ;;  %v640_v31 = vunpack.c.3.s8 %v150_v18 }
  0x93   :  { %1996 = vmatpush.bf16.msrb.mxu1 %v1705_v24  ;;  %v1785_v62 = vpack.c.bf16 %v1450_v26, %v1445_v25  ;;  %v1200_v32 = vcvt.s32.f32 %v560_v27  ;;  %v715_v33 = vunpack.c.2.s8 %v170_v23  ;;  %v720_v34 = vunpack.c.3.s8 %v170_v23 }
  0x94   :  { %2009 = vmatpush.bf16.msrb.mxu2 %v1745_v29  ;;  %v1275_v35 = vcvt.s32.f32 %v635_v30  ;;  %v1280_v36 = vcvt.s32.f32 %v640_v31  ;;  %v795_v37 = vunpack.c.2.s8 %v190_v28  ;;  %v800_v3 = vunpack.c.3.s8 %v190_v28 }
  0x95   :  { %2022 = vmatpush.bf16.msrb.mxu3 %v1785_v62  ;;  %v1660_v38 = vpack.c.bf16 %v1200_v32, %v1195_v61  ;;  %v1355_v39 = vcvt.s32.f32 %v715_v33  ;;  %v1360_v40 = vcvt.s32.f32 %v720_v34  ;;  %v545_v41 = vunpack.c.0.s8 %v130_v9 }
  0x96   :  { %v1700_v42 = vpack.c.bf16 %v1280_v36, %v1275_v35  ;;  %v1435_v8 = vcvt.s32.f32 %v795_v37  ;;  %v1440_v43 = vcvt.s32.f32 %v800_v3  ;;  %v550_v44 = vunpack.c.1.s8 %v130_v9  ;;  %v61_v35 = vld [vmem:[#allocation2 + $0x88] sm:$0xff] }
  0x97   :  { %1984 = vmatpush.bf16.msrb.mxu0 %v1660_v38  ;;  %v1740_v45 = vpack.c.bf16 %v1360_v40, %v1355_v39  ;;  %v1185_v46 = vcvt.s32.f32 %v545_v41  ;;  %v625_v47 = vunpack.c.0.s8 %v150_v18  ;;  %v630_v48 = vunpack.c.1.s8 %v150_v18 }
  0x98   :  { %1997 = vmatpush.bf16.msrb.mxu1 %v1700_v42  ;;  %v1780_v50 = vpack.c.bf16 %v1440_v43, %v1435_v8  ;;  %v1190_v51 = vcvt.s32.f32 %v550_v44  ;;  %v705_v52 = vunpack.c.0.s8 %v170_v23  ;;  %v710_v54 = vunpack.c.1.s8 %v170_v23  ;;  %v81_v8 = vld [vmem:[#allocation2 + $0x128] sm:$0xff] }
  0x99   :  { %2010 = vmatpush.bf16.msrb.mxu2 %v1740_v45  ;;  %v1265_v55 = vcvt.s32.f32 %v625_v47  ;;  %v1270_v56 = vcvt.s32.f32 %v630_v48  ;;  %v785_v57 = vunpack.c.0.s8 %v190_v28  ;;  %v790_v59 = vunpack.c.1.s8 %v190_v28  ;;  %v101_v47 = vld [vmem:[#allocation2 + $0x1c8] sm:$0xff] }
  0x9a   :  { %2023 = vmatpush.bf16.msrb.mxu3 %v1780_v50  ;;  %v1655_v63 = vpack.c.bf16 %v1190_v51, %v1185_v46  ;;  %v1345_v0 = vcvt.s32.f32 %v705_v52  ;;  %v1350_v2 = vcvt.s32.f32 %v710_v54  ;;  %v535_v4 = vunpack.c.2.s8 %v125_v49  ;;  %v121_v52 = vld [vmem:[#allocation2 + $0x268] sm:$0xff] }
  0x9b   :  { %v1695_v6 = vpack.c.bf16 %v1270_v56, %v1265_v55  ;;  %v1425_v9 = vcvt.s32.f32 %v785_v57  ;;  %v1430_v10 = vcvt.s32.f32 %v790_v59  ;;  %v540_v11 = vunpack.c.3.s8 %v125_v49 }
  0x9c   :  { %1985 = vmatpush.bf16.msrb.mxu0 %v1655_v63  ;;  %v1735_v13 = vpack.c.bf16 %v1350_v2, %v1345_v0  ;;  %v1175_v14 = vcvt.s32.f32 %v535_v4  ;;  %v615_v15 = vunpack.c.2.s8 %v145_v60  ;;  %v620_v16 = vunpack.c.3.s8 %v145_v60 }
  0x9d   :  { %1998 = vmatpush.bf16.msrb.mxu1 %v1695_v6  ;;  %v1775_v17 = vpack.c.bf16 %v1430_v10, %v1425_v9  ;;  %v1180_v18 = vcvt.s32.f32 %v540_v11  ;;  %v695_v19 = vunpack.c.2.s8 %v165_v5  ;;  %v700_v20 = vunpack.c.3.s8 %v165_v5 }
  0x9e   :  { %2011 = vmatpush.bf16.msrb.mxu2 %v1735_v13  ;;  %v1255_v21 = vcvt.s32.f32 %v615_v15  ;;  %v1260_v22 = vcvt.s32.f32 %v620_v16  ;;  %v775_v23 = vunpack.c.2.s8 %v185_v12  ;;  %v780_v24 = vunpack.c.3.s8 %v185_v12 }
  0x9f   :  { %2024 = vmatpush.bf16.msrb.mxu3 %v1775_v17  ;;  %v1650_v25 = vpack.c.bf16 %v1180_v18, %v1175_v14  ;;  %v1335_v26 = vcvt.s32.f32 %v695_v19  ;;  %v1340_v27 = vcvt.s32.f32 %v700_v20  ;;  %v525_v28 = vunpack.c.0.s8 %v125_v49 }
  0xa0   :  { %v1690_v29 = vpack.c.bf16 %v1260_v22, %v1255_v21  ;;  %v1415_v61 = vcvt.s32.f32 %v775_v23  ;;  %v1420_v30 = vcvt.s32.f32 %v780_v24  ;;  %v530_v31 = vunpack.c.1.s8 %v125_v49  ;;  %v56_v21 = vld [vmem:[#allocation2 + $0x60] sm:$0xff] }
  0xa1   :  { %1986 = vmatpush.bf16.msrb.mxu0 %v1650_v25  ;;  %v1730_v62 = vpack.c.bf16 %v1340_v27, %v1335_v26  ;;  %v1165_v32 = vcvt.s32.f32 %v525_v28  ;;  %v605_v33 = vunpack.c.0.s8 %v145_v60  ;;  %v610_v34 = vunpack.c.1.s8 %v145_v60  ;;  %v76_v28 = vld [vmem:[#allocation2 + $0x100] sm:$0xff] }
  0xa2   :  { %1999 = vmatpush.bf16.msrb.mxu1 %v1690_v29  ;;  %v1770_v36 = vpack.c.bf16 %v1420_v30, %v1415_v61  ;;  %v1170_v37 = vcvt.s32.f32 %v530_v31  ;;  %v685_v3 = vunpack.c.0.s8 %v165_v5  ;;  %v690_v38 = vunpack.c.1.s8 %v165_v5  ;;  %v96_v31 = vld [vmem:[#allocation2 + $0x1a0] sm:$0xff] }
  0xa3   :  { %2012 = vmatpush.bf16.msrb.mxu2 %v1730_v62  ;;  %v1245_v39 = vcvt.s32.f32 %v605_v33  ;;  %v1250_v40 = vcvt.s32.f32 %v610_v34  ;;  %v765_v41 = vunpack.c.0.s8 %v185_v12  ;;  %v770_v42 = vunpack.c.1.s8 %v185_v12 }
  0xa4   :  { %2025 = vmatpush.bf16.msrb.mxu3 %v1770_v36  ;;  %v1645_v43 = vpack.c.bf16 %v1170_v37, %v1165_v32  ;;  %v1325_v44 = vcvt.s32.f32 %v685_v3  ;;  %v1330_v45 = vcvt.s32.f32 %v690_v38  ;;  %v276_v46 = vunpack.c.2.s8 %v61_v35 }
  0xa5   :  { %v1685_v48 = vpack.c.bf16 %v1250_v40, %v1245_v39  ;;  %v1405_v49 = vcvt.s32.f32 %v765_v41  ;;  %v1410_v50 = vcvt.s32.f32 %v770_v42  ;;  %v281_v51 = vunpack.c.3.s8 %v61_v35 }
  0xa6   :  { %1987 = vmatpush.bf16.msrb.mxu0 %v1645_v43  ;;  %v1725_v54 = vpack.c.bf16 %v1330_v45, %v1325_v44  ;;  %v916_v55 = vcvt.s32.f32 %v276_v46  ;;  %v356_v56 = vunpack.c.2.s8 %v81_v8  ;;  %v361_v57 = vunpack.c.3.s8 %v81_v8 }
  0xa7   :  { %2000 = vmatpush.bf16.msrb.mxu1 %v1685_v48  ;;  %v1765_v59 = vpack.c.bf16 %v1410_v50, %v1405_v49  ;;  %v921_v60 = vcvt.s32.f32 %v281_v51  ;;  %v436_v63 = vunpack.c.2.s8 %v101_v47  ;;  %v441_v0 = vunpack.c.3.s8 %v101_v47 }
  0xa8   :  { %2013 = vmatpush.bf16.msrb.mxu2 %v1725_v54  ;;  %v996_v2 = vcvt.s32.f32 %v356_v56  ;;  %v1001_v4 = vcvt.s32.f32 %v361_v57  ;;  %v516_v5 = vunpack.c.2.s8 %v121_v52  ;;  %v521_v6 = vunpack.c.3.s8 %v121_v52 }
  0xa9   :  { %2026 = vmatpush.bf16.msrb.mxu3 %v1765_v59  ;;  %v1521_v9 = vpack.c.bf16 %v921_v60, %v916_v55  ;;  %v1076_v10 = vcvt.s32.f32 %v436_v63  ;;  %v1081_v11 = vcvt.s32.f32 %v441_v0  ;;  %1988 = vmatmul.bf16.vlgmr.msrb.gmra.mxu0 %v2526_v53  ;;  %v266_v12 = vunpack.c.0.s8 %v61_v35  ;;  %v51_v59 = vld [vmem:[#allocation2 + $0x38] sm:$0xff] }
  0xaa   :  { %v1561_v13 = vpack.c.bf16 %v1001_v4, %v996_v2  ;;  %v1156_v14 = vcvt.s32.f32 %v516_v5  ;;  %v1161_v15 = vcvt.s32.f32 %v521_v6  ;;  %v271_v16 = vunpack.c.1.s8 %v61_v35  ;;  %2001 = vmatmul.bf16.vlgmr.msrb.gmra.mxu1 %v2528_v58 }
  0xab   :  { %2032 = vmatpush.bf16.msra.mxu0 %v1521_v9  ;;  %v1601_v17 = vpack.c.bf16 %v1081_v11, %v1076_v10  ;;  %2014 = vmatmul.bf16.vlgmr.msrb.gmra.mxu2 %v2530_v1  ;;  %v906_v18 = vcvt.s32.f32 %v266_v12  ;;  %v346_v19 = vunpack.c.0.s8 %v81_v8  ;;  %v351_v20 = vunpack.c.1.s8 %v81_v8  ;;  %v71_v10 = vld [vmem:[#allocation2 + $0xd8] sm:$0xff] }
  0xac   :  { %2045 = vmatpush.bf16.msra.mxu1 %v1561_v13  ;;  %v1641_v22 = vpack.c.bf16 %v1161_v15, %v1156_v14  ;;  %2027 = vmatmul.bf16.vlgmr.msrb.gmra.mxu3 %v2533_v7  ;;  %v911_v53 = vcvt.s32.f32 %v271_v16  ;;  %v426_v23 = vunpack.c.0.s8 %v101_v47  ;;  %v431_v24 = vunpack.c.1.s8 %v101_v47  ;;  %v116_v7 = vld [vmem:[#allocation2 + $0x240] sm:$0xff]  ;;  %v91_v15 = vld [vmem:[#allocation2 + $0x178] sm:$0xff] }
  0xad   :  { %2058 = vmatpush.bf16.msra.mxu2 %v1601_v17  ;;  %v986_v25 = vcvt.s32.f32 %v346_v19  ;;  %v991_v26 = vcvt.s32.f32 %v351_v20  ;;  %v506_v27 = vunpack.c.0.s8 %v121_v52  ;;  %v511_v58 = vunpack.c.1.s8 %v121_v52  ;;  %v111_v20 = vld [vmem:[#allocation2 + $0x218] sm:$0xff] }
  0xae   :  { %2071 = vmatpush.bf16.msra.mxu3 %v1641_v22  ;;  %v1516_v29 = vpack.c.bf16 %v911_v53, %v906_v18  ;;  %v1066_v1 = vcvt.s32.f32 %v426_v23  ;;  %v1071_v61 = vcvt.s32.f32 %v431_v24  ;;  %v256_v30 = vunpack.c.2.s8 %v56_v21 }
  0xaf   :  { %v1556_v62 = vpack.c.bf16 %v991_v26, %v986_v25  ;;  %v1146_v32 = vcvt.s32.f32 %v506_v27  ;;  %v1151_v33 = vcvt.s32.f32 %v511_v58  ;;  %v261_v34 = vunpack.c.3.s8 %v56_v21 }
  0xb0   :  { %2033 = vmatpush.bf16.msra.mxu0 %v1516_v29  ;;  %v1596_v35 = vpack.c.bf16 %v1071_v61, %v1066_v1  ;;  %v896_v36 = vcvt.s32.f32 %v256_v30  ;;  %v336_v37 = vunpack.c.2.s8 %v76_v28  ;;  %v341_v3 = vunpack.c.3.s8 %v76_v28 }
  0xb1   :  { %2046 = vmatpush.bf16.msra.mxu1 %v1556_v62  ;;  %v1636_v38 = vpack.c.bf16 %v1151_v33, %v1146_v32  ;;  %v901_v39 = vcvt.s32.f32 %v261_v34  ;;  %v416_v40 = vunpack.c.2.s8 %v96_v31  ;;  %v421_v41 = vunpack.c.3.s8 %v96_v31 }
  0xb2   :  { %2059 = vmatpush.bf16.msra.mxu2 %v1596_v35  ;;  %v976_v42 = vcvt.s32.f32 %v336_v37  ;;  %v981_v8 = vcvt.s32.f32 %v341_v3  ;;  %v496_v43 = vunpack.c.2.s8 %v116_v7  ;;  %v501_v44 = vunpack.c.3.s8 %v116_v7 }
  0xb3   :  { %2072 = vmatpush.bf16.msra.mxu3 %v1636_v38  ;;  %v1511_v45 = vpack.c.bf16 %v901_v39, %v896_v36  ;;  %v1056_v46 = vcvt.s32.f32 %v416_v40  ;;  %v1061_v47 = vcvt.s32.f32 %v421_v41  ;;  %v246_v48 = vunpack.c.0.s8 %v56_v21  ;;  %v46_v38 = vld [vmem:[#allocation2 + $0x10] sm:$0xff] }
  0xb4   :  { %v1551_v49 = vpack.c.bf16 %v981_v8, %v976_v42  ;;  %v1136_v50 = vcvt.s32.f32 %v496_v43  ;;  %v1141_v51 = vcvt.s32.f32 %v501_v44  ;;  %v251_v52 = vunpack.c.1.s8 %v56_v21 }
  0xb5   :  { %2034 = vmatpush.bf16.msra.mxu0 %v1511_v45  ;;  %v1591_v54 = vpack.c.bf16 %v1061_v47, %v1056_v46  ;;  %v886_v55 = vcvt.s32.f32 %v246_v48  ;;  %v326_v56 = vunpack.c.0.s8 %v76_v28  ;;  %v331_v57 = vunpack.c.1.s8 %v76_v28  ;;  %v66_v46 = vld [vmem:[#allocation2 + $0xb0] sm:$0xff] }
  0xb6   :  { %2047 = vmatpush.bf16.msra.mxu1 %v1551_v49  ;;  %v1631_v60 = vpack.c.bf16 %v1141_v51, %v1136_v50  ;;  %v891_v63 = vcvt.s32.f32 %v251_v52  ;;  %v406_v0 = vunpack.c.0.s8 %v96_v31  ;;  %v411_v2 = vunpack.c.1.s8 %v96_v31  ;;  %v86_v51 = vld [vmem:[#allocation2 + $0x150] sm:$0xff] }
  0xb7   :  { %2060 = vmatpush.bf16.msra.mxu2 %v1591_v54  ;;  %v966_v4 = vcvt.s32.f32 %v326_v56  ;;  %v971_v5 = vcvt.s32.f32 %v331_v57  ;;  %v486_v6 = vunpack.c.0.s8 %v116_v7  ;;  %v491_v9 = vunpack.c.1.s8 %v116_v7  ;;  %v106_v57 = vld [vmem:[#allocation2 + $0x1f0] sm:$0xff] }
  0xb8   :  { %2073 = vmatpush.bf16.msra.mxu3 %v1631_v60  ;;  %v1506_v11 = vpack.c.bf16 %v891_v63, %v886_v55  ;;  %v1046_v12 = vcvt.s32.f32 %v406_v0  ;;  %v1051_v13 = vcvt.s32.f32 %v411_v2  ;;  %v236_v14 = vunpack.c.2.s8 %v51_v59 }
  0xb9   :  { %v1546_v16 = vpack.c.bf16 %v971_v5, %v966_v4  ;;  %v1126_v17 = vcvt.s32.f32 %v486_v6  ;;  %v1131_v18 = vcvt.s32.f32 %v491_v9  ;;  %v241_v19 = vunpack.c.3.s8 %v51_v59 }
  0xba   :  { %2035 = vmatpush.bf16.msra.mxu0 %v1506_v11  ;;  %v1586_v21 = vpack.c.bf16 %v1051_v13, %v1046_v12  ;;  %v876_v22 = vcvt.s32.f32 %v236_v14  ;;  %v316_v53 = vunpack.c.2.s8 %v71_v10  ;;  %v321_v23 = vunpack.c.3.s8 %v71_v10 }
  0xbb   :  { %2048 = vmatpush.bf16.msra.mxu1 %v1546_v16  ;;  %v1626_v24 = vpack.c.bf16 %v1131_v18, %v1126_v17  ;;  %v881_v25 = vcvt.s32.f32 %v241_v19  ;;  %v396_v26 = vunpack.c.2.s8 %v91_v15  ;;  %v401_v27 = vunpack.c.3.s8 %v91_v15 }
  0xbc   :  { %2061 = vmatpush.bf16.msra.mxu2 %v1586_v21  ;;  %v956_v58 = vcvt.s32.f32 %v316_v53  ;;  %v961_v28 = vcvt.s32.f32 %v321_v23  ;;  %v476_v29 = vunpack.c.2.s8 %v111_v20  ;;  %v481_v1 = vunpack.c.3.s8 %v111_v20 }
  0xbd   :  { %2074 = vmatpush.bf16.msra.mxu3 %v1626_v24  ;;  %v1501_v61 = vpack.c.bf16 %v881_v25, %v876_v22  ;;  %v1036_v30 = vcvt.s32.f32 %v396_v26  ;;  %v1041_v31 = vcvt.s32.f32 %v401_v27  ;;  %v226_v62 = vunpack.c.0.s8 %v51_v59  ;;  %v141_v24 = vld [vmem:[#allocation2 + $0x308] sm:$0xff] }
  0xbe   :  { %v1541_v32 = vpack.c.bf16 %v961_v28, %v956_v58  ;;  %v1116_v33 = vcvt.s32.f32 %v476_v29  ;;  %v1121_v34 = vcvt.s32.f32 %v481_v1  ;;  %v231_v7 = vunpack.c.1.s8 %v51_v59 }
  0xbf   :  { %2036 = vmatpush.bf16.msra.mxu0 %v1501_v61  ;;  %v1581_v35 = vpack.c.bf16 %v1041_v31, %v1036_v30  ;;  %v866_v36 = vcvt.s32.f32 %v226_v62  ;;  %v306_v37 = vunpack.c.0.s8 %v71_v10  ;;  %v311_v3 = vunpack.c.1.s8 %v71_v10  ;;  %v161_v30 = vld [vmem:[#allocation2 + $0x3a8] sm:$0xff] }
  0xc0   :  { %2049 = vmatpush.bf16.msra.mxu1 %v1541_v32  ;;  %v1621_v39 = vpack.c.bf16 %v1121_v34, %v1116_v33  ;;  %v871_v40 = vcvt.s32.f32 %v231_v7  ;;  %v386_v41 = vunpack.c.0.s8 %v91_v15  ;;  %v391_v42 = vunpack.c.1.s8 %v91_v15  ;;  %v181_v34 = vld [vmem:[#allocation2 + $0x448] sm:$0xff] }
  0xc1   :  { %2062 = vmatpush.bf16.msra.mxu2 %v1581_v35  ;;  %v946_v8 = vcvt.s32.f32 %v306_v37  ;;  %v951_v43 = vcvt.s32.f32 %v311_v3  ;;  %v466_v44 = vunpack.c.0.s8 %v111_v20  ;;  %v471_v45 = vunpack.c.1.s8 %v111_v20  ;;  %v201_v3 = vld [vmem:[#allocation2 + $0x4e8] sm:$0xff] }
  0xc2   :  { %2075 = vmatpush.bf16.msra.mxu3 %v1621_v39  ;;  %v1496_v47 = vpack.c.bf16 %v871_v40, %v866_v36  ;;  %v1026_v48 = vcvt.s32.f32 %v386_v41  ;;  %v1031_v49 = vcvt.s32.f32 %v391_v42  ;;  %v216_v50 = vunpack.c.2.s8 %v46_v38 }
  0xc3   :  { %v1536_v52 = vpack.c.bf16 %v951_v43, %v946_v8  ;;  %v1106_v54 = vcvt.s32.f32 %v466_v44  ;;  %v1111_v55 = vcvt.s32.f32 %v471_v45  ;;  %v221_v56 = vunpack.c.3.s8 %v46_v38 }
  0xc4   :  { %2037 = vmatpush.bf16.msra.mxu0 %v1496_v47  ;;  %v1576_v59 = vpack.c.bf16 %v1031_v49, %v1026_v48  ;;  %v856_v60 = vcvt.s32.f32 %v216_v50  ;;  %v296_v63 = vunpack.c.2.s8 %v66_v46  ;;  %v301_v0 = vunpack.c.3.s8 %v66_v46 }
  0xc5   :  { %2050 = vmatpush.bf16.msra.mxu1 %v1536_v52  ;;  %v1616_v2 = vpack.c.bf16 %v1111_v55, %v1106_v54  ;;  %v861_v4 = vcvt.s32.f32 %v221_v56  ;;  %v376_v5 = vunpack.c.2.s8 %v86_v51  ;;  %v381_v6 = vunpack.c.3.s8 %v86_v51  ;;  %v2546_v54 = vld [vmem:[#allocation1] sm:$0xff] }
  0xc6   :  { %2063 = vmatpush.bf16.msra.mxu2 %v1576_v59  ;;  %v936_v9 = vcvt.s32.f32 %v296_v63  ;;  %v941_v10 = vcvt.s32.f32 %v301_v0  ;;  %v456_v11 = vunpack.c.2.s8 %v106_v57  ;;  %v461_v12 = vunpack.c.3.s8 %v106_v57 }
  0xc7   :  { %2076 = vmatpush.bf16.msra.mxu3 %v1616_v2  ;;  %v1491_v13 = vpack.c.bf16 %v861_v4, %v856_v60  ;;  %v1016_v14 = vcvt.s32.f32 %v376_v5  ;;  %v1021_v15 = vcvt.s32.f32 %v381_v6  ;;  %v206_v16 = vunpack.c.0.s8 %v46_v38  ;;  %v2549_v60 = vld [vmem:[#allocation1 + $0x9] sm:$0xff]  ;;  %v2552_v6 = vld [vmem:[#allocation1 + $0x12] sm:$0xff] }
  0xc8   :  { %v1531_v17 = vpack.c.bf16 %v941_v10, %v936_v9  ;;  %v1096_v18 = vcvt.s32.f32 %v456_v11  ;;  %v1101_v19 = vcvt.s32.f32 %v461_v12  ;;  %v211_v20 = vunpack.c.1.s8 %v46_v38  ;;  %v136_v5 = vld [vmem:[#allocation2 + $0x2e0] sm:$0xff] }
  0xc9   :  { %2038 = vmatpush.bf16.msra.mxu0 %v1491_v13  ;;  %v1571_v21 = vpack.c.bf16 %v1021_v15, %v1016_v14  ;;  %v846_v22 = vcvt.s32.f32 %v206_v16  ;;  %v286_v53 = vunpack.c.0.s8 %v66_v46  ;;  %v291_v23 = vunpack.c.1.s8 %v66_v46  ;;  %v2555_v13 = vld [vmem:[#allocation1 + $0x1b] sm:$0xff] }
  0xca   :  { %2051 = vmatpush.bf16.msra.mxu1 %v1531_v17  ;;  %v1611_v25 = vpack.c.bf16 %v1101_v19, %v1096_v18  ;;  %v851_v26 = vcvt.s32.f32 %v211_v20  ;;  %v366_v27 = vunpack.c.0.s8 %v86_v51  ;;  %v371_v58 = vunpack.c.1.s8 %v86_v51  ;;  %v156_v18 = vld [vmem:[#allocation2 + $0x380] sm:$0xff] }
  0xcb   :  { %2064 = vmatpush.bf16.msra.mxu2 %v1571_v21  ;;  %v926_v28 = vcvt.s32.f32 %v286_v53  ;;  %v931_v29 = vcvt.s32.f32 %v291_v23  ;;  %v446_v1 = vunpack.c.0.s8 %v106_v57  ;;  %v451_v61 = vunpack.c.1.s8 %v106_v57  ;;  %v176_v53 = vld [vmem:[#allocation2 + $0x420] sm:$0xff] }
  0xcc   :  { %2077 = vmatpush.bf16.msra.mxu3 %v1611_v25  ;;  %v1486_v31 = vpack.c.bf16 %v851_v26, %v846_v22  ;;  %v1006_v62 = vcvt.s32.f32 %v366_v27  ;;  %v1011_v32 = vcvt.s32.f32 %v371_v58  ;;  %v596_v33 = vunpack.c.2.s8 %v141_v24  ;;  %v196_v27 = vld [vmem:[#allocation2 + $0x4c0] sm:$0xff] }
  0xcd   :  { %v1526_v7 = vpack.c.bf16 %v931_v29, %v926_v28  ;;  %v1086_v35 = vcvt.s32.f32 %v446_v1  ;;  %v1091_v36 = vcvt.s32.f32 %v451_v61  ;;  %v601_v37 = vunpack.c.3.s8 %v141_v24 }
  0xce   :  { %2039 = vmatpush.bf16.msra.mxu0 %v1486_v31  ;;  %v1566_v38 = vpack.c.bf16 %v1011_v32, %v1006_v62  ;;  %v1236_v39 = vcvt.s32.f32 %v596_v33  ;;  %v676_v40 = vunpack.c.2.s8 %v161_v30  ;;  %v681_v41 = vunpack.c.3.s8 %v161_v30 }
  0xcf   :  { %2052 = vmatpush.bf16.msra.mxu1 %v1526_v7  ;;  %v1606_v42 = vpack.c.bf16 %v1091_v36, %v1086_v35  ;;  %v1241_v8 = vcvt.s32.f32 %v601_v37  ;;  %v756_v43 = vunpack.c.2.s8 %v181_v34  ;;  %v761_v44 = vunpack.c.3.s8 %v181_v34 }
  0xd0   :  { %2065 = vmatpush.bf16.msra.mxu2 %v1566_v38  ;;  %v1316_v45 = vcvt.s32.f32 %v676_v40  ;;  %v1321_v46 = vcvt.s32.f32 %v681_v41  ;;  %v836_v47 = vunpack.c.2.s8 %v201_v3  ;;  %v841_v48 = vunpack.c.3.s8 %v201_v3 }
  0xd1   :  { %2078 = vmatpush.bf16.msra.mxu3 %v1606_v42  ;;  %v1681_v49 = vpack.c.bf16 %v1241_v8, %v1236_v39  ;;  %v1396_v50 = vcvt.s32.f32 %v756_v43  ;;  %v1401_v51 = vcvt.s32.f32 %v761_v44  ;;  %v586_v52 = vunpack.c.0.s8 %v141_v24  ;;  %2040 = vmatmul.bf16.vlgmr.msra.gmra.mxu0 %v2546_v54 }
  0xd2   :  { %v1721_v55 = vpack.c.bf16 %v1321_v46, %v1316_v45  ;;  %v1476_v56 = vcvt.s32.f32 %v836_v47  ;;  %v1481_v57 = vcvt.s32.f32 %v841_v48  ;;  %v591_v59 = vunpack.c.1.s8 %v141_v24  ;;  %2053 = vmatmul.bf16.vlgmr.msra.gmra.mxu1 %v2549_v60  ;;  %v131_v45 = vld [vmem:[#allocation2 + $0x2b8] sm:$0xff] }
  0xd3   :  { %2084 = vmatpush.bf16.msrb.mxu0 %v1681_v49  ;;  %v1761_v63 = vpack.c.bf16 %v1401_v51, %v1396_v50  ;;  %v1226_v0 = vcvt.s32.f32 %v586_v52  ;;  %v666_v2 = vunpack.c.0.s8 %v161_v30  ;;  %v671_v4 = vunpack.c.1.s8 %v161_v30  ;;  %2066 = vmatmul.bf16.vlgmr.msra.gmra.mxu2 %v2552_v6  ;;  %v2558_v50 = vpop.f32.mrf.mxu0  ;;  %v2560_v51 = vpop.f32.mrf.mxu1 }
  0xd4   :  { %2097 = vmatpush.bf16.msrb.mxu1 %v1721_v55  ;;  %v1801_v9 = vpack.c.bf16 %v1481_v57, %v1476_v56  ;;  %v1231_v10 = vcvt.s32.f32 %v591_v59  ;;  %v746_v11 = vunpack.c.0.s8 %v181_v34  ;;  %v751_v12 = vunpack.c.1.s8 %v181_v34  ;;  %2079 = vmatmul.bf16.vlgmr.msra.gmra.mxu3 %v2555_v13  ;;  %v151_v59 = vld [vmem:[#allocation2 + $0x358] sm:$0xff] }
  0xd5   :  { %2110 = vmatpush.bf16.msrb.mxu2 %v1761_v63  ;;  %v1306_v14 = vcvt.s32.f32 %v666_v2  ;;  %v1311_v15 = vcvt.s32.f32 %v671_v4  ;;  %v826_v16 = vunpack.c.0.s8 %v201_v3  ;;  %v831_v17 = vunpack.c.1.s8 %v201_v3 }
  0xd6   :  { %2123 = vmatpush.bf16.msrb.mxu3 %v1801_v9  ;;  %v1676_v19 = vpack.c.bf16 %v1231_v10, %v1226_v0  ;;  %v1386_v20 = vcvt.s32.f32 %v746_v11  ;;  %v1391_v21 = vcvt.s32.f32 %v751_v12  ;;  %v576_v22 = vunpack.c.2.s8 %v136_v5 }
  0xd7   :  { %v1716_v23 = vpack.c.bf16 %v1311_v15, %v1306_v14  ;;  %v1466_v24 = vcvt.s32.f32 %v826_v16  ;;  %v1471_v25 = vcvt.s32.f32 %v831_v17  ;;  %v581_v26 = vunpack.c.3.s8 %v136_v5  ;;  %v191_v14 = vld [vmem:[#allocation2 + $0x498] sm:$0xff] }
  0xd8   :  { %2085 = vmatpush.bf16.msrb.mxu0 %v1676_v19  ;;  %v1756_v58 = vpack.c.bf16 %v1391_v21, %v1386_v20  ;;  %v1216_v28 = vcvt.s32.f32 %v576_v22  ;;  %v656_v29 = vunpack.c.2.s8 %v156_v18  ;;  %v661_v1 = vunpack.c.3.s8 %v156_v18 }
  0xd9   :  { %2098 = vmatpush.bf16.msrb.mxu1 %v1716_v23  ;;  %v1796_v61 = vpack.c.bf16 %v1471_v25, %v1466_v24  ;;  %v1221_v30 = vcvt.s32.f32 %v581_v26  ;;  %v736_v31 = vunpack.c.2.s8 %v176_v53  ;;  %v741_v62 = vunpack.c.3.s8 %v176_v53  ;;  %v2562_v26 = vpop.f32.mrf.mxu2 }
  0xda   :  { %2111 = vmatpush.bf16.msrb.mxu2 %v1756_v58  ;;  %v1296_v32 = vcvt.s32.f32 %v656_v29  ;;  %v1301_v33 = vcvt.s32.f32 %v661_v1  ;;  %v816_v34 = vunpack.c.2.s8 %v196_v27  ;;  %v821_v7 = vunpack.c.3.s8 %v196_v27 }
  0xdb   :  { %2124 = vmatpush.bf16.msrb.mxu3 %v1796_v61  ;;  %v1671_v35 = vpack.c.bf16 %v1221_v30, %v1216_v28  ;;  %v1376_v36 = vcvt.s32.f32 %v736_v31  ;;  %v1381_v37 = vcvt.s32.f32 %v741_v62  ;;  %v566_v3 = vunpack.c.0.s8 %v136_v5 }
  0xdc   :  { %v1711_v38 = vpack.c.bf16 %v1301_v33, %v1296_v32  ;;  %v1456_v39 = vcvt.s32.f32 %v816_v34  ;;  %v1461_v40 = vcvt.s32.f32 %v821_v7  ;;  %v571_v41 = vunpack.c.1.s8 %v136_v5  ;;  %v171_v5 = vld [vmem:[#allocation2 + $0x3f8] sm:$0xff]  ;;  %v1835_v32 = vpop.f32.mrf.mxu0  ;;  %v1848_v33 = vpop.f32.mrf.mxu1 }
  0xdd   :  { %2086 = vmatpush.bf16.msrb.mxu0 %v1671_v35  ;;  %v1751_v42 = vpack.c.bf16 %v1381_v37, %v1376_v36  ;;  %v1206_v8 = vcvt.s32.f32 %v566_v3  ;;  %v646_v43 = vunpack.c.0.s8 %v156_v18  ;;  %v651_v44 = vunpack.c.1.s8 %v156_v18  ;;  %v126_v37 = vld [vmem:[#allocation2 + $0x290] sm:$0xff] }
  0xde   :  { %2099 = vmatpush.bf16.msrb.mxu1 %v1711_v38  ;;  %v1791_v46 = vpack.c.bf16 %v1461_v40, %v1456_v39  ;;  %v1211_v47 = vcvt.s32.f32 %v571_v41  ;;  %v726_v48 = vunpack.c.0.s8 %v176_v53  ;;  %v731_v49 = vunpack.c.1.s8 %v176_v53 }
  0xdf   :  { %2112 = vmatpush.bf16.msrb.mxu2 %v1751_v42  ;;  %v1286_v52 = vcvt.s32.f32 %v646_v43  ;;  %v1291_v55 = vcvt.s32.f32 %v651_v44  ;;  %v806_v56 = vunpack.c.0.s8 %v196_v27  ;;  %v811_v57 = vunpack.c.1.s8 %v196_v27  ;;  %v2564_v27 = vpop.f32.mrf.mxu3  ;;  %v146_v44 = vld [vmem:[#allocation2 + $0x330] sm:$0xff] }
  0xe0   :  { %2125 = vmatpush.bf16.msrb.mxu3 %v1791_v46  ;;  %v1666_v63 = vpack.c.bf16 %v1211_v47, %v1206_v8  ;;  %v1366_v0 = vcvt.s32.f32 %v726_v48  ;;  %v1371_v2 = vcvt.s32.f32 %v731_v49  ;;  %v556_v4 = vunpack.c.2.s8 %v131_v45  ;;  %v166_v49 = vld [vmem:[#allocation2 + $0x3d0] sm:$0xff] }
  0xe1   :  { %v1706_v9 = vpack.c.bf16 %v1291_v55, %v1286_v52  ;;  %v1446_v10 = vcvt.s32.f32 %v806_v56  ;;  %v1451_v11 = vcvt.s32.f32 %v811_v57  ;;  %v561_v12 = vunpack.c.3.s8 %v131_v45 }
  0xe2   :  { %2087 = vmatpush.bf16.msrb.mxu0 %v1666_v63  ;;  %v1746_v15 = vpack.c.bf16 %v1371_v2, %v1366_v0  ;;  %v1196_v16 = vcvt.s32.f32 %v556_v4  ;;  %v636_v17 = vunpack.c.2.s8 %v151_v59  ;;  %v641_v18 = vunpack.c.3.s8 %v151_v59 }
  0xe3   :  { %2100 = vmatpush.bf16.msrb.mxu1 %v1706_v9  ;;  %v1786_v19 = vpack.c.bf16 %v1451_v11, %v1446_v10  ;;  %v1201_v20 = vcvt.s32.f32 %v561_v12  ;;  %v716_v21 = vunpack.c.2.s8 %v171_v5  ;;  %v721_v22 = vunpack.c.3.s8 %v171_v5 }
  0xe4   :  { %2113 = vmatpush.bf16.msrb.mxu2 %v1746_v15  ;;  %v1276_v53 = vcvt.s32.f32 %v636_v17  ;;  %v1281_v23 = vcvt.s32.f32 %v641_v18  ;;  %v796_v24 = vunpack.c.2.s8 %v191_v14  ;;  %v801_v25 = vunpack.c.3.s8 %v191_v14 }
  0xe5   :  { %2126 = vmatpush.bf16.msrb.mxu3 %v1786_v19  ;;  %v1661_v58 = vpack.c.bf16 %v1201_v20, %v1196_v16  ;;  %v1356_v28 = vcvt.s32.f32 %v716_v21  ;;  %v1361_v29 = vcvt.s32.f32 %v721_v22  ;;  %v546_v1 = vunpack.c.0.s8 %v131_v45 }
  0xe6   :  { %v1701_v61 = vpack.c.bf16 %v1281_v23, %v1276_v53  ;;  %v1436_v30 = vcvt.s32.f32 %v796_v24  ;;  %v1441_v31 = vcvt.s32.f32 %v801_v25  ;;  %v551_v62 = vunpack.c.1.s8 %v131_v45 }
  0xe7   :  { %2088 = vmatpush.bf16.msrb.mxu0 %v1661_v58  ;;  %v1741_v34 = vpack.c.bf16 %v1361_v29, %v1356_v28  ;;  %v1186_v7 = vcvt.s32.f32 %v546_v1  ;;  %v626_v35 = vunpack.c.0.s8 %v151_v59  ;;  %v631_v36 = vunpack.c.1.s8 %v151_v59  ;;  %v186_v59 = vld [vmem:[#allocation2 + $0x470] sm:$0xff]  ;;  %v1874_v9 = vpop.f32.mrf.mxu3 }
  0xe8   :  { %2101 = vmatpush.bf16.msrb.mxu1 %v1701_v61  ;;  %v1781_v3 = vpack.c.bf16 %v1441_v31, %v1436_v30  ;;  %v1191_v38 = vcvt.s32.f32 %v551_v62  ;;  %v706_v39 = vunpack.c.0.s8 %v171_v5  ;;  %v711_v40 = vunpack.c.1.s8 %v171_v5  ;;  %v1861_v5 = vpop.f32.mrf.mxu2  ;;  %v2566_v61 = vld [vmem:[#allocation2 + $0x90] sm:$0xff] }
  0xe9   :  { %2114 = vmatpush.bf16.msrb.mxu2 %v1741_v34  ;;  %v1266_v41 = vcvt.s32.f32 %v626_v35  ;;  %v1271_v42 = vcvt.s32.f32 %v631_v36  ;;  %v786_v8 = vunpack.c.0.s8 %v191_v14  ;;  %v791_v43 = vunpack.c.1.s8 %v191_v14  ;;  %v2568_v36 = vld [vmem:[#allocation2 + $0x130] sm:$0xff] }
  0xea   :  { %2127 = vmatpush.bf16.msrb.mxu3 %v1781_v3  ;;  %v1656_v45 = vpack.c.bf16 %v1191_v38, %v1186_v7  ;;  %v1346_v46 = vcvt.s32.f32 %v706_v39  ;;  %v1351_v47 = vcvt.s32.f32 %v711_v40  ;;  %v536_v48 = vunpack.c.2.s8 %v126_v37  ;;  %v2572_v3 = vpop.f32.mrf.mxu1 }
  0xeb   :  { %v1696_v52 = vpack.c.bf16 %v1271_v42, %v1266_v41  ;;  %v1426_v55 = vcvt.s32.f32 %v786_v8  ;;  %v1431_v56 = vcvt.s32.f32 %v791_v43  ;;  %v541_v57 = vunpack.c.3.s8 %v126_v37  ;;  %v102_v42 = vld [vmem:[#allocation2 + $0x1d0] sm:$0xff] }
  0xec   :  { %2089 = vmatpush.bf16.msrb.mxu0 %v1656_v45  ;;  %v1736_v63 = vpack.c.bf16 %v1351_v47, %v1346_v46  ;;  %v1176_v0 = vcvt.s32.f32 %v536_v48  ;;  %v616_v2 = vunpack.c.2.s8 %v146_v44  ;;  %v621_v4 = vunpack.c.3.s8 %v146_v44  ;;  %v2576_v46 = vld [vmem:[#allocation2 + $0x270] sm:$0xff] }
  0xed   :  { %2102 = vmatpush.bf16.msrb.mxu1 %v1696_v52  ;;  %v1776_v10 = vpack.c.bf16 %v1431_v56, %v1426_v55  ;;  %v1181_v11 = vcvt.s32.f32 %v541_v57  ;;  %v696_v12 = vunpack.c.2.s8 %v166_v49  ;;  %v701_v14 = vunpack.c.3.s8 %v166_v49 }
  0xee   :  { %2115 = vmatpush.bf16.msrb.mxu2 %v1736_v63  ;;  %v1256_v15 = vcvt.s32.f32 %v616_v2  ;;  %v1261_v16 = vcvt.s32.f32 %v621_v4  ;;  %v776_v17 = vunpack.c.2.s8 %v186_v59  ;;  %v781_v18 = vunpack.c.3.s8 %v186_v59 }
  0xef   :  { %2128 = vmatpush.bf16.msrb.mxu3 %v1776_v10  ;;  %v1651_v19 = vpack.c.bf16 %v1181_v11, %v1176_v0  ;;  %v1336_v20 = vcvt.s32.f32 %v696_v12  ;;  %v1341_v21 = vcvt.s32.f32 %v701_v14  ;;  %v526_v22 = vunpack.c.0.s8 %v126_v37  ;;  %v2584_v9 = vpop.f32.mrf.mxu3 }
  0xf0   :  { %v1691_v53 = vpack.c.bf16 %v1261_v16, %v1256_v15  ;;  %v1416_v23 = vcvt.s32.f32 %v776_v17  ;;  %v1421_v24 = vcvt.s32.f32 %v781_v18  ;;  %v531_v25 = vunpack.c.1.s8 %v126_v37  ;;  %v2570_v37 = vpop.f32.mrf.mxu0  ;;  %v2582_v5 = vpop.f32.mrf.mxu2  ;;  %v2588_v15 = vld [vmem:[#allocation1 + $0x24] sm:$0xff] }
  0xf1   :  { %2090 = vmatpush.bf16.msrb.mxu0 %v1651_v19  ;;  %v1731_v58 = vpack.c.bf16 %v1341_v21, %v1336_v20  ;;  %v1166_v28 = vcvt.s32.f32 %v526_v22  ;;  %v606_v29 = vunpack.c.0.s8 %v146_v44  ;;  %v611_v1 = vunpack.c.1.s8 %v146_v44  ;;  %v2592_v20 = vld [vmem:[#allocation1 + $0x2d] sm:$0xff] }
  0xf2   :  { %2103 = vmatpush.bf16.msrb.mxu1 %v1691_v53  ;;  %v1771_v30 = vpack.c.bf16 %v1421_v24, %v1416_v23  ;;  %v1171_v31 = vcvt.s32.f32 %v531_v25  ;;  %v686_v62 = vunpack.c.0.s8 %v166_v49  ;;  %v691_v32 = vunpack.c.1.s8 %v166_v49  ;;  %v1900_v24 = vpop.f32.mrf.mxu1 }
  0xf3   :  { %2116 = vmatpush.bf16.msrb.mxu2 %v1731_v58  ;;  %v1246_v33 = vcvt.s32.f32 %v606_v29  ;;  %v1251_v34 = vcvt.s32.f32 %v611_v1  ;;  %v766_v7 = vunpack.c.0.s8 %v186_v59  ;;  %v771_v35 = vunpack.c.1.s8 %v186_v59  ;;  %v2601_v1 = vld [vmem:[#allocation1 + $0x3f] sm:$0xff] }
  0xf4   :  { %2129 = vmatpush.bf16.msrb.mxu3 %v1771_v30  ;;  %v1646_v38 = vpack.c.bf16 %v1171_v31, %v1166_v28  ;;  %v1326_v39 = vcvt.s32.f32 %v686_v62  ;;  %v1331_v40 = vcvt.s32.f32 %v691_v32  ;;  %v277_v41 = vunpack.c.2.s8 %v2566_v61 }
  0xf5   :  { %v1686_v8 = vpack.c.bf16 %v1251_v34, %v1246_v33  ;;  %v1406_v43 = vcvt.s32.f32 %v766_v7  ;;  %v1411_v44 = vcvt.s32.f32 %v771_v35  ;;  %v282_v45 = vunpack.c.3.s8 %v2566_v61 }
  0xf6   :  { %2091 = vmatpush.bf16.msrb.mxu0 %v1646_v38  ;;  %v1726_v47 = vpack.c.bf16 %v1331_v40, %v1326_v39  ;;  %v917_v48 = vcvt.s32.f32 %v277_v41  ;;  %v357_v49 = vunpack.c.2.s8 %v2568_v36  ;;  %v362_v52 = vunpack.c.3.s8 %v2568_v36  ;;  %v97_v38 = vld [vmem:[#allocation2 + $0x1a8] sm:$0xff] }
  0xf7   :  { %2104 = vmatpush.bf16.msrb.mxu1 %v1686_v8  ;;  %v1766_v55 = vpack.c.bf16 %v1411_v44, %v1406_v43  ;;  %v922_v56 = vcvt.s32.f32 %v282_v45  ;;  %v437_v57 = vunpack.c.2.s8 %v102_v42  ;;  %v442_v59 = vunpack.c.3.s8 %v102_v42  ;;  %v117_v8 = vld [vmem:[#allocation2 + $0x248] sm:$0xff] }
  0xf8   :  { %2117 = vmatpush.bf16.msrb.mxu2 %v1726_v47  ;;  %v997_v63 = vcvt.s32.f32 %v357_v49  ;;  %v1002_v0 = vcvt.s32.f32 %v362_v52  ;;  %v517_v2 = vunpack.c.2.s8 %v2576_v46  ;;  %v522_v4 = vunpack.c.3.s8 %v2576_v46  ;;  %v1887_v23 = vpop.f32.mrf.mxu0  ;;  %v1926_v49 = vpop.f32.mrf.mxu3 }
  0xf9   :  { %2130 = vmatpush.bf16.msrb.mxu3 %v1766_v55  ;;  %v1522_v10 = vpack.c.bf16 %v922_v56, %v917_v48  ;;  %v1077_v11 = vcvt.s32.f32 %v437_v57  ;;  %v1082_v12 = vcvt.s32.f32 %v442_v59  ;;  %v1847_v14 = vadd.f32 %v2560_v51, %v2558_v50  ;;  %2092 = vmatmul.bf16.vlgmr.msrb.gmra.mxu0 %v2588_v15  ;;  %v2598_v51 = vld [vmem:[#allocation1 + $0x36] sm:$0xff]  ;;  %v1913_v48 = vpop.f32.mrf.mxu2  ;;  %v52_v23 = vld [vmem:[#allocation2 + $0x40] sm:$0xff] }
  0xfa   :  { %v1562_v16 = vpack.c.bf16 %v1002_v0, %v997_v63  ;;  %v1157_v17 = vcvt.s32.f32 %v517_v2  ;;  %v1162_v18 = vcvt.s32.f32 %v522_v4  ;;  %v267_v19 = vunpack.c.0.s8 %v2566_v61  ;;  %2105 = vmatmul.bf16.vlgmr.msrb.gmra.mxu1 %v2592_v20 }
  0xfb   :  { %2136 = vmatpush.bf16.msra.mxu0 %v1522_v10  ;;  %v1602_v21 = vpack.c.bf16 %v1082_v12, %v1077_v11  ;;  %v272_v22 = vunpack.c.1.s8 %v2566_v61  ;;  %v347_v53 = vunpack.c.0.s8 %v2568_v36  ;;  %v352_v50 = vunpack.c.1.s8 %v2568_v36  ;;  %2118 = vmatmul.bf16.vlgmr.msrb.gmra.mxu2 %v2598_v51  ;;  %v57_v61 = vld [vmem:[#allocation2 + $0x68] sm:$0xff] }
  0xfc   :  { %2149 = vmatpush.bf16.msra.mxu1 %v1562_v16  ;;  %v1642_v25 = vpack.c.bf16 %v1162_v18, %v1157_v17  ;;  %v907_v58 = vcvt.s32.f32 %v267_v19  ;;  %v427_v28 = vunpack.c.0.s8 %v102_v42  ;;  %v432_v29 = vunpack.c.1.s8 %v102_v42  ;;  %2131 = vmatmul.bf16.vlgmr.msrb.gmra.mxu3 %v2601_v1  ;;  %v77_v36 = vld [vmem:[#allocation2 + $0x108] sm:$0xff] }
  0xfd   :  { %2162 = vmatpush.bf16.msra.mxu2 %v1602_v21  ;;  %v912_v30 = vcvt.s32.f32 %v272_v22  ;;  %v987_v31 = vcvt.s32.f32 %v347_v53  ;;  %v992_v62 = vcvt.s32.f32 %v352_v50  ;;  %v507_v32 = vunpack.c.0.s8 %v2576_v46 }
  0xfe   :  { %2175 = vmatpush.bf16.msra.mxu3 %v1642_v25  ;;  %v1067_v33 = vcvt.s32.f32 %v427_v28  ;;  %v1072_v34 = vcvt.s32.f32 %v432_v29  ;;  %v512_v7 = vunpack.c.1.s8 %v2576_v46  ;;  %v1860_v35 = vadd.f32 %v2562_v26, %v1847_v14  ;;  %v72_v29 = vld [vmem:[#allocation2 + $0xe0] sm:$0xff] }
  0xff   :  { %v1517_v39 = vpack.c.bf16 %v912_v30, %v907_v58  ;;  %v1557_v40 = vpack.c.bf16 %v992_v62, %v987_v31  ;;  %v1147_v41 = vcvt.s32.f32 %v507_v32  ;;  %v257_v42 = vunpack.c.2.s8 %v57_v61 }
 0x100   :  { %v1597_v43 = vpack.c.bf16 %v1072_v34, %v1067_v33  ;;  %v1152_v44 = vcvt.s32.f32 %v512_v7  ;;  %v2608_v45 = vadd.f32 %v2564_v27, %v1860_v35  ;;  %v262_v47 = vunpack.c.3.s8 %v57_v61  ;;  %v92_v35 = vld [vmem:[#allocation2 + $0x180] sm:$0xff] }
 0x101   :  { %2137 = vmatpush.bf16.msra.mxu0 %v1517_v39  ;;  %2150 = vmatpush.bf16.msra.mxu1 %v1557_v40  ;;  %v897_v46 = vcvt.s32.f32 %v257_v42  ;;  %v337_v52 = vunpack.c.2.s8 %v77_v36  ;;  %v342_v26 = vunpack.c.3.s8 %v77_v36  ;;  %v417_v55 = vunpack.c.2.s8 %v97_v38  ;;  %v112_v42 = vld [vmem:[#allocation2 + $0x220] sm:$0xff] }
 0x102   :  { %2163 = vmatpush.bf16.msra.mxu2 %v1597_v43  ;;  %v1637_v56 = vpack.c.bf16 %v1152_v44, %v1147_v41  ;;  %v902_v57 = vcvt.s32.f32 %v262_v47  ;;  %v422_v59 = vunpack.c.3.s8 %v97_v38  ;;  %v497_v63 = vunpack.c.2.s8 %v117_v8 }
 0x103   :  { %v977_v0 = vcvt.s32.f32 %v337_v52  ;;  %v982_v2 = vcvt.s32.f32 %v342_v26  ;;  %v1057_v4 = vcvt.s32.f32 %v417_v55  ;;  %v502_v10 = vunpack.c.3.s8 %v117_v8 }
 0x104   :  { %2176 = vmatpush.bf16.msra.mxu3 %v1637_v56  ;;  %v1512_v27 = vpack.c.bf16 %v902_v57, %v897_v46  ;;  %v1062_v11 = vcvt.s32.f32 %v422_v59  ;;  %v1137_v12 = vcvt.s32.f32 %v497_v63  ;;  %v247_v14 = vunpack.c.0.s8 %v57_v61 }
 0x105   :  { %v1552_v16 = vpack.c.bf16 %v982_v2, %v977_v0  ;;  %v1142_v17 = vcvt.s32.f32 %v502_v10  ;;  %v252_v18 = vunpack.c.1.s8 %v57_v61  ;;  %v327_v19 = vunpack.c.0.s8 %v77_v36 }
 0x106   :  { %2138 = vmatpush.bf16.msra.mxu0 %v1512_v27  ;;  %v1592_v21 = vpack.c.bf16 %v1062_v11, %v1057_v4  ;;  %v887_v22 = vcvt.s32.f32 %v247_v14  ;;  %v332_v53 = vunpack.c.1.s8 %v77_v36  ;;  %v407_v50 = vunpack.c.0.s8 %v97_v38 }
 0x107   :  { %2151 = vmatpush.bf16.msra.mxu1 %v1552_v16  ;;  %v1632_v24 = vpack.c.bf16 %v1142_v17, %v1137_v12  ;;  %v892_v25 = vcvt.s32.f32 %v252_v18  ;;  %v967_v58 = vcvt.s32.f32 %v327_v19  ;;  %v412_v28 = vunpack.c.1.s8 %v97_v38 }
 0x108   :  { %2164 = vmatpush.bf16.msra.mxu2 %v1592_v21  ;;  %v972_v30 = vcvt.s32.f32 %v332_v53  ;;  %v1047_v31 = vcvt.s32.f32 %v407_v50  ;;  %v487_v62 = vunpack.c.0.s8 %v117_v8  ;;  %v492_v32 = vunpack.c.1.s8 %v117_v8 }
 0x109   :  { %2177 = vmatpush.bf16.msra.mxu3 %v1632_v24  ;;  %v1507_v61 = vpack.c.bf16 %v892_v25, %v887_v22  ;;  %v1052_v33 = vcvt.s32.f32 %v412_v28  ;;  %v237_v34 = vunpack.c.2.s8 %v52_v23  ;;  %v242_v7 = vunpack.c.3.s8 %v52_v23  ;;  %v47_v22 = vld [vmem:[#allocation2 + $0x18] sm:$0xff] }
 0x10a   :  { %v1547_v36 = vpack.c.bf16 %v972_v30, %v967_v58  ;;  %v1127_v39 = vcvt.s32.f32 %v487_v62  ;;  %v1132_v40 = vcvt.s32.f32 %v492_v32  ;;  %v317_v41 = vunpack.c.2.s8 %v72_v29  ;;  %v67_v24 = vld [vmem:[#allocation2 + $0xb8] sm:$0xff] }
 0x10b   :  { %2139 = vmatpush.bf16.msra.mxu0 %v1507_v61  ;;  %v1587_v43 = vpack.c.bf16 %v1052_v33, %v1047_v31  ;;  %v877_v38 = vcvt.s32.f32 %v237_v34  ;;  %v882_v44 = vcvt.s32.f32 %v242_v7  ;;  %v322_v47 = vunpack.c.3.s8 %v72_v29  ;;  %v87_v32 = vld [vmem:[#allocation2 + $0x158] sm:$0xff] }
 0x10c   :  { %2152 = vmatpush.bf16.msra.mxu1 %v1547_v36  ;;  %v1627_v48 = vpack.c.bf16 %v1132_v40, %v1127_v39  ;;  %v957_v49 = vcvt.s32.f32 %v317_v41  ;;  %v397_v8 = vunpack.c.2.s8 %v92_v35  ;;  %v402_v46 = vunpack.c.3.s8 %v92_v35  ;;  %v107_v7 = vld [vmem:[#allocation2 + $0x1f8] sm:$0xff] }
 0x10d   :  { %2165 = vmatpush.bf16.msra.mxu2 %v1587_v43  ;;  %v1502_v52 = vpack.c.bf16 %v882_v44, %v877_v38  ;;  %v962_v26 = vcvt.s32.f32 %v322_v47  ;;  %v477_v55 = vunpack.c.2.s8 %v112_v42  ;;  %v482_v56 = vunpack.c.3.s8 %v112_v42 }
 0x10e   :  { %2178 = vmatpush.bf16.msra.mxu3 %v1627_v48  ;;  %v1037_v57 = vcvt.s32.f32 %v397_v8  ;;  %v1042_v59 = vcvt.s32.f32 %v402_v46  ;;  %v1886_v63 = vadd.f32 %v2570_v37, %v2608_v45  ;;  %v227_v0 = vunpack.c.0.s8 %v52_v23 }
 0x10f   :  { %2140 = vmatpush.bf16.msra.mxu0 %v1502_v52  ;;  %v1542_v2 = vpack.c.bf16 %v962_v26, %v957_v49  ;;  %v1117_v4 = vcvt.s32.f32 %v477_v55  ;;  %v1122_v10 = vcvt.s32.f32 %v482_v56  ;;  %v232_v27 = vunpack.c.1.s8 %v52_v23 }
 0x110   :  { %v1582_v11 = vpack.c.bf16 %v1042_v59, %v1037_v57  ;;  %v1899_v12 = vadd.f32 %v2572_v3, %v1886_v63  ;;  %v867_v14 = vcvt.s32.f32 %v227_v0  ;;  %v307_v16 = vunpack.c.0.s8 %v72_v29 }
 0x111   :  { %2153 = vmatpush.bf16.msra.mxu1 %v1542_v2  ;;  %v1622_v17 = vpack.c.bf16 %v1122_v10, %v1117_v4  ;;  %v872_v18 = vcvt.s32.f32 %v232_v27  ;;  %v312_v19 = vunpack.c.1.s8 %v72_v29  ;;  %v387_v21 = vunpack.c.0.s8 %v92_v35  ;;  %v142_v2 = vld [vmem:[#allocation2 + $0x310] sm:$0xff] }
 0x112   :  { %2166 = vmatpush.bf16.msra.mxu2 %v1582_v11  ;;  %v947_v53 = vcvt.s32.f32 %v307_v16  ;;  %v392_v37 = vunpack.c.1.s8 %v92_v35  ;;  %v467_v45 = vunpack.c.0.s8 %v112_v42  ;;  %v472_v50 = vunpack.c.1.s8 %v112_v42 }
 0x113   :  { %2179 = vmatpush.bf16.msra.mxu3 %v1622_v17  ;;  %v1497_v25 = vpack.c.bf16 %v872_v18, %v867_v14  ;;  %v952_v23 = vcvt.s32.f32 %v312_v19  ;;  %v1027_v58 = vcvt.s32.f32 %v387_v21  ;;  %v1912_v3 = vadd.f32 %v2582_v5, %v1899_v12  ;;  %v162_v12 = vld [vmem:[#allocation2 + $0x3b0] sm:$0xff] }
 0x114   :  { %v1032_v28 = vcvt.s32.f32 %v392_v37  ;;  %v1107_v30 = vcvt.s32.f32 %v467_v45  ;;  %v1112_v31 = vcvt.s32.f32 %v472_v50  ;;  %v217_v62 = vunpack.c.2.s8 %v47_v22  ;;  %v182_v19 = vld [vmem:[#allocation2 + $0x450] sm:$0xff] }
 0x115   :  { %2141 = vmatpush.bf16.msra.mxu0 %v1497_v25  ;;  %v1537_v29 = vpack.c.bf16 %v952_v23, %v947_v53  ;;  %v2615_v61 = vadd.f32 %v2584_v9, %v1912_v3  ;;  %v222_v33 = vunpack.c.3.s8 %v47_v22  ;;  %v297_v34 = vunpack.c.2.s8 %v67_v24  ;;  %v202_v23 = vld [vmem:[#allocation2 + $0x4f0] sm:$0xff] }
 0x116   :  { %v1577_v35 = vpack.c.bf16 %v1032_v28, %v1027_v58  ;;  %v1617_v36 = vpack.c.bf16 %v1112_v31, %v1107_v30  ;;  %v857_v39 = vcvt.s32.f32 %v217_v62  ;;  %v302_v40 = vunpack.c.3.s8 %v67_v24 }
 0x117   :  { %2154 = vmatpush.bf16.msra.mxu1 %v1537_v29  ;;  %v862_v41 = vcvt.s32.f32 %v222_v33  ;;  %v937_v5 = vcvt.s32.f32 %v297_v34  ;;  %v377_v42 = vunpack.c.2.s8 %v87_v32  ;;  %v382_v43 = vunpack.c.3.s8 %v87_v32 }
 0x118   :  { %2167 = vmatpush.bf16.msra.mxu2 %v1577_v35  ;;  %2180 = vmatpush.bf16.msra.mxu3 %v1617_v36  ;;  %v942_v38 = vcvt.s32.f32 %v302_v40  ;;  %v457_v44 = vunpack.c.2.s8 %v107_v7  ;;  %v462_v47 = vunpack.c.3.s8 %v107_v7  ;;  %v207_v48 = vunpack.c.0.s8 %v47_v22 }
 0x119   :  { %v1492_v9 = vpack.c.bf16 %v862_v41, %v857_v39  ;;  %v1017_v49 = vcvt.s32.f32 %v377_v42  ;;  %v1022_v8 = vcvt.s32.f32 %v382_v43  ;;  %v212_v46 = vunpack.c.1.s8 %v47_v22 }
 0x11a   :  { %v1532_v52 = vpack.c.bf16 %v942_v38, %v937_v5  ;;  %v1097_v26 = vcvt.s32.f32 %v457_v44  ;;  %v1102_v55 = vcvt.s32.f32 %v462_v47  ;;  %v847_v56 = vcvt.s32.f32 %v207_v48 }
 0x11b   :  { %2142 = vmatpush.bf16.msra.mxu0 %v1492_v9  ;;  %v1572_v57 = vpack.c.bf16 %v1022_v8, %v1017_v49  ;;  %v852_v59 = vcvt.s32.f32 %v212_v46  ;;  %v287_v63 = vunpack.c.0.s8 %v67_v24  ;;  %v292_v0 = vunpack.c.1.s8 %v67_v24  ;;  %v137_v49 = vld [vmem:[#allocation2 + $0x2e8] sm:$0xff] }
 0x11c   :  { %2155 = vmatpush.bf16.msra.mxu1 %v1532_v52  ;;  %v1612_v4 = vpack.c.bf16 %v1102_v55, %v1097_v26  ;;  %v367_v10 = vunpack.c.0.s8 %v87_v32  ;;  %v372_v27 = vunpack.c.1.s8 %v87_v32  ;;  %v447_v11 = vunpack.c.0.s8 %v107_v7  ;;  %v157_v26 = vld [vmem:[#allocation2 + $0x388] sm:$0xff]  ;;  %v2621_v55 = vpop.f32.mrf.mxu0 }
 0x11d   :  { %2168 = vmatpush.bf16.msra.mxu2 %v1572_v57  ;;  %v1487_v14 = vpack.c.bf16 %v852_v59, %v847_v56  ;;  %v927_v16 = vcvt.s32.f32 %v287_v63  ;;  %v932_v17 = vcvt.s32.f32 %v292_v0  ;;  %v452_v18 = vunpack.c.1.s8 %v107_v7  ;;  %v2623_v56 = vpop.f32.mrf.mxu1 }
 0x11e   :  { %2181 = vmatpush.bf16.msra.mxu3 %v1612_v4  ;;  %v1007_v21 = vcvt.s32.f32 %v367_v10  ;;  %v1012_v22 = vcvt.s32.f32 %v372_v27  ;;  %v1087_v53 = vcvt.s32.f32 %v447_v11  ;;  %v597_v37 = vunpack.c.2.s8 %v142_v2  ;;  %v177_v10 = vld [vmem:[#allocation2 + $0x428] sm:$0xff] }
 0x11f   :  { %2143 = vmatpush.bf16.msra.mxu0 %v1487_v14  ;;  %v1527_v45 = vpack.c.bf16 %v932_v17, %v927_v16  ;;  %v1092_v50 = vcvt.s32.f32 %v452_v18  ;;  %v602_v24 = vunpack.c.3.s8 %v142_v2  ;;  %v677_v25 = vunpack.c.2.s8 %v162_v12  ;;  %v197_v14 = vld [vmem:[#allocation2 + $0x4c8] sm:$0xff] }
 0x120   :  { %v1567_v58 = vpack.c.bf16 %v1012_v22, %v1007_v21  ;;  %v1237_v3 = vcvt.s32.f32 %v597_v37  ;;  %v682_v28 = vunpack.c.3.s8 %v162_v12  ;;  %v757_v30 = vunpack.c.2.s8 %v182_v19 }
 0x121   :  { %2156 = vmatpush.bf16.msra.mxu1 %v1527_v45  ;;  %v1607_v31 = vpack.c.bf16 %v1092_v50, %v1087_v53  ;;  %v1242_v62 = vcvt.s32.f32 %v602_v24  ;;  %v1317_v32 = vcvt.s32.f32 %v677_v25  ;;  %v762_v29 = vunpack.c.3.s8 %v182_v19 }
 0x122   :  { %2169 = vmatpush.bf16.msra.mxu2 %v1567_v58  ;;  %v1322_v33 = vcvt.s32.f32 %v682_v28  ;;  %v1397_v34 = vcvt.s32.f32 %v757_v30  ;;  %v837_v7 = vunpack.c.2.s8 %v202_v23  ;;  %v842_v35 = vunpack.c.3.s8 %v202_v23  ;;  %2144 = vmatmul.bf16.vlgmr.msra.gmra.mxu0 %v2546_v54 }
 0x123   :  { %2182 = vmatpush.bf16.msra.mxu3 %v1607_v31  ;;  %v1682_v36 = vpack.c.bf16 %v1242_v62, %v1237_v3  ;;  %v1402_v39 = vcvt.s32.f32 %v762_v29  ;;  %v587_v40 = vunpack.c.0.s8 %v142_v2  ;;  %v592_v41 = vunpack.c.1.s8 %v142_v2 }
 0x124   :  { %v1722_v5 = vpack.c.bf16 %v1322_v33, %v1317_v32  ;;  %v1477_v42 = vcvt.s32.f32 %v837_v7  ;;  %v1482_v43 = vcvt.s32.f32 %v842_v35  ;;  %v667_v38 = vunpack.c.0.s8 %v162_v12  ;;  %2157 = vmatmul.bf16.vlgmr.msra.gmra.mxu1 %v2549_v60  ;;  %v1939_v29 = vpop.f32.mrf.mxu0 }
 0x125   :  { %2188 = vmatpush.bf16.msrb.mxu0 %v1682_v36  ;;  %v1762_v44 = vpack.c.bf16 %v1402_v39, %v1397_v34  ;;  %v1227_v47 = vcvt.s32.f32 %v587_v40  ;;  %v1232_v48 = vcvt.s32.f32 %v592_v41  ;;  %v672_v9 = vunpack.c.1.s8 %v162_v12  ;;  %2170 = vmatmul.bf16.vlgmr.msra.gmra.mxu2 %v2552_v6  ;;  %v1952_v33 = vpop.f32.mrf.mxu1  ;;  %v132_v39 = vld [vmem:[#allocation2 + $0x2c0] sm:$0xff] }
 0x126   :  { %2201 = vmatpush.bf16.msrb.mxu1 %v1722_v5  ;;  %v1802_v54 = vpack.c.bf16 %v1482_v43, %v1477_v42  ;;  %v1307_v8 = vcvt.s32.f32 %v667_v38  ;;  %v747_v46 = vunpack.c.0.s8 %v182_v19  ;;  %v752_v52 = vunpack.c.1.s8 %v182_v19  ;;  %2183 = vmatmul.bf16.vlgmr.msra.gmra.mxu3 %v2555_v13  ;;  %v152_v43 = vld [vmem:[#allocation2 + $0x360] sm:$0xff]  ;;  %v2625_v38 = vpop.f32.mrf.mxu2 }
 0x127   :  { %2214 = vmatpush.bf16.msrb.mxu2 %v1762_v44  ;;  %v1677_v60 = vpack.c.bf16 %v1232_v48, %v1227_v47  ;;  %v1312_v57 = vcvt.s32.f32 %v672_v9  ;;  %v827_v59 = vunpack.c.0.s8 %v202_v23  ;;  %v832_v63 = vunpack.c.1.s8 %v202_v23  ;;  %v2627_v44 = vpop.f32.mrf.mxu3 }
 0x128   :  { %2227 = vmatpush.bf16.msrb.mxu3 %v1802_v54  ;;  %v1387_v0 = vcvt.s32.f32 %v747_v46  ;;  %v1392_v6 = vcvt.s32.f32 %v752_v52  ;;  %v577_v2 = vunpack.c.2.s8 %v137_v49  ;;  %v582_v4 = vunpack.c.3.s8 %v137_v49 }
 0x129   :  { %2189 = vmatpush.bf16.msrb.mxu0 %v1677_v60  ;;  %v1717_v27 = vpack.c.bf16 %v1312_v57, %v1307_v8  ;;  %v1467_v11 = vcvt.s32.f32 %v827_v59  ;;  %v1472_v12 = vcvt.s32.f32 %v832_v63  ;;  %v657_v13 = vunpack.c.2.s8 %v157_v26 }
 0x12a   :  { %v1757_v16 = vpack.c.bf16 %v1392_v6, %v1387_v0  ;;  %v1217_v17 = vcvt.s32.f32 %v577_v2  ;;  %v1222_v18 = vcvt.s32.f32 %v582_v4  ;;  %v662_v19 = vunpack.c.3.s8 %v157_v26  ;;  %v192_v0 = vld [vmem:[#allocation2 + $0x4a0] sm:$0xff] }
 0x12b   :  { %2202 = vmatpush.bf16.msrb.mxu1 %v1717_v27  ;;  %v1797_v21 = vpack.c.bf16 %v1472_v12, %v1467_v11  ;;  %v1297_v22 = vcvt.s32.f32 %v657_v13  ;;  %v737_v53 = vunpack.c.2.s8 %v177_v10  ;;  %v742_v37 = vunpack.c.3.s8 %v177_v10 }
 0x12c   :  { %2215 = vmatpush.bf16.msrb.mxu2 %v1757_v16  ;;  %v1672_v45 = vpack.c.bf16 %v1222_v18, %v1217_v17  ;;  %v1302_v50 = vcvt.s32.f32 %v662_v19  ;;  %v817_v24 = vunpack.c.2.s8 %v197_v14  ;;  %v822_v25 = vunpack.c.3.s8 %v197_v14 }
 0x12d   :  { %2228 = vmatpush.bf16.msrb.mxu3 %v1797_v21  ;;  %v1377_v23 = vcvt.s32.f32 %v737_v53  ;;  %v1382_v58 = vcvt.s32.f32 %v742_v37  ;;  %v567_v3 = vunpack.c.0.s8 %v137_v49  ;;  %v572_v28 = vunpack.c.1.s8 %v137_v49 }
 0x12e   :  { %2190 = vmatpush.bf16.msrb.mxu0 %v1672_v45  ;;  %v1712_v30 = vpack.c.bf16 %v1302_v50, %v1297_v22  ;;  %v1457_v31 = vcvt.s32.f32 %v817_v24  ;;  %v1462_v62 = vcvt.s32.f32 %v822_v25  ;;  %v647_v32 = vunpack.c.0.s8 %v157_v26  ;;  %v1965_v25 = vpop.f32.mrf.mxu2 }
 0x12f   :  { %v1752_v34 = vpack.c.bf16 %v1382_v58, %v1377_v23  ;;  %v1207_v7 = vcvt.s32.f32 %v567_v3  ;;  %v1212_v35 = vcvt.s32.f32 %v572_v28  ;;  %v652_v36 = vunpack.c.1.s8 %v157_v26  ;;  %v172_v26 = vld [vmem:[#allocation2 + $0x400] sm:$0xff]  ;;  %v1978_v23 = vpop.f32.mrf.mxu3 }
 0x130   :  { %2203 = vmatpush.bf16.msrb.mxu1 %v1712_v30  ;;  %v1792_v40 = vpack.c.bf16 %v1462_v62, %v1457_v31  ;;  %v1287_v41 = vcvt.s32.f32 %v647_v32  ;;  %v727_v5 = vunpack.c.0.s8 %v177_v10  ;;  %v732_v42 = vunpack.c.1.s8 %v177_v10  ;;  %v127_v31 = vld [vmem:[#allocation2 + $0x298] sm:$0xff] }
 0x131   :  { %2216 = vmatpush.bf16.msrb.mxu2 %v1752_v34  ;;  %v1667_v47 = vpack.c.bf16 %v1212_v35, %v1207_v7  ;;  %v1292_v48 = vcvt.s32.f32 %v652_v36  ;;  %v807_v9 = vunpack.c.0.s8 %v197_v14  ;;  %v812_v49 = vunpack.c.1.s8 %v197_v14  ;;  %v147_v34 = vld [vmem:[#allocation2 + $0x338] sm:$0xff] }
 0x132   :  { %2229 = vmatpush.bf16.msrb.mxu3 %v1792_v40  ;;  %v1367_v54 = vcvt.s32.f32 %v727_v5  ;;  %v1372_v8 = vcvt.s32.f32 %v732_v42  ;;  %v557_v46 = vunpack.c.2.s8 %v132_v39  ;;  %v562_v52 = vunpack.c.3.s8 %v132_v39 }
 0x133   :  { %2191 = vmatpush.bf16.msrb.mxu0 %v1667_v47  ;;  %v1707_v60 = vpack.c.bf16 %v1292_v48, %v1287_v41  ;;  %v1447_v57 = vcvt.s32.f32 %v807_v9  ;;  %v1452_v59 = vcvt.s32.f32 %v812_v49  ;;  %v637_v63 = vunpack.c.2.s8 %v152_v43  ;;  %v167_v47 = vld [vmem:[#allocation2 + $0x3d8] sm:$0xff] }
 0x134   :  { %v1747_v6 = vpack.c.bf16 %v1372_v8, %v1367_v54  ;;  %v1197_v2 = vcvt.s32.f32 %v557_v46  ;;  %v1202_v4 = vcvt.s32.f32 %v562_v52  ;;  %v642_v10 = vunpack.c.3.s8 %v152_v43  ;;  %v187_v54 = vld [vmem:[#allocation2 + $0x478] sm:$0xff] }
 0x135   :  { %2204 = vmatpush.bf16.msrb.mxu1 %v1707_v60  ;;  %v1787_v27 = vpack.c.bf16 %v1452_v59, %v1447_v57  ;;  %v1277_v11 = vcvt.s32.f32 %v637_v63  ;;  %v717_v12 = vunpack.c.2.s8 %v172_v26  ;;  %v722_v13 = vunpack.c.3.s8 %v172_v26 }
 0x136   :  { %2217 = vmatpush.bf16.msrb.mxu2 %v1747_v6  ;;  %v1662_v14 = vpack.c.bf16 %v1202_v4, %v1197_v2  ;;  %v1282_v16 = vcvt.s32.f32 %v642_v10  ;;  %v797_v17 = vunpack.c.2.s8 %v192_v0  ;;  %v802_v18 = vunpack.c.3.s8 %v192_v0  ;;  %v2629_v10 = vpop.f32.mrf.mxu0 }
 0x137   :  { %2230 = vmatpush.bf16.msrb.mxu3 %v1787_v27  ;;  %v1357_v19 = vcvt.s32.f32 %v717_v12  ;;  %v1362_v21 = vcvt.s32.f32 %v722_v13  ;;  %v547_v22 = vunpack.c.0.s8 %v132_v39  ;;  %v552_v53 = vunpack.c.1.s8 %v132_v39  ;;  %v2631_v27 = vpop.f32.mrf.mxu1 }
 0x138   :  { %2192 = vmatpush.bf16.msrb.mxu0 %v1662_v14  ;;  %v1702_v37 = vpack.c.bf16 %v1282_v16, %v1277_v11  ;;  %v1437_v45 = vcvt.s32.f32 %v797_v17  ;;  %v1442_v50 = vcvt.s32.f32 %v802_v18  ;;  %v627_v24 = vunpack.c.0.s8 %v152_v43 }
 0x139   :  { %v1742_v58 = vpack.c.bf16 %v1362_v21, %v1357_v19  ;;  %v1187_v3 = vcvt.s32.f32 %v547_v22  ;;  %v1192_v28 = vcvt.s32.f32 %v552_v53  ;;  %v632_v30 = vunpack.c.1.s8 %v152_v43 }
 0x13a   :  { %2205 = vmatpush.bf16.msrb.mxu1 %v1702_v37  ;;  %v1782_v62 = vpack.c.bf16 %v1442_v50, %v1437_v45  ;;  %v1267_v32 = vcvt.s32.f32 %v627_v24  ;;  %v707_v29 = vunpack.c.0.s8 %v172_v26  ;;  %v712_v33 = vunpack.c.1.s8 %v172_v26  ;;  %v2635_v45 = vld [vmem:[#allocation2 + $0x98] sm:$0xff] }
 0x13b   :  { %2218 = vmatpush.bf16.msrb.mxu2 %v1742_v58  ;;  %v1657_v7 = vpack.c.bf16 %v1192_v28, %v1187_v3  ;;  %v1272_v35 = vcvt.s32.f32 %v632_v30  ;;  %v787_v36 = vunpack.c.0.s8 %v192_v0  ;;  %v792_v39 = vunpack.c.1.s8 %v192_v0  ;;  %v2637_v28 = vld [vmem:[#allocation2 + $0x138] sm:$0xff]  ;;  %v2639_v30 = vpop.f32.mrf.mxu2 }
 0x13c   :  { %2231 = vmatpush.bf16.msrb.mxu3 %v1782_v62  ;;  %v1347_v40 = vcvt.s32.f32 %v707_v29  ;;  %v1352_v41 = vcvt.s32.f32 %v712_v33  ;;  %v537_v5 = vunpack.c.2.s8 %v127_v31  ;;  %v542_v42 = vunpack.c.3.s8 %v127_v31 }
 0x13d   :  { %2193 = vmatpush.bf16.msrb.mxu0 %v1657_v7  ;;  %v1697_v43 = vpack.c.bf16 %v1272_v35, %v1267_v32  ;;  %v1427_v48 = vcvt.s32.f32 %v787_v36  ;;  %v1432_v9 = vcvt.s32.f32 %v792_v39  ;;  %v617_v49 = vunpack.c.2.s8 %v147_v34 }
 0x13e   :  { %v1737_v8 = vpack.c.bf16 %v1352_v41, %v1347_v40  ;;  %v1177_v46 = vcvt.s32.f32 %v537_v5  ;;  %v1182_v52 = vcvt.s32.f32 %v542_v42  ;;  %v622_v26 = vunpack.c.3.s8 %v147_v34  ;;  %v123_v40 = vld [vmem:[#allocation2 + $0x278] sm:$0xff] }
 0x13f   :  { %2206 = vmatpush.bf16.msrb.mxu1 %v1697_v43  ;;  %v1777_v60 = vpack.c.bf16 %v1432_v9, %v1427_v48  ;;  %v1257_v57 = vcvt.s32.f32 %v617_v49  ;;  %v697_v59 = vunpack.c.2.s8 %v167_v47  ;;  %v702_v63 = vunpack.c.3.s8 %v167_v47  ;;  %v1991_v43 = vpop.f32.mrf.mxu0  ;;  %v2004_v48 = vpop.f32.mrf.mxu1 }
 0x140   :  { %2219 = vmatpush.bf16.msrb.mxu2 %v1737_v8  ;;  %v1652_v0 = vpack.c.bf16 %v1182_v52, %v1177_v46  ;;  %v1262_v6 = vcvt.s32.f32 %v622_v26  ;;  %v777_v2 = vunpack.c.2.s8 %v187_v54  ;;  %v782_v4 = vunpack.c.3.s8 %v187_v54 }
 0x141   :  { %2232 = vmatpush.bf16.msrb.mxu3 %v1777_v60  ;;  %v1337_v11 = vcvt.s32.f32 %v697_v59  ;;  %v1342_v12 = vcvt.s32.f32 %v702_v63  ;;  %v1951_v13 = vadd.f32 %v2623_v56, %v2621_v55  ;;  %v527_v14 = vunpack.c.0.s8 %v127_v31 }
 0x142   :  { %2194 = vmatpush.bf16.msrb.mxu0 %v1652_v0  ;;  %v1692_v16 = vpack.c.bf16 %v1262_v6, %v1257_v57  ;;  %v1417_v17 = vcvt.s32.f32 %v777_v2  ;;  %v1422_v18 = vcvt.s32.f32 %v782_v4  ;;  %v532_v19 = vunpack.c.1.s8 %v127_v31  ;;  %v2641_v31 = vpop.f32.mrf.mxu3 }
 0x143   :  { %v1732_v21 = vpack.c.bf16 %v1342_v12, %v1337_v11  ;;  %v1167_v22 = vcvt.s32.f32 %v527_v14  ;;  %v607_v53 = vunpack.c.0.s8 %v147_v34  ;;  %v612_v37 = vunpack.c.1.s8 %v147_v34  ;;  %v103_v34 = vld [vmem:[#allocation2 + $0x1d8] sm:$0xff] }
 0x144   :  { %2207 = vmatpush.bf16.msrb.mxu1 %v1692_v16  ;;  %v1772_v50 = vpack.c.bf16 %v1422_v18, %v1417_v17  ;;  %v1172_v24 = vcvt.s32.f32 %v532_v19  ;;  %v687_v25 = vunpack.c.0.s8 %v167_v47  ;;  %v692_v23 = vunpack.c.1.s8 %v167_v47 }
 0x145   :  { %2220 = vmatpush.bf16.msrb.mxu2 %v1732_v21  ;;  %v1247_v58 = vcvt.s32.f32 %v607_v53  ;;  %v1252_v55 = vcvt.s32.f32 %v612_v37  ;;  %v767_v56 = vunpack.c.0.s8 %v187_v54  ;;  %v772_v3 = vunpack.c.1.s8 %v187_v54  ;;  %v78_v37 = vld [vmem:[#allocation2 + $0x110] sm:$0xff] }
 0x146   :  { %2233 = vmatpush.bf16.msrb.mxu3 %v1772_v50  ;;  %v1647_v62 = vpack.c.bf16 %v1172_v24, %v1167_v22  ;;  %v1327_v32 = vcvt.s32.f32 %v687_v25  ;;  %v1332_v29 = vcvt.s32.f32 %v692_v23  ;;  %v278_v33 = vunpack.c.2.s8 %v2635_v45  ;;  %v98_v23 = vld [vmem:[#allocation2 + $0x1b0] sm:$0xff] }
 0x147   :  { %v1687_v7 = vpack.c.bf16 %v1252_v55, %v1247_v58  ;;  %v1407_v35 = vcvt.s32.f32 %v767_v56  ;;  %v1412_v36 = vcvt.s32.f32 %v772_v3  ;;  %v283_v39 = vunpack.c.3.s8 %v2635_v45  ;;  %v118_v3 = vld [vmem:[#allocation2 + $0x250] sm:$0xff] }
 0x148   :  { %2195 = vmatpush.bf16.msrb.mxu0 %v1647_v62  ;;  %v1727_v41 = vpack.c.bf16 %v1332_v29, %v1327_v32  ;;  %v918_v5 = vcvt.s32.f32 %v278_v33  ;;  %v358_v42 = vunpack.c.2.s8 %v2637_v28  ;;  %v363_v47 = vunpack.c.3.s8 %v2637_v28 }
 0x149   :  { %2208 = vmatpush.bf16.msrb.mxu1 %v1687_v7  ;;  %v1767_v9 = vpack.c.bf16 %v1412_v36, %v1407_v35  ;;  %v923_v49 = vcvt.s32.f32 %v283_v39  ;;  %v438_v54 = vunpack.c.2.s8 %v103_v34  ;;  %v443_v8 = vunpack.c.3.s8 %v103_v34 }
 0x14a   :  { %2221 = vmatpush.bf16.msrb.mxu2 %v1727_v41  ;;  %v998_v46 = vcvt.s32.f32 %v358_v42  ;;  %v1003_v52 = vcvt.s32.f32 %v363_v47  ;;  %v518_v26 = vunpack.c.2.s8 %v123_v40  ;;  %v523_v60 = vunpack.c.3.s8 %v123_v40  ;;  %v2030_v17 = vpop.f32.mrf.mxu3 }
 0x14b   :  { %2234 = vmatpush.bf16.msrb.mxu3 %v1767_v9  ;;  %v1523_v57 = vpack.c.bf16 %v923_v49, %v918_v5  ;;  %v1078_v59 = vcvt.s32.f32 %v438_v54  ;;  %v1083_v63 = vcvt.s32.f32 %v443_v8  ;;  %v1964_v0 = vadd.f32 %v2625_v38, %v1951_v13  ;;  %2196 = vmatmul.bf16.vlgmr.msrb.gmra.mxu0 %v2588_v15  ;;  %v58_v13 = vld [vmem:[#allocation2 + $0x70] sm:$0xff]  ;;  %v2017_v15 = vpop.f32.mrf.mxu2 }
 0x14c   :  { %v1563_v6 = vpack.c.bf16 %v1003_v52, %v998_v46  ;;  %v1158_v2 = vcvt.s32.f32 %v518_v26  ;;  %v1163_v4 = vcvt.s32.f32 %v523_v60  ;;  %v268_v11 = vunpack.c.0.s8 %v2635_v45  ;;  %2209 = vmatmul.bf16.vlgmr.msrb.gmra.mxu1 %v2592_v20 }
 0x14d   :  { %2240 = vmatpush.bf16.msra.mxu0 %v1523_v57  ;;  %v1603_v12 = vpack.c.bf16 %v1083_v63, %v1078_v59  ;;  %2222 = vmatmul.bf16.vlgmr.msrb.gmra.mxu2 %v2598_v51  ;;  %v2653_v14 = vadd.f32 %v2627_v44, %v1964_v0  ;;  %v273_v16 = vunpack.c.1.s8 %v2635_v45  ;;  %v348_v38 = vunpack.c.0.s8 %v2637_v28  ;;  %v2659_v0 = vld [vmem:[#allocation2 + $0x48] sm:$0xff] }
 0x14e   :  { %2253 = vmatpush.bf16.msra.mxu1 %v1563_v6  ;;  %v1643_v18 = vpack.c.bf16 %v1163_v4, %v1158_v2  ;;  %2235 = vmatmul.bf16.vlgmr.msrb.gmra.mxu3 %v2601_v1  ;;  %v908_v19 = vcvt.s32.f32 %v268_v11  ;;  %v353_v20 = vunpack.c.1.s8 %v2637_v28  ;;  %v428_v21 = vunpack.c.0.s8 %v103_v34 }
 0x14f   :  { %2266 = vmatpush.bf16.msra.mxu2 %v1603_v12  ;;  %v913_v51 = vcvt.s32.f32 %v273_v16  ;;  %v988_v22 = vcvt.s32.f32 %v348_v38  ;;  %v433_v44 = vunpack.c.1.s8 %v103_v34  ;;  %v508_v53 = vunpack.c.0.s8 %v123_v40  ;;  %v73_v12 = vld [vmem:[#allocation2 + $0xe8] sm:$0xff] }
 0x150   :  { %2279 = vmatpush.bf16.msra.mxu3 %v1643_v18  ;;  %v993_v45 = vcvt.s32.f32 %v353_v20  ;;  %v1068_v50 = vcvt.s32.f32 %v428_v21  ;;  %v513_v24 = vunpack.c.1.s8 %v123_v40  ;;  %v258_v25 = vunpack.c.2.s8 %v58_v13  ;;  %v93_v21 = vld [vmem:[#allocation2 + $0x188] sm:$0xff] }
 0x151   :  { %v1518_v58 = vpack.c.bf16 %v913_v51, %v908_v19  ;;  %v1073_v55 = vcvt.s32.f32 %v433_v44  ;;  %v1148_v56 = vcvt.s32.f32 %v508_v53  ;;  %v263_v1 = vunpack.c.3.s8 %v58_v13 }
 0x152   :  { %v1558_v62 = vpack.c.bf16 %v993_v45, %v988_v22  ;;  %v1153_v28 = vcvt.s32.f32 %v513_v24  ;;  %v898_v32 = vcvt.s32.f32 %v258_v25  ;;  %v338_v29 = vunpack.c.2.s8 %v78_v37 }
 0x153   :  { %2241 = vmatpush.bf16.msra.mxu0 %v1518_v58  ;;  %v1598_v33 = vpack.c.bf16 %v1073_v55, %v1068_v50  ;;  %v903_v34 = vcvt.s32.f32 %v263_v1  ;;  %v343_v7 = vunpack.c.3.s8 %v78_v37  ;;  %v418_v35 = vunpack.c.2.s8 %v98_v23 }
 0x154   :  { %2254 = vmatpush.bf16.msra.mxu1 %v1558_v62  ;;  %v1638_v36 = vpack.c.bf16 %v1153_v28, %v1148_v56  ;;  %v978_v39 = vcvt.s32.f32 %v338_v29  ;;  %v423_v40 = vunpack.c.3.s8 %v98_v23  ;;  %v498_v41 = vunpack.c.2.s8 %v118_v3 }
 0x155   :  { %2267 = vmatpush.bf16.msra.mxu2 %v1598_v33  ;;  %v1513_v5 = vpack.c.bf16 %v903_v34, %v898_v32  ;;  %v983_v42 = vcvt.s32.f32 %v343_v7  ;;  %v1058_v47 = vcvt.s32.f32 %v418_v35  ;;  %v503_v43 = vunpack.c.3.s8 %v118_v3 }
 0x156   :  { %2280 = vmatpush.bf16.msra.mxu3 %v1638_v36  ;;  %v1063_v48 = vcvt.s32.f32 %v423_v40  ;;  %v1138_v9 = vcvt.s32.f32 %v498_v41  ;;  %v248_v49 = vunpack.c.0.s8 %v58_v13  ;;  %v253_v54 = vunpack.c.1.s8 %v58_v13 }
 0x157   :  { %2242 = vmatpush.bf16.msra.mxu0 %v1513_v5  ;;  %v1553_v8 = vpack.c.bf16 %v983_v42, %v978_v39  ;;  %v1143_v46 = vcvt.s32.f32 %v503_v43  ;;  %v328_v52 = vunpack.c.0.s8 %v78_v37  ;;  %v333_v26 = vunpack.c.1.s8 %v78_v37  ;;  %v113_v37 = vld [vmem:[#allocation2 + $0x228] sm:$0xff]  ;;  %v48_v43 = vld [vmem:[#allocation2 + $0x20] sm:$0xff] }
 0x158   :  { %v1593_v60 = vpack.c.bf16 %v1063_v48, %v1058_v47  ;;  %v888_v57 = vcvt.s32.f32 %v248_v49  ;;  %v893_v59 = vcvt.s32.f32 %v253_v54  ;;  %v408_v63 = vunpack.c.0.s8 %v98_v23  ;;  %v68_v49 = vld [vmem:[#allocation2 + $0xc0] sm:$0xff] }
 0x159   :  { %2255 = vmatpush.bf16.msra.mxu1 %v1553_v8  ;;  %v1633_v6 = vpack.c.bf16 %v1143_v46, %v1138_v9  ;;  %v968_v2 = vcvt.s32.f32 %v328_v52  ;;  %v973_v4 = vcvt.s32.f32 %v333_v26  ;;  %v413_v11 = vunpack.c.1.s8 %v98_v23 }
 0x15a   :  { %2268 = vmatpush.bf16.msra.mxu2 %v1593_v60  ;;  %v1508_v16 = vpack.c.bf16 %v893_v59, %v888_v57  ;;  %v1048_v38 = vcvt.s32.f32 %v408_v63  ;;  %v488_v13 = vunpack.c.0.s8 %v118_v3  ;;  %v493_v15 = vunpack.c.1.s8 %v118_v3  ;;  %v88_v59 = vld [vmem:[#allocation2 + $0x160] sm:$0xff] }
 0x15b   :  { %2281 = vmatpush.bf16.msra.mxu3 %v1633_v6  ;;  %v1548_v17 = vpack.c.bf16 %v973_v4, %v968_v2  ;;  %v1053_v18 = vcvt.s32.f32 %v413_v11  ;;  %v1990_v19 = vadd.f32 %v2629_v10, %v2653_v14  ;;  %v238_v20 = vunpack.c.2.s8 %v2659_v0  ;;  %v108_v4 = vld [vmem:[#allocation2 + $0x200] sm:$0xff] }
 0x15c   :  { %2243 = vmatpush.bf16.msra.mxu0 %v1508_v16  ;;  %v1128_v51 = vcvt.s32.f32 %v488_v13  ;;  %v1133_v22 = vcvt.s32.f32 %v493_v15  ;;  %v243_v44 = vunpack.c.3.s8 %v2659_v0  ;;  %v318_v53 = vunpack.c.2.s8 %v73_v12 }
 0x15d   :  { %2256 = vmatpush.bf16.msra.mxu1 %v1548_v17  ;;  %v1588_v45 = vpack.c.bf16 %v1053_v18, %v1048_v38  ;;  %v2003_v50 = vadd.f32 %v2631_v27, %v1990_v19  ;;  %v878_v24 = vcvt.s32.f32 %v238_v20  ;;  %v323_v25 = vunpack.c.3.s8 %v73_v12 }
 0x15e   :  { %v1628_v23 = vpack.c.bf16 %v1133_v22, %v1128_v51  ;;  %v883_v58 = vcvt.s32.f32 %v243_v44  ;;  %v958_v55 = vcvt.s32.f32 %v318_v53  ;;  %v398_v10 = vunpack.c.2.s8 %v93_v21 }
 0x15f   :  { %2269 = vmatpush.bf16.msra.mxu2 %v1588_v45  ;;  %v963_v14 = vcvt.s32.f32 %v323_v25  ;;  %v403_v56 = vunpack.c.3.s8 %v93_v21  ;;  %v478_v1 = vunpack.c.2.s8 %v113_v37  ;;  %v483_v3 = vunpack.c.3.s8 %v113_v37 }
 0x160   :  { %2282 = vmatpush.bf16.msra.mxu3 %v1628_v23  ;;  %v1503_v62 = vpack.c.bf16 %v883_v58, %v878_v24  ;;  %v1038_v28 = vcvt.s32.f32 %v398_v10  ;;  %v2016_v32 = vadd.f32 %v2639_v30, %v2003_v50  ;;  %v228_v39 = vunpack.c.0.s8 %v2659_v0 }
 0x161   :  { %v1543_v29 = vpack.c.bf16 %v963_v14, %v958_v55  ;;  %v1043_v33 = vcvt.s32.f32 %v403_v56  ;;  %v1118_v34 = vcvt.s32.f32 %v478_v1  ;;  %v1123_v27 = vcvt.s32.f32 %v483_v3  ;;  %v143_v3 = vld [vmem:[#allocation2 + $0x318] sm:$0xff] }
 0x162   :  { %2244 = vmatpush.bf16.msra.mxu0 %v1503_v62  ;;  %v2029_v7 = vadd.f32 %v2641_v31, %v2016_v32  ;;  %v233_v41 = vunpack.c.1.s8 %v2659_v0  ;;  %v308_v5 = vunpack.c.0.s8 %v73_v12  ;;  %v868_v30 = vcvt.s32.f32 %v228_v39 }
 0x163   :  { %2257 = vmatpush.bf16.msra.mxu1 %v1543_v29  ;;  %v1583_v35 = vpack.c.bf16 %v1043_v33, %v1038_v28  ;;  %v1623_v36 = vpack.c.bf16 %v1123_v27, %v1118_v34  ;;  %v313_v42 = vunpack.c.1.s8 %v73_v12  ;;  %v388_v47 = vunpack.c.0.s8 %v93_v21  ;;  %v163_v33 = vld [vmem:[#allocation2 + $0x3b8] sm:$0xff] }
 0x164   :  { %v2348_v40 = vrot.slane %v2029_v7, 6  ;;  %v873_v31 = vcvt.s32.f32 %v233_v41  ;;  %v948_v9 = vcvt.s32.f32 %v308_v5  ;;  %v393_v8 = vunpack.c.1.s8 %v93_v21 }
 0x165   :  { %2270 = vmatpush.bf16.msra.mxu2 %v1583_v35  ;;  %2283 = vmatpush.bf16.msra.mxu3 %v1623_v36  ;;  %v953_v54 = vcvt.s32.f32 %v313_v42  ;;  %v1028_v46 = vcvt.s32.f32 %v388_v47  ;;  %v468_v26 = vunpack.c.0.s8 %v113_v37  ;;  %v473_v60 = vunpack.c.1.s8 %v113_v37  ;;  %v183_v36 = vld [vmem:[#allocation2 + $0x458] sm:$0xff] }
 0x166   :  { %v2672_v48 = vsel %vm2351_vm0, %v2615_v61, %v2348_v40  ;;  %v1498_v52 = vpack.c.bf16 %v873_v31, %v868_v30  ;;  %v218_v57 = vunpack.c.2.s8 %v48_v43  ;;  %v1033_v0 = vcvt.s32.f32 %v393_v8  ;;  %v2674_v30 = vld [vmem:[#allocation2 + $0x4f8] sm:$0xff] }
 0x167   :  { %v1538_v63 = vpack.c.bf16 %v953_v54, %v948_v9  ;;  %v223_v6 = vunpack.c.3.s8 %v48_v43  ;;  %v298_v2 = vunpack.c.2.s8 %v68_v49  ;;  %v1108_v11 = vcvt.s32.f32 %v468_v26 }
 0x168   :  { %2245 = vmatpush.bf16.msra.mxu0 %v1498_v52  ;;  %v1113_v61 = vcvt.s32.f32 %v473_v60  ;;  %v858_v12 = vcvt.s32.f32 %v218_v57  ;;  %v303_v16 = vunpack.c.3.s8 %v68_v49  ;;  %v1578_v38 = vpack.c.bf16 %v1033_v0, %v1028_v46 }
 0x169   :  { %2258 = vmatpush.bf16.msra.mxu1 %v1538_v63  ;;  %v863_v13 = vcvt.s32.f32 %v223_v6  ;;  %v938_v15 = vcvt.s32.f32 %v298_v2  ;;  %v378_v17 = vunpack.c.2.s8 %v88_v59  ;;  %v383_v20 = vunpack.c.3.s8 %v88_v59  ;;  %v2445_v6 = vld [vmem:[#allocation1] sm:$0xff] }
 0x16a   :  { %v1618_v18 = vpack.c.bf16 %v1113_v61, %v1108_v11  ;;  %v943_v19 = vcvt.s32.f32 %v303_v16  ;;  %v458_v21 = vunpack.c.2.s8 %v108_v4  ;;  %2271 = vmatpush.bf16.msra.mxu2 %v1578_v38  ;;  %v463_v44 = vunpack.c.3.s8 %v108_v4 }
 0x16b   :  { %v1493_v51 = vpack.c.bf16 %v863_v13, %v858_v12  ;;  %v1018_v22 = vcvt.s32.f32 %v378_v17  ;;  %v208_v53 = vunpack.c.0.s8 %v48_v43  ;;  %v1023_v45 = vcvt.s32.f32 %v383_v20  ;;  %v2446_v12 = vld [vmem:[#allocation1 + $0x9] sm:$0xff]  ;;  %v2447_v17 = vld [vmem:[#allocation1 + $0x12] sm:$0xff] }
 0x16c   :  { %2284 = vmatpush.bf16.msra.mxu3 %v1618_v18  ;;  %v1533_v37 = vpack.c.bf16 %v943_v19, %v938_v15  ;;  %v1098_v50 = vcvt.s32.f32 %v458_v21  ;;  %v213_v24 = vunpack.c.1.s8 %v48_v43  ;;  %v1103_v25 = vcvt.s32.f32 %v463_v44 }
 0x16d   :  { %2246 = vmatpush.bf16.msra.mxu0 %v1493_v51  ;;  %v848_v23 = vcvt.s32.f32 %v208_v53  ;;  %v288_v58 = vunpack.c.0.s8 %v68_v49  ;;  %v293_v55 = vunpack.c.1.s8 %v68_v49  ;;  %v1573_v10 = vpack.c.bf16 %v1023_v45, %v1018_v22  ;;  %v138_v51 = vld [vmem:[#allocation2 + $0x2f0] sm:$0xff] }
 0x16e   :  { %2259 = vmatpush.bf16.msra.mxu1 %v1533_v37  ;;  %v853_v14 = vcvt.s32.f32 %v213_v24  ;;  %v368_v56 = vunpack.c.0.s8 %v88_v59  ;;  %v373_v1 = vunpack.c.1.s8 %v88_v59  ;;  %v1613_v62 = vpack.c.bf16 %v1103_v25, %v1098_v50  ;;  %v158_v45 = vld [vmem:[#allocation2 + $0x390] sm:$0xff] }
 0x16f   :  { %v928_v28 = vcvt.s32.f32 %v288_v58  ;;  %v933_v32 = vcvt.s32.f32 %v293_v55  ;;  %v448_v29 = vunpack.c.0.s8 %v108_v4  ;;  %2272 = vmatpush.bf16.msra.mxu2 %v1573_v10  ;;  %v453_v35 = vunpack.c.1.s8 %v108_v4  ;;  %v2448_v50 = vld [vmem:[#allocation1 + $0x1b] sm:$0xff] }
 0x170   :  { %v1488_v34 = vpack.c.bf16 %v853_v14, %v848_v23  ;;  %v1008_v27 = vcvt.s32.f32 %v368_v56  ;;  %v1013_v7 = vcvt.s32.f32 %v373_v1  ;;  %2285 = vmatpush.bf16.msra.mxu3 %v1613_v62  ;;  %v598_v41 = vunpack.c.2.s8 %v143_v3  ;;  %v178_v55 = vld [vmem:[#allocation2 + $0x430] sm:$0xff] }
 0x171   :  { %v1528_v39 = vpack.c.bf16 %v933_v32, %v928_v28  ;;  %v1088_v40 = vcvt.s32.f32 %v448_v29  ;;  %v603_v5 = vunpack.c.3.s8 %v143_v3  ;;  %v1093_v47 = vcvt.s32.f32 %v453_v35 }
 0x172   :  { %2247 = vmatpush.bf16.msra.mxu0 %v1488_v34  ;;  %v1568_v42 = vpack.c.bf16 %v1013_v7, %v1008_v27  ;;  %v678_v43 = vunpack.c.2.s8 %v163_v33  ;;  %v683_v31 = vunpack.c.3.s8 %v163_v33  ;;  %v1238_v9 = vcvt.s32.f32 %v598_v41  ;;  %v2680_v41 = vpop.f32.mrf.mxu0 }
 0x173   :  { %2260 = vmatpush.bf16.msra.mxu1 %v1528_v39  ;;  %v1243_v49 = vcvt.s32.f32 %v603_v5  ;;  %v758_v54 = vunpack.c.2.s8 %v183_v36  ;;  %v763_v8 = vunpack.c.3.s8 %v183_v36  ;;  %v1608_v46 = vpack.c.bf16 %v1093_v47, %v1088_v40 }
 0x174   :  { %2273 = vmatpush.bf16.msra.mxu2 %v1568_v42  ;;  %v1318_v52 = vcvt.s32.f32 %v678_v43  ;;  %v1323_v26 = vcvt.s32.f32 %v683_v31  ;;  %v838_v60 = vunpack.c.2.s8 %v2674_v30  ;;  %v843_v0 = vunpack.c.3.s8 %v2674_v30 }
 0x175   :  { %v1683_v57 = vpack.c.bf16 %v1243_v49, %v1238_v9  ;;  %v1398_v59 = vcvt.s32.f32 %v758_v54  ;;  %v1403_v63 = vcvt.s32.f32 %v763_v8  ;;  %2248 = vmatmul.bf16.vlgmr.msra.gmra.mxu0 %v2445_v6  ;;  %2286 = vmatpush.bf16.msra.mxu3 %v1608_v46  ;;  %v588_v11 = vunpack.c.0.s8 %v143_v3  ;;  %v133_v6 = vld [vmem:[#allocation2 + $0x2c8] sm:$0xff] }
 0x176   :  { %v1723_v2 = vpack.c.bf16 %v1323_v26, %v1318_v52  ;;  %v1478_v4 = vcvt.s32.f32 %v838_v60  ;;  %v593_v61 = vunpack.c.1.s8 %v143_v3  ;;  %2261 = vmatmul.bf16.vlgmr.msra.gmra.mxu1 %v2446_v12  ;;  %v1483_v38 = vcvt.s32.f32 %v843_v0  ;;  %v198_v3 = vld [vmem:[#allocation2 + $0x4d0] sm:$0xff]  ;;  %v2682_v26 = vpop.f32.mrf.mxu1  ;;  %v2684_v60 = vpop.f32.mrf.mxu2 }
 0x177   :  { %2292 = vmatpush.bf16.msrb.mxu0 %v1683_v57  ;;  %v1763_v16 = vpack.c.bf16 %v1403_v63, %v1398_v59  ;;  %v668_v13 = vunpack.c.0.s8 %v163_v33  ;;  %v673_v15 = vunpack.c.1.s8 %v163_v33  ;;  %2274 = vmatmul.bf16.vlgmr.msra.gmra.mxu2 %v2447_v17  ;;  %v1228_v18 = vcvt.s32.f32 %v588_v11 }
 0x178   :  { %2305 = vmatpush.bf16.msrb.mxu1 %v1723_v2  ;;  %v1233_v19 = vcvt.s32.f32 %v593_v61  ;;  %v748_v20 = vunpack.c.0.s8 %v183_v36  ;;  %v753_v21 = vunpack.c.1.s8 %v183_v36  ;;  %v1803_v22 = vpack.c.bf16 %v1483_v38, %v1478_v4  ;;  %2287 = vmatmul.bf16.vlgmr.msra.gmra.mxu3 %v2448_v50  ;;  %v2686_v2 = vpop.f32.mrf.mxu3 }
 0x179   :  { %2318 = vmatpush.bf16.msrb.mxu2 %v1763_v16  ;;  %v1308_v44 = vcvt.s32.f32 %v668_v13  ;;  %v1313_v53 = vcvt.s32.f32 %v673_v15  ;;  %v828_v37 = vunpack.c.0.s8 %v2674_v30  ;;  %v833_v58 = vunpack.c.1.s8 %v2674_v30  ;;  %v153_v16 = vld [vmem:[#allocation2 + $0x368] sm:$0xff] }
 0x17a   :  { %v1678_v24 = vpack.c.bf16 %v1233_v19, %v1228_v18  ;;  %v1388_v25 = vcvt.s32.f32 %v748_v20  ;;  %v1393_v23 = vcvt.s32.f32 %v753_v21  ;;  %2331 = vmatpush.bf16.msrb.mxu3 %v1803_v22  ;;  %v578_v56 = vunpack.c.2.s8 %v138_v51  ;;  %v173_v18 = vld [vmem:[#allocation2 + $0x408] sm:$0xff]  ;;  %v2043_v50 = vpop.f32.mrf.mxu0 }
 0x17b   :  { %v1718_v10 = vpack.c.bf16 %v1313_v53, %v1308_v44  ;;  %v1468_v14 = vcvt.s32.f32 %v828_v37  ;;  %v583_v1 = vunpack.c.3.s8 %v138_v51  ;;  %v1473_v28 = vcvt.s32.f32 %v833_v58  ;;  %v193_v22 = vld [vmem:[#allocation2 + $0x4a8] sm:$0xff] }
 0x17c   :  { %2293 = vmatpush.bf16.msrb.mxu0 %v1678_v24  ;;  %v1758_v62 = vpack.c.bf16 %v1393_v23, %v1388_v25  ;;  %v658_v32 = vunpack.c.2.s8 %v158_v45  ;;  %v663_v29 = vunpack.c.3.s8 %v158_v45  ;;  %v1218_v33 = vcvt.s32.f32 %v578_v56 }
 0x17d   :  { %2306 = vmatpush.bf16.msrb.mxu1 %v1718_v10  ;;  %v1223_v34 = vcvt.s32.f32 %v583_v1  ;;  %v738_v27 = vunpack.c.2.s8 %v178_v55  ;;  %v743_v7 = vunpack.c.3.s8 %v178_v55  ;;  %v1798_v35 = vpack.c.bf16 %v1473_v28, %v1468_v14 }
 0x17e   :  { %2319 = vmatpush.bf16.msrb.mxu2 %v1758_v62  ;;  %v1298_v36 = vcvt.s32.f32 %v658_v32  ;;  %v1303_v39 = vcvt.s32.f32 %v663_v29  ;;  %v818_v40 = vunpack.c.2.s8 %v198_v3  ;;  %v823_v47 = vunpack.c.3.s8 %v198_v3  ;;  %v2056_v32 = vpop.f32.mrf.mxu1  ;;  %v2069_v29 = vpop.f32.mrf.mxu2 }
 0x17f   :  { %v1673_v5 = vpack.c.bf16 %v1223_v34, %v1218_v33  ;;  %v1378_v30 = vcvt.s32.f32 %v738_v27  ;;  %v1383_v42 = vcvt.s32.f32 %v743_v7  ;;  %2332 = vmatpush.bf16.msrb.mxu3 %v1798_v35  ;;  %v568_v9 = vunpack.c.0.s8 %v138_v51 }
 0x180   :  { %v1713_v43 = vpack.c.bf16 %v1303_v39, %v1298_v36  ;;  %v1458_v31 = vcvt.s32.f32 %v818_v40  ;;  %v573_v49 = vunpack.c.1.s8 %v138_v51  ;;  %v1463_v8 = vcvt.s32.f32 %v823_v47  ;;  %v2082_v35 = vpop.f32.mrf.mxu3 }
 0x181   :  { %2294 = vmatpush.bf16.msrb.mxu0 %v1673_v5  ;;  %v1753_v54 = vpack.c.bf16 %v1383_v42, %v1378_v30  ;;  %v648_v46 = vunpack.c.0.s8 %v158_v45  ;;  %v653_v52 = vunpack.c.1.s8 %v158_v45  ;;  %v1208_v57 = vcvt.s32.f32 %v568_v9 }
 0x182   :  { %2307 = vmatpush.bf16.msrb.mxu1 %v1713_v43  ;;  %v1213_v59 = vcvt.s32.f32 %v573_v49  ;;  %v728_v63 = vunpack.c.0.s8 %v178_v55  ;;  %v733_v0 = vunpack.c.1.s8 %v178_v55  ;;  %v1793_v4 = vpack.c.bf16 %v1463_v8, %v1458_v31  ;;  %v128_v31 = vld [vmem:[#allocation2 + $0x2a0] sm:$0xff] }
 0x183   :  { %2320 = vmatpush.bf16.msrb.mxu2 %v1753_v54  ;;  %v1288_v11 = vcvt.s32.f32 %v648_v46  ;;  %v1293_v61 = vcvt.s32.f32 %v653_v52  ;;  %v808_v12 = vunpack.c.0.s8 %v198_v3  ;;  %v813_v17 = vunpack.c.1.s8 %v198_v3  ;;  %v148_v46 = vld [vmem:[#allocation2 + $0x340] sm:$0xff] }
 0x184   :  { %v1668_v38 = vpack.c.bf16 %v1213_v59, %v1208_v57  ;;  %v1368_v13 = vcvt.s32.f32 %v728_v63  ;;  %v1373_v15 = vcvt.s32.f32 %v733_v0  ;;  %2333 = vmatpush.bf16.msrb.mxu3 %v1793_v4  ;;  %v558_v21 = vunpack.c.2.s8 %v133_v6  ;;  %v168_v0 = vld [vmem:[#allocation2 + $0x3e0] sm:$0xff] }
 0x185   :  { %v1708_v19 = vpack.c.bf16 %v1293_v61, %v1288_v11  ;;  %v1448_v20 = vcvt.s32.f32 %v808_v12  ;;  %v563_v51 = vunpack.c.3.s8 %v133_v6  ;;  %v1453_v53 = vcvt.s32.f32 %v813_v17 }
 0x186   :  { %2295 = vmatpush.bf16.msrb.mxu0 %v1668_v38  ;;  %v1748_v44 = vpack.c.bf16 %v1373_v15, %v1368_v13  ;;  %v638_v37 = vunpack.c.2.s8 %v153_v16  ;;  %v643_v45 = vunpack.c.3.s8 %v153_v16  ;;  %v1198_v24 = vcvt.s32.f32 %v558_v21 }
 0x187   :  { %2308 = vmatpush.bf16.msrb.mxu1 %v1708_v19  ;;  %v1203_v25 = vcvt.s32.f32 %v563_v51  ;;  %v718_v23 = vunpack.c.2.s8 %v173_v18  ;;  %v723_v58 = vunpack.c.3.s8 %v173_v18  ;;  %v1788_v55 = vpack.c.bf16 %v1453_v53, %v1448_v20  ;;  %v2690_v51 = vpop.f32.mrf.mxu1 }
 0x188   :  { %2321 = vmatpush.bf16.msrb.mxu2 %v1748_v44  ;;  %v1278_v10 = vcvt.s32.f32 %v638_v37  ;;  %v1283_v14 = vcvt.s32.f32 %v643_v45  ;;  %v798_v56 = vunpack.c.2.s8 %v193_v22  ;;  %v803_v28 = vunpack.c.3.s8 %v193_v22  ;;  %v2694_v50 = vpop.f32.mrf.mxu3 }
 0x189   :  { %v1663_v1 = vpack.c.bf16 %v1203_v25, %v1198_v24  ;;  %v1358_v3 = vcvt.s32.f32 %v718_v23  ;;  %v1363_v62 = vcvt.s32.f32 %v723_v58  ;;  %2334 = vmatpush.bf16.msrb.mxu3 %v1788_v55  ;;  %v548_v27 = vunpack.c.0.s8 %v133_v6 }
 0x18a   :  { %v1703_v33 = vpack.c.bf16 %v1283_v14, %v1278_v10  ;;  %v1438_v34 = vcvt.s32.f32 %v798_v56  ;;  %v553_v7 = vunpack.c.1.s8 %v133_v6  ;;  %v1443_v39 = vcvt.s32.f32 %v803_v28  ;;  %v2688_v6 = vpop.f32.mrf.mxu0 }
 0x18b   :  { %2296 = vmatpush.bf16.msrb.mxu0 %v1663_v1  ;;  %v1743_v36 = vpack.c.bf16 %v1363_v62, %v1358_v3  ;;  %v628_v40 = vunpack.c.0.s8 %v153_v16  ;;  %v633_v5 = vunpack.c.1.s8 %v153_v16  ;;  %v1188_v30 = vcvt.s32.f32 %v548_v27  ;;  %v188_v16 = vld [vmem:[#allocation2 + $0x480] sm:$0xff] }
 0x18c   :  { %2309 = vmatpush.bf16.msrb.mxu1 %v1703_v33  ;;  %v1193_v42 = vcvt.s32.f32 %v553_v7  ;;  %v708_v47 = vunpack.c.0.s8 %v173_v18  ;;  %v713_v43 = vunpack.c.1.s8 %v173_v18  ;;  %v1783_v9 = vpack.c.bf16 %v1443_v39, %v1438_v34 }
 0x18d   :  { %2322 = vmatpush.bf16.msrb.mxu2 %v1743_v36  ;;  %v1268_v49 = vcvt.s32.f32 %v628_v40  ;;  %v1273_v54 = vcvt.s32.f32 %v633_v5  ;;  %v788_v8 = vunpack.c.0.s8 %v193_v22  ;;  %v793_v63 = vunpack.c.1.s8 %v193_v22  ;;  %v2692_v22 = vpop.f32.mrf.mxu2 }
 0x18e   :  { %v1658_v52 = vpack.c.bf16 %v1193_v42, %v1188_v30  ;;  %v1348_v57 = vcvt.s32.f32 %v708_v47  ;;  %v1353_v59 = vcvt.s32.f32 %v713_v43  ;;  %2335 = vmatpush.bf16.msrb.mxu3 %v1783_v9  ;;  %v538_v61 = vunpack.c.2.s8 %v128_v31 }
 0x18f   :  { %v1698_v4 = vpack.c.bf16 %v1273_v54, %v1268_v49  ;;  %v1428_v11 = vcvt.s32.f32 %v788_v8  ;;  %v543_v12 = vunpack.c.3.s8 %v128_v31  ;;  %v1433_v13 = vcvt.s32.f32 %v793_v63  ;;  %v2108_v9 = vpop.f32.mrf.mxu1 }
 0x190   :  { %2297 = vmatpush.bf16.msrb.mxu0 %v1658_v52  ;;  %v1738_v38 = vpack.c.bf16 %v1353_v59, %v1348_v57  ;;  %v618_v15 = vunpack.c.2.s8 %v148_v46  ;;  %v623_v17 = vunpack.c.3.s8 %v148_v46  ;;  %v1178_v18 = vcvt.s32.f32 %v538_v61  ;;  %v2449_v59 = vld [vmem:[#allocation1 + $0x24] sm:$0xff] }
 0x191   :  { %2310 = vmatpush.bf16.msrb.mxu1 %v1698_v4  ;;  %v1183_v19 = vcvt.s32.f32 %v543_v12  ;;  %v698_v20 = vunpack.c.2.s8 %v168_v0  ;;  %v703_v21 = vunpack.c.3.s8 %v168_v0  ;;  %v1778_v44 = vpack.c.bf16 %v1433_v13, %v1428_v11 }
 0x192   :  { %2323 = vmatpush.bf16.msrb.mxu2 %v1738_v38  ;;  %v1258_v53 = vcvt.s32.f32 %v618_v15  ;;  %v1263_v37 = vcvt.s32.f32 %v623_v17  ;;  %v778_v45 = vunpack.c.2.s8 %v188_v16  ;;  %v783_v58 = vunpack.c.3.s8 %v188_v16  ;;  %v2095_v27 = vpop.f32.mrf.mxu0 }
 0x193   :  { %v1653_v24 = vpack.c.bf16 %v1183_v19, %v1178_v18  ;;  %v1338_v25 = vcvt.s32.f32 %v698_v20  ;;  %v1343_v23 = vcvt.s32.f32 %v703_v21  ;;  %2336 = vmatpush.bf16.msrb.mxu3 %v1778_v44  ;;  %v528_v14 = vunpack.c.0.s8 %v128_v31  ;;  %v2707_v21 = vld [vmem:[%s2747_s2] sm:$0x1f] }
 0x194   :  { %v1693_v55 = vpack.c.bf16 %v1263_v37, %v1258_v53  ;;  %v1418_v10 = vcvt.s32.f32 %v778_v45  ;;  %v533_v56 = vunpack.c.1.s8 %v128_v31  ;;  %v1423_v3 = vcvt.s32.f32 %v783_v58 }
 0x195   :  { %2298 = vmatpush.bf16.msrb.mxu0 %v1653_v24  ;;  %v1733_v1 = vpack.c.bf16 %v1343_v23, %v1338_v25  ;;  %v608_v62 = vunpack.c.0.s8 %v148_v46  ;;  %v613_v28 = vunpack.c.1.s8 %v148_v46  ;;  %v1168_v32 = vcvt.s32.f32 %v528_v14  ;;  %v2121_v49 = vpop.f32.mrf.mxu2  ;;  %v2134_v46 = vpop.f32.mrf.mxu3  ;;  %v2714_v24 = vld [vmem:[%s2748_s3] sm:$0x1f] }
 0x196   :  { %2311 = vmatpush.bf16.msrb.mxu1 %v1693_v55  ;;  %v1173_v29 = vcvt.s32.f32 %v533_v56  ;;  %v688_v33 = vunpack.c.0.s8 %v168_v0  ;;  %v693_v34 = vunpack.c.1.s8 %v168_v0  ;;  %v1773_v7 = vpack.c.bf16 %v1423_v3, %v1418_v10  ;;  %v2450_v0 = vld [vmem:[#allocation1 + $0x2d] sm:$0xff] }
 0x197   :  { %2324 = vmatpush.bf16.msrb.mxu2 %v1733_v1  ;;  %v1248_v35 = vcvt.s32.f32 %v608_v62  ;;  %v1253_v36 = vcvt.s32.f32 %v613_v28  ;;  %v768_v39 = vunpack.c.0.s8 %v188_v16  ;;  %v773_v42 = vunpack.c.1.s8 %v188_v16 }
 0x198   :  { %v1648_v40 = vpack.c.bf16 %v1173_v29, %v1168_v32  ;;  %v1328_v5 = vcvt.s32.f32 %v688_v33  ;;  %v1333_v30 = vcvt.s32.f32 %v693_v34  ;;  %2337 = vmatpush.bf16.msrb.mxu3 %v1773_v7  ;;  %v2055_v31 = vadd.f32 %v2682_v26, %v2680_v41  ;;  %v2451_v41 = vld [vmem:[#allocation1 + $0x36] sm:$0xff]  ;;  %v2452_v26 = vld [vmem:[#allocation1 + $0x3f] sm:$0xff] }
 0x199   :  { %v1688_v47 = vpack.c.bf16 %v1253_v36, %v1248_v35  ;;  %v1408_v43 = vcvt.s32.f32 %v768_v39  ;;  %v1413_v8 = vcvt.s32.f32 %v773_v42  ;;  %v2482_v15 = vmov 0.0  }
 0x19a   :  { %2299 = vmatpush.bf16.msrb.mxu0 %v1648_v40  ;;  %v1728_v54 = vpack.c.bf16 %v1333_v30, %v1328_v5  ;;  %v2068_v52 = vadd.f32 %v2684_v60, %v2055_v31  ;;  %38 = vst [vmem:[%s2749_s4 + $0x8] sm:$0x3] %v2482_v15  ;;  %v2370_v45 = vperm.slane %v2707_v21, 1  ;;  %v2371_v23 = vperm.slane %v2707_v21, 2 }
 0x19b   :  { %2312 = vmatpush.bf16.msrb.mxu1 %v1688_v47  ;;  %v1768_v57 = vpack.c.bf16 %v1413_v8, %v1408_v43  ;;  %v2372_v58 = vperm.slane %v2707_v21, 3  ;;  %v2387_v55 = vperm.slane %v2714_v24, 1  ;;  %v2389_v10 = vperm.slane %v2714_v24, 3 }
 0x19c   :  { %2325 = vmatpush.bf16.msrb.mxu2 %v1728_v54  ;;  %v2081_v63 = vadd.f32 %v2686_v2, %v2068_v52  ;;  %v2369_v14 = vperm.slane %v2707_v21, 0  ;;  %v2375_v56 = vrot.slane %v2370_v45, 6  ;;  %v2376_v32 = vrot.slane %v2371_v23, 4 }
 0x19d   :  { %2300 = vmatmul.bf16.vlgmr.msrb.gmra.mxu0 %v2449_v59  ;;  %2338 = vmatpush.bf16.msrb.mxu3 %v1768_v57  ;;  %v2377_v29 = vrot.slane %v2372_v58, 2  ;;  %v2386_v34 = vperm.slane %v2714_v24, 0  ;;  %v2392_v27 = vrot.slane %v2387_v55, 6  ;;  %v2394_v36 = vrot.slane %v2389_v10, 2 }
 0x19e   :  { %2313 = vmatmul.bf16.vlgmr.msrb.gmra.mxu1 %v2450_v0  ;;  %v2094_v18 = vadd.f32 %v2688_v6, %v2081_v63  ;;  %v2378_v39 = vsel %vm2351_vm0, %v2369_v14, %v2375_v56  ;;  %vm2355_vm2 = vcmask 1043456   ;;  %v2390_v10 = vperm.slane %v2714_v24, 4 }
 0x19f   :  { %v2145_v4 = vpop.f32.mrf.mxu0  ;;  %2326 = vmatmul.bf16.vlgmr.msrb.gmra.mxu2 %v2451_v41  ;;  %v2379_v30 = vsel %vm2353_vm1, %v2376_v32, %v2377_v29 }
 0x1a0   :  { %2339 = vmatmul.bf16.vlgmr.msrb.gmra.mxu3 %v2452_v26  ;;  %v2107_v44 = vadd.f32 %v2690_v51, %v2094_v18  ;;  %v2388_v51 = vperm.slane %v2714_v24, 2  ;;  %v2380_v31 = vsel %vm2355_vm2, %v2378_v39, %v2379_v30 }
 0x1a1   :  { %v2158_v11 = vpop.f32.mrf.mxu1  ;;  %v1805_v45 = vld [vmem:[%s2749_s4 + $0x8] sm:$0x3] }
 0x1a2   :  { %v2159_v2 = vadd.f32 %v2158_v11, %v2145_v4  ;;  %v2120_v6 = vadd.f32 %v2692_v22, %v2107_v44  ;;  %v2393_v35 = vrot.slane %v2388_v51, 4  ;;  %v2373_v51 = vperm.slane %v2707_v21, 4 }
 0x1a4   :  { %v2133_v62 = vadd.f32 %v2694_v50, %v2120_v6  ;;  %v2395_v50 = vsel %vm2351_vm0, %v2386_v34, %v2392_v27  ;;  %v2396_v47 = vsel %vm2353_vm1, %v2393_v35, %v2394_v36 }
 0x1a5   :  { %v2397_v54 = vsel %vm2355_vm2, %v2395_v50, %v2396_v47 }
 0x1a6   :  { %v2349_v40 = vrot.slane %v2133_v62, 4 }
 0x1a7   :  { %v2147_v12 = vpop.f32.mrf.mxu0 }
 0x1a8   :  { %v2171_v61 = vpop.f32.mrf.mxu2 }
 0x1a9   :  { %v2184_v16 = vpop.f32.mrf.mxu3  ;;  %v2160_v38 = vpop.f32.mrf.mxu1  ;;  %v2172_v17 = vadd.f32 %v2171_v61, %v2159_v2 }
 0x1ab   :  { %v2185_v19 = vadd.f32 %v2184_v16, %v2172_v17 }
 0x1b0   :  { %v2173_v60 = vpop.f32.mrf.mxu2 }
 0x1b1   :  { %v2186_v13 = vpop.f32.mrf.mxu3 }
 0x1c8   :  { %v2197_v20 = vpop.f32.mrf.mxu0 }
 0x1c9   :  { %v2198_v53 = vadd.f32 %v2197_v20, %v2185_v19  ;;  %v2210_v37 = vpop.f32.mrf.mxu1 }
 0x1cb   :  { %v2211_v25 = vadd.f32 %v2210_v37, %v2198_v53 }
 0x1d0   :  { %v2223_v1 = vpop.f32.mrf.mxu2  ;;  %v2199_v3 = vpop.f32.mrf.mxu0 }
 0x1d1   :  { %v2224_v28 = vadd.f32 %v2223_v1, %v2211_v25  ;;  %v2236_v22 = vpop.f32.mrf.mxu3  ;;  %v2212_v33 = vpop.f32.mrf.mxu1 }
 0x1d3   :  { %v2237_v7 = vadd.f32 %v2236_v22, %v2224_v28 }
 0x1d5   :  { %v2350_v5 = vrot.slane %v2237_v7, 2 }
 0x1d7   :  { %v2354_v42 = vsel %vm2353_vm1, %v2349_v40, %v2350_v5 }
 0x1d8   :  { %v2356_v43 = vsel %vm2355_vm2, %v2672_v48, %v2354_v42  ;;  %v2225_v9 = vpop.f32.mrf.mxu2 }
 0x1d9   :  { %v2238_v49 = vpop.f32.mrf.mxu3  ;;  %v2382_v8 = vmul.f32 %v2380_v31, %v2356_v43 }
 0x1db   :  { %v2399_v46 = vadd.f32 %v2397_v54, %v2382_v8 }
 0x1dd   :  { %v2423_v52 = vclamps-f32 %v2399_v46, 40.0 }
 0x1df   :  { %v2405_v57 = vsub.f32 0.0, %v2423_v52 }
 0x1e1   :  { %v2407_v59 = vmul.f32 1.442695, %v2405_v57 }
 0x1e3   :  { %2429 = vpow2.f32 %v2407_v59 }
 0x1e9   :  { %v2430_v63 = vpop.eup %2429 }
 0x1ea   :  { %v2411_v0 = vadd.f32 1.0, %v2430_v63 }
 0x1ec   :  { %2431 = vrcp.f32 %v2411_v0 }
 0x1f2   :  { %v2432_v4 = vpop.eup %2431  ;;  %v2249_v41 = vpop.f32.mrf.mxu0 }
 0x1f3   :  { %2415 = vst [vmem:[%s2749_s4] sm:$0xff] %v2432_v4  ;;  %v2262_v48 = vpop.f32.mrf.mxu1 }
 0x1f4   :  { %v2263_v60 = vadd.f32 %v2262_v48, %v2249_v41 }
 0x1fa   :  { %v2275_v26 = vpop.f32.mrf.mxu2  ;;  %v2251_v11 = vpop.f32.mrf.mxu0 }
 0x1fb   :  { %v2264_v61 = vpop.f32.mrf.mxu1  ;;  %v2288_v12 = vpop.f32.mrf.mxu3  ;;  %v2276_v13 = vadd.f32 %v2275_v26, %v2263_v60 }
 0x1fd   :  { %v2289_v2 = vadd.f32 %v2288_v12, %v2276_v13 }
 0x202   :  { %v2277_v16 = vpop.f32.mrf.mxu2 }
 0x203   :  { %v2290_v38 = vpop.f32.mrf.mxu3 }
 0x21a   :  { %v2301_v15 = vpop.f32.mrf.mxu0 }
 0x21b   :  { %v2314_v17 = vpop.f32.mrf.mxu1  ;;  %v2302_v18 = vadd.f32 %v2301_v15, %v2289_v2 }
 0x21d   :  { %v2315_v19 = vadd.f32 %v2314_v17, %v2302_v18 }
 0x222   :  { %v2327_v20 = vpop.f32.mrf.mxu2  ;;  %v2303_v44 = vpop.f32.mrf.mxu0 }
 0x223   :  { %v2328_v53 = vadd.f32 %v2327_v20, %v2315_v19  ;;  %v2316_v37 = vpop.f32.mrf.mxu1  ;;  %v2340_v6 = vpop.f32.mrf.mxu3 }
 0x225   :  { %v2341_v25 = vadd.f32 %v2340_v6, %v2328_v53 }
 0x227   :  { %v2359_v23 = vadd.f32 %v2341_v25, %v1805_v45 }
 0x229   :  { %2361 = vst [vmem:[%s2749_s4 + $0x8] sm:$0x3] %v2359_v23 }
 0x22a   :  { %v2329_v58 = vpop.f32.mrf.mxu2 }
 0x22b   :  { %v2342_v55 = vpop.f32.mrf.mxu3 }
 0x230   :  { %v2366_v14 = vld [vmem:[%s2749_s4 + $0x8] sm:$0x3] }
 0x231   :  { %v2383_v56 = vmul.f32 %v2373_v51, %v2366_v14 }
 0x233   :  { %v2400_v1 = vadd.f32 %v2390_v10, %v2383_v56 }
 0x235   :  { %v2424_v3 = vclamps-f32 %v2400_v1, 40.0 }
 0x237   :  { %v2406_v62 = vsub.f32 0.0, %v2424_v3 }
 0x239   :  { %v2409_v28 = vmul.f32 1.442695, %v2406_v62 }
 0x23b   :  { %2433 = vpow2.f32 %v2409_v28 }
 0x241   :  { %v2434_v22 = vpop.eup %2433 }
 0x242   :  { %v2412_v32 = vadd.f32 1.0, %v2434_v22 }
 0x244   :  { %2435 = vrcp.f32 %v2412_v32 }
 0x24a   :  { %v2436_v29 = vpop.eup %2435 }
 0x24b   :  { %2416 = vst [vmem:[%s2749_s4 + $0x8] sm:$0x3] %v2436_v29 }
 0x24c   :  { %2421 = vsyncpa [#allocation3], 1 }

// kernel: _lambda_.11
= control target key start
LH: loop header
LB: loop body
LE: loop exit
PB: predicated region body
PF: predicated region fallthrough
CT: control target
= control target key end

     0   :  { %9 = vsyncpa [#allocation3], 0  ;;  %s2810_s0 = inlined_call_operand.vmem [shape: bf16[2,640], index: 0, kind: input, shape index: {}]   ;;  %s2811_s1 = inlined_call_operand.hbm [shape: s8[640,1024], index: 1, kind: input, shape index: {}]   ;;  %s2812_s2 = inlined_call_operand.vmem [shape: f32[1,1024], index: 2, kind: input, shape index: {}]   ;;  %s2813_s3 = inlined_call_operand.vmem [shape: f32[1,1024], index: 3, kind: input, shape index: {}]   ;;  %s2814_s4 = inlined_call_operand.hbm [shape: f32[2,1024], index: 4, kind: output, shape index: {}]  }
   0x1   :  { %10 = vsyncpa [#allocation4], 0  ;;  %s17_s17 = sshll.u32 %s2811_s1, 4  ;;  %s2537_s18 = smov [#allocation2]   ;;  %s18_s17 = int_to_ptr.hbm [resolvable:$true] %s17_s17 }
   0x2   :  { %s19_s19 = sshll.u32 %s2537_s18, 4  ;;  %s2538_s20 = smov 1024   ;;  %s20_s19 = int_to_ptr.vmem [resolvable:$true] %s19_s19 }
   0x3   :  { %s2539_s21 = smov 64  }
   0x4   :  { %25 = dma.hbm_to_vmem [thread:$0]  %s18_s17, 20480, %s20_s19, [#allocation3], %s2538_s20, %s2538_s20, %s2539_s21  }
   0x5   :  { %2533 = dma.done.wait [#allocation3], 20480  }
   0x6   :  { %2534 = vsyncadd [#allocation3], 4294946816  ;;  %v69_v0 = vld [vmem:[#allocation2 + $0xc0] sm:$0xff]  ;;  %vm2353_vm0 = vcmask 1041408   ;;  %vm2355_vm1 = vcmask 1045508   ;;  %vm2357_vm2 = vcmask 1043456  }
   0x7   :  { %v101_v1 = vld [vmem:[#allocation2 + $0x1c0] sm:$0xff]  ;;  %v317_v3 = vunpack.c.2.s8 %v69_v0  ;;  %v325_v4 = vunpack.c.3.s8 %v69_v0  ;;  %v301_v22 = vunpack.c.0.s8 %v69_v0  ;;  %v309_v23 = vunpack.c.1.s8 %v69_v0  ;;  %s2448_s28 = sshll.u32 %s2814_s4, 4  ;;  %s2449_s28 = int_to_ptr.hbm [resolvable:$true] %s2448_s28 }
   0x8   :  { %v133_v2 = vld [vmem:[#allocation2 + $0x2c0] sm:$0xff]  ;;  %v445_v5 = vunpack.c.2.s8 %v101_v1  ;;  %v453_v6 = vunpack.c.3.s8 %v101_v1  ;;  %v429_v26 = vunpack.c.0.s8 %v101_v1  ;;  %v437_v27 = vunpack.c.1.s8 %v101_v1 }
   0x9   :  { %v165_v7 = vld [vmem:[#allocation2 + $0x3c0] sm:$0xff]  ;;  %v573_v8 = vunpack.c.2.s8 %v133_v2  ;;  %v581_v9 = vunpack.c.3.s8 %v133_v2  ;;  %v957_v12 = vcvt.s32.f32 %v317_v3  ;;  %v965_v13 = vcvt.s32.f32 %v325_v4 }
   0xa   :  { %v701_v10 = vunpack.c.2.s8 %v165_v7  ;;  %v709_v11 = vunpack.c.3.s8 %v165_v7  ;;  %v1085_v14 = vcvt.s32.f32 %v445_v5  ;;  %v1093_v15 = vcvt.s32.f32 %v453_v6  ;;  %v61_v28 = vld [vmem:[#allocation2 + $0x80] sm:$0xff] }
   0xb   :  { %v1213_v16 = vcvt.s32.f32 %v573_v8  ;;  %v1221_v17 = vcvt.s32.f32 %v581_v9  ;;  %v1541_v20 = vpack.c.bf16 %v965_v13, %v957_v12  ;;  %v941_v29 = vcvt.s32.f32 %v301_v22  ;;  %v93_v37 = vld [vmem:[#allocation2 + $0x180] sm:$0xff] }
   0xc   :  { %v1341_v18 = vcvt.s32.f32 %v701_v10  ;;  %v1349_v19 = vcvt.s32.f32 %v709_v11  ;;  %v1605_v21 = vpack.c.bf16 %v1093_v15, %v1085_v14  ;;  %v949_v30 = vcvt.s32.f32 %v309_v23  ;;  %v125_v42 = vld [vmem:[#allocation2 + $0x280] sm:$0xff] }
   0xd   :  { %v1669_v24 = vpack.c.bf16 %v1221_v17, %v1213_v16  ;;  %1819 = vmatpush.bf16.msra.mxu0 %v1541_v20  ;;  %v557_v31 = vunpack.c.0.s8 %v133_v2  ;;  %v565_v32 = vunpack.c.1.s8 %v133_v2  ;;  %v1069_v33 = vcvt.s32.f32 %v429_v26  ;;  %v157_v47 = vld [vmem:[#allocation2 + $0x380] sm:$0xff] }
   0xe   :  { %v1733_v25 = vpack.c.bf16 %v1349_v19, %v1341_v18  ;;  %1832 = vmatpush.bf16.msra.mxu1 %v1605_v21  ;;  %v1077_v34 = vcvt.s32.f32 %v437_v27  ;;  %v685_v35 = vunpack.c.0.s8 %v165_v7  ;;  %v693_v36 = vunpack.c.1.s8 %v165_v7  ;;  %v53_v8 = vld [vmem:[#allocation2 + $0x40] sm:$0xff] }
   0xf   :  { %1845 = vmatpush.bf16.msra.mxu2 %v1669_v24  ;;  %v1533_v38 = vpack.c.bf16 %v949_v30, %v941_v29  ;;  %v1197_v39 = vcvt.s32.f32 %v557_v31  ;;  %v1205_v40 = vcvt.s32.f32 %v565_v32  ;;  %v285_v41 = vunpack.c.2.s8 %v61_v28  ;;  %v85_v17 = vld [vmem:[#allocation2 + $0x140] sm:$0xff] }
  0x10   :  { %1858 = vmatpush.bf16.msra.mxu3 %v1733_v25  ;;  %v1597_v43 = vpack.c.bf16 %v1077_v34, %v1069_v33  ;;  %v1325_v44 = vcvt.s32.f32 %v685_v35  ;;  %v1333_v45 = vcvt.s32.f32 %v693_v36  ;;  %v293_v46 = vunpack.c.3.s8 %v61_v28  ;;  %v117_v22 = vld [vmem:[#allocation2 + $0x240] sm:$0xff] }
  0x11   :  { %1820 = vmatpush.bf16.msra.mxu0 %v1533_v38  ;;  %v1661_v48 = vpack.c.bf16 %v1205_v40, %v1197_v39  ;;  %v925_v49 = vcvt.s32.f32 %v285_v41  ;;  %v413_v50 = vunpack.c.2.s8 %v93_v37  ;;  %v421_v51 = vunpack.c.3.s8 %v93_v37  ;;  %v149_v27 = vld [vmem:[#allocation2 + $0x340] sm:$0xff] }
  0x12   :  { %1833 = vmatpush.bf16.msra.mxu1 %v1597_v43  ;;  %v1725_v52 = vpack.c.bf16 %v1333_v45, %v1325_v44  ;;  %v933_v53 = vcvt.s32.f32 %v293_v46  ;;  %v541_v54 = vunpack.c.2.s8 %v125_v42  ;;  %v549_v55 = vunpack.c.3.s8 %v125_v42 }
  0x13   :  { %1846 = vmatpush.bf16.msra.mxu2 %v1661_v48  ;;  %v1053_v56 = vcvt.s32.f32 %v413_v50  ;;  %v1061_v57 = vcvt.s32.f32 %v421_v51  ;;  %v669_v58 = vunpack.c.2.s8 %v157_v47  ;;  %v677_v59 = vunpack.c.3.s8 %v157_v47 }
  0x14   :  { %1859 = vmatpush.bf16.msra.mxu3 %v1725_v52  ;;  %v1525_v60 = vpack.c.bf16 %v933_v53, %v925_v49  ;;  %v1181_v61 = vcvt.s32.f32 %v541_v54  ;;  %v1189_v62 = vcvt.s32.f32 %v549_v55  ;;  %v269_v63 = vunpack.c.0.s8 %v61_v28  ;;  %v45_v52 = vld [vmem:[#allocation2] sm:$0xff] }
  0x15   :  { %v1589_v0 = vpack.c.bf16 %v1061_v57, %v1053_v56  ;;  %v1309_v1 = vcvt.s32.f32 %v669_v58  ;;  %v1317_v2 = vcvt.s32.f32 %v677_v59  ;;  %v277_v3 = vunpack.c.1.s8 %v61_v28 }
  0x16   :  { %1821 = vmatpush.bf16.msra.mxu0 %v1525_v60  ;;  %v1653_v4 = vpack.c.bf16 %v1189_v62, %v1181_v61  ;;  %v909_v5 = vcvt.s32.f32 %v269_v63  ;;  %v397_v6 = vunpack.c.0.s8 %v93_v37  ;;  %v405_v7 = vunpack.c.1.s8 %v93_v37  ;;  %v77_v61 = vld [vmem:[#allocation2 + $0x100] sm:$0xff] }
  0x17   :  { %1834 = vmatpush.bf16.msra.mxu1 %v1589_v0  ;;  %v1717_v9 = vpack.c.bf16 %v1317_v2, %v1309_v1  ;;  %v917_v10 = vcvt.s32.f32 %v277_v3  ;;  %v525_v11 = vunpack.c.0.s8 %v125_v42  ;;  %v533_v12 = vunpack.c.1.s8 %v125_v42  ;;  %v109_v2 = vld [vmem:[#allocation2 + $0x200] sm:$0xff] }
  0x18   :  { %1847 = vmatpush.bf16.msra.mxu2 %v1653_v4  ;;  %v1037_v13 = vcvt.s32.f32 %v397_v6  ;;  %v1045_v14 = vcvt.s32.f32 %v405_v7  ;;  %v653_v15 = vunpack.c.0.s8 %v157_v47  ;;  %v661_v16 = vunpack.c.1.s8 %v157_v47  ;;  %v141_v7 = vld [vmem:[#allocation2 + $0x300] sm:$0xff] }
  0x19   :  { %1860 = vmatpush.bf16.msra.mxu3 %v1717_v9  ;;  %v1517_v18 = vpack.c.bf16 %v917_v10, %v909_v5  ;;  %v1165_v19 = vcvt.s32.f32 %v525_v11  ;;  %v1173_v20 = vcvt.s32.f32 %v533_v12  ;;  %v253_v21 = vunpack.c.2.s8 %v53_v8 }
  0x1a   :  { %v1581_v23 = vpack.c.bf16 %v1045_v14, %v1037_v13  ;;  %v1293_v24 = vcvt.s32.f32 %v653_v15  ;;  %v1301_v25 = vcvt.s32.f32 %v661_v16  ;;  %v261_v26 = vunpack.c.3.s8 %v53_v8 }
  0x1b   :  { %1822 = vmatpush.bf16.msra.mxu0 %v1517_v18  ;;  %v1645_v28 = vpack.c.bf16 %v1173_v20, %v1165_v19  ;;  %v893_v29 = vcvt.s32.f32 %v253_v21  ;;  %v381_v30 = vunpack.c.2.s8 %v85_v17  ;;  %v389_v31 = vunpack.c.3.s8 %v85_v17 }
  0x1c   :  { %1835 = vmatpush.bf16.msra.mxu1 %v1581_v23  ;;  %v1709_v32 = vpack.c.bf16 %v1301_v25, %v1293_v24  ;;  %v901_v33 = vcvt.s32.f32 %v261_v26  ;;  %v509_v34 = vunpack.c.2.s8 %v117_v22  ;;  %v517_v35 = vunpack.c.3.s8 %v117_v22  ;;  %v44_v24 = vld [vmem:[%s2810_s0] sm:$0x1f] }
  0x1d   :  { %1848 = vmatpush.bf16.msra.mxu2 %v1645_v28  ;;  %v1021_v36 = vcvt.s32.f32 %v381_v30  ;;  %v1029_v37 = vcvt.s32.f32 %v389_v31  ;;  %v637_v38 = vunpack.c.2.s8 %v149_v27  ;;  %v645_v39 = vunpack.c.3.s8 %v149_v27  ;;  %1808 = vst [vmem:[#allocation1] ss:$9 sm:$0xff] %v44_v24 }
  0x1e   :  { %1861 = vmatpush.bf16.msra.mxu3 %v1709_v32  ;;  %v1509_v40 = vpack.c.bf16 %v901_v33, %v893_v29  ;;  %v1149_v41 = vcvt.s32.f32 %v509_v34  ;;  %v1157_v42 = vcvt.s32.f32 %v517_v35  ;;  %v237_v43 = vunpack.c.0.s8 %v53_v8  ;;  %v197_v33 = vld [vmem:[#allocation2 + $0x4c0] sm:$0xff] }
  0x1f   :  { %v1573_v44 = vpack.c.bf16 %v1029_v37, %v1021_v36  ;;  %v1277_v45 = vcvt.s32.f32 %v637_v38  ;;  %v1285_v46 = vcvt.s32.f32 %v645_v39  ;;  %v245_v47 = vunpack.c.1.s8 %v53_v8 }
  0x20   :  { %1823 = vmatpush.bf16.msra.mxu0 %v1509_v40  ;;  %v1637_v48 = vpack.c.bf16 %v1157_v42, %v1149_v41  ;;  %v877_v49 = vcvt.s32.f32 %v237_v43  ;;  %v365_v50 = vunpack.c.0.s8 %v85_v17  ;;  %v373_v51 = vunpack.c.1.s8 %v85_v17  ;;  %v70_v42 = vld [vmem:[#allocation2 + $0xc8] sm:$0xff] }
  0x21   :  { %1836 = vmatpush.bf16.msra.mxu1 %v1573_v44  ;;  %v1701_v53 = vpack.c.bf16 %v1285_v46, %v1277_v45  ;;  %v885_v54 = vcvt.s32.f32 %v245_v47  ;;  %v493_v55 = vunpack.c.0.s8 %v117_v22  ;;  %v501_v56 = vunpack.c.1.s8 %v117_v22  ;;  %v102_v47 = vld [vmem:[#allocation2 + $0x1c8] sm:$0xff] }
  0x22   :  { %1849 = vmatpush.bf16.msra.mxu2 %v1637_v48  ;;  %v1005_v57 = vcvt.s32.f32 %v365_v50  ;;  %v1013_v58 = vcvt.s32.f32 %v373_v51  ;;  %v621_v59 = vunpack.c.0.s8 %v149_v27  ;;  %v629_v60 = vunpack.c.1.s8 %v149_v27 }
  0x23   :  { %1862 = vmatpush.bf16.msra.mxu3 %v1701_v53  ;;  %v1501_v62 = vpack.c.bf16 %v885_v54, %v877_v49  ;;  %v1133_v63 = vcvt.s32.f32 %v493_v55  ;;  %v1141_v0 = vcvt.s32.f32 %v501_v56  ;;  %v221_v1 = vunpack.c.2.s8 %v45_v52 }
  0x24   :  { %v1565_v3 = vpack.c.bf16 %v1013_v58, %v1005_v57  ;;  %v1261_v4 = vcvt.s32.f32 %v621_v59  ;;  %v1269_v5 = vcvt.s32.f32 %v629_v60  ;;  %v229_v6 = vunpack.c.3.s8 %v45_v52 }
  0x25   :  { %1824 = vmatpush.bf16.msra.mxu0 %v1501_v62  ;;  %v1629_v8 = vpack.c.bf16 %v1141_v0, %v1133_v63  ;;  %v861_v9 = vcvt.s32.f32 %v221_v1  ;;  %v349_v10 = vunpack.c.2.s8 %v77_v61  ;;  %v357_v11 = vunpack.c.3.s8 %v77_v61 }
  0x26   :  { %1837 = vmatpush.bf16.msra.mxu1 %v1565_v3  ;;  %v1693_v12 = vpack.c.bf16 %v1269_v5, %v1261_v4  ;;  %v869_v13 = vcvt.s32.f32 %v229_v6  ;;  %v477_v14 = vunpack.c.2.s8 %v109_v2  ;;  %v485_v15 = vunpack.c.3.s8 %v109_v2 }
  0x27   :  { %1850 = vmatpush.bf16.msra.mxu2 %v1629_v8  ;;  %v989_v16 = vcvt.s32.f32 %v349_v10  ;;  %v997_v17 = vcvt.s32.f32 %v357_v11  ;;  %v605_v18 = vunpack.c.2.s8 %v141_v7  ;;  %v613_v19 = vunpack.c.3.s8 %v141_v7 }
  0x28   :  { %1863 = vmatpush.bf16.msra.mxu3 %v1693_v12  ;;  %v1493_v20 = vpack.c.bf16 %v869_v13, %v861_v9  ;;  %v1117_v21 = vcvt.s32.f32 %v477_v14  ;;  %v1125_v22 = vcvt.s32.f32 %v485_v15  ;;  %v205_v23 = vunpack.c.0.s8 %v45_v52 }
  0x29   :  { %v1557_v25 = vpack.c.bf16 %v997_v17, %v989_v16  ;;  %v1245_v26 = vcvt.s32.f32 %v605_v18  ;;  %v1253_v27 = vcvt.s32.f32 %v613_v19  ;;  %v213_v28 = vunpack.c.1.s8 %v45_v52  ;;  %v134_v52 = vld [vmem:[#allocation2 + $0x2c8] sm:$0xff]  ;;  %v189_v16 = vld [vmem:[#allocation2 + $0x480] sm:$0xff] }
  0x2a   :  { %1825 = vmatpush.bf16.msra.mxu0 %v1493_v20  ;;  %v1621_v29 = vpack.c.bf16 %v1125_v22, %v1117_v21  ;;  %v845_v30 = vcvt.s32.f32 %v205_v23  ;;  %v333_v31 = vunpack.c.0.s8 %v77_v61  ;;  %v341_v32 = vunpack.c.1.s8 %v77_v61  ;;  %v2572_v61 = vld [vmem:[#allocation1] sm:$0xff]  ;;  %v2581_v21 = vld [vmem:[#allocation1 + $0x9] sm:$0xff] }
  0x2b   :  { %1838 = vmatpush.bf16.msra.mxu1 %v1557_v25  ;;  %v1685_v34 = vpack.c.bf16 %v1253_v27, %v1245_v26  ;;  %v853_v35 = vcvt.s32.f32 %v213_v28  ;;  %v461_v36 = vunpack.c.0.s8 %v109_v2  ;;  %v469_v37 = vunpack.c.1.s8 %v109_v2  ;;  %v2574_v2 = vld [vmem:[#allocation1 + $0x12] sm:$0xff] }
  0x2c   :  { %1851 = vmatpush.bf16.msra.mxu2 %v1621_v29  ;;  %v973_v38 = vcvt.s32.f32 %v333_v31  ;;  %v981_v39 = vcvt.s32.f32 %v341_v32  ;;  %v589_v40 = vunpack.c.0.s8 %v141_v7  ;;  %v597_v41 = vunpack.c.1.s8 %v141_v7  ;;  %v2577_v7 = vld [vmem:[#allocation1 + $0x1b] sm:$0xff]  ;;  %v62_v26 = vld [vmem:[#allocation2 + $0x88] sm:$0xff] }
  0x2d   :  { %1864 = vmatpush.bf16.msra.mxu3 %v1685_v34  ;;  %v1485_v43 = vpack.c.bf16 %v853_v35, %v845_v30  ;;  %v1101_v44 = vcvt.s32.f32 %v461_v36  ;;  %v1109_v45 = vcvt.s32.f32 %v469_v37  ;;  %v829_v46 = vunpack.c.2.s8 %v197_v33  ;;  %v94_v31 = vld [vmem:[#allocation2 + $0x188] sm:$0xff] }
  0x2e   :  { %v1549_v48 = vpack.c.bf16 %v981_v39, %v973_v38  ;;  %v1229_v49 = vcvt.s32.f32 %v589_v40  ;;  %v1237_v50 = vcvt.s32.f32 %v597_v41  ;;  %v837_v51 = vunpack.c.3.s8 %v197_v33  ;;  %v126_v36 = vld [vmem:[#allocation2 + $0x288] sm:$0xff] }
  0x2f   :  { %1826 = vmatpush.bf16.msra.mxu0 %v1485_v43  ;;  %v1613_v53 = vpack.c.bf16 %v1109_v45, %v1101_v44  ;;  %v1469_v54 = vcvt.s32.f32 %v829_v46  ;;  %v318_v55 = vunpack.c.2.s8 %v70_v42  ;;  %v326_v56 = vunpack.c.3.s8 %v70_v42 }
  0x30   :  { %1839 = vmatpush.bf16.msra.mxu1 %v1549_v48  ;;  %v1677_v57 = vpack.c.bf16 %v1237_v50, %v1229_v49  ;;  %v1477_v58 = vcvt.s32.f32 %v837_v51  ;;  %v446_v59 = vunpack.c.2.s8 %v102_v47  ;;  %v454_v60 = vunpack.c.3.s8 %v102_v47 }
  0x31   :  { %1852 = vmatpush.bf16.msra.mxu2 %v1613_v53  ;;  %v958_v62 = vcvt.s32.f32 %v318_v55  ;;  %v966_v63 = vcvt.s32.f32 %v326_v56  ;;  %v574_v0 = vunpack.c.2.s8 %v134_v52  ;;  %v582_v1 = vunpack.c.3.s8 %v134_v52 }
  0x32   :  { %1865 = vmatpush.bf16.msra.mxu3 %v1677_v57  ;;  %v1797_v3 = vpack.c.bf16 %v1477_v58, %v1469_v54  ;;  %v1086_v4 = vcvt.s32.f32 %v446_v59  ;;  %v1094_v5 = vcvt.s32.f32 %v454_v60  ;;  %v813_v6 = vunpack.c.0.s8 %v197_v33  ;;  %1827 = vmatmul.bf16.vlgmr.msra.gmra.mxu0 %v2572_v61 }
  0x33   :  { %v1542_v8 = vpack.c.bf16 %v966_v63, %v958_v62  ;;  %v1214_v9 = vcvt.s32.f32 %v574_v0  ;;  %v1222_v10 = vcvt.s32.f32 %v582_v1  ;;  %v821_v11 = vunpack.c.1.s8 %v197_v33  ;;  %1840 = vmatmul.bf16.vlgmr.msra.gmra.mxu1 %v2581_v21  ;;  %v181_v62 = vld [vmem:[#allocation2 + $0x440] sm:$0xff] }
  0x34   :  { %1871 = vmatpush.bf16.msrb.mxu0 %v1797_v3  ;;  %v1606_v12 = vpack.c.bf16 %v1094_v5, %v1086_v4  ;;  %v1453_v13 = vcvt.s32.f32 %v813_v6  ;;  %v302_v14 = vunpack.c.0.s8 %v70_v42  ;;  %v310_v15 = vunpack.c.1.s8 %v70_v42  ;;  %1853 = vmatmul.bf16.vlgmr.msra.gmra.mxu2 %v2574_v2 }
  0x35   :  { %1884 = vmatpush.bf16.msrb.mxu1 %v1542_v8  ;;  %v1670_v17 = vpack.c.bf16 %v1222_v10, %v1214_v9  ;;  %v1461_v18 = vcvt.s32.f32 %v821_v11  ;;  %v430_v19 = vunpack.c.0.s8 %v102_v47  ;;  %v438_v20 = vunpack.c.1.s8 %v102_v47  ;;  %1866 = vmatmul.bf16.vlgmr.msra.gmra.mxu3 %v2577_v7  ;;  %v54_v9 = vld [vmem:[#allocation2 + $0x48] sm:$0xff] }
  0x36   :  { %1897 = vmatpush.bf16.msrb.mxu2 %v1606_v12  ;;  %v942_v22 = vcvt.s32.f32 %v302_v14  ;;  %v950_v23 = vcvt.s32.f32 %v310_v15  ;;  %v558_v24 = vunpack.c.0.s8 %v134_v52  ;;  %v566_v25 = vunpack.c.1.s8 %v134_v52  ;;  %v86_v14 = vld [vmem:[#allocation2 + $0x148] sm:$0xff] }
  0x37   :  { %1910 = vmatpush.bf16.msrb.mxu3 %v1670_v17  ;;  %v1789_v27 = vpack.c.bf16 %v1461_v18, %v1453_v13  ;;  %v1070_v28 = vcvt.s32.f32 %v430_v19  ;;  %v1078_v29 = vcvt.s32.f32 %v438_v20  ;;  %v797_v30 = vunpack.c.2.s8 %v189_v16  ;;  %v118_v19 = vld [vmem:[#allocation2 + $0x248] sm:$0xff] }
  0x38   :  { %v1534_v32 = vpack.c.bf16 %v950_v23, %v942_v22  ;;  %v1198_v33 = vcvt.s32.f32 %v558_v24  ;;  %v1206_v34 = vcvt.s32.f32 %v566_v25  ;;  %v805_v35 = vunpack.c.3.s8 %v189_v16 }
  0x39   :  { %1872 = vmatpush.bf16.msrb.mxu0 %v1789_v27  ;;  %v1598_v37 = vpack.c.bf16 %v1078_v29, %v1070_v28  ;;  %v1437_v38 = vcvt.s32.f32 %v797_v30  ;;  %v286_v39 = vunpack.c.2.s8 %v62_v26  ;;  %v294_v40 = vunpack.c.3.s8 %v62_v26 }
  0x3a   :  { %1885 = vmatpush.bf16.msrb.mxu1 %v1534_v32  ;;  %v1662_v41 = vpack.c.bf16 %v1206_v34, %v1198_v33  ;;  %v1445_v42 = vcvt.s32.f32 %v805_v35  ;;  %v414_v43 = vunpack.c.2.s8 %v94_v31  ;;  %v422_v44 = vunpack.c.3.s8 %v94_v31 }
  0x3b   :  { %1898 = vmatpush.bf16.msrb.mxu2 %v1598_v37  ;;  %v926_v45 = vcvt.s32.f32 %v286_v39  ;;  %v934_v46 = vcvt.s32.f32 %v294_v40  ;;  %v542_v47 = vunpack.c.2.s8 %v126_v36  ;;  %v550_v48 = vunpack.c.3.s8 %v126_v36 }
  0x3c   :  { %1911 = vmatpush.bf16.msrb.mxu3 %v1662_v41  ;;  %v1781_v49 = vpack.c.bf16 %v1445_v42, %v1437_v38  ;;  %v1054_v50 = vcvt.s32.f32 %v414_v43  ;;  %v1062_v51 = vcvt.s32.f32 %v422_v44  ;;  %v781_v52 = vunpack.c.0.s8 %v189_v16 }
  0x3d   :  { %v1526_v53 = vpack.c.bf16 %v934_v46, %v926_v45  ;;  %v1182_v54 = vcvt.s32.f32 %v542_v47  ;;  %v1190_v55 = vcvt.s32.f32 %v550_v48  ;;  %v789_v56 = vunpack.c.1.s8 %v189_v16  ;;  %v173_v45 = vld [vmem:[#allocation2 + $0x400] sm:$0xff] }
  0x3e   :  { %1873 = vmatpush.bf16.msrb.mxu0 %v1781_v49  ;;  %v1590_v57 = vpack.c.bf16 %v1062_v51, %v1054_v50  ;;  %v1421_v58 = vcvt.s32.f32 %v781_v52  ;;  %v270_v59 = vunpack.c.0.s8 %v62_v26  ;;  %v278_v60 = vunpack.c.1.s8 %v62_v26 }
  0x3f   :  { %1886 = vmatpush.bf16.msrb.mxu1 %v1526_v53  ;;  %v1654_v63 = vpack.c.bf16 %v1190_v55, %v1182_v54  ;;  %v1429_v0 = vcvt.s32.f32 %v789_v56  ;;  %v398_v1 = vunpack.c.0.s8 %v94_v31  ;;  %v406_v3 = vunpack.c.1.s8 %v94_v31  ;;  %v46_v54 = vld [vmem:[#allocation2 + $0x8] sm:$0xff] }
  0x40   :  { %1899 = vmatpush.bf16.msrb.mxu2 %v1590_v57  ;;  %v910_v4 = vcvt.s32.f32 %v270_v59  ;;  %v918_v5 = vcvt.s32.f32 %v278_v60  ;;  %v526_v6 = vunpack.c.0.s8 %v126_v36  ;;  %v534_v8 = vunpack.c.1.s8 %v126_v36  ;;  %v78_v59 = vld [vmem:[#allocation2 + $0x108] sm:$0xff] }
  0x41   :  { %1912 = vmatpush.bf16.msrb.mxu3 %v1654_v63  ;;  %v1773_v10 = vpack.c.bf16 %v1429_v0, %v1421_v58  ;;  %v1038_v11 = vcvt.s32.f32 %v398_v1  ;;  %v1046_v12 = vcvt.s32.f32 %v406_v3  ;;  %v765_v13 = vunpack.c.2.s8 %v181_v62  ;;  %v110_v1 = vld [vmem:[#allocation2 + $0x208] sm:$0xff] }
  0x42   :  { %v1518_v15 = vpack.c.bf16 %v918_v5, %v910_v4  ;;  %v1166_v16 = vcvt.s32.f32 %v526_v6  ;;  %v1174_v17 = vcvt.s32.f32 %v534_v8  ;;  %v773_v18 = vunpack.c.3.s8 %v181_v62 }
  0x43   :  { %1874 = vmatpush.bf16.msrb.mxu0 %v1773_v10  ;;  %v1582_v20 = vpack.c.bf16 %v1046_v12, %v1038_v11  ;;  %v1405_v22 = vcvt.s32.f32 %v765_v13  ;;  %v254_v23 = vunpack.c.2.s8 %v54_v9  ;;  %v262_v24 = vunpack.c.3.s8 %v54_v9 }
  0x44   :  { %1887 = vmatpush.bf16.msrb.mxu1 %v1518_v15  ;;  %v1646_v25 = vpack.c.bf16 %v1174_v17, %v1166_v16  ;;  %v1413_v26 = vcvt.s32.f32 %v773_v18  ;;  %v382_v27 = vunpack.c.2.s8 %v86_v14  ;;  %v390_v28 = vunpack.c.3.s8 %v86_v14 }
  0x45   :  { %1900 = vmatpush.bf16.msrb.mxu2 %v1582_v20  ;;  %v894_v29 = vcvt.s32.f32 %v254_v23  ;;  %v902_v30 = vcvt.s32.f32 %v262_v24  ;;  %v510_v31 = vunpack.c.2.s8 %v118_v19  ;;  %v518_v32 = vunpack.c.3.s8 %v118_v19 }
  0x46   :  { %1913 = vmatpush.bf16.msrb.mxu3 %v1646_v25  ;;  %v1765_v33 = vpack.c.bf16 %v1413_v26, %v1405_v22  ;;  %v1022_v34 = vcvt.s32.f32 %v382_v27  ;;  %v1030_v35 = vcvt.s32.f32 %v390_v28  ;;  %v749_v36 = vunpack.c.0.s8 %v181_v62 }
  0x47   :  { %v1510_v37 = vpack.c.bf16 %v902_v30, %v894_v29  ;;  %v1150_v38 = vcvt.s32.f32 %v510_v31  ;;  %v1158_v39 = vcvt.s32.f32 %v518_v32  ;;  %v757_v40 = vunpack.c.1.s8 %v181_v62  ;;  %v166_v29 = vld [vmem:[#allocation2 + $0x3c8] sm:$0xff] }
  0x48   :  { %1875 = vmatpush.bf16.msrb.mxu0 %v1765_v33  ;;  %v1574_v41 = vpack.c.bf16 %v1030_v35, %v1022_v34  ;;  %v1389_v42 = vcvt.s32.f32 %v749_v36  ;;  %v238_v43 = vunpack.c.0.s8 %v54_v9  ;;  %v246_v44 = vunpack.c.1.s8 %v54_v9 }
  0x49   :  { %1888 = vmatpush.bf16.msrb.mxu1 %v1510_v37  ;;  %v1638_v46 = vpack.c.bf16 %v1158_v39, %v1150_v38  ;;  %v1397_v47 = vcvt.s32.f32 %v757_v40  ;;  %v366_v48 = vunpack.c.0.s8 %v86_v14  ;;  %v374_v49 = vunpack.c.1.s8 %v86_v14  ;;  %v198_v38 = vld [vmem:[#allocation2 + $0x4c8] sm:$0xff] }
  0x4a   :  { %1901 = vmatpush.bf16.msrb.mxu2 %v1574_v41  ;;  %v878_v50 = vcvt.s32.f32 %v238_v43  ;;  %v886_v51 = vcvt.s32.f32 %v246_v44  ;;  %v494_v52 = vunpack.c.0.s8 %v118_v19  ;;  %v502_v53 = vunpack.c.1.s8 %v118_v19  ;;  %v71_v43 = vld [vmem:[#allocation2 + $0xd0] sm:$0xff] }
  0x4b   :  { %1914 = vmatpush.bf16.msrb.mxu3 %v1638_v46  ;;  %v1757_v55 = vpack.c.bf16 %v1397_v47, %v1389_v42  ;;  %v1006_v56 = vcvt.s32.f32 %v366_v48  ;;  %v1014_v57 = vcvt.s32.f32 %v374_v49  ;;  %v733_v58 = vunpack.c.2.s8 %v173_v45  ;;  %v103_v48 = vld [vmem:[#allocation2 + $0x1d0] sm:$0xff] }
  0x4c   :  { %v1502_v60 = vpack.c.bf16 %v886_v51, %v878_v50  ;;  %v1134_v62 = vcvt.s32.f32 %v494_v52  ;;  %v1142_v63 = vcvt.s32.f32 %v502_v53  ;;  %v741_v0 = vunpack.c.3.s8 %v173_v45  ;;  %v2584_v53 = vld [vmem:[#allocation1 + $0x24] sm:$0xff] }
  0x4d   :  { %1876 = vmatpush.bf16.msrb.mxu0 %v1757_v55  ;;  %v1566_v3 = vpack.c.bf16 %v1014_v57, %v1006_v56  ;;  %v1373_v4 = vcvt.s32.f32 %v733_v58  ;;  %v222_v5 = vunpack.c.2.s8 %v46_v54  ;;  %v230_v6 = vunpack.c.3.s8 %v46_v54 }
  0x4e   :  { %1889 = vmatpush.bf16.msrb.mxu1 %v1502_v60  ;;  %v1630_v8 = vpack.c.bf16 %v1142_v63, %v1134_v62  ;;  %v1381_v9 = vcvt.s32.f32 %v741_v0  ;;  %v350_v10 = vunpack.c.2.s8 %v78_v59  ;;  %v358_v11 = vunpack.c.3.s8 %v78_v59 }
  0x4f   :  { %1902 = vmatpush.bf16.msrb.mxu2 %v1566_v3  ;;  %v862_v12 = vcvt.s32.f32 %v222_v5  ;;  %v870_v13 = vcvt.s32.f32 %v230_v6  ;;  %v478_v14 = vunpack.c.2.s8 %v110_v1  ;;  %v486_v15 = vunpack.c.3.s8 %v110_v1 }
  0x50   :  { %1915 = vmatpush.bf16.msrb.mxu3 %v1630_v8  ;;  %v1749_v16 = vpack.c.bf16 %v1381_v9, %v1373_v4  ;;  %v990_v17 = vcvt.s32.f32 %v350_v10  ;;  %v998_v18 = vcvt.s32.f32 %v358_v11  ;;  %v717_v19 = vunpack.c.0.s8 %v173_v45 }
  0x51   :  { %v1494_v20 = vpack.c.bf16 %v870_v13, %v862_v12  ;;  %v1118_v22 = vcvt.s32.f32 %v478_v14  ;;  %v1126_v23 = vcvt.s32.f32 %v486_v15  ;;  %v725_v24 = vunpack.c.1.s8 %v173_v45  ;;  %v158_v13 = vld [vmem:[#allocation2 + $0x388] sm:$0xff] }
  0x52   :  { %1877 = vmatpush.bf16.msrb.mxu0 %v1749_v16  ;;  %v1558_v25 = vpack.c.bf16 %v998_v18, %v990_v17  ;;  %v1357_v26 = vcvt.s32.f32 %v717_v19  ;;  %v206_v27 = vunpack.c.0.s8 %v46_v54  ;;  %v214_v28 = vunpack.c.1.s8 %v46_v54 }
  0x53   :  { %1890 = vmatpush.bf16.msrb.mxu1 %v1494_v20  ;;  %v1622_v30 = vpack.c.bf16 %v1126_v23, %v1118_v22  ;;  %v1365_v31 = vcvt.s32.f32 %v725_v24  ;;  %v334_v32 = vunpack.c.0.s8 %v78_v59  ;;  %v342_v33 = vunpack.c.1.s8 %v78_v59  ;;  %v190_v23 = vld [vmem:[#allocation2 + $0x488] sm:$0xff] }
  0x54   :  { %1903 = vmatpush.bf16.msrb.mxu2 %v1558_v25  ;;  %v846_v34 = vcvt.s32.f32 %v206_v27  ;;  %v854_v35 = vcvt.s32.f32 %v214_v28  ;;  %v462_v36 = vunpack.c.0.s8 %v110_v1  ;;  %v470_v37 = vunpack.c.1.s8 %v110_v1  ;;  %v63_v28 = vld [vmem:[#allocation2 + $0x90] sm:$0xff] }
  0x55   :  { %1916 = vmatpush.bf16.msrb.mxu3 %v1622_v30  ;;  %v1741_v39 = vpack.c.bf16 %v1365_v31, %v1357_v26  ;;  %v974_v40 = vcvt.s32.f32 %v334_v32  ;;  %v982_v41 = vcvt.s32.f32 %v342_v33  ;;  %v702_v42 = vunpack.c.2.s8 %v166_v29  ;;  %v95_v33 = vld [vmem:[#allocation2 + $0x190] sm:$0xff] }
  0x56   :  { %v1486_v44 = vpack.c.bf16 %v854_v35, %v846_v34  ;;  %v1102_v45 = vcvt.s32.f32 %v462_v36  ;;  %v1110_v46 = vcvt.s32.f32 %v470_v37  ;;  %v710_v47 = vunpack.c.3.s8 %v166_v29 }
  0x57   :  { %1878 = vmatpush.bf16.msrb.mxu0 %v1741_v39  ;;  %v1550_v49 = vpack.c.bf16 %v982_v41, %v974_v40  ;;  %v1342_v50 = vcvt.s32.f32 %v702_v42  ;;  %v830_v51 = vunpack.c.2.s8 %v198_v38  ;;  %v838_v52 = vunpack.c.3.s8 %v198_v38 }
  0x58   :  { %1891 = vmatpush.bf16.msrb.mxu1 %v1486_v44  ;;  %v1614_v54 = vpack.c.bf16 %v1110_v46, %v1102_v45  ;;  %v1350_v55 = vcvt.s32.f32 %v710_v47  ;;  %v319_v56 = vunpack.c.2.s8 %v71_v43  ;;  %v327_v57 = vunpack.c.3.s8 %v71_v43 }
  0x59   :  { %1904 = vmatpush.bf16.msrb.mxu2 %v1550_v49  ;;  %v1470_v58 = vcvt.s32.f32 %v830_v51  ;;  %v1478_v59 = vcvt.s32.f32 %v838_v52  ;;  %v447_v60 = vunpack.c.2.s8 %v103_v48  ;;  %v455_v62 = vunpack.c.3.s8 %v103_v48 }
  0x5a   :  { %1917 = vmatpush.bf16.msrb.mxu3 %v1614_v54  ;;  %v1734_v63 = vpack.c.bf16 %v1350_v55, %v1342_v50  ;;  %v959_v0 = vcvt.s32.f32 %v319_v56  ;;  %v967_v1 = vcvt.s32.f32 %v327_v57  ;;  %v686_v3 = vunpack.c.0.s8 %v166_v29  ;;  %1879 = vmatmul.bf16.vlgmr.msrb.gmra.mxu0 %v2584_v53 }
  0x5b   :  { %v1798_v4 = vpack.c.bf16 %v1478_v59, %v1470_v58  ;;  %v1087_v5 = vcvt.s32.f32 %v447_v60  ;;  %v1095_v6 = vcvt.s32.f32 %v455_v62  ;;  %v694_v8 = vunpack.c.1.s8 %v166_v29  ;;  %1892 = vmatmul.bf16.vlgmr.msrb.gmra.mxu1 %v2572_v61  ;;  %v150_v58 = vld [vmem:[#allocation2 + $0x348] sm:$0xff] }
  0x5c   :  { %1923 = vmatpush.bf16.msra.mxu0 %v1734_v63  ;;  %v1543_v9 = vpack.c.bf16 %v967_v1, %v959_v0  ;;  %v1326_v10 = vcvt.s32.f32 %v686_v3  ;;  %v814_v11 = vunpack.c.0.s8 %v198_v38  ;;  %v822_v12 = vunpack.c.1.s8 %v198_v38  ;;  %1905 = vmatmul.bf16.vlgmr.msrb.gmra.mxu2 %v2581_v21 }
  0x5d   :  { %1936 = vmatpush.bf16.msra.mxu1 %v1798_v4  ;;  %v1607_v14 = vpack.c.bf16 %v1095_v6, %v1087_v5  ;;  %v1334_v15 = vcvt.s32.f32 %v694_v8  ;;  %v303_v16 = vunpack.c.0.s8 %v71_v43  ;;  %v311_v17 = vunpack.c.1.s8 %v71_v43  ;;  %1918 = vmatmul.bf16.vlgmr.msrb.gmra.mxu3 %v2574_v2  ;;  %v182_v5 = vld [vmem:[#allocation2 + $0x448] sm:$0xff] }
  0x5e   :  { %1949 = vmatpush.bf16.msra.mxu2 %v1543_v9  ;;  %v1454_v18 = vcvt.s32.f32 %v814_v11  ;;  %v1462_v19 = vcvt.s32.f32 %v822_v12  ;;  %v431_v20 = vunpack.c.0.s8 %v103_v48  ;;  %v439_v22 = vunpack.c.1.s8 %v103_v48  ;;  %v55_v11 = vld [vmem:[#allocation2 + $0x50] sm:$0xff] }
  0x5f   :  { %1962 = vmatpush.bf16.msra.mxu3 %v1607_v14  ;;  %v1726_v24 = vpack.c.bf16 %v1334_v15, %v1326_v10  ;;  %v943_v25 = vcvt.s32.f32 %v303_v16  ;;  %v951_v26 = vcvt.s32.f32 %v311_v17  ;;  %v670_v27 = vunpack.c.2.s8 %v158_v13  ;;  %v87_v16 = vld [vmem:[#allocation2 + $0x150] sm:$0xff] }
  0x60   :  { %v1790_v29 = vpack.c.bf16 %v1462_v19, %v1454_v18  ;;  %v1071_v30 = vcvt.s32.f32 %v431_v20  ;;  %v1079_v31 = vcvt.s32.f32 %v439_v22  ;;  %v678_v32 = vunpack.c.3.s8 %v158_v13 }
  0x61   :  { %1924 = vmatpush.bf16.msra.mxu0 %v1726_v24  ;;  %v1535_v34 = vpack.c.bf16 %v951_v26, %v943_v25  ;;  %v1310_v2 = vcvt.s32.f32 %v670_v27  ;;  %v798_v35 = vunpack.c.2.s8 %v190_v23  ;;  %v806_v36 = vunpack.c.3.s8 %v190_v23 }
  0x62   :  { %1937 = vmatpush.bf16.msra.mxu1 %v1790_v29  ;;  %v1599_v37 = vpack.c.bf16 %v1079_v31, %v1071_v30  ;;  %v1318_v38 = vcvt.s32.f32 %v678_v32  ;;  %v287_v39 = vunpack.c.2.s8 %v63_v28  ;;  %v295_v40 = vunpack.c.3.s8 %v63_v28 }
  0x63   :  { %1950 = vmatpush.bf16.msra.mxu2 %v1535_v34  ;;  %v1438_v41 = vcvt.s32.f32 %v798_v35  ;;  %v1446_v42 = vcvt.s32.f32 %v806_v36  ;;  %v415_v43 = vunpack.c.2.s8 %v95_v33  ;;  %v423_v44 = vunpack.c.3.s8 %v95_v33 }
  0x64   :  { %1963 = vmatpush.bf16.msra.mxu3 %v1599_v37  ;;  %v1718_v45 = vpack.c.bf16 %v1318_v38, %v1310_v2  ;;  %v927_v46 = vcvt.s32.f32 %v287_v39  ;;  %v935_v47 = vcvt.s32.f32 %v295_v40  ;;  %v654_v48 = vunpack.c.0.s8 %v158_v13 }
  0x65   :  { %v1782_v49 = vpack.c.bf16 %v1446_v42, %v1438_v41  ;;  %v1055_v50 = vcvt.s32.f32 %v415_v43  ;;  %v1063_v51 = vcvt.s32.f32 %v423_v44  ;;  %v662_v52 = vunpack.c.1.s8 %v158_v13  ;;  %v142_v41 = vld [vmem:[#allocation2 + $0x308] sm:$0xff] }
  0x66   :  { %1925 = vmatpush.bf16.msra.mxu0 %v1718_v45  ;;  %v1527_v54 = vpack.c.bf16 %v935_v47, %v927_v46  ;;  %v1294_v55 = vcvt.s32.f32 %v654_v48  ;;  %v782_v56 = vunpack.c.0.s8 %v190_v23  ;;  %v790_v57 = vunpack.c.1.s8 %v190_v23 }
  0x67   :  { %1938 = vmatpush.bf16.msra.mxu1 %v1782_v49  ;;  %v1591_v59 = vpack.c.bf16 %v1063_v51, %v1055_v50  ;;  %v1302_v60 = vcvt.s32.f32 %v662_v52  ;;  %v271_v62 = vunpack.c.0.s8 %v63_v28  ;;  %v279_v63 = vunpack.c.1.s8 %v63_v28  ;;  %v174_v50 = vld [vmem:[#allocation2 + $0x408] sm:$0xff] }
  0x68   :  { %1951 = vmatpush.bf16.msra.mxu2 %v1527_v54  ;;  %v1422_v0 = vcvt.s32.f32 %v782_v56  ;;  %v1430_v1 = vcvt.s32.f32 %v790_v57  ;;  %v399_v3 = vunpack.c.0.s8 %v95_v33  ;;  %v407_v4 = vunpack.c.1.s8 %v95_v33  ;;  %v47_v56 = vld [vmem:[#allocation2 + $0x10] sm:$0xff] }
  0x69   :  { %1964 = vmatpush.bf16.msra.mxu3 %v1591_v59  ;;  %v1710_v6 = vpack.c.bf16 %v1302_v60, %v1294_v55  ;;  %v911_v8 = vcvt.s32.f32 %v271_v62  ;;  %v919_v9 = vcvt.s32.f32 %v279_v63  ;;  %v638_v10 = vunpack.c.2.s8 %v150_v58  ;;  %v79_v62 = vld [vmem:[#allocation2 + $0x110] sm:$0xff] }
  0x6a   :  { %v1774_v12 = vpack.c.bf16 %v1430_v1, %v1422_v0  ;;  %v1039_v13 = vcvt.s32.f32 %v399_v3  ;;  %v1047_v14 = vcvt.s32.f32 %v407_v4  ;;  %v646_v15 = vunpack.c.3.s8 %v150_v58 }
  0x6b   :  { %1926 = vmatpush.bf16.msra.mxu0 %v1710_v6  ;;  %v1519_v17 = vpack.c.bf16 %v919_v9, %v911_v8  ;;  %v1278_v18 = vcvt.s32.f32 %v638_v10  ;;  %v766_v19 = vunpack.c.2.s8 %v182_v5  ;;  %v774_v20 = vunpack.c.3.s8 %v182_v5 }
  0x6c   :  { %1939 = vmatpush.bf16.msra.mxu1 %v1774_v12  ;;  %v1583_v22 = vpack.c.bf16 %v1047_v14, %v1039_v13  ;;  %v1286_v23 = vcvt.s32.f32 %v646_v15  ;;  %v255_v24 = vunpack.c.2.s8 %v55_v11  ;;  %v263_v25 = vunpack.c.3.s8 %v55_v11 }
  0x6d   :  { %1952 = vmatpush.bf16.msra.mxu2 %v1519_v17  ;;  %v1406_v26 = vcvt.s32.f32 %v766_v19  ;;  %v1414_v27 = vcvt.s32.f32 %v774_v20  ;;  %v383_v28 = vunpack.c.2.s8 %v87_v16  ;;  %v391_v29 = vunpack.c.3.s8 %v87_v16 }
  0x6e   :  { %1965 = vmatpush.bf16.msra.mxu3 %v1583_v22  ;;  %v1702_v30 = vpack.c.bf16 %v1286_v23, %v1278_v18  ;;  %v895_v31 = vcvt.s32.f32 %v255_v24  ;;  %v903_v32 = vcvt.s32.f32 %v263_v25  ;;  %v622_v33 = vunpack.c.0.s8 %v150_v58 }
  0x6f   :  { %v1766_v34 = vpack.c.bf16 %v1414_v27, %v1406_v26  ;;  %v1023_v2 = vcvt.s32.f32 %v383_v28  ;;  %v1031_v35 = vcvt.s32.f32 %v391_v29  ;;  %v630_v36 = vunpack.c.1.s8 %v150_v58  ;;  %v135_v26 = vld [vmem:[#allocation2 + $0x2d0] sm:$0xff] }
  0x70   :  { %1927 = vmatpush.bf16.msra.mxu0 %v1702_v30  ;;  %v1511_v37 = vpack.c.bf16 %v903_v32, %v895_v31  ;;  %v1262_v38 = vcvt.s32.f32 %v622_v33  ;;  %v750_v39 = vunpack.c.0.s8 %v182_v5  ;;  %v758_v40 = vunpack.c.1.s8 %v182_v5 }
  0x71   :  { %1940 = vmatpush.bf16.msra.mxu1 %v1766_v34  ;;  %v1575_v42 = vpack.c.bf16 %v1031_v35, %v1023_v2  ;;  %v1270_v43 = vcvt.s32.f32 %v630_v36  ;;  %v239_v44 = vunpack.c.0.s8 %v55_v11  ;;  %v247_v45 = vunpack.c.1.s8 %v55_v11  ;;  %v167_v2 = vld [vmem:[#allocation2 + $0x3d0] sm:$0xff] }
  0x72   :  { %1953 = vmatpush.bf16.msra.mxu2 %v1511_v37  ;;  %v1390_v46 = vcvt.s32.f32 %v750_v39  ;;  %v1398_v47 = vcvt.s32.f32 %v758_v40  ;;  %v367_v48 = vunpack.c.0.s8 %v87_v16  ;;  %v375_v49 = vunpack.c.1.s8 %v87_v16  ;;  %v199_v39 = vld [vmem:[#allocation2 + $0x4d0] sm:$0xff] }
  0x73   :  { %1966 = vmatpush.bf16.msra.mxu3 %v1575_v42  ;;  %v1694_v51 = vpack.c.bf16 %v1270_v43, %v1262_v38  ;;  %v879_v52 = vcvt.s32.f32 %v239_v44  ;;  %v887_v54 = vcvt.s32.f32 %v247_v45  ;;  %v606_v55 = vunpack.c.2.s8 %v142_v41  ;;  %v72_v44 = vld [vmem:[#allocation2 + $0xd8] sm:$0xff] }
  0x74   :  { %v1758_v57 = vpack.c.bf16 %v1398_v47, %v1390_v46  ;;  %v1007_v58 = vcvt.s32.f32 %v367_v48  ;;  %v1015_v59 = vcvt.s32.f32 %v375_v49  ;;  %v614_v60 = vunpack.c.3.s8 %v142_v41 }
  0x75   :  { %1928 = vmatpush.bf16.msra.mxu0 %v1694_v51  ;;  %v1503_v63 = vpack.c.bf16 %v887_v54, %v879_v52  ;;  %v1246_v0 = vcvt.s32.f32 %v606_v55  ;;  %v734_v1 = vunpack.c.2.s8 %v174_v50  ;;  %v742_v3 = vunpack.c.3.s8 %v174_v50 }
  0x76   :  { %1941 = vmatpush.bf16.msra.mxu1 %v1758_v57  ;;  %v1567_v4 = vpack.c.bf16 %v1015_v59, %v1007_v58  ;;  %v1254_v5 = vcvt.s32.f32 %v614_v60  ;;  %v223_v6 = vunpack.c.2.s8 %v47_v56  ;;  %v231_v8 = vunpack.c.3.s8 %v47_v56 }
  0x77   :  { %1954 = vmatpush.bf16.msra.mxu2 %v1503_v63  ;;  %v1374_v9 = vcvt.s32.f32 %v734_v1  ;;  %v1382_v10 = vcvt.s32.f32 %v742_v3  ;;  %v351_v11 = vunpack.c.2.s8 %v79_v62  ;;  %v359_v12 = vunpack.c.3.s8 %v79_v62 }
  0x78   :  { %1967 = vmatpush.bf16.msra.mxu3 %v1567_v4  ;;  %v1686_v13 = vpack.c.bf16 %v1254_v5, %v1246_v0  ;;  %v863_v14 = vcvt.s32.f32 %v223_v6  ;;  %v871_v15 = vcvt.s32.f32 %v231_v8  ;;  %v590_v16 = vunpack.c.0.s8 %v142_v41 }
  0x79   :  { %v1750_v17 = vpack.c.bf16 %v1382_v10, %v1374_v9  ;;  %v991_v18 = vcvt.s32.f32 %v351_v11  ;;  %v999_v19 = vcvt.s32.f32 %v359_v12  ;;  %v598_v20 = vunpack.c.1.s8 %v142_v41  ;;  %v127_v9 = vld [vmem:[#allocation2 + $0x290] sm:$0xff] }
  0x7a   :  { %1929 = vmatpush.bf16.msra.mxu0 %v1686_v13  ;;  %v1495_v22 = vpack.c.bf16 %v871_v15, %v863_v14  ;;  %v1230_v23 = vcvt.s32.f32 %v590_v16  ;;  %v718_v24 = vunpack.c.0.s8 %v174_v50  ;;  %v726_v25 = vunpack.c.1.s8 %v174_v50 }
  0x7b   :  { %1942 = vmatpush.bf16.msra.mxu1 %v1750_v17  ;;  %v1559_v27 = vpack.c.bf16 %v999_v19, %v991_v18  ;;  %v1238_v28 = vcvt.s32.f32 %v598_v20  ;;  %v207_v29 = vunpack.c.0.s8 %v47_v56  ;;  %v215_v30 = vunpack.c.1.s8 %v47_v56  ;;  %v159_v17 = vld [vmem:[#allocation2 + $0x390] sm:$0xff] }
  0x7c   :  { %1955 = vmatpush.bf16.msra.mxu2 %v1495_v22  ;;  %v1358_v31 = vcvt.s32.f32 %v718_v24  ;;  %v1366_v32 = vcvt.s32.f32 %v726_v25  ;;  %v335_v33 = vunpack.c.0.s8 %v79_v62  ;;  %v343_v34 = vunpack.c.1.s8 %v79_v62 }
  0x7d   :  { %1968 = vmatpush.bf16.msra.mxu3 %v1559_v27  ;;  %v1678_v35 = vpack.c.bf16 %v1238_v28, %v1230_v23  ;;  %v847_v36 = vcvt.s32.f32 %v207_v29  ;;  %v855_v37 = vcvt.s32.f32 %v215_v30  ;;  %v575_v38 = vunpack.c.2.s8 %v135_v26  ;;  %v191_v23 = vld [vmem:[#allocation2 + $0x490] sm:$0xff]  ;;  %v64_v27 = vld [vmem:[#allocation2 + $0x98] sm:$0xff] }
  0x7e   :  { %v1742_v40 = vpack.c.bf16 %v1366_v32, %v1358_v31  ;;  %v975_v41 = vcvt.s32.f32 %v335_v33  ;;  %v983_v42 = vcvt.s32.f32 %v343_v34  ;;  %v583_v43 = vunpack.c.3.s8 %v135_v26 }
  0x7f   :  { %1930 = vmatpush.bf16.msra.mxu0 %v1678_v35  ;;  %v1487_v45 = vpack.c.bf16 %v855_v37, %v847_v36  ;;  %v1215_v46 = vcvt.s32.f32 %v575_v38  ;;  %v703_v47 = vunpack.c.2.s8 %v167_v2  ;;  %v711_v48 = vunpack.c.3.s8 %v167_v2 }
  0x80   :  { %1943 = vmatpush.bf16.msra.mxu1 %v1742_v40  ;;  %v1551_v49 = vpack.c.bf16 %v983_v42, %v975_v41  ;;  %v1223_v50 = vcvt.s32.f32 %v583_v43  ;;  %v831_v51 = vunpack.c.2.s8 %v199_v39  ;;  %v839_v52 = vunpack.c.3.s8 %v199_v39 }
  0x81   :  { %1956 = vmatpush.bf16.msra.mxu2 %v1487_v45  ;;  %v1343_v54 = vcvt.s32.f32 %v703_v47  ;;  %v1351_v55 = vcvt.s32.f32 %v711_v48  ;;  %v320_v56 = vunpack.c.2.s8 %v72_v44  ;;  %v328_v57 = vunpack.c.3.s8 %v72_v44 }
  0x82   :  { %1969 = vmatpush.bf16.msra.mxu3 %v1551_v49  ;;  %v1671_v58 = vpack.c.bf16 %v1223_v50, %v1215_v46  ;;  %v1471_v59 = vcvt.s32.f32 %v831_v51  ;;  %v1479_v60 = vcvt.s32.f32 %v839_v52  ;;  %1931 = vmatmul.bf16.vlgmr.msra.gmra.mxu0 %v2577_v7  ;;  %v559_v62 = vunpack.c.0.s8 %v135_v26  ;;  %v119_v50 = vld [vmem:[#allocation2 + $0x250] sm:$0xff] }
  0x83   :  { %v1735_v63 = vpack.c.bf16 %v1351_v55, %v1343_v54  ;;  %v960_v0 = vcvt.s32.f32 %v320_v56  ;;  %v968_v1 = vcvt.s32.f32 %v328_v57  ;;  %1944 = vmatmul.bf16.vlgmr.msra.gmra.mxu1 %v2584_v53  ;;  %v567_v3 = vunpack.c.1.s8 %v135_v26 }
  0x84   :  { %1975 = vmatpush.bf16.msrb.mxu0 %v1671_v58  ;;  %v1799_v4 = vpack.c.bf16 %v1479_v60, %v1471_v59  ;;  %v1199_v5 = vcvt.s32.f32 %v559_v62  ;;  %v687_v6 = vunpack.c.0.s8 %v167_v2  ;;  %v695_v8 = vunpack.c.1.s8 %v167_v2  ;;  %1957 = vmatmul.bf16.vlgmr.msra.gmra.mxu2 %v2572_v61  ;;  %v151_v60 = vld [vmem:[#allocation2 + $0x350] sm:$0xff] }
  0x85   :  { %1988 = vmatpush.bf16.msrb.mxu1 %v1735_v63  ;;  %v1544_v10 = vpack.c.bf16 %v968_v1, %v960_v0  ;;  %v1207_v11 = vcvt.s32.f32 %v567_v3  ;;  %v815_v12 = vunpack.c.0.s8 %v199_v39  ;;  %v823_v7 = vunpack.c.1.s8 %v199_v39  ;;  %1970 = vmatmul.bf16.vlgmr.msra.gmra.mxu3 %v2581_v21  ;;  %v183_v3 = vld [vmem:[#allocation2 + $0x450] sm:$0xff] }
  0x86   :  { %2001 = vmatpush.bf16.msrb.mxu2 %v1799_v4  ;;  %v1327_v13 = vcvt.s32.f32 %v687_v6  ;;  %v1335_v14 = vcvt.s32.f32 %v695_v8  ;;  %v304_v15 = vunpack.c.0.s8 %v72_v44  ;;  %v312_v16 = vunpack.c.1.s8 %v72_v44 }
  0x87   :  { %2014 = vmatpush.bf16.msrb.mxu3 %v1544_v10  ;;  %v1663_v18 = vpack.c.bf16 %v1207_v11, %v1199_v5  ;;  %v1455_v19 = vcvt.s32.f32 %v815_v12  ;;  %v1463_v20 = vcvt.s32.f32 %v823_v7  ;;  %v543_v22 = vunpack.c.2.s8 %v127_v9 }
  0x88   :  { %v1727_v61 = vpack.c.bf16 %v1335_v14, %v1327_v13  ;;  %v944_v24 = vcvt.s32.f32 %v304_v15  ;;  %v952_v25 = vcvt.s32.f32 %v312_v16  ;;  %v551_v26 = vunpack.c.3.s8 %v127_v9 }
  0x89   :  { %1976 = vmatpush.bf16.msrb.mxu0 %v1663_v18  ;;  %v1791_v28 = vpack.c.bf16 %v1463_v20, %v1455_v19  ;;  %v1183_v21 = vcvt.s32.f32 %v543_v22  ;;  %v671_v29 = vunpack.c.2.s8 %v159_v17  ;;  %v679_v30 = vunpack.c.3.s8 %v159_v17 }
  0x8a   :  { %1989 = vmatpush.bf16.msrb.mxu1 %v1727_v61  ;;  %v1536_v31 = vpack.c.bf16 %v952_v25, %v944_v24  ;;  %v1191_v32 = vcvt.s32.f32 %v551_v26  ;;  %v799_v33 = vunpack.c.2.s8 %v191_v23  ;;  %v807_v34 = vunpack.c.3.s8 %v191_v23 }
  0x8b   :  { %2002 = vmatpush.bf16.msrb.mxu2 %v1791_v28  ;;  %v1311_v2 = vcvt.s32.f32 %v671_v29  ;;  %v1319_v35 = vcvt.s32.f32 %v679_v30  ;;  %v288_v36 = vunpack.c.2.s8 %v64_v27  ;;  %v296_v37 = vunpack.c.3.s8 %v64_v27 }
  0x8c   :  { %2015 = vmatpush.bf16.msrb.mxu3 %v1536_v31  ;;  %v1655_v38 = vpack.c.bf16 %v1191_v32, %v1183_v21  ;;  %v1439_v39 = vcvt.s32.f32 %v799_v33  ;;  %v1447_v40 = vcvt.s32.f32 %v807_v34  ;;  %v527_v41 = vunpack.c.0.s8 %v127_v9  ;;  %v111_v32 = vld [vmem:[#allocation2 + $0x210] sm:$0xff] }
  0x8d   :  { %v1719_v42 = vpack.c.bf16 %v1319_v35, %v1311_v2  ;;  %v928_v43 = vcvt.s32.f32 %v288_v36  ;;  %v936_v44 = vcvt.s32.f32 %v296_v37  ;;  %v535_v45 = vunpack.c.1.s8 %v127_v9  ;;  %v56_v9 = vld [vmem:[#allocation2 + $0x58] sm:$0xff] }
  0x8e   :  { %1977 = vmatpush.bf16.msrb.mxu0 %v1655_v38  ;;  %v1783_v46 = vpack.c.bf16 %v1447_v40, %v1439_v39  ;;  %v1167_v47 = vcvt.s32.f32 %v527_v41  ;;  %v655_v48 = vunpack.c.0.s8 %v159_v17  ;;  %v663_v49 = vunpack.c.1.s8 %v159_v17  ;;  %v143_v40 = vld [vmem:[#allocation2 + $0x310] sm:$0xff] }
  0x8f   :  { %1990 = vmatpush.bf16.msrb.mxu1 %v1719_v42  ;;  %v1528_v51 = vpack.c.bf16 %v936_v44, %v928_v43  ;;  %v1175_v52 = vcvt.s32.f32 %v535_v45  ;;  %v783_v54 = vunpack.c.0.s8 %v191_v23  ;;  %v791_v55 = vunpack.c.1.s8 %v191_v23  ;;  %v175_v45 = vld [vmem:[#allocation2 + $0x410] sm:$0xff] }
  0x90   :  { %2003 = vmatpush.bf16.msrb.mxu2 %v1783_v46  ;;  %v1295_v56 = vcvt.s32.f32 %v655_v48  ;;  %v1303_v57 = vcvt.s32.f32 %v663_v49  ;;  %v272_v58 = vunpack.c.0.s8 %v64_v27  ;;  %v280_v59 = vunpack.c.1.s8 %v64_v27 }
  0x91   :  { %2016 = vmatpush.bf16.msrb.mxu3 %v1528_v51  ;;  %v1647_v62 = vpack.c.bf16 %v1175_v52, %v1167_v47  ;;  %v1423_v63 = vcvt.s32.f32 %v783_v54  ;;  %v1431_v0 = vcvt.s32.f32 %v791_v55  ;;  %v511_v1 = vunpack.c.2.s8 %v119_v50 }
  0x92   :  { %v1711_v4 = vpack.c.bf16 %v1303_v57, %v1295_v56  ;;  %v912_v5 = vcvt.s32.f32 %v272_v58  ;;  %v920_v6 = vcvt.s32.f32 %v280_v59  ;;  %v519_v8 = vunpack.c.3.s8 %v119_v50 }
  0x93   :  { %1978 = vmatpush.bf16.msrb.mxu0 %v1647_v62  ;;  %v1775_v10 = vpack.c.bf16 %v1431_v0, %v1423_v63  ;;  %v1151_v11 = vcvt.s32.f32 %v511_v1  ;;  %v639_v12 = vunpack.c.2.s8 %v151_v60  ;;  %v647_v7 = vunpack.c.3.s8 %v151_v60 }
  0x94   :  { %1991 = vmatpush.bf16.msrb.mxu1 %v1711_v4  ;;  %v1520_v13 = vpack.c.bf16 %v920_v6, %v912_v5  ;;  %v1159_v14 = vcvt.s32.f32 %v519_v8  ;;  %v767_v15 = vunpack.c.2.s8 %v183_v3  ;;  %v775_v16 = vunpack.c.3.s8 %v183_v3 }
  0x95   :  { %2004 = vmatpush.bf16.msrb.mxu2 %v1775_v10  ;;  %v1279_v17 = vcvt.s32.f32 %v639_v12  ;;  %v1287_v18 = vcvt.s32.f32 %v647_v7  ;;  %v256_v19 = vunpack.c.2.s8 %v56_v9  ;;  %v264_v20 = vunpack.c.3.s8 %v56_v9 }
  0x96   :  { %2017 = vmatpush.bf16.msrb.mxu3 %v1520_v13  ;;  %v1639_v22 = vpack.c.bf16 %v1159_v14, %v1151_v11  ;;  %v1407_v23 = vcvt.s32.f32 %v767_v15  ;;  %v1415_v61 = vcvt.s32.f32 %v775_v16  ;;  %v495_v24 = vunpack.c.0.s8 %v119_v50  ;;  %v104_v14 = vld [vmem:[#allocation2 + $0x1d8] sm:$0xff] }
  0x97   :  { %v1703_v25 = vpack.c.bf16 %v1287_v18, %v1279_v17  ;;  %v896_v26 = vcvt.s32.f32 %v256_v19  ;;  %v904_v27 = vcvt.s32.f32 %v264_v20  ;;  %v503_v28 = vunpack.c.1.s8 %v119_v50  ;;  %v48_v50 = vld [vmem:[#allocation2 + $0x18] sm:$0xff] }
  0x98   :  { %1979 = vmatpush.bf16.msrb.mxu0 %v1639_v22  ;;  %v1767_v21 = vpack.c.bf16 %v1415_v61, %v1407_v23  ;;  %v1135_v29 = vcvt.s32.f32 %v495_v24  ;;  %v623_v30 = vunpack.c.0.s8 %v151_v60  ;;  %v631_v31 = vunpack.c.1.s8 %v151_v60  ;;  %v136_v61 = vld [vmem:[#allocation2 + $0x2d8] sm:$0xff] }
  0x99   :  { %1992 = vmatpush.bf16.msrb.mxu1 %v1703_v25  ;;  %v1512_v33 = vpack.c.bf16 %v904_v27, %v896_v26  ;;  %v1143_v34 = vcvt.s32.f32 %v503_v28  ;;  %v751_v2 = vunpack.c.0.s8 %v183_v3  ;;  %v759_v35 = vunpack.c.1.s8 %v183_v3  ;;  %v168_v28 = vld [vmem:[#allocation2 + $0x3d8] sm:$0xff] }
  0x9a   :  { %2005 = vmatpush.bf16.msrb.mxu2 %v1767_v21  ;;  %v1263_v36 = vcvt.s32.f32 %v623_v30  ;;  %v1271_v37 = vcvt.s32.f32 %v631_v31  ;;  %v240_v38 = vunpack.c.0.s8 %v56_v9  ;;  %v248_v39 = vunpack.c.1.s8 %v56_v9 }
  0x9b   :  { %2018 = vmatpush.bf16.msrb.mxu3 %v1512_v33  ;;  %v1631_v41 = vpack.c.bf16 %v1143_v34, %v1135_v29  ;;  %v1391_v42 = vcvt.s32.f32 %v751_v2  ;;  %v1399_v43 = vcvt.s32.f32 %v759_v35  ;;  %v479_v44 = vunpack.c.2.s8 %v111_v32 }
  0x9c   :  { %v1695_v46 = vpack.c.bf16 %v1271_v37, %v1263_v36  ;;  %v880_v47 = vcvt.s32.f32 %v240_v38  ;;  %v888_v48 = vcvt.s32.f32 %v248_v39  ;;  %v487_v49 = vunpack.c.3.s8 %v111_v32 }
  0x9d   :  { %1980 = vmatpush.bf16.msrb.mxu0 %v1631_v41  ;;  %v1759_v51 = vpack.c.bf16 %v1399_v43, %v1391_v42  ;;  %v1119_v52 = vcvt.s32.f32 %v479_v44  ;;  %v607_v54 = vunpack.c.2.s8 %v143_v40  ;;  %v615_v55 = vunpack.c.3.s8 %v143_v40 }
  0x9e   :  { %1993 = vmatpush.bf16.msrb.mxu1 %v1695_v46  ;;  %v1504_v56 = vpack.c.bf16 %v888_v48, %v880_v47  ;;  %v1127_v57 = vcvt.s32.f32 %v487_v49  ;;  %v735_v58 = vunpack.c.2.s8 %v175_v45  ;;  %v743_v59 = vunpack.c.3.s8 %v175_v45  ;;  %v2594_v48 = vld [vmem:[#allocation1 + $0x12] sm:$0xff] }
  0x9f   :  { %2006 = vmatpush.bf16.msrb.mxu2 %v1759_v51  ;;  %v1247_v60 = vcvt.s32.f32 %v607_v54  ;;  %v1255_v62 = vcvt.s32.f32 %v615_v55  ;;  %v224_v63 = vunpack.c.2.s8 %v48_v50  ;;  %v232_v0 = vunpack.c.3.s8 %v48_v50  ;;  %v2597_v54 = vld [vmem:[#allocation1 + $0x1b] sm:$0xff] }
  0xa0   :  { %2019 = vmatpush.bf16.msrb.mxu3 %v1504_v56  ;;  %v1623_v1 = vpack.c.bf16 %v1127_v57, %v1119_v52  ;;  %v1375_v3 = vcvt.s32.f32 %v735_v58  ;;  %v1383_v4 = vcvt.s32.f32 %v743_v59  ;;  %v463_v5 = vunpack.c.0.s8 %v111_v32  ;;  %v96_v59 = vld [vmem:[#allocation2 + $0x198] sm:$0xff] }
  0xa1   :  { %v1687_v6 = vpack.c.bf16 %v1255_v62, %v1247_v60  ;;  %v864_v8 = vcvt.s32.f32 %v224_v63  ;;  %v872_v9 = vcvt.s32.f32 %v232_v0  ;;  %v471_v10 = vunpack.c.1.s8 %v111_v32  ;;  %v200_v32 = vld [vmem:[#allocation2 + $0x4d8] sm:$0xff] }
  0xa2   :  { %1981 = vmatpush.bf16.msrb.mxu0 %v1623_v1  ;;  %v1751_v11 = vpack.c.bf16 %v1383_v4, %v1375_v3  ;;  %v1103_v12 = vcvt.s32.f32 %v463_v5  ;;  %v591_v7 = vunpack.c.0.s8 %v143_v40  ;;  %v599_v13 = vunpack.c.1.s8 %v143_v40  ;;  %v2601_v1 = vld [vmem:[#allocation1] sm:$0xff] }
  0xa3   :  { %1994 = vmatpush.bf16.msrb.mxu1 %v1687_v6  ;;  %v1496_v15 = vpack.c.bf16 %v872_v9, %v864_v8  ;;  %v1111_v16 = vcvt.s32.f32 %v471_v10  ;;  %v719_v17 = vunpack.c.0.s8 %v175_v45  ;;  %v727_v18 = vunpack.c.1.s8 %v175_v45  ;;  %v128_v8 = vld [vmem:[#allocation2 + $0x298] sm:$0xff] }
  0xa4   :  { %2007 = vmatpush.bf16.msrb.mxu2 %v1751_v11  ;;  %v1231_v19 = vcvt.s32.f32 %v591_v7  ;;  %v1239_v20 = vcvt.s32.f32 %v599_v13  ;;  %v208_v22 = vunpack.c.0.s8 %v48_v50  ;;  %v216_v23 = vunpack.c.1.s8 %v48_v50 }
  0xa5   :  { %2020 = vmatpush.bf16.msrb.mxu3 %v1496_v15  ;;  %v1615_v24 = vpack.c.bf16 %v1111_v16, %v1103_v12  ;;  %v1359_v25 = vcvt.s32.f32 %v719_v17  ;;  %v1367_v26 = vcvt.s32.f32 %v727_v18  ;;  %v448_v27 = vunpack.c.2.s8 %v104_v14  ;;  %v160_v12 = vld [vmem:[#allocation2 + $0x398] sm:$0xff] }
  0xa6   :  { %v1679_v21 = vpack.c.bf16 %v1239_v20, %v1231_v19  ;;  %v848_v29 = vcvt.s32.f32 %v208_v22  ;;  %v856_v30 = vcvt.s32.f32 %v216_v23  ;;  %v456_v31 = vunpack.c.3.s8 %v104_v14  ;;  %v192_v16 = vld [vmem:[#allocation2 + $0x498] sm:$0xff] }
  0xa7   :  { %1982 = vmatpush.bf16.msrb.mxu0 %v1615_v24  ;;  %v1743_v33 = vpack.c.bf16 %v1367_v26, %v1359_v25  ;;  %v1088_v34 = vcvt.s32.f32 %v448_v27  ;;  %v576_v2 = vunpack.c.2.s8 %v136_v61  ;;  %v584_v35 = vunpack.c.3.s8 %v136_v61 }
  0xa8   :  { %1995 = vmatpush.bf16.msrb.mxu1 %v1679_v21  ;;  %v1488_v36 = vpack.c.bf16 %v856_v30, %v848_v29  ;;  %v1096_v37 = vcvt.s32.f32 %v456_v31  ;;  %v704_v38 = vunpack.c.2.s8 %v168_v28  ;;  %v712_v39 = vunpack.c.3.s8 %v168_v28 }
  0xa9   :  { %2008 = vmatpush.bf16.msrb.mxu2 %v1743_v33  ;;  %v1216_v40 = vcvt.s32.f32 %v576_v2  ;;  %v1224_v41 = vcvt.s32.f32 %v584_v35  ;;  %v832_v42 = vunpack.c.2.s8 %v200_v32  ;;  %v840_v43 = vunpack.c.3.s8 %v200_v32 }
  0xaa   :  { %2021 = vmatpush.bf16.msrb.mxu3 %v1488_v36  ;;  %v1608_v44 = vpack.c.bf16 %v1096_v37, %v1088_v34  ;;  %v1344_v45 = vcvt.s32.f32 %v704_v38  ;;  %v1352_v46 = vcvt.s32.f32 %v712_v39  ;;  %v432_v47 = vunpack.c.0.s8 %v104_v14  ;;  %1983 = vmatmul.bf16.vlgmr.msrb.gmra.mxu0 %v2594_v48  ;;  %v88_v39 = vld [vmem:[#allocation2 + $0x158] sm:$0xff] }
  0xab   :  { %v1672_v49 = vpack.c.bf16 %v1224_v41, %v1216_v40  ;;  %v1472_v50 = vcvt.s32.f32 %v832_v42  ;;  %v1480_v51 = vcvt.s32.f32 %v840_v43  ;;  %v440_v52 = vunpack.c.1.s8 %v104_v14  ;;  %1996 = vmatmul.bf16.vlgmr.msrb.gmra.mxu1 %v2597_v54 }
  0xac   :  { %2027 = vmatpush.bf16.msra.mxu0 %v1608_v44  ;;  %v1736_v55 = vpack.c.bf16 %v1352_v46, %v1344_v45  ;;  %v1072_v56 = vcvt.s32.f32 %v432_v47  ;;  %v560_v57 = vunpack.c.0.s8 %v136_v61  ;;  %v568_v58 = vunpack.c.1.s8 %v136_v61  ;;  %2009 = vmatmul.bf16.vlgmr.msrb.gmra.mxu2 %v2584_v53 }
  0xad   :  { %2040 = vmatpush.bf16.msra.mxu1 %v1672_v49  ;;  %v1800_v60 = vpack.c.bf16 %v1480_v51, %v1472_v50  ;;  %v1080_v62 = vcvt.s32.f32 %v440_v52  ;;  %v688_v63 = vunpack.c.0.s8 %v168_v28  ;;  %v696_v0 = vunpack.c.1.s8 %v168_v28  ;;  %2022 = vmatmul.bf16.vlgmr.msrb.gmra.mxu3 %v2601_v1  ;;  %v120_v49 = vld [vmem:[#allocation2 + $0x258] sm:$0xff] }
  0xae   :  { %2053 = vmatpush.bf16.msra.mxu2 %v1736_v55  ;;  %v1200_v3 = vcvt.s32.f32 %v560_v57  ;;  %v1208_v4 = vcvt.s32.f32 %v568_v58  ;;  %v816_v5 = vunpack.c.0.s8 %v200_v32  ;;  %v824_v6 = vunpack.c.1.s8 %v200_v32 }
  0xaf   :  { %2066 = vmatpush.bf16.msra.mxu3 %v1800_v60  ;;  %v1600_v9 = vpack.c.bf16 %v1080_v62, %v1072_v56  ;;  %v1328_v10 = vcvt.s32.f32 %v688_v63  ;;  %v1336_v53 = vcvt.s32.f32 %v696_v0  ;;  %v416_v11 = vunpack.c.2.s8 %v96_v59  ;;  %v152_v56 = vld [vmem:[#allocation2 + $0x358] sm:$0xff] }
  0xb0   :  { %v1664_v7 = vpack.c.bf16 %v1208_v4, %v1200_v3  ;;  %v1456_v13 = vcvt.s32.f32 %v816_v5  ;;  %v1464_v14 = vcvt.s32.f32 %v824_v6  ;;  %v424_v15 = vunpack.c.3.s8 %v96_v59  ;;  %v184_v62 = vld [vmem:[#allocation2 + $0x458] sm:$0xff] }
  0xb1   :  { %2028 = vmatpush.bf16.msra.mxu0 %v1600_v9  ;;  %v1728_v17 = vpack.c.bf16 %v1336_v53, %v1328_v10  ;;  %v1056_v18 = vcvt.s32.f32 %v416_v11  ;;  %v544_v19 = vunpack.c.2.s8 %v128_v8  ;;  %v552_v20 = vunpack.c.3.s8 %v128_v8 }
  0xb2   :  { %2041 = vmatpush.bf16.msra.mxu1 %v1664_v7  ;;  %v1792_v22 = vpack.c.bf16 %v1464_v14, %v1456_v13  ;;  %v1064_v23 = vcvt.s32.f32 %v424_v15  ;;  %v672_v61 = vunpack.c.2.s8 %v160_v12  ;;  %v680_v24 = vunpack.c.3.s8 %v160_v12 }
  0xb3   :  { %2054 = vmatpush.bf16.msra.mxu2 %v1728_v17  ;;  %v1184_v25 = vcvt.s32.f32 %v544_v19  ;;  %v1192_v26 = vcvt.s32.f32 %v552_v20  ;;  %v800_v27 = vunpack.c.2.s8 %v192_v16  ;;  %v808_v28 = vunpack.c.3.s8 %v192_v16 }
  0xb4   :  { %2067 = vmatpush.bf16.msra.mxu3 %v1792_v22  ;;  %v1592_v21 = vpack.c.bf16 %v1064_v23, %v1056_v18  ;;  %v1312_v29 = vcvt.s32.f32 %v672_v61  ;;  %v1320_v30 = vcvt.s32.f32 %v680_v24  ;;  %v400_v31 = vunpack.c.0.s8 %v96_v59  ;;  %v80_v24 = vld [vmem:[#allocation2 + $0x118] sm:$0xff] }
  0xb5   :  { %v1656_v32 = vpack.c.bf16 %v1192_v26, %v1184_v25  ;;  %v1440_v33 = vcvt.s32.f32 %v800_v27  ;;  %v1448_v34 = vcvt.s32.f32 %v808_v28  ;;  %v408_v2 = vunpack.c.1.s8 %v96_v59 }
  0xb6   :  { %2029 = vmatpush.bf16.msra.mxu0 %v1592_v21  ;;  %v1720_v35 = vpack.c.bf16 %v1320_v30, %v1312_v29  ;;  %v1040_v36 = vcvt.s32.f32 %v400_v31  ;;  %v528_v37 = vunpack.c.0.s8 %v128_v8  ;;  %v536_v38 = vunpack.c.1.s8 %v128_v8 }
  0xb7   :  { %2042 = vmatpush.bf16.msra.mxu1 %v1656_v32  ;;  %v1784_v40 = vpack.c.bf16 %v1448_v34, %v1440_v33  ;;  %v1048_v41 = vcvt.s32.f32 %v408_v2  ;;  %v656_v42 = vunpack.c.0.s8 %v160_v12  ;;  %v664_v43 = vunpack.c.1.s8 %v160_v12  ;;  %v112_v32 = vld [vmem:[#allocation2 + $0x218] sm:$0xff] }
  0xb8   :  { %2055 = vmatpush.bf16.msra.mxu2 %v1720_v35  ;;  %v1168_v44 = vcvt.s32.f32 %v528_v37  ;;  %v1176_v45 = vcvt.s32.f32 %v536_v38  ;;  %v784_v46 = vunpack.c.0.s8 %v192_v16  ;;  %v792_v47 = vunpack.c.1.s8 %v192_v16 }
  0xb9   :  { %2068 = vmatpush.bf16.msra.mxu3 %v1784_v40  ;;  %v1584_v50 = vpack.c.bf16 %v1048_v41, %v1040_v36  ;;  %v1296_v51 = vcvt.s32.f32 %v656_v42  ;;  %v1304_v52 = vcvt.s32.f32 %v664_v43  ;;  %v384_v55 = vunpack.c.2.s8 %v88_v39  ;;  %v144_v36 = vld [vmem:[#allocation2 + $0x318] sm:$0xff] }
  0xba   :  { %v1648_v57 = vpack.c.bf16 %v1176_v45, %v1168_v44  ;;  %v1424_v58 = vcvt.s32.f32 %v784_v46  ;;  %v1432_v59 = vcvt.s32.f32 %v792_v47  ;;  %v392_v60 = vunpack.c.3.s8 %v88_v39  ;;  %v176_v41 = vld [vmem:[#allocation2 + $0x418] sm:$0xff] }
  0xbb   :  { %2030 = vmatpush.bf16.msra.mxu0 %v1584_v50  ;;  %v1712_v63 = vpack.c.bf16 %v1304_v52, %v1296_v51  ;;  %v1024_v0 = vcvt.s32.f32 %v384_v55  ;;  %v512_v3 = vunpack.c.2.s8 %v120_v49  ;;  %v520_v4 = vunpack.c.3.s8 %v120_v49 }
  0xbc   :  { %2043 = vmatpush.bf16.msra.mxu1 %v1648_v57  ;;  %v1776_v5 = vpack.c.bf16 %v1432_v59, %v1424_v58  ;;  %v1032_v6 = vcvt.s32.f32 %v392_v60  ;;  %v640_v8 = vunpack.c.2.s8 %v152_v56  ;;  %v648_v9 = vunpack.c.3.s8 %v152_v56 }
  0xbd   :  { %2056 = vmatpush.bf16.msra.mxu2 %v1712_v63  ;;  %v1152_v10 = vcvt.s32.f32 %v512_v3  ;;  %v1160_v53 = vcvt.s32.f32 %v520_v4  ;;  %v768_v11 = vunpack.c.2.s8 %v184_v62  ;;  %v776_v12 = vunpack.c.3.s8 %v184_v62 }
  0xbe   :  { %2069 = vmatpush.bf16.msra.mxu3 %v1776_v5  ;;  %v1576_v7 = vpack.c.bf16 %v1032_v6, %v1024_v0  ;;  %v1280_v13 = vcvt.s32.f32 %v640_v8  ;;  %v1288_v14 = vcvt.s32.f32 %v648_v9  ;;  %v368_v15 = vunpack.c.0.s8 %v88_v39  ;;  %v73_v9 = vld [vmem:[#allocation2 + $0xe0] sm:$0xff] }
  0xbf   :  { %v1640_v16 = vpack.c.bf16 %v1160_v53, %v1152_v10  ;;  %v1408_v17 = vcvt.s32.f32 %v768_v11  ;;  %v1416_v18 = vcvt.s32.f32 %v776_v12  ;;  %v376_v19 = vunpack.c.1.s8 %v88_v39 }
  0xc0   :  { %2031 = vmatpush.bf16.msra.mxu0 %v1576_v7  ;;  %v1704_v20 = vpack.c.bf16 %v1288_v14, %v1280_v13  ;;  %v1008_v22 = vcvt.s32.f32 %v368_v15  ;;  %v496_v23 = vunpack.c.0.s8 %v120_v49  ;;  %v504_v61 = vunpack.c.1.s8 %v120_v49 }
  0xc1   :  { %2044 = vmatpush.bf16.msra.mxu1 %v1640_v16  ;;  %v1768_v25 = vpack.c.bf16 %v1416_v18, %v1408_v17  ;;  %v1016_v26 = vcvt.s32.f32 %v376_v19  ;;  %v624_v27 = vunpack.c.0.s8 %v152_v56  ;;  %v632_v28 = vunpack.c.1.s8 %v152_v56  ;;  %v105_v16 = vld [vmem:[#allocation2 + $0x1e0] sm:$0xff] }
  0xc2   :  { %2057 = vmatpush.bf16.msra.mxu2 %v1704_v20  ;;  %v1136_v21 = vcvt.s32.f32 %v496_v23  ;;  %v1144_v29 = vcvt.s32.f32 %v504_v61  ;;  %v752_v30 = vunpack.c.0.s8 %v184_v62  ;;  %v760_v31 = vunpack.c.1.s8 %v184_v62 }
  0xc3   :  { %2070 = vmatpush.bf16.msra.mxu3 %v1768_v25  ;;  %v1568_v33 = vpack.c.bf16 %v1016_v26, %v1008_v22  ;;  %v1264_v34 = vcvt.s32.f32 %v624_v27  ;;  %v1272_v2 = vcvt.s32.f32 %v632_v28  ;;  %v352_v35 = vunpack.c.2.s8 %v80_v24  ;;  %v137_v22 = vld [vmem:[#allocation2 + $0x2e0] sm:$0xff] }
  0xc4   :  { %v1632_v37 = vpack.c.bf16 %v1144_v29, %v1136_v21  ;;  %v1392_v38 = vcvt.s32.f32 %v752_v30  ;;  %v1400_v39 = vcvt.s32.f32 %v760_v31  ;;  %v360_v40 = vunpack.c.3.s8 %v80_v24  ;;  %v169_v26 = vld [vmem:[#allocation2 + $0x3e0] sm:$0xff] }
  0xc5   :  { %2032 = vmatpush.bf16.msra.mxu0 %v1568_v33  ;;  %v1696_v42 = vpack.c.bf16 %v1272_v2, %v1264_v34  ;;  %v992_v43 = vcvt.s32.f32 %v352_v35  ;;  %v480_v44 = vunpack.c.2.s8 %v112_v32  ;;  %v488_v45 = vunpack.c.3.s8 %v112_v32 }
  0xc6   :  { %2045 = vmatpush.bf16.msra.mxu1 %v1632_v37  ;;  %v1760_v46 = vpack.c.bf16 %v1400_v39, %v1392_v38  ;;  %v1000_v47 = vcvt.s32.f32 %v360_v40  ;;  %v608_v49 = vunpack.c.2.s8 %v144_v36  ;;  %v616_v50 = vunpack.c.3.s8 %v144_v36  ;;  %v2604_v40 = vld [vmem:[#allocation1 + $0x9] sm:$0xff] }
  0xc7   :  { %2058 = vmatpush.bf16.msra.mxu2 %v1696_v42  ;;  %v1120_v51 = vcvt.s32.f32 %v480_v44  ;;  %v1128_v52 = vcvt.s32.f32 %v488_v45  ;;  %v736_v55 = vunpack.c.2.s8 %v176_v41  ;;  %v744_v56 = vunpack.c.3.s8 %v176_v41 }
  0xc8   :  { %2071 = vmatpush.bf16.msra.mxu3 %v1760_v46  ;;  %v1560_v57 = vpack.c.bf16 %v1000_v47, %v992_v43  ;;  %v1248_v58 = vcvt.s32.f32 %v608_v49  ;;  %v1256_v59 = vcvt.s32.f32 %v616_v50  ;;  %v336_v60 = vunpack.c.0.s8 %v80_v24 }
  0xc9   :  { %v1624_v62 = vpack.c.bf16 %v1128_v52, %v1120_v51  ;;  %v1376_v63 = vcvt.s32.f32 %v736_v55  ;;  %v1384_v0 = vcvt.s32.f32 %v744_v56  ;;  %v344_v3 = vunpack.c.1.s8 %v80_v24  ;;  %v65_v51 = vld [vmem:[#allocation2 + $0xa0] sm:$0xff] }
  0xca   :  { %2033 = vmatpush.bf16.msra.mxu0 %v1560_v57  ;;  %v1688_v4 = vpack.c.bf16 %v1256_v59, %v1248_v58  ;;  %v976_v5 = vcvt.s32.f32 %v336_v60  ;;  %v464_v6 = vunpack.c.0.s8 %v112_v32  ;;  %v472_v8 = vunpack.c.1.s8 %v112_v32  ;;  %v2609_v55 = vld [vmem:[#allocation1 + $0x24] sm:$0xff] }
  0xcb   :  { %2046 = vmatpush.bf16.msra.mxu1 %v1624_v62  ;;  %v1752_v10 = vpack.c.bf16 %v1384_v0, %v1376_v63  ;;  %v984_v53 = vcvt.s32.f32 %v344_v3  ;;  %v592_v11 = vunpack.c.0.s8 %v144_v36  ;;  %v600_v12 = vunpack.c.1.s8 %v144_v36  ;;  %v97_v0 = vld [vmem:[#allocation2 + $0x1a0] sm:$0xff] }
  0xcc   :  { %2059 = vmatpush.bf16.msra.mxu2 %v1688_v4  ;;  %v1104_v7 = vcvt.s32.f32 %v464_v6  ;;  %v1112_v13 = vcvt.s32.f32 %v472_v8  ;;  %v720_v14 = vunpack.c.0.s8 %v176_v41  ;;  %v728_v15 = vunpack.c.1.s8 %v176_v41  ;;  %v129_v8 = vld [vmem:[#allocation2 + $0x2a0] sm:$0xff] }
  0xcd   :  { %2072 = vmatpush.bf16.msra.mxu3 %v1752_v10  ;;  %v1552_v17 = vpack.c.bf16 %v984_v53, %v976_v5  ;;  %v1232_v18 = vcvt.s32.f32 %v592_v11  ;;  %v1240_v19 = vcvt.s32.f32 %v600_v12  ;;  %v321_v20 = vunpack.c.2.s8 %v73_v9  ;;  %v161_v12 = vld [vmem:[#allocation2 + $0x3a0] sm:$0xff] }
  0xce   :  { %v1616_v23 = vpack.c.bf16 %v1112_v13, %v1104_v7  ;;  %v1360_v61 = vcvt.s32.f32 %v720_v14  ;;  %v1368_v24 = vcvt.s32.f32 %v728_v15  ;;  %v329_v25 = vunpack.c.3.s8 %v73_v9 }
  0xcf   :  { %2034 = vmatpush.bf16.msra.mxu0 %v1552_v17  ;;  %v1680_v27 = vpack.c.bf16 %v1240_v19, %v1232_v18  ;;  %v961_v28 = vcvt.s32.f32 %v321_v20  ;;  %v449_v21 = vunpack.c.2.s8 %v105_v16  ;;  %v457_v29 = vunpack.c.3.s8 %v105_v16 }
  0xd0   :  { %2047 = vmatpush.bf16.msra.mxu1 %v1616_v23  ;;  %v1744_v30 = vpack.c.bf16 %v1368_v24, %v1360_v61  ;;  %v969_v31 = vcvt.s32.f32 %v329_v25  ;;  %v577_v32 = vunpack.c.2.s8 %v137_v22  ;;  %v585_v33 = vunpack.c.3.s8 %v137_v22 }
  0xd1   :  { %2060 = vmatpush.bf16.msra.mxu2 %v1680_v27  ;;  %v1089_v34 = vcvt.s32.f32 %v449_v21  ;;  %v1097_v2 = vcvt.s32.f32 %v457_v29  ;;  %v705_v35 = vunpack.c.2.s8 %v169_v26  ;;  %v713_v36 = vunpack.c.3.s8 %v169_v26 }
  0xd2   :  { %2073 = vmatpush.bf16.msra.mxu3 %v1744_v30  ;;  %v1545_v37 = vpack.c.bf16 %v969_v31, %v961_v28  ;;  %v1217_v38 = vcvt.s32.f32 %v577_v32  ;;  %v1225_v39 = vcvt.s32.f32 %v585_v33  ;;  %2035 = vmatmul.bf16.vlgmr.msra.gmra.mxu0 %v2604_v40  ;;  %v305_v41 = vunpack.c.0.s8 %v73_v9 }
  0xd3   :  { %v1609_v42 = vpack.c.bf16 %v1097_v2, %v1089_v34  ;;  %v1345_v43 = vcvt.s32.f32 %v705_v35  ;;  %v1353_v44 = vcvt.s32.f32 %v713_v36  ;;  %v313_v45 = vunpack.c.1.s8 %v73_v9  ;;  %2048 = vmatmul.bf16.vlgmr.msra.gmra.mxu1 %v2594_v48  ;;  %v57_v2 = vld [vmem:[#allocation2 + $0x60] sm:$0xff] }
  0xd4   :  { %2079 = vmatpush.bf16.msrb.mxu0 %v1545_v37  ;;  %v1673_v46 = vpack.c.bf16 %v1225_v39, %v1217_v38  ;;  %2061 = vmatmul.bf16.vlgmr.msra.gmra.mxu2 %v2597_v54  ;;  %v945_v47 = vcvt.s32.f32 %v305_v41  ;;  %v433_v49 = vunpack.c.0.s8 %v105_v16  ;;  %v441_v50 = vunpack.c.1.s8 %v105_v16  ;;  %v2612_v39 = vpop.f32.mrf.mxu0 }
  0xd5   :  { %2092 = vmatpush.bf16.msrb.mxu1 %v1609_v42  ;;  %v1737_v52 = vpack.c.bf16 %v1353_v44, %v1345_v43  ;;  %2074 = vmatmul.bf16.vlgmr.msra.gmra.mxu3 %v2609_v55  ;;  %v953_v56 = vcvt.s32.f32 %v313_v45  ;;  %v561_v57 = vunpack.c.0.s8 %v137_v22  ;;  %v569_v58 = vunpack.c.1.s8 %v137_v22  ;;  %v89_v45 = vld [vmem:[#allocation2 + $0x160] sm:$0xff] }
  0xd6   :  { %2105 = vmatpush.bf16.msrb.mxu2 %v1673_v46  ;;  %v1073_v59 = vcvt.s32.f32 %v433_v49  ;;  %v1081_v60 = vcvt.s32.f32 %v441_v50  ;;  %v689_v62 = vunpack.c.0.s8 %v169_v26  ;;  %v697_v63 = vunpack.c.1.s8 %v169_v26 }
  0xd7   :  { %2118 = vmatpush.bf16.msrb.mxu3 %v1737_v52  ;;  %v1537_v3 = vpack.c.bf16 %v953_v56, %v945_v47  ;;  %v1201_v4 = vcvt.s32.f32 %v561_v57  ;;  %v1209_v5 = vcvt.s32.f32 %v569_v58  ;;  %v289_v6 = vunpack.c.2.s8 %v65_v51 }
  0xd8   :  { %v1601_v9 = vpack.c.bf16 %v1081_v60, %v1073_v59  ;;  %v1329_v10 = vcvt.s32.f32 %v689_v62  ;;  %v1337_v53 = vcvt.s32.f32 %v697_v63  ;;  %v297_v11 = vunpack.c.3.s8 %v65_v51  ;;  %v153_v59 = vld [vmem:[#allocation2 + $0x360] sm:$0xff] }
  0xd9   :  { %2080 = vmatpush.bf16.msrb.mxu0 %v1537_v3  ;;  %v1665_v7 = vpack.c.bf16 %v1209_v5, %v1201_v4  ;;  %v929_v13 = vcvt.s32.f32 %v289_v6  ;;  %v417_v14 = vunpack.c.2.s8 %v97_v0  ;;  %v425_v15 = vunpack.c.3.s8 %v97_v0 }
  0xda   :  { %2093 = vmatpush.bf16.msrb.mxu1 %v1601_v9  ;;  %v1729_v16 = vpack.c.bf16 %v1337_v53, %v1329_v10  ;;  %v937_v17 = vcvt.s32.f32 %v297_v11  ;;  %v545_v18 = vunpack.c.2.s8 %v129_v8  ;;  %v553_v19 = vunpack.c.3.s8 %v129_v8  ;;  %v2616_v9 = vpop.f32.mrf.mxu2 }
  0xdb   :  { %2106 = vmatpush.bf16.msrb.mxu2 %v1665_v7  ;;  %v1057_v20 = vcvt.s32.f32 %v417_v14  ;;  %v1065_v22 = vcvt.s32.f32 %v425_v15  ;;  %v673_v23 = vunpack.c.2.s8 %v161_v12  ;;  %v681_v61 = vunpack.c.3.s8 %v161_v12 }
  0xdc   :  { %2119 = vmatpush.bf16.msrb.mxu3 %v1729_v16  ;;  %v1529_v24 = vpack.c.bf16 %v937_v17, %v929_v13  ;;  %v1185_v25 = vcvt.s32.f32 %v545_v18  ;;  %v1193_v26 = vcvt.s32.f32 %v553_v19  ;;  %v273_v27 = vunpack.c.0.s8 %v65_v51 }
  0xdd   :  { %v1593_v28 = vpack.c.bf16 %v1065_v22, %v1057_v20  ;;  %v1313_v21 = vcvt.s32.f32 %v673_v23  ;;  %v1321_v29 = vcvt.s32.f32 %v681_v61  ;;  %v281_v30 = vunpack.c.1.s8 %v65_v51  ;;  %v121_v51 = vld [vmem:[#allocation2 + $0x260] sm:$0xff]  ;;  %v1830_v20 = vpop.f32.mrf.mxu0 }
  0xde   :  { %2081 = vmatpush.bf16.msrb.mxu0 %v1529_v24  ;;  %v1657_v31 = vpack.c.bf16 %v1193_v26, %v1185_v25  ;;  %v913_v32 = vcvt.s32.f32 %v273_v27  ;;  %v401_v33 = vunpack.c.0.s8 %v97_v0  ;;  %v409_v34 = vunpack.c.1.s8 %v97_v0  ;;  %v49_v25 = vld [vmem:[#allocation2 + $0x20] sm:$0xff] }
  0xdf   :  { %2094 = vmatpush.bf16.msrb.mxu1 %v1593_v28  ;;  %v1721_v35 = vpack.c.bf16 %v1321_v29, %v1313_v21  ;;  %v921_v36 = vcvt.s32.f32 %v281_v30  ;;  %v529_v37 = vunpack.c.0.s8 %v129_v8  ;;  %v537_v38 = vunpack.c.1.s8 %v129_v8  ;;  %v2614_v8 = vpop.f32.mrf.mxu1 }
  0xe0   :  { %2107 = vmatpush.bf16.msrb.mxu2 %v1657_v31  ;;  %v1041_v41 = vcvt.s32.f32 %v401_v33  ;;  %v1049_v42 = vcvt.s32.f32 %v409_v34  ;;  %v657_v43 = vunpack.c.0.s8 %v161_v12  ;;  %v665_v44 = vunpack.c.1.s8 %v161_v12  ;;  %v81_v33 = vld [vmem:[#allocation2 + $0x120] sm:$0xff]  ;;  %v2618_v34 = vpop.f32.mrf.mxu3 }
  0xe1   :  { %2120 = vmatpush.bf16.msrb.mxu3 %v1721_v35  ;;  %v1521_v46 = vpack.c.bf16 %v921_v36, %v913_v32  ;;  %v1169_v47 = vcvt.s32.f32 %v529_v37  ;;  %v1177_v49 = vcvt.s32.f32 %v537_v38  ;;  %v257_v50 = vunpack.c.2.s8 %v57_v2  ;;  %v113_v38 = vld [vmem:[#allocation2 + $0x220] sm:$0xff] }
  0xe2   :  { %v1585_v52 = vpack.c.bf16 %v1049_v42, %v1041_v41  ;;  %v1297_v56 = vcvt.s32.f32 %v657_v43  ;;  %v1305_v57 = vcvt.s32.f32 %v665_v44  ;;  %v265_v58 = vunpack.c.3.s8 %v57_v2 }
  0xe3   :  { %2082 = vmatpush.bf16.msrb.mxu0 %v1521_v46  ;;  %v1649_v60 = vpack.c.bf16 %v1177_v49, %v1169_v47  ;;  %v897_v62 = vcvt.s32.f32 %v257_v50  ;;  %v385_v63 = vunpack.c.2.s8 %v89_v45  ;;  %v393_v0 = vunpack.c.3.s8 %v89_v45  ;;  %v1856_v47 = vpop.f32.mrf.mxu2 }
  0xe4   :  { %2095 = vmatpush.bf16.msrb.mxu1 %v1585_v52  ;;  %v1713_v3 = vpack.c.bf16 %v1305_v57, %v1297_v56  ;;  %v905_v4 = vcvt.s32.f32 %v265_v58  ;;  %v513_v5 = vunpack.c.2.s8 %v121_v51  ;;  %v521_v6 = vunpack.c.3.s8 %v121_v51 }
  0xe5   :  { %2108 = vmatpush.bf16.msrb.mxu2 %v1649_v60  ;;  %v1025_v10 = vcvt.s32.f32 %v385_v63  ;;  %v1033_v53 = vcvt.s32.f32 %v393_v0  ;;  %v641_v11 = vunpack.c.2.s8 %v153_v59  ;;  %v649_v12 = vunpack.c.3.s8 %v153_v59 }
  0xe6   :  { %2121 = vmatpush.bf16.msrb.mxu3 %v1713_v3  ;;  %v1513_v7 = vpack.c.bf16 %v905_v4, %v897_v62  ;;  %v1153_v13 = vcvt.s32.f32 %v513_v5  ;;  %v1161_v14 = vcvt.s32.f32 %v521_v6  ;;  %v241_v15 = vunpack.c.0.s8 %v57_v2 }
  0xe7   :  { %v1577_v16 = vpack.c.bf16 %v1033_v53, %v1025_v10  ;;  %v1281_v17 = vcvt.s32.f32 %v641_v11  ;;  %v1289_v18 = vcvt.s32.f32 %v649_v12  ;;  %v249_v19 = vunpack.c.1.s8 %v57_v2  ;;  %v1843_v46 = vpop.f32.mrf.mxu1 }
  0xe8   :  { %2083 = vmatpush.bf16.msrb.mxu0 %v1513_v7  ;;  %v1641_v22 = vpack.c.bf16 %v1161_v14, %v1153_v13  ;;  %v881_v23 = vcvt.s32.f32 %v241_v15  ;;  %v369_v61 = vunpack.c.0.s8 %v89_v45  ;;  %v377_v24 = vunpack.c.1.s8 %v89_v45  ;;  %v145_v45 = vld [vmem:[#allocation2 + $0x320] sm:$0xff] }
  0xe9   :  { %2096 = vmatpush.bf16.msrb.mxu1 %v1577_v16  ;;  %v1705_v26 = vpack.c.bf16 %v1289_v18, %v1281_v17  ;;  %v889_v27 = vcvt.s32.f32 %v249_v19  ;;  %v497_v28 = vunpack.c.0.s8 %v121_v51  ;;  %v505_v21 = vunpack.c.1.s8 %v121_v51  ;;  %v201_v16 = vld [vmem:[#allocation2 + $0x4e0] sm:$0xff]  ;;  %v1869_v17 = vpop.f32.mrf.mxu3 }
  0xea   :  { %2109 = vmatpush.bf16.msrb.mxu2 %v1641_v22  ;;  %v1009_v29 = vcvt.s32.f32 %v369_v61  ;;  %v1017_v30 = vcvt.s32.f32 %v377_v24  ;;  %v625_v31 = vunpack.c.0.s8 %v153_v59  ;;  %v633_v32 = vunpack.c.1.s8 %v153_v59 }
  0xeb   :  { %2122 = vmatpush.bf16.msrb.mxu3 %v1705_v26  ;;  %v1505_v2 = vpack.c.bf16 %v889_v27, %v881_v23  ;;  %v1137_v35 = vcvt.s32.f32 %v497_v28  ;;  %v1145_v36 = vcvt.s32.f32 %v505_v21  ;;  %v225_v37 = vunpack.c.2.s8 %v49_v25  ;;  %v74_v27 = vld [vmem:[#allocation2 + $0xe8] sm:$0xff]  ;;  %v2620_v28 = vpop.f32.mrf.mxu0 }
  0xec   :  { %v1569_v41 = vpack.c.bf16 %v1017_v30, %v1009_v29  ;;  %v1265_v42 = vcvt.s32.f32 %v625_v31  ;;  %v1273_v43 = vcvt.s32.f32 %v633_v32  ;;  %v233_v44 = vunpack.c.3.s8 %v49_v25  ;;  %v106_v31 = vld [vmem:[#allocation2 + $0x1e8] sm:$0xff] }
  0xed   :  { %2084 = vmatpush.bf16.msrb.mxu0 %v1505_v2  ;;  %v1633_v49 = vpack.c.bf16 %v1145_v36, %v1137_v35  ;;  %v865_v50 = vcvt.s32.f32 %v225_v37  ;;  %v353_v51 = vunpack.c.2.s8 %v81_v33  ;;  %v361_v52 = vunpack.c.3.s8 %v81_v33  ;;  %v138_v36 = vld [vmem:[#allocation2 + $0x2e8] sm:$0xff] }
  0xee   :  { %2097 = vmatpush.bf16.msrb.mxu1 %v1569_v41  ;;  %v1697_v56 = vpack.c.bf16 %v1273_v43, %v1265_v42  ;;  %v873_v57 = vcvt.s32.f32 %v233_v44  ;;  %v481_v58 = vunpack.c.2.s8 %v113_v38  ;;  %v489_v59 = vunpack.c.3.s8 %v113_v38 }
  0xef   :  { %2110 = vmatpush.bf16.msrb.mxu2 %v1633_v49  ;;  %v993_v60 = vcvt.s32.f32 %v353_v51  ;;  %v1001_v62 = vcvt.s32.f32 %v361_v52  ;;  %v609_v63 = vunpack.c.2.s8 %v145_v45  ;;  %v617_v0 = vunpack.c.3.s8 %v145_v45  ;;  %v2626_v17 = vpop.f32.mrf.mxu1 }
  0xf0   :  { %2123 = vmatpush.bf16.msrb.mxu3 %v1697_v56  ;;  %v1497_v3 = vpack.c.bf16 %v873_v57, %v865_v50  ;;  %v1121_v4 = vcvt.s32.f32 %v481_v58  ;;  %v1129_v5 = vcvt.s32.f32 %v489_v59  ;;  %v209_v6 = vunpack.c.0.s8 %v49_v25 }
  0xf1   :  { %v1561_v10 = vpack.c.bf16 %v1001_v62, %v993_v60  ;;  %v1249_v53 = vcvt.s32.f32 %v609_v63  ;;  %v1257_v11 = vcvt.s32.f32 %v617_v0  ;;  %v217_v12 = vunpack.c.1.s8 %v49_v25 }
  0xf2   :  { %2085 = vmatpush.bf16.msrb.mxu0 %v1497_v3  ;;  %v1625_v7 = vpack.c.bf16 %v1129_v5, %v1121_v4  ;;  %v849_v13 = vcvt.s32.f32 %v209_v6  ;;  %v337_v14 = vunpack.c.0.s8 %v81_v33  ;;  %v345_v15 = vunpack.c.1.s8 %v81_v33 }
  0xf3   :  { %2098 = vmatpush.bf16.msrb.mxu1 %v1561_v10  ;;  %v1689_v18 = vpack.c.bf16 %v1257_v11, %v1249_v53  ;;  %v857_v19 = vcvt.s32.f32 %v217_v12  ;;  %v465_v20 = vunpack.c.0.s8 %v113_v38  ;;  %v473_v22 = vunpack.c.1.s8 %v113_v38  ;;  %v1882_v6 = vpop.f32.mrf.mxu0 }
  0xf4   :  { %2111 = vmatpush.bf16.msrb.mxu2 %v1625_v7  ;;  %v977_v23 = vcvt.s32.f32 %v337_v14  ;;  %v985_v61 = vcvt.s32.f32 %v345_v15  ;;  %v593_v24 = vunpack.c.0.s8 %v145_v45  ;;  %v601_v26 = vunpack.c.1.s8 %v145_v45 }
  0xf5   :  { %2124 = vmatpush.bf16.msrb.mxu3 %v1689_v18  ;;  %v1489_v25 = vpack.c.bf16 %v857_v19, %v849_v13  ;;  %v1105_v21 = vcvt.s32.f32 %v465_v20  ;;  %v1113_v29 = vcvt.s32.f32 %v473_v22  ;;  %v833_v30 = vunpack.c.2.s8 %v201_v16  ;;  %v98_v22 = vld [vmem:[#allocation2 + $0x1a8] sm:$0xff] }
  0xf6   :  { %v1553_v32 = vpack.c.bf16 %v985_v61, %v977_v23  ;;  %v1233_v33 = vcvt.s32.f32 %v593_v24  ;;  %v1241_v2 = vcvt.s32.f32 %v601_v26  ;;  %v841_v35 = vunpack.c.3.s8 %v201_v16  ;;  %v130_v26 = vld [vmem:[#allocation2 + $0x2a8] sm:$0xff] }
  0xf7   :  { %2086 = vmatpush.bf16.msrb.mxu0 %v1489_v25  ;;  %v1617_v37 = vpack.c.bf16 %v1113_v29, %v1105_v21  ;;  %v1473_v38 = vcvt.s32.f32 %v833_v30  ;;  %v322_v41 = vunpack.c.2.s8 %v74_v27  ;;  %v330_v42 = vunpack.c.3.s8 %v74_v27 }
  0xf8   :  { %2099 = vmatpush.bf16.msrb.mxu1 %v1553_v32  ;;  %v1681_v43 = vpack.c.bf16 %v1241_v2, %v1233_v33  ;;  %v1481_v44 = vcvt.s32.f32 %v841_v35  ;;  %v450_v45 = vunpack.c.2.s8 %v106_v31  ;;  %v458_v46 = vunpack.c.3.s8 %v106_v31 }
  0xf9   :  { %2112 = vmatpush.bf16.msrb.mxu2 %v1617_v37  ;;  %v962_v47 = vcvt.s32.f32 %v322_v41  ;;  %v970_v49 = vcvt.s32.f32 %v330_v42  ;;  %v578_v50 = vunpack.c.2.s8 %v138_v36  ;;  %v586_v51 = vunpack.c.3.s8 %v138_v36 }
  0xfa   :  { %2125 = vmatpush.bf16.msrb.mxu3 %v1681_v43  ;;  %v1801_v52 = vpack.c.bf16 %v1481_v44, %v1473_v38  ;;  %v1090_v56 = vcvt.s32.f32 %v450_v45  ;;  %v1098_v57 = vcvt.s32.f32 %v458_v46  ;;  %v817_v58 = vunpack.c.0.s8 %v201_v16  ;;  %2087 = vmatmul.bf16.vlgmr.msrb.gmra.mxu0 %v2601_v1  ;;  %v193_v1 = vld [vmem:[#allocation2 + $0x4a0] sm:$0xff] }
  0xfb   :  { %v1546_v59 = vpack.c.bf16 %v970_v49, %v962_v47  ;;  %v1218_v60 = vcvt.s32.f32 %v578_v50  ;;  %v1226_v62 = vcvt.s32.f32 %v586_v51  ;;  %v825_v63 = vunpack.c.1.s8 %v201_v16  ;;  %2100 = vmatmul.bf16.vlgmr.msrb.gmra.mxu1 %v2604_v40  ;;  %v66_v16 = vld [vmem:[#allocation2 + $0xa8] sm:$0xff]  ;;  %v1895_v50 = vpop.f32.mrf.mxu1 }
  0xfc   :  { %2131 = vmatpush.bf16.msra.mxu0 %v1801_v52  ;;  %v1610_v0 = vpack.c.bf16 %v1098_v57, %v1090_v56  ;;  %v1457_v3 = vcvt.s32.f32 %v817_v58  ;;  %v306_v4 = vunpack.c.0.s8 %v74_v27  ;;  %v314_v5 = vunpack.c.1.s8 %v74_v27  ;;  %2113 = vmatmul.bf16.vlgmr.msrb.gmra.mxu2 %v2594_v48  ;;  %v185_v58 = vld [vmem:[#allocation2 + $0x460] sm:$0xff] }
  0xfd   :  { %2144 = vmatpush.bf16.msra.mxu1 %v1546_v59  ;;  %v1674_v10 = vpack.c.bf16 %v1226_v62, %v1218_v60  ;;  %v1465_v53 = vcvt.s32.f32 %v825_v63  ;;  %v434_v11 = vunpack.c.0.s8 %v106_v31  ;;  %v442_v12 = vunpack.c.1.s8 %v106_v31  ;;  %2126 = vmatmul.bf16.vlgmr.msrb.gmra.mxu3 %v2597_v54  ;;  %v58_v63 = vld [vmem:[#allocation2 + $0x68] sm:$0xff] }
  0xfe   :  { %2157 = vmatpush.bf16.msra.mxu2 %v1610_v0  ;;  %v946_v7 = vcvt.s32.f32 %v306_v4  ;;  %v954_v13 = vcvt.s32.f32 %v314_v5  ;;  %v562_v14 = vunpack.c.0.s8 %v138_v36  ;;  %v570_v15 = vunpack.c.1.s8 %v138_v36 }
  0xff   :  { %2170 = vmatpush.bf16.msra.mxu3 %v1674_v10  ;;  %v1793_v18 = vpack.c.bf16 %v1465_v53, %v1457_v3  ;;  %v1074_v48 = vcvt.s32.f32 %v434_v11  ;;  %v1082_v19 = vcvt.s32.f32 %v442_v12  ;;  %v1842_v20 = vadd.f32 %v2614_v8, %v2612_v39  ;;  %v90_v12 = vld [vmem:[#allocation2 + $0x168] sm:$0xff]  ;;  %v2639_v50 = vpop.f32.mrf.mxu0 }
 0x100   :  { %v1538_v23 = vpack.c.bf16 %v954_v13, %v946_v7  ;;  %v1202_v61 = vcvt.s32.f32 %v562_v14  ;;  %v1210_v24 = vcvt.s32.f32 %v570_v15  ;;  %v801_v54 = vunpack.c.2.s8 %v193_v1  ;;  %v122_v15 = vld [vmem:[#allocation2 + $0x268] sm:$0xff] }
 0x101   :  { %2132 = vmatpush.bf16.msra.mxu0 %v1793_v18  ;;  %v1602_v27 = vpack.c.bf16 %v1082_v19, %v1074_v48  ;;  %v1855_v25 = vadd.f32 %v2616_v9, %v1842_v20  ;;  %v809_v21 = vunpack.c.3.s8 %v193_v1  ;;  %v290_v29 = vunpack.c.2.s8 %v66_v16 }
 0x102   :  { %2145 = vmatpush.bf16.msra.mxu1 %v1538_v23  ;;  %v1666_v30 = vpack.c.bf16 %v1210_v24, %v1202_v61  ;;  %v1441_v31 = vcvt.s32.f32 %v801_v54  ;;  %v298_v32 = vunpack.c.3.s8 %v66_v16  ;;  %v418_v33 = vunpack.c.2.s8 %v98_v22  ;;  %v2632_v24 = vpop.f32.mrf.mxu2 }
 0x103   :  { %2158 = vmatpush.bf16.msra.mxu2 %v1602_v27  ;;  %v1449_v2 = vcvt.s32.f32 %v809_v21  ;;  %v930_v39 = vcvt.s32.f32 %v290_v29  ;;  %v426_v8 = vunpack.c.3.s8 %v98_v22  ;;  %v546_v35 = vunpack.c.2.s8 %v130_v26 }
 0x104   :  { %2171 = vmatpush.bf16.msra.mxu3 %v1666_v30  ;;  %v938_v36 = vcvt.s32.f32 %v298_v32  ;;  %v1058_v37 = vcvt.s32.f32 %v418_v33  ;;  %v554_v38 = vunpack.c.3.s8 %v130_v26  ;;  %v1868_v41 = vadd.f32 %v2618_v34, %v1855_v25 }
 0x105   :  { %v1785_v42 = vpack.c.bf16 %v1449_v2, %v1441_v31  ;;  %v1066_v9 = vcvt.s32.f32 %v426_v8  ;;  %v1186_v43 = vcvt.s32.f32 %v546_v35  ;;  %v785_v44 = vunpack.c.0.s8 %v193_v1 }
 0x106   :  { %v1530_v45 = vpack.c.bf16 %v938_v36, %v930_v39  ;;  %v1194_v46 = vcvt.s32.f32 %v554_v38  ;;  %v793_v47 = vunpack.c.1.s8 %v193_v1  ;;  %v274_v49 = vunpack.c.0.s8 %v66_v16  ;;  %v177_v38 = vld [vmem:[#allocation2 + $0x420] sm:$0xff] }
 0x107   :  { %2133 = vmatpush.bf16.msra.mxu0 %v1785_v42  ;;  %v1594_v51 = vpack.c.bf16 %v1066_v9, %v1058_v37  ;;  %v1425_v52 = vcvt.s32.f32 %v785_v44  ;;  %v282_v56 = vunpack.c.1.s8 %v66_v16  ;;  %v402_v57 = vunpack.c.0.s8 %v98_v22 }
 0x108   :  { %2146 = vmatpush.bf16.msra.mxu1 %v1530_v45  ;;  %v1658_v59 = vpack.c.bf16 %v1194_v46, %v1186_v43  ;;  %v1433_v60 = vcvt.s32.f32 %v793_v47  ;;  %v914_v62 = vcvt.s32.f32 %v274_v49  ;;  %v410_v34 = vunpack.c.1.s8 %v98_v22  ;;  %v50_v47 = vld [vmem:[#allocation2 + $0x28] sm:$0xff]  ;;  %v2637_v49 = vpop.f32.mrf.mxu3 }
 0x109   :  { %2159 = vmatpush.bf16.msra.mxu2 %v1594_v51  ;;  %v922_v0 = vcvt.s32.f32 %v282_v56  ;;  %v1042_v3 = vcvt.s32.f32 %v402_v57  ;;  %v530_v4 = vunpack.c.0.s8 %v130_v26  ;;  %v538_v5 = vunpack.c.1.s8 %v130_v26 }
 0x10a   :  { %2172 = vmatpush.bf16.msra.mxu3 %v1658_v59  ;;  %v1777_v6 = vpack.c.bf16 %v1433_v60, %v1425_v52  ;;  %v1050_v10 = vcvt.s32.f32 %v410_v34  ;;  %v769_v53 = vunpack.c.2.s8 %v185_v58  ;;  %v777_v11 = vunpack.c.3.s8 %v185_v58 }
 0x10b   :  { %v1522_v1 = vpack.c.bf16 %v922_v0, %v914_v62  ;;  %v1170_v7 = vcvt.s32.f32 %v530_v4  ;;  %v1178_v13 = vcvt.s32.f32 %v538_v5  ;;  %v258_v14 = vunpack.c.2.s8 %v58_v63  ;;  %v1908_v0 = vpop.f32.mrf.mxu2 }
 0x10c   :  { %2134 = vmatpush.bf16.msra.mxu0 %v1777_v6  ;;  %v1586_v16 = vpack.c.bf16 %v1050_v10, %v1042_v3  ;;  %v1409_v18 = vcvt.s32.f32 %v769_v53  ;;  %v1417_v48 = vcvt.s32.f32 %v777_v11  ;;  %v266_v19 = vunpack.c.3.s8 %v58_v63 }
 0x10d   :  { %2147 = vmatpush.bf16.msra.mxu1 %v1522_v1  ;;  %v1650_v20 = vpack.c.bf16 %v1178_v13, %v1170_v7  ;;  %v898_v22 = vcvt.s32.f32 %v258_v14  ;;  %v386_v23 = vunpack.c.2.s8 %v90_v12  ;;  %v394_v61 = vunpack.c.3.s8 %v90_v12 }
 0x10e   :  { %2160 = vmatpush.bf16.msra.mxu2 %v1586_v16  ;;  %v1769_v54 = vpack.c.bf16 %v1417_v48, %v1409_v18  ;;  %v906_v26 = vcvt.s32.f32 %v266_v19  ;;  %v514_v27 = vunpack.c.2.s8 %v122_v15  ;;  %v522_v25 = vunpack.c.3.s8 %v122_v15 }
 0x10f   :  { %2173 = vmatpush.bf16.msra.mxu3 %v1650_v20  ;;  %v1026_v21 = vcvt.s32.f32 %v386_v23  ;;  %v1034_v29 = vcvt.s32.f32 %v394_v61  ;;  %v2635_v30 = vadd.f32 %v2620_v28, %v1868_v41  ;;  %v753_v31 = vunpack.c.0.s8 %v185_v58 }
 0x110   :  { %2135 = vmatpush.bf16.msra.mxu0 %v1769_v54  ;;  %v1514_v32 = vpack.c.bf16 %v906_v26, %v898_v22  ;;  %v1154_v33 = vcvt.s32.f32 %v514_v27  ;;  %v1162_v2 = vcvt.s32.f32 %v522_v25  ;;  %v761_v39 = vunpack.c.1.s8 %v185_v58  ;;  %v82_v58 = vld [vmem:[#allocation2 + $0x128] sm:$0xff] }
 0x111   :  { %v1578_v8 = vpack.c.bf16 %v1034_v29, %v1026_v21  ;;  %v1393_v35 = vcvt.s32.f32 %v753_v31  ;;  %v242_v36 = vunpack.c.0.s8 %v58_v63  ;;  %v250_v37 = vunpack.c.1.s8 %v58_v63  ;;  %v114_v63 = vld [vmem:[#allocation2 + $0x228] sm:$0xff]  ;;  %v1921_v29 = vpop.f32.mrf.mxu3  ;;  %v1934_v31 = vpop.f32.mrf.mxu0 }
 0x112   :  { %2148 = vmatpush.bf16.msra.mxu1 %v1514_v32  ;;  %v1642_v42 = vpack.c.bf16 %v1162_v2, %v1154_v33  ;;  %v1401_v9 = vcvt.s32.f32 %v761_v39  ;;  %v370_v43 = vunpack.c.0.s8 %v90_v12  ;;  %v378_v44 = vunpack.c.1.s8 %v90_v12  ;;  %v170_v21 = vld [vmem:[#allocation2 + $0x3e8] sm:$0xff] }
 0x113   :  { %2161 = vmatpush.bf16.msra.mxu2 %v1578_v8  ;;  %v882_v45 = vcvt.s32.f32 %v242_v36  ;;  %v890_v28 = vcvt.s32.f32 %v250_v37  ;;  %v498_v41 = vunpack.c.0.s8 %v122_v15  ;;  %v506_v46 = vunpack.c.1.s8 %v122_v15  ;;  %v2641_v15 = vpop.f32.mrf.mxu1  ;;  %v194_v29 = vld [vmem:[#allocation2 + $0x4a8] sm:$0xff] }
 0x114   :  { %2174 = vmatpush.bf16.msra.mxu3 %v1642_v42  ;;  %v1761_v51 = vpack.c.bf16 %v1401_v9, %v1393_v35  ;;  %v1010_v52 = vcvt.s32.f32 %v370_v43  ;;  %v1018_v56 = vcvt.s32.f32 %v378_v44  ;;  %v737_v57 = vunpack.c.2.s8 %v177_v38  ;;  %v202_v42 = vld [vmem:[#allocation2 + $0x4e8] sm:$0xff] }
 0x115   :  { %v1506_v59 = vpack.c.bf16 %v890_v28, %v882_v45  ;;  %v1138_v60 = vcvt.s32.f32 %v498_v41  ;;  %v1146_v62 = vcvt.s32.f32 %v506_v46  ;;  %v745_v34 = vunpack.c.3.s8 %v177_v38  ;;  %v75_v45 = vld [vmem:[#allocation2 + $0xf0] sm:$0xff] }
 0x116   :  { %2136 = vmatpush.bf16.msra.mxu0 %v1761_v51  ;;  %v1570_v3 = vpack.c.bf16 %v1018_v56, %v1010_v52  ;;  %v1377_v4 = vcvt.s32.f32 %v737_v57  ;;  %v226_v5 = vunpack.c.2.s8 %v50_v47  ;;  %v234_v6 = vunpack.c.3.s8 %v50_v47  ;;  %v107_v51 = vld [vmem:[#allocation2 + $0x1f0] sm:$0xff] }
 0x117   :  { %2149 = vmatpush.bf16.msra.mxu1 %v1506_v59  ;;  %v1634_v10 = vpack.c.bf16 %v1146_v62, %v1138_v60  ;;  %v1385_v53 = vcvt.s32.f32 %v745_v34  ;;  %v354_v11 = vunpack.c.2.s8 %v82_v58  ;;  %v362_v12 = vunpack.c.3.s8 %v82_v58 }
 0x118   :  { %2162 = vmatpush.bf16.msra.mxu2 %v1570_v3  ;;  %v866_v1 = vcvt.s32.f32 %v226_v5  ;;  %v874_v7 = vcvt.s32.f32 %v234_v6  ;;  %v482_v13 = vunpack.c.2.s8 %v114_v63  ;;  %v490_v14 = vunpack.c.3.s8 %v114_v63 }
 0x119   :  { %2175 = vmatpush.bf16.msra.mxu3 %v1634_v10  ;;  %v1753_v16 = vpack.c.bf16 %v1385_v53, %v1377_v4  ;;  %v994_v18 = vcvt.s32.f32 %v354_v11  ;;  %v1002_v48 = vcvt.s32.f32 %v362_v12  ;;  %v721_v19 = vunpack.c.0.s8 %v177_v38 }
 0x11a   :  { %v1498_v20 = vpack.c.bf16 %v874_v7, %v866_v1  ;;  %v1122_v22 = vcvt.s32.f32 %v482_v13  ;;  %v1130_v23 = vcvt.s32.f32 %v490_v14  ;;  %v729_v61 = vunpack.c.1.s8 %v177_v38  ;;  %v2644_v14 = vld [vmem:[#allocation1] sm:$0xff] }
 0x11b   :  { %2137 = vmatpush.bf16.msra.mxu0 %v1753_v16  ;;  %v1562_v54 = vpack.c.bf16 %v1002_v48, %v994_v18  ;;  %v1361_v26 = vcvt.s32.f32 %v721_v19  ;;  %v210_v27 = vunpack.c.0.s8 %v50_v47  ;;  %v218_v25 = vunpack.c.1.s8 %v50_v47  ;;  %v1947_v59 = vpop.f32.mrf.mxu1 }
 0x11c   :  { %2150 = vmatpush.bf16.msra.mxu1 %v1498_v20  ;;  %v1626_v32 = vpack.c.bf16 %v1130_v23, %v1122_v22  ;;  %v1369_v33 = vcvt.s32.f32 %v729_v61  ;;  %v338_v2 = vunpack.c.0.s8 %v82_v58  ;;  %v346_v39 = vunpack.c.1.s8 %v82_v58  ;;  %v162_v61 = vld [vmem:[#allocation2 + $0x3a8] sm:$0xff] }
 0x11d   :  { %2163 = vmatpush.bf16.msra.mxu2 %v1562_v54  ;;  %v850_v8 = vcvt.s32.f32 %v210_v27  ;;  %v858_v35 = vcvt.s32.f32 %v218_v25  ;;  %v466_v36 = vunpack.c.0.s8 %v114_v63  ;;  %v474_v37 = vunpack.c.1.s8 %v114_v63  ;;  %v2648_v54 = vld [vmem:[#allocation1 + $0x12] sm:$0xff] }
 0x11e   :  { %2176 = vmatpush.bf16.msra.mxu3 %v1626_v32  ;;  %v1745_v38 = vpack.c.bf16 %v1369_v33, %v1361_v26  ;;  %v978_v9 = vcvt.s32.f32 %v338_v2  ;;  %v986_v43 = vcvt.s32.f32 %v346_v39  ;;  %v706_v44 = vunpack.c.2.s8 %v170_v21  ;;  %v67_v2 = vld [vmem:[#allocation2 + $0xb0] sm:$0xff] }
 0x11f   :  { %v1490_v28 = vpack.c.bf16 %v858_v35, %v850_v8  ;;  %v1106_v41 = vcvt.s32.f32 %v466_v36  ;;  %v1114_v46 = vcvt.s32.f32 %v474_v37  ;;  %v714_v47 = vunpack.c.3.s8 %v170_v21  ;;  %v99_v37 = vld [vmem:[#allocation2 + $0x1b0] sm:$0xff] }
 0x120   :  { %2138 = vmatpush.bf16.msra.mxu0 %v1745_v38  ;;  %v1554_v52 = vpack.c.bf16 %v986_v43, %v978_v9  ;;  %v1346_v56 = vcvt.s32.f32 %v706_v44  ;;  %v834_v57 = vunpack.c.2.s8 %v202_v42  ;;  %v842_v58 = vunpack.c.3.s8 %v202_v42 }
 0x121   :  { %2151 = vmatpush.bf16.msra.mxu1 %v1490_v28  ;;  %v1618_v60 = vpack.c.bf16 %v1114_v46, %v1106_v41  ;;  %v1354_v62 = vcvt.s32.f32 %v714_v47  ;;  %v323_v34 = vunpack.c.2.s8 %v75_v45  ;;  %v331_v63 = vunpack.c.3.s8 %v75_v45 }
 0x122   :  { %2164 = vmatpush.bf16.msra.mxu2 %v1554_v52  ;;  %v1474_v0 = vcvt.s32.f32 %v834_v57  ;;  %v1482_v3 = vcvt.s32.f32 %v842_v58  ;;  %v451_v4 = vunpack.c.2.s8 %v107_v51  ;;  %v459_v5 = vunpack.c.3.s8 %v107_v51 }
 0x123   :  { %2177 = vmatpush.bf16.msra.mxu3 %v1618_v60  ;;  %v1738_v6 = vpack.c.bf16 %v1354_v62, %v1346_v56  ;;  %v963_v10 = vcvt.s32.f32 %v323_v34  ;;  %v971_v53 = vcvt.s32.f32 %v331_v63  ;;  %v690_v11 = vunpack.c.0.s8 %v170_v21  ;;  %2139 = vmatmul.bf16.vlgmr.msra.gmra.mxu0 %v2609_v55 }
 0x124   :  { %v1802_v12 = vpack.c.bf16 %v1482_v3, %v1474_v0  ;;  %v1091_v1 = vcvt.s32.f32 %v451_v4  ;;  %v1099_v7 = vcvt.s32.f32 %v459_v5  ;;  %v698_v13 = vunpack.c.1.s8 %v170_v21  ;;  %2152 = vmatmul.bf16.vlgmr.msra.gmra.mxu1 %v2644_v14 }
 0x125   :  { %2183 = vmatpush.bf16.msrb.mxu0 %v1738_v6  ;;  %v1547_v16 = vpack.c.bf16 %v971_v53, %v963_v10  ;;  %v1330_v18 = vcvt.s32.f32 %v690_v11  ;;  %v818_v48 = vunpack.c.0.s8 %v202_v42  ;;  %v826_v19 = vunpack.c.1.s8 %v202_v42  ;;  %2165 = vmatmul.bf16.vlgmr.msra.gmra.mxu2 %v2604_v40 }
 0x126   :  { %2196 = vmatpush.bf16.msrb.mxu1 %v1802_v12  ;;  %v1611_v20 = vpack.c.bf16 %v1099_v7, %v1091_v1  ;;  %v1338_v22 = vcvt.s32.f32 %v698_v13  ;;  %v307_v23 = vunpack.c.0.s8 %v75_v45  ;;  %v315_v55 = vunpack.c.1.s8 %v75_v45  ;;  %2178 = vmatmul.bf16.vlgmr.msra.gmra.mxu3 %v2648_v54  ;;  %v154_v1 = vld [vmem:[#allocation2 + $0x368] sm:$0xff] }
 0x127   :  { %2209 = vmatpush.bf16.msrb.mxu2 %v1547_v16  ;;  %v1458_v26 = vcvt.s32.f32 %v818_v48  ;;  %v1466_v27 = vcvt.s32.f32 %v826_v19  ;;  %v435_v25 = vunpack.c.0.s8 %v107_v51  ;;  %v443_v21 = vunpack.c.1.s8 %v107_v51  ;;  %v186_v48 = vld [vmem:[#allocation2 + $0x468] sm:$0xff] }
 0x128   :  { %2222 = vmatpush.bf16.msrb.mxu3 %v1611_v20  ;;  %v1730_v31 = vpack.c.bf16 %v1338_v22, %v1330_v18  ;;  %v947_v32 = vcvt.s32.f32 %v307_v23  ;;  %v955_v40 = vcvt.s32.f32 %v315_v55  ;;  %v1907_v33 = vadd.f32 %v2632_v24, %v2626_v17  ;;  %v59_v23 = vld [vmem:[#allocation2 + $0x70] sm:$0xff] }
 0x129   :  { %v1794_v39 = vpack.c.bf16 %v1466_v27, %v1458_v26  ;;  %v1075_v8 = vcvt.s32.f32 %v435_v25  ;;  %v1083_v35 = vcvt.s32.f32 %v443_v21  ;;  %v674_v36 = vunpack.c.2.s8 %v162_v61 }
 0x12a   :  { %2184 = vmatpush.bf16.msrb.mxu0 %v1730_v31  ;;  %v1539_v42 = vpack.c.bf16 %v955_v40, %v947_v32  ;;  %v682_v38 = vunpack.c.3.s8 %v162_v61  ;;  %v802_v9 = vunpack.c.2.s8 %v194_v29  ;;  %v810_v43 = vunpack.c.3.s8 %v194_v29  ;;  %v91_v31 = vld [vmem:[#allocation2 + $0x170] sm:$0xff] }
 0x12b   :  { %2197 = vmatpush.bf16.msrb.mxu1 %v1794_v39  ;;  %v1603_v44 = vpack.c.bf16 %v1083_v35, %v1075_v8  ;;  %v1314_v45 = vcvt.s32.f32 %v674_v36  ;;  %v291_v28 = vunpack.c.2.s8 %v67_v2  ;;  %v299_v41 = vunpack.c.3.s8 %v67_v2  ;;  %v2660_v36 = vpop.f32.mrf.mxu2 }
 0x12c   :  { %2210 = vmatpush.bf16.msrb.mxu2 %v1539_v42  ;;  %v1322_v46 = vcvt.s32.f32 %v682_v38  ;;  %v1442_v47 = vcvt.s32.f32 %v802_v9  ;;  %v1450_v17 = vcvt.s32.f32 %v810_v43  ;;  %v419_v24 = vunpack.c.2.s8 %v99_v37 }
 0x12d   :  { %2223 = vmatpush.bf16.msrb.mxu3 %v1603_v44  ;;  %v931_v51 = vcvt.s32.f32 %v291_v28  ;;  %v939_v52 = vcvt.s32.f32 %v299_v41  ;;  %v427_v56 = vunpack.c.3.s8 %v99_v37  ;;  %v1920_v57 = vadd.f32 %v2637_v49, %v1907_v33 }
 0x12e   :  { %v1722_v58 = vpack.c.bf16 %v1322_v46, %v1314_v45  ;;  %v1786_v59 = vpack.c.bf16 %v1450_v17, %v1442_v47  ;;  %v1059_v60 = vcvt.s32.f32 %v419_v24  ;;  %v658_v62 = vunpack.c.0.s8 %v162_v61 }
 0x12f   :  { %v1531_v34 = vpack.c.bf16 %v939_v52, %v931_v51  ;;  %v1067_v63 = vcvt.s32.f32 %v427_v56  ;;  %v1933_v0 = vadd.f32 %v2639_v50, %v1920_v57  ;;  %v666_v3 = vunpack.c.1.s8 %v162_v61  ;;  %v146_v56 = vld [vmem:[#allocation2 + $0x328] sm:$0xff] }
 0x130   :  { %2185 = vmatpush.bf16.msrb.mxu0 %v1722_v58  ;;  %2198 = vmatpush.bf16.msrb.mxu1 %v1786_v59  ;;  %v1298_v4 = vcvt.s32.f32 %v658_v62  ;;  %v786_v5 = vunpack.c.0.s8 %v194_v29  ;;  %v794_v6 = vunpack.c.1.s8 %v194_v29  ;;  %v275_v10 = vunpack.c.0.s8 %v67_v2  ;;  %v178_v62 = vld [vmem:[#allocation2 + $0x428] sm:$0xff] }
 0x131   :  { %2211 = vmatpush.bf16.msrb.mxu2 %v1531_v34  ;;  %v1595_v53 = vpack.c.bf16 %v1067_v63, %v1059_v60  ;;  %v1306_v11 = vcvt.s32.f32 %v666_v3  ;;  %v283_v12 = vunpack.c.1.s8 %v67_v2  ;;  %v403_v49 = vunpack.c.0.s8 %v99_v37  ;;  %v2662_v34 = vpop.f32.mrf.mxu3 }
 0x132   :  { %v1426_v7 = vcvt.s32.f32 %v786_v5  ;;  %v1434_v13 = vcvt.s32.f32 %v794_v6  ;;  %v915_v16 = vcvt.s32.f32 %v275_v10  ;;  %v411_v18 = vunpack.c.1.s8 %v99_v37 }
 0x133   :  { %2224 = vmatpush.bf16.msrb.mxu3 %v1595_v53  ;;  %v1714_v50 = vpack.c.bf16 %v1306_v11, %v1298_v4  ;;  %v923_v19 = vcvt.s32.f32 %v283_v12  ;;  %v1043_v20 = vcvt.s32.f32 %v403_v49  ;;  %v1946_v22 = vadd.f32 %v2641_v15, %v1933_v0  ;;  %v51_v11 = vld [vmem:[#allocation2 + $0x30] sm:$0xff] }
 0x134   :  { %v1778_v55 = vpack.c.bf16 %v1434_v13, %v1426_v7  ;;  %v1051_v61 = vcvt.s32.f32 %v411_v18  ;;  %v642_v26 = vunpack.c.2.s8 %v154_v1  ;;  %v650_v21 = vunpack.c.3.s8 %v154_v1  ;;  %v83_v13 = vld [vmem:[#allocation2 + $0x130] sm:$0xff] }
 0x135   :  { %2186 = vmatpush.bf16.msrb.mxu0 %v1714_v50  ;;  %v1523_v27 = vpack.c.bf16 %v923_v19, %v915_v16  ;;  %v2347_v25 = vrot.slane %v1946_v22, 6  ;;  %v770_v29 = vunpack.c.2.s8 %v186_v48  ;;  %v778_v33 = vunpack.c.3.s8 %v186_v48  ;;  %v1960_v16 = vpop.f32.mrf.mxu2 }
 0x136   :  { %2199 = vmatpush.bf16.msrb.mxu1 %v1778_v55  ;;  %v1587_v32 = vpack.c.bf16 %v1051_v61, %v1043_v20  ;;  %v1282_v40 = vcvt.s32.f32 %v642_v26  ;;  %v259_v2 = vunpack.c.2.s8 %v59_v23  ;;  %v1290_v39 = vcvt.s32.f32 %v650_v21 }
 0x137   :  { %2212 = vmatpush.bf16.msrb.mxu2 %v1523_v27  ;;  %v2658_v15 = vsel %vm2353_vm0, %v2635_v30, %v2347_v25  ;;  %v1410_v8 = vcvt.s32.f32 %v770_v29  ;;  %v267_v35 = vunpack.c.3.s8 %v59_v23  ;;  %v1418_v37 = vcvt.s32.f32 %v778_v33 }
 0x138   :  { %2225 = vmatpush.bf16.msrb.mxu3 %v1587_v32  ;;  %v899_v42 = vcvt.s32.f32 %v259_v2  ;;  %v387_v38 = vunpack.c.2.s8 %v91_v31  ;;  %v395_v9 = vunpack.c.3.s8 %v91_v31  ;;  %v1706_v43 = vpack.c.bf16 %v1290_v39, %v1282_v40 }
 0x139   :  { %v907_v44 = vcvt.s32.f32 %v267_v35  ;;  %v626_v45 = vunpack.c.0.s8 %v154_v1  ;;  %v634_v28 = vunpack.c.1.s8 %v154_v1  ;;  %v1770_v41 = vpack.c.bf16 %v1418_v37, %v1410_v8  ;;  %v1973_v8 = vpop.f32.mrf.mxu3 }
 0x13a   :  { %v1027_v46 = vcvt.s32.f32 %v387_v38  ;;  %v1035_v47 = vcvt.s32.f32 %v395_v9  ;;  %v754_v17 = vunpack.c.0.s8 %v186_v48  ;;  %2187 = vmatpush.bf16.msrb.mxu0 %v1706_v43  ;;  %v762_v52 = vunpack.c.1.s8 %v186_v48  ;;  %v139_v9 = vld [vmem:[#allocation2 + $0x2f0] sm:$0xff] }
 0x13b   :  { %v1515_v30 = vpack.c.bf16 %v907_v44, %v899_v42  ;;  %v1266_v24 = vcvt.s32.f32 %v626_v45  ;;  %v1274_v51 = vcvt.s32.f32 %v634_v28  ;;  %2200 = vmatpush.bf16.msrb.mxu1 %v1770_v41  ;;  %v243_v59 = vunpack.c.0.s8 %v59_v23  ;;  %v2664_v41 = vld [vmem:[#allocation2 + $0x3f0] sm:$0xff] }
 0x13c   :  { %v1579_v57 = vpack.c.bf16 %v1035_v47, %v1027_v46  ;;  %v1394_v58 = vcvt.s32.f32 %v754_v17  ;;  %v251_v60 = vunpack.c.1.s8 %v59_v23  ;;  %v1402_v0 = vcvt.s32.f32 %v762_v52  ;;  %v2666_v46 = vpop.f32.mrf.mxu0  ;;  %v2668_v47 = vpop.f32.mrf.mxu1 }
 0x13d   :  { %2213 = vmatpush.bf16.msrb.mxu2 %v1515_v30  ;;  %v1698_v63 = vpack.c.bf16 %v1274_v51, %v1266_v24  ;;  %v371_v3 = vunpack.c.0.s8 %v91_v31  ;;  %v379_v4 = vunpack.c.1.s8 %v91_v31  ;;  %v883_v5 = vcvt.s32.f32 %v243_v59  ;;  %v203_v59 = vld [vmem:[#allocation2 + $0x4f0] sm:$0xff] }
 0x13e   :  { %2226 = vmatpush.bf16.msrb.mxu3 %v1579_v57  ;;  %v891_v6 = vcvt.s32.f32 %v251_v60  ;;  %v610_v10 = vunpack.c.2.s8 %v146_v56  ;;  %v618_v53 = vunpack.c.3.s8 %v146_v56  ;;  %v1762_v12 = vpack.c.bf16 %v1402_v0, %v1394_v58 }
 0x13f   :  { %2188 = vmatpush.bf16.msrb.mxu0 %v1698_v63  ;;  %v1011_v49 = vcvt.s32.f32 %v371_v3  ;;  %v1019_v1 = vcvt.s32.f32 %v379_v4  ;;  %v738_v7 = vunpack.c.2.s8 %v178_v62  ;;  %v746_v19 = vunpack.c.3.s8 %v178_v62  ;;  %v76_v3 = vld [vmem:[#allocation2 + $0xf8] sm:$0xff] }
 0x140   :  { %v1507_v18 = vpack.c.bf16 %v891_v6, %v883_v5  ;;  %v1250_v48 = vcvt.s32.f32 %v610_v10  ;;  %v1258_v50 = vcvt.s32.f32 %v618_v53  ;;  %2201 = vmatpush.bf16.msrb.mxu1 %v1762_v12  ;;  %v227_v23 = vunpack.c.2.s8 %v51_v11 }
 0x141   :  { %v1571_v20 = vpack.c.bf16 %v1019_v1, %v1011_v49  ;;  %v1378_v22 = vcvt.s32.f32 %v738_v7  ;;  %v235_v55 = vunpack.c.3.s8 %v51_v11  ;;  %v1386_v26 = vcvt.s32.f32 %v746_v19 }
 0x142   :  { %2214 = vmatpush.bf16.msrb.mxu2 %v1507_v18  ;;  %v1690_v61 = vpack.c.bf16 %v1258_v50, %v1250_v48  ;;  %v355_v27 = vunpack.c.2.s8 %v83_v13  ;;  %v363_v25 = vunpack.c.3.s8 %v83_v13  ;;  %v867_v21 = vcvt.s32.f32 %v227_v23  ;;  %v2672_v18 = vld [vmem:[#allocation1 + $0x1b] sm:$0xff]  ;;  %v2675_v48 = vpop.f32.mrf.mxu2 }
 0x143   :  { %2227 = vmatpush.bf16.msrb.mxu3 %v1571_v20  ;;  %v875_v29 = vcvt.s32.f32 %v235_v55  ;;  %v594_v31 = vunpack.c.0.s8 %v146_v56  ;;  %v602_v32 = vunpack.c.1.s8 %v146_v56  ;;  %v1754_v40 = vpack.c.bf16 %v1386_v26, %v1378_v22  ;;  %v2677_v26 = vld [vmem:[#allocation1 + $0x24] sm:$0xff] }
 0x144   :  { %2189 = vmatpush.bf16.msrb.mxu0 %v1690_v61  ;;  %v995_v33 = vcvt.s32.f32 %v355_v27  ;;  %v1003_v2 = vcvt.s32.f32 %v363_v25  ;;  %v722_v39 = vunpack.c.0.s8 %v178_v62  ;;  %v730_v38 = vunpack.c.1.s8 %v178_v62  ;;  %v1986_v25 = vpop.f32.mrf.mxu0 }
 0x145   :  { %v1499_v35 = vpack.c.bf16 %v875_v29, %v867_v21  ;;  %v1234_v37 = vcvt.s32.f32 %v594_v31  ;;  %v1242_v42 = vcvt.s32.f32 %v602_v32  ;;  %2202 = vmatpush.bf16.msrb.mxu1 %v1754_v40  ;;  %v211_v45 = vunpack.c.0.s8 %v51_v11  ;;  %v1999_v21 = vpop.f32.mrf.mxu1 }
 0x146   :  { %v1563_v43 = vpack.c.bf16 %v1003_v2, %v995_v33  ;;  %v1362_v44 = vcvt.s32.f32 %v722_v39  ;;  %v219_v28 = vunpack.c.1.s8 %v51_v11  ;;  %v1370_v30 = vcvt.s32.f32 %v730_v38  ;;  %v131_v33 = vld [vmem:[#allocation2 + $0x2b0] sm:$0xff] }
 0x147   :  { %2215 = vmatpush.bf16.msrb.mxu2 %v1499_v35  ;;  %v1682_v17 = vpack.c.bf16 %v1242_v42, %v1234_v37  ;;  %v339_v24 = vunpack.c.0.s8 %v83_v13  ;;  %v347_v51 = vunpack.c.1.s8 %v83_v13  ;;  %v851_v52 = vcvt.s32.f32 %v211_v45  ;;  %v163_v37 = vld [vmem:[#allocation2 + $0x3b0] sm:$0xff]  ;;  %v2683_v42 = vld [vmem:[#allocation1 + $0x9] sm:$0xff] }
 0x148   :  { %2228 = vmatpush.bf16.msrb.mxu3 %v1563_v43  ;;  %v859_v56 = vcvt.s32.f32 %v219_v28  ;;  %v579_v57 = vunpack.c.2.s8 %v139_v9  ;;  %v587_v58 = vunpack.c.3.s8 %v139_v9  ;;  %v1746_v60 = vpack.c.bf16 %v1370_v30, %v1362_v44  ;;  %v195_v30 = vld [vmem:[#allocation2 + $0x4b0] sm:$0xff] }
 0x149   :  { %2190 = vmatpush.bf16.msrb.mxu0 %v1682_v17  ;;  %v979_v62 = vcvt.s32.f32 %v339_v24  ;;  %v987_v63 = vcvt.s32.f32 %v347_v51  ;;  %v707_v0 = vunpack.c.2.s8 %v2664_v41  ;;  %v715_v10 = vunpack.c.3.s8 %v2664_v41 }
 0x14a   :  { %v1491_v4 = vpack.c.bf16 %v859_v56, %v851_v52  ;;  %v1219_v5 = vcvt.s32.f32 %v579_v57  ;;  %v1227_v6 = vcvt.s32.f32 %v587_v58  ;;  %2203 = vmatpush.bf16.msrb.mxu1 %v1746_v60  ;;  %v835_v12 = vunpack.c.2.s8 %v203_v59  ;;  %v68_v57 = vld [vmem:[#allocation2 + $0xb8] sm:$0xff] }
 0x14b   :  { %v1555_v53 = vpack.c.bf16 %v987_v63, %v979_v62  ;;  %v1347_v11 = vcvt.s32.f32 %v707_v0  ;;  %v843_v49 = vunpack.c.3.s8 %v203_v59  ;;  %v1355_v7 = vcvt.s32.f32 %v715_v10  ;;  %v2012_v63 = vpop.f32.mrf.mxu2 }
 0x14c   :  { %2216 = vmatpush.bf16.msrb.mxu2 %v1491_v4  ;;  %v1675_v1 = vpack.c.bf16 %v1227_v6, %v1219_v5  ;;  %v324_v13 = vunpack.c.2.s8 %v76_v3  ;;  %v332_v16 = vunpack.c.3.s8 %v76_v3  ;;  %2191 = vmatmul.bf16.vlgmr.msrb.gmra.mxu0 %v2672_v18  ;;  %v1475_v50 = vcvt.s32.f32 %v835_v12 }
 0x14d   :  { %2229 = vmatpush.bf16.msrb.mxu3 %v1555_v53  ;;  %v1483_v19 = vcvt.s32.f32 %v843_v49  ;;  %v563_v20 = vunpack.c.0.s8 %v139_v9  ;;  %v571_v22 = vunpack.c.1.s8 %v139_v9  ;;  %v1739_v23 = vpack.c.bf16 %v1355_v7, %v1347_v11  ;;  %2204 = vmatmul.bf16.vlgmr.msrb.gmra.mxu1 %v2677_v26 }
 0x14e   :  { %2235 = vmatpush.bf16.msra.mxu0 %v1675_v1  ;;  %v964_v55 = vcvt.s32.f32 %v324_v13  ;;  %v972_v61 = vcvt.s32.f32 %v332_v16  ;;  %v691_v27 = vunpack.c.0.s8 %v2664_v41  ;;  %v699_v40 = vunpack.c.1.s8 %v2664_v41 }
 0x14f   :  { %v1803_v29 = vpack.c.bf16 %v1483_v19, %v1475_v50  ;;  %v1203_v31 = vcvt.s32.f32 %v563_v20  ;;  %v1211_v32 = vcvt.s32.f32 %v571_v22  ;;  %2217 = vmatmul.bf16.vlgmr.msrb.gmra.mxu2 %v2644_v14  ;;  %2248 = vmatpush.bf16.msra.mxu1 %v1739_v23  ;;  %v819_v8 = vunpack.c.0.s8 %v203_v59 }
 0x150   :  { %v1548_v2 = vpack.c.bf16 %v972_v61, %v964_v55  ;;  %v1331_v39 = vcvt.s32.f32 %v691_v27  ;;  %v827_v35 = vunpack.c.1.s8 %v203_v59  ;;  %2230 = vmatmul.bf16.vlgmr.msrb.gmra.mxu3 %v2683_v42  ;;  %v1339_v9 = vcvt.s32.f32 %v699_v40  ;;  %v123_v61 = vld [vmem:[#allocation2 + $0x270] sm:$0xff] }
 0x151   :  { %2261 = vmatpush.bf16.msra.mxu2 %v1803_v29  ;;  %v1667_v38 = vpack.c.bf16 %v1211_v32, %v1203_v31  ;;  %v308_v43 = vunpack.c.0.s8 %v76_v3  ;;  %v316_v44 = vunpack.c.1.s8 %v76_v3  ;;  %v1459_v45 = vcvt.s32.f32 %v819_v8  ;;  %v155_v40 = vld [vmem:[#allocation2 + $0x370] sm:$0xff] }
 0x152   :  { %2274 = vmatpush.bf16.msra.mxu3 %v1548_v2  ;;  %v1467_v28 = vcvt.s32.f32 %v827_v35  ;;  %v547_v41 = vunpack.c.2.s8 %v131_v33  ;;  %v555_v17 = vunpack.c.3.s8 %v131_v33  ;;  %v1731_v24 = vpack.c.bf16 %v1339_v9, %v1331_v39  ;;  %v2688_v2 = vpop.f32.mrf.mxu3 }
 0x153   :  { %2236 = vmatpush.bf16.msra.mxu0 %v1667_v38  ;;  %v948_v51 = vcvt.s32.f32 %v308_v43  ;;  %v956_v52 = vcvt.s32.f32 %v316_v44  ;;  %v675_v56 = vunpack.c.2.s8 %v163_v37  ;;  %v683_v62 = vunpack.c.3.s8 %v163_v37 }
 0x154   :  { %v1795_v58 = vpack.c.bf16 %v1467_v28, %v1459_v45  ;;  %v1187_v59 = vcvt.s32.f32 %v547_v41  ;;  %v1195_v60 = vcvt.s32.f32 %v555_v17  ;;  %2249 = vmatpush.bf16.msra.mxu1 %v1731_v24  ;;  %v803_v4 = vunpack.c.2.s8 %v195_v30  ;;  %v60_v45 = vld [vmem:[#allocation2 + $0x78] sm:$0xff] }
 0x155   :  { %v1540_v0 = vpack.c.bf16 %v956_v52, %v948_v51  ;;  %v1315_v3 = vcvt.s32.f32 %v675_v56  ;;  %v811_v5 = vunpack.c.3.s8 %v195_v30  ;;  %v1323_v10 = vcvt.s32.f32 %v683_v62 }
 0x156   :  { %2262 = vmatpush.bf16.msra.mxu2 %v1795_v58  ;;  %v1659_v6 = vpack.c.bf16 %v1195_v60, %v1187_v59  ;;  %v292_v53 = vunpack.c.2.s8 %v68_v57  ;;  %v300_v11 = vunpack.c.3.s8 %v68_v57  ;;  %v1443_v12 = vcvt.s32.f32 %v803_v4 }
 0x157   :  { %2275 = vmatpush.bf16.msra.mxu3 %v1540_v0  ;;  %v1451_v49 = vcvt.s32.f32 %v811_v5  ;;  %v1972_v1 = vadd.f32 %v2662_v34, %v2660_v36  ;;  %v531_v7 = vunpack.c.0.s8 %v131_v33  ;;  %v1723_v13 = vpack.c.bf16 %v1323_v10, %v1315_v3 }
 0x158   :  { %2237 = vmatpush.bf16.msra.mxu0 %v1659_v6  ;;  %v932_v16 = vcvt.s32.f32 %v292_v53  ;;  %v940_v50 = vcvt.s32.f32 %v300_v11  ;;  %v539_v19 = vunpack.c.1.s8 %v131_v33  ;;  %v659_v23 = vunpack.c.0.s8 %v163_v37 }
 0x159   :  { %v1787_v20 = vpack.c.bf16 %v1451_v49, %v1443_v12  ;;  %v1171_v22 = vcvt.s32.f32 %v531_v7  ;;  %v667_v55 = vunpack.c.1.s8 %v163_v37  ;;  %2250 = vmatpush.bf16.msra.mxu1 %v1723_v13  ;;  %v787_v21 = vunpack.c.0.s8 %v195_v30  ;;  %v187_v37 = vld [vmem:[#allocation2 + $0x470] sm:$0xff] }
 0x15a   :  { %v1532_v27 = vpack.c.bf16 %v940_v50, %v932_v16  ;;  %v1179_v25 = vcvt.s32.f32 %v539_v19  ;;  %v795_v29 = vunpack.c.1.s8 %v195_v30  ;;  %v1299_v31 = vcvt.s32.f32 %v659_v23  ;;  %v2025_v7 = vpop.f32.mrf.mxu3 }
 0x15b   :  { %2263 = vmatpush.bf16.msra.mxu2 %v1787_v20  ;;  %v1307_v32 = vcvt.s32.f32 %v667_v55  ;;  %v276_v36 = vunpack.c.0.s8 %v68_v57  ;;  %v284_v34 = vunpack.c.1.s8 %v68_v57  ;;  %v1427_v39 = vcvt.s32.f32 %v787_v21  ;;  %v115_v20 = vld [vmem:[#allocation2 + $0x230] sm:$0xff] }
 0x15c   :  { %2276 = vmatpush.bf16.msra.mxu3 %v1532_v27  ;;  %v1651_v33 = vpack.c.bf16 %v1179_v25, %v1171_v22  ;;  %v1435_v8 = vcvt.s32.f32 %v795_v29  ;;  %v515_v35 = vunpack.c.2.s8 %v123_v61  ;;  %v523_v44 = vunpack.c.3.s8 %v123_v61 }
 0x15d   :  { %v1715_v38 = vpack.c.bf16 %v1307_v32, %v1299_v31  ;;  %v916_v9 = vcvt.s32.f32 %v276_v36  ;;  %v924_v43 = vcvt.s32.f32 %v284_v34  ;;  %v643_v17 = vunpack.c.2.s8 %v155_v40  ;;  %v179_v36 = vld [vmem:[#allocation2 + $0x430] sm:$0xff] }
 0x15e   :  { %2238 = vmatpush.bf16.msra.mxu0 %v1651_v33  ;;  %v1779_v28 = vpack.c.bf16 %v1435_v8, %v1427_v39  ;;  %v1155_v41 = vcvt.s32.f32 %v515_v35  ;;  %v651_v30 = vunpack.c.3.s8 %v155_v40  ;;  %v1163_v51 = vcvt.s32.f32 %v523_v44  ;;  %v52_v8 = vld [vmem:[#allocation2 + $0x38] sm:$0xff] }
 0x15f   :  { %2251 = vmatpush.bf16.msra.mxu1 %v1715_v38  ;;  %v1524_v24 = vpack.c.bf16 %v924_v43, %v916_v9  ;;  %v771_v52 = vunpack.c.2.s8 %v187_v37  ;;  %v779_v56 = vunpack.c.3.s8 %v187_v37  ;;  %v1283_v57 = vcvt.s32.f32 %v643_v17 }
 0x160   :  { %2264 = vmatpush.bf16.msra.mxu2 %v1779_v28  ;;  %v1291_v58 = vcvt.s32.f32 %v651_v30  ;;  %v260_v59 = vunpack.c.2.s8 %v60_v45  ;;  %v268_v60 = vunpack.c.3.s8 %v60_v45  ;;  %v1643_v62 = vpack.c.bf16 %v1163_v51, %v1155_v41  ;;  %v2696_v28 = vpop.f32.mrf.mxu0  ;;  %v2698_v41 = vpop.f32.mrf.mxu1 }
 0x161   :  { %2277 = vmatpush.bf16.msra.mxu3 %v1524_v24  ;;  %v1411_v63 = vcvt.s32.f32 %v771_v52  ;;  %v1419_v0 = vcvt.s32.f32 %v779_v56  ;;  %v1985_v3 = vadd.f32 %v2666_v46, %v1972_v1  ;;  %v499_v10 = vunpack.c.0.s8 %v123_v61 }
 0x162   :  { %v1707_v4 = vpack.c.bf16 %v1291_v58, %v1283_v57  ;;  %v900_v5 = vcvt.s32.f32 %v260_v59  ;;  %v908_v6 = vcvt.s32.f32 %v268_v60  ;;  %2239 = vmatpush.bf16.msra.mxu0 %v1643_v62  ;;  %v507_v12 = vunpack.c.1.s8 %v123_v61  ;;  %v147_v61 = vld [vmem:[#allocation2 + $0x330] sm:$0xff] }
 0x163   :  { %v1771_v53 = vpack.c.bf16 %v1419_v0, %v1411_v63  ;;  %v1998_v11 = vadd.f32 %v2668_v47, %v1985_v3  ;;  %v627_v49 = vunpack.c.0.s8 %v155_v40  ;;  %v1139_v16 = vcvt.s32.f32 %v499_v10 }
 0x164   :  { %2252 = vmatpush.bf16.msra.mxu1 %v1707_v4  ;;  %v1516_v13 = vpack.c.bf16 %v908_v6, %v900_v5  ;;  %v635_v50 = vunpack.c.1.s8 %v155_v40  ;;  %v755_v19 = vunpack.c.0.s8 %v187_v37  ;;  %v1147_v22 = vcvt.s32.f32 %v507_v12  ;;  %v2700_v6 = vld [vmem:[#allocation2 + $0x1f8] sm:$0xff] }
 0x165   :  { %2265 = vmatpush.bf16.msra.mxu2 %v1771_v53  ;;  %v1267_v46 = vcvt.s32.f32 %v627_v49  ;;  %v763_v1 = vunpack.c.1.s8 %v187_v37  ;;  %v244_v23 = vunpack.c.0.s8 %v60_v45  ;;  %v252_v25 = vunpack.c.1.s8 %v60_v45 }
 0x166   :  { %2278 = vmatpush.bf16.msra.mxu3 %v1516_v13  ;;  %v1275_v55 = vcvt.s32.f32 %v635_v50  ;;  %v1395_v27 = vcvt.s32.f32 %v755_v19  ;;  %v2693_v47 = vadd.f32 %v2675_v48, %v1998_v11  ;;  %v1635_v21 = vpack.c.bf16 %v1147_v22, %v1139_v16  ;;  %v140_v50 = vld [vmem:[#allocation2 + $0x2f8] sm:$0xff]  ;;  %v2702_v19 = vpop.f32.mrf.mxu2 }
 0x167   :  { %v1403_v29 = vcvt.s32.f32 %v763_v1  ;;  %v884_v31 = vcvt.s32.f32 %v244_v23  ;;  %v483_v32 = vunpack.c.2.s8 %v115_v20  ;;  %v892_v40 = vcvt.s32.f32 %v252_v25 }
 0x168   :  { %v1699_v34 = vpack.c.bf16 %v1275_v55, %v1267_v46  ;;  %v2348_v33 = vrot.slane %v2693_v47, 4  ;;  %v491_v39 = vunpack.c.3.s8 %v115_v20  ;;  %2240 = vmatpush.bf16.msra.mxu0 %v1635_v21  ;;  %v611_v38 = vunpack.c.2.s8 %v147_v61  ;;  %v172_v55 = vld [vmem:[#allocation2 + $0x3f8] sm:$0xff] }
 0x169   :  { %v1763_v35 = vpack.c.bf16 %v1403_v29, %v1395_v27  ;;  %v1123_v37 = vcvt.s32.f32 %v483_v32  ;;  %v619_v9 = vunpack.c.3.s8 %v147_v61  ;;  %v1508_v48 = vpack.c.bf16 %v892_v40, %v884_v31  ;;  %v204_v29 = vld [vmem:[#allocation2 + $0x4f8] sm:$0xff]  ;;  %v2038_v31 = vpop.f32.mrf.mxu0  ;;  %v2051_v32 = vpop.f32.mrf.mxu1 }
 0x16a   :  { %2253 = vmatpush.bf16.msra.mxu1 %v1699_v34  ;;  %v1131_v43 = vcvt.s32.f32 %v491_v39  ;;  %v739_v44 = vunpack.c.2.s8 %v179_v36  ;;  %v747_v45 = vunpack.c.3.s8 %v179_v36  ;;  %v1251_v17 = vcvt.s32.f32 %v611_v38 }
 0x16b   :  { %2266 = vmatpush.bf16.msra.mxu2 %v1763_v35  ;;  %v1259_v30 = vcvt.s32.f32 %v619_v9  ;;  %v228_v24 = vunpack.c.2.s8 %v52_v8  ;;  %v236_v51 = vunpack.c.3.s8 %v52_v8  ;;  %2279 = vmatpush.bf16.msra.mxu3 %v1508_v48  ;;  %v467_v58 = vunpack.c.0.s8 %v115_v20 }
 0x16c   :  { %v1627_v52 = vpack.c.bf16 %v1131_v43, %v1123_v37  ;;  %v1379_v56 = vcvt.s32.f32 %v739_v44  ;;  %v1387_v57 = vcvt.s32.f32 %v747_v45  ;;  %v475_v63 = vunpack.c.1.s8 %v115_v20  ;;  %v2704_v20 = vpop.f32.mrf.mxu3 }
 0x16d   :  { %v1691_v59 = vpack.c.bf16 %v1259_v30, %v1251_v17  ;;  %v868_v60 = vcvt.s32.f32 %v228_v24  ;;  %v876_v62 = vcvt.s32.f32 %v236_v51  ;;  %v1107_v3 = vcvt.s32.f32 %v467_v58 }
 0x16e   :  { %2241 = vmatpush.bf16.msra.mxu0 %v1627_v52  ;;  %v1755_v0 = vpack.c.bf16 %v1387_v57, %v1379_v56  ;;  %v595_v4 = vunpack.c.0.s8 %v147_v61  ;;  %v603_v5 = vunpack.c.1.s8 %v147_v61  ;;  %v1115_v53 = vcvt.s32.f32 %v475_v63  ;;  %v100_v63 = vld [vmem:[#allocation2 + $0x1b8] sm:$0xff] }
 0x16f   :  { %2254 = vmatpush.bf16.msra.mxu1 %v1691_v59  ;;  %v1500_v10 = vpack.c.bf16 %v876_v62, %v868_v60  ;;  %v723_v11 = vunpack.c.0.s8 %v179_v36  ;;  %v731_v12 = vunpack.c.1.s8 %v179_v36  ;;  %v212_v13 = vunpack.c.0.s8 %v52_v8 }
 0x170   :  { %2267 = vmatpush.bf16.msra.mxu2 %v1755_v0  ;;  %v1235_v49 = vcvt.s32.f32 %v595_v4  ;;  %v1243_v7 = vcvt.s32.f32 %v603_v5  ;;  %v220_v16 = vunpack.c.1.s8 %v52_v8  ;;  %v1619_v22 = vpack.c.bf16 %v1115_v53, %v1107_v3  ;;  %v2064_v0 = vpop.f32.mrf.mxu2 }
 0x171   :  { %2280 = vmatpush.bf16.msra.mxu3 %v1500_v10  ;;  %v1363_v46 = vcvt.s32.f32 %v723_v11  ;;  %v1371_v1 = vcvt.s32.f32 %v731_v12  ;;  %v452_v23 = vunpack.c.2.s8 %v2700_v6  ;;  %v852_v25 = vcvt.s32.f32 %v212_v13 }
 0x172   :  { %v1683_v27 = vpack.c.bf16 %v1243_v7, %v1235_v49  ;;  %v860_v61 = vcvt.s32.f32 %v220_v16  ;;  %v460_v21 = vunpack.c.3.s8 %v2700_v6  ;;  %2242 = vmatpush.bf16.msra.mxu0 %v1619_v22  ;;  %v580_v40 = vunpack.c.2.s8 %v140_v50  ;;  %v132_v49 = vld [vmem:[#allocation2 + $0x2b8] sm:$0xff] }
 0x173   :  { %v1747_v36 = vpack.c.bf16 %v1371_v1, %v1363_v46  ;;  %v1092_v34 = vcvt.s32.f32 %v452_v23  ;;  %v588_v39 = vunpack.c.3.s8 %v140_v50  ;;  %v708_v37 = vunpack.c.2.s8 %v172_v55  ;;  %v164_v22 = vld [vmem:[#allocation2 + $0x3b8] sm:$0xff] }
 0x174   :  { %2255 = vmatpush.bf16.msra.mxu1 %v1683_v27  ;;  %v1492_v8 = vpack.c.bf16 %v860_v61, %v852_v25  ;;  %v1100_v35 = vcvt.s32.f32 %v460_v21  ;;  %v716_v38 = vunpack.c.3.s8 %v172_v55  ;;  %v1220_v9 = vcvt.s32.f32 %v580_v40  ;;  %v2077_v3 = vpop.f32.mrf.mxu3  ;;  %v196_v25 = vld [vmem:[#allocation2 + $0x4b8] sm:$0xff] }
 0x175   :  { %2268 = vmatpush.bf16.msra.mxu2 %v1747_v36  ;;  %v1228_v48 = vcvt.s32.f32 %v588_v39  ;;  %v836_v43 = vunpack.c.2.s8 %v204_v29  ;;  %v844_v44 = vunpack.c.3.s8 %v204_v29  ;;  %v1348_v17 = vcvt.s32.f32 %v708_v37  ;;  %2243 = vmatmul.bf16.vlgmr.msra.gmra.mxu0 %v2648_v54 }
 0x176   :  { %2281 = vmatpush.bf16.msra.mxu3 %v1492_v8  ;;  %v1612_v45 = vpack.c.bf16 %v1100_v35, %v1092_v34  ;;  %v1356_v30 = vcvt.s32.f32 %v716_v38  ;;  %v436_v24 = vunpack.c.0.s8 %v2700_v6  ;;  %v444_v57 = vunpack.c.1.s8 %v2700_v6 }
 0x177   :  { %v1676_v51 = vpack.c.bf16 %v1228_v48, %v1220_v9  ;;  %v1476_v52 = vcvt.s32.f32 %v836_v43  ;;  %v1484_v56 = vcvt.s32.f32 %v844_v44  ;;  %2256 = vmatmul.bf16.vlgmr.msra.gmra.mxu1 %v2672_v18  ;;  %v564_v60 = vunpack.c.0.s8 %v140_v50 }
 0x178   :  { %2287 = vmatpush.bf16.msrb.mxu0 %v1612_v45  ;;  %v1740_v58 = vpack.c.bf16 %v1356_v30, %v1348_v17  ;;  %v1076_v59 = vcvt.s32.f32 %v436_v24  ;;  %v572_v62 = vunpack.c.1.s8 %v140_v50  ;;  %2269 = vmatmul.bf16.vlgmr.msra.gmra.mxu2 %v2677_v26  ;;  %v1084_v54 = vcvt.s32.f32 %v444_v57 }
 0x179   :  { %2300 = vmatpush.bf16.msrb.mxu1 %v1676_v51  ;;  %v1804_v4 = vpack.c.bf16 %v1484_v56, %v1476_v52  ;;  %v692_v5 = vunpack.c.0.s8 %v172_v55  ;;  %v700_v10 = vunpack.c.1.s8 %v172_v55  ;;  %2282 = vmatmul.bf16.vlgmr.msra.gmra.mxu3 %v2644_v14  ;;  %v1204_v6 = vcvt.s32.f32 %v564_v60 }
 0x17a   :  { %2313 = vmatpush.bf16.msrb.mxu2 %v1740_v58  ;;  %v1212_v53 = vcvt.s32.f32 %v572_v62  ;;  %v820_v11 = vunpack.c.0.s8 %v204_v29  ;;  %v828_v12 = vunpack.c.1.s8 %v204_v29  ;;  %v1604_v7 = vpack.c.bf16 %v1084_v54, %v1076_v59  ;;  %v2714_v59 = vld [vmem:[#allocation2 + $0x178] sm:$0xff]  ;;  %v2720_v54 = vpop.f32.mrf.mxu1 }
 0x17b   :  { %2326 = vmatpush.bf16.msrb.mxu3 %v1804_v4  ;;  %v1332_v13 = vcvt.s32.f32 %v692_v5  ;;  %v1340_v16 = vcvt.s32.f32 %v700_v10  ;;  %v420_v50 = vunpack.c.2.s8 %v100_v63  ;;  %v428_v27 = vunpack.c.3.s8 %v100_v63  ;;  %v2716_v4 = vld [vmem:[#allocation2 + $0x278] sm:$0xff] }
 0x17c   :  { %v1668_v46 = vpack.c.bf16 %v1212_v53, %v1204_v6  ;;  %v1460_v1 = vcvt.s32.f32 %v820_v11  ;;  %v1468_v23 = vcvt.s32.f32 %v828_v12  ;;  %2288 = vmatpush.bf16.msrb.mxu0 %v1604_v7  ;;  %v548_v61 = vunpack.c.2.s8 %v132_v49  ;;  %v2724_v11 = vld [vmem:[#allocation2 + $0x378] sm:$0xff] }
 0x17d   :  { %v1732_v55 = vpack.c.bf16 %v1340_v16, %v1332_v13  ;;  %v1060_v14 = vcvt.s32.f32 %v420_v50  ;;  %v556_v21 = vunpack.c.3.s8 %v132_v49  ;;  %v1068_v29 = vcvt.s32.f32 %v428_v27 }
 0x17e   :  { %2301 = vmatpush.bf16.msrb.mxu1 %v1668_v46  ;;  %v1796_v31 = vpack.c.bf16 %v1468_v23, %v1460_v1  ;;  %v676_v32 = vunpack.c.2.s8 %v164_v22  ;;  %v684_v36 = vunpack.c.3.s8 %v164_v22  ;;  %v1188_v34 = vcvt.s32.f32 %v548_v61 }
 0x17f   :  { %2314 = vmatpush.bf16.msrb.mxu2 %v1732_v55  ;;  %v1196_v40 = vcvt.s32.f32 %v556_v21  ;;  %v804_v39 = vunpack.c.2.s8 %v196_v25  ;;  %v812_v8 = vunpack.c.3.s8 %v196_v25  ;;  %v1596_v35 = vpack.c.bf16 %v1068_v29, %v1060_v14  ;;  %v2726_v12 = vpop.f32.mrf.mxu2 }
 0x180   :  { %2327 = vmatpush.bf16.msrb.mxu3 %v1796_v31  ;;  %v1316_v37 = vcvt.s32.f32 %v676_v32  ;;  %v1324_v38 = vcvt.s32.f32 %v684_v36  ;;  %v404_v9 = vunpack.c.0.s8 %v100_v63  ;;  %v412_v45 = vunpack.c.1.s8 %v100_v63  ;;  %v2718_v63 = vpop.f32.mrf.mxu0 }
 0x181   :  { %v1660_v48 = vpack.c.bf16 %v1196_v40, %v1188_v34  ;;  %v1444_v43 = vcvt.s32.f32 %v804_v39  ;;  %v1452_v44 = vcvt.s32.f32 %v812_v8  ;;  %2289 = vmatpush.bf16.msrb.mxu0 %v1596_v35  ;;  %v532_v24 = vunpack.c.0.s8 %v132_v49 }
 0x182   :  { %v1724_v17 = vpack.c.bf16 %v1324_v38, %v1316_v37  ;;  %v1044_v30 = vcvt.s32.f32 %v404_v9  ;;  %v540_v51 = vunpack.c.1.s8 %v132_v49  ;;  %v1052_v56 = vcvt.s32.f32 %v412_v45  ;;  %v2728_v49 = vpop.f32.mrf.mxu3  ;;  %v2103_v9 = vpop.f32.mrf.mxu1 }
 0x183   :  { %2302 = vmatpush.bf16.msrb.mxu1 %v1660_v48  ;;  %v1788_v52 = vpack.c.bf16 %v1452_v44, %v1444_v43  ;;  %v660_v57 = vunpack.c.0.s8 %v164_v22  ;;  %v668_v58 = vunpack.c.1.s8 %v164_v22  ;;  %v1172_v60 = vcvt.s32.f32 %v532_v24  ;;  %v2731_v22 = vld [vmem:[#allocation2 + $0x478] sm:$0xff] }
 0x184   :  { %2315 = vmatpush.bf16.msrb.mxu2 %v1724_v17  ;;  %v1180_v62 = vcvt.s32.f32 %v540_v51  ;;  %v788_v0 = vunpack.c.0.s8 %v196_v25  ;;  %v796_v3 = vunpack.c.1.s8 %v196_v25  ;;  %v1588_v5 = vpack.c.bf16 %v1052_v56, %v1044_v30 }
 0x185   :  { %2328 = vmatpush.bf16.msrb.mxu3 %v1788_v52  ;;  %v1300_v10 = vcvt.s32.f32 %v660_v57  ;;  %v1308_v6 = vcvt.s32.f32 %v668_v58  ;;  %v2037_v53 = vadd.f32 %v2696_v28, %v2688_v2  ;;  %v388_v50 = vunpack.c.2.s8 %v2714_v59 }
 0x186   :  { %v1652_v7 = vpack.c.bf16 %v1180_v62, %v1172_v60  ;;  %v1428_v13 = vcvt.s32.f32 %v788_v0  ;;  %v1436_v16 = vcvt.s32.f32 %v796_v3  ;;  %2290 = vmatpush.bf16.msrb.mxu0 %v1588_v5  ;;  %v396_v23 = vunpack.c.3.s8 %v2714_v59  ;;  %v84_v0 = vld [vmem:[#allocation2 + $0x138] sm:$0xff] }
 0x187   :  { %v1716_v46 = vpack.c.bf16 %v1308_v6, %v1300_v10  ;;  %v2050_v1 = vadd.f32 %v2698_v41, %v2037_v53  ;;  %v516_v2 = vunpack.c.2.s8 %v2716_v4  ;;  %v1028_v27 = vcvt.s32.f32 %v388_v50  ;;  %v2116_v45 = vpop.f32.mrf.mxu2  ;;  %v116_v3 = vld [vmem:[#allocation2 + $0x238] sm:$0xff] }
 0x188   :  { %2303 = vmatpush.bf16.msrb.mxu1 %v1652_v7  ;;  %v1780_v28 = vpack.c.bf16 %v1436_v16, %v1428_v13  ;;  %v524_v25 = vunpack.c.3.s8 %v2716_v4  ;;  %v644_v55 = vunpack.c.2.s8 %v2724_v11  ;;  %v1036_v14 = vcvt.s32.f32 %v396_v23  ;;  %v2090_v38 = vpop.f32.mrf.mxu0  ;;  %v148_v53 = vld [vmem:[#allocation2 + $0x338] sm:$0xff] }
 0x189   :  { %2316 = vmatpush.bf16.msrb.mxu2 %v1716_v46  ;;  %v1156_v61 = vcvt.s32.f32 %v516_v2  ;;  %v652_v21 = vunpack.c.3.s8 %v2724_v11  ;;  %v772_v31 = vunpack.c.2.s8 %v2731_v22  ;;  %v780_v32 = vunpack.c.3.s8 %v2731_v22  ;;  %v180_v13 = vld [vmem:[#allocation2 + $0x438] sm:$0xff] }
 0x18a   :  { %2329 = vmatpush.bf16.msrb.mxu3 %v1780_v28  ;;  %v1164_v41 = vcvt.s32.f32 %v524_v25  ;;  %v1284_v29 = vcvt.s32.f32 %v644_v55  ;;  %v2063_v36 = vadd.f32 %v2702_v19, %v2050_v1  ;;  %v1580_v34 = vpack.c.bf16 %v1036_v14, %v1028_v27  ;;  %v2129_v17 = vpop.f32.mrf.mxu3  ;;  %v2761_v45 = vld [vmem:[%s2812_s2] sm:$0xff]  ;;  %s2540_s2 = smov [#allocation5]  }
 0x18b   :  { %v1292_v40 = vcvt.s32.f32 %v652_v21  ;;  %v1412_v39 = vcvt.s32.f32 %v772_v31  ;;  %v1420_v35 = vcvt.s32.f32 %v780_v32  ;;  %v372_v43 = vunpack.c.0.s8 %v2714_v59 }
 0x18c   :  { %v1644_v8 = vpack.c.bf16 %v1164_v41, %v1156_v61  ;;  %v2076_v37 = vadd.f32 %v2704_v20, %v2063_v36  ;;  %2291 = vmatpush.bf16.msrb.mxu0 %v1580_v34  ;;  %v380_v44 = vunpack.c.1.s8 %v2714_v59  ;;  %v500_v24 = vunpack.c.0.s8 %v2716_v4 }
 0x18d   :  { %v1708_v48 = vpack.c.bf16 %v1292_v40, %v1284_v29  ;;  %v1772_v19 = vpack.c.bf16 %v1420_v35, %v1412_v39  ;;  %v508_v51 = vunpack.c.1.s8 %v2716_v4  ;;  %v1012_v20 = vcvt.s32.f32 %v372_v43 }
 0x18e   :  { %2304 = vmatpush.bf16.msrb.mxu1 %v1644_v8  ;;  %v2349_v30 = vrot.slane %v2076_v37, 2  ;;  %v1020_v52 = vcvt.s32.f32 %v380_v44  ;;  %v628_v56 = vunpack.c.0.s8 %v2724_v11  ;;  %v636_v57 = vunpack.c.1.s8 %v2724_v11 }
 0x18f   :  { %2317 = vmatpush.bf16.msrb.mxu2 %v1708_v48  ;;  %2330 = vmatpush.bf16.msrb.mxu3 %v1772_v19  ;;  %v1140_v59 = vcvt.s32.f32 %v500_v24  ;;  %v1148_v60 = vcvt.s32.f32 %v508_v51  ;;  %v756_v62 = vunpack.c.0.s8 %v2731_v22  ;;  %v764_v7 = vunpack.c.1.s8 %v2731_v22 }
 0x190   :  { %v2356_v58 = vsel %vm2355_vm1, %v2348_v33, %v2349_v30  ;;  %v1572_v5 = vpack.c.bf16 %v1020_v52, %v1012_v20  ;;  %v1268_v10 = vcvt.s32.f32 %v628_v56  ;;  %v1276_v6 = vcvt.s32.f32 %v636_v57  ;;  %v2768_v57 = vld [vmem:[%s2813_s3] sm:$0xff]  ;;  %s2446_s3 = sshll.u32 %s2540_s2, 4  ;;  %s2447_s3 = int_to_ptr.vmem [resolvable:$true] %s2446_s3 }
 0x191   :  { %v2755_v4 = vsel %vm2357_vm2, %v2658_v15, %v2356_v58  ;;  %v1636_v11 = vpack.c.bf16 %v1148_v60, %v1140_v59  ;;  %v1396_v47 = vcvt.s32.f32 %v756_v62  ;;  %v356_v16 = vunpack.c.2.s8 %v84_v0 }
 0x192   :  { %2292 = vmatpush.bf16.msrb.mxu0 %v1572_v5  ;;  %v1700_v33 = vpack.c.bf16 %v1276_v6, %v1268_v10  ;;  %v364_v50 = vunpack.c.3.s8 %v84_v0  ;;  %v484_v46 = vunpack.c.2.s8 %v116_v3  ;;  %v1404_v1 = vcvt.s32.f32 %v764_v7 }
 0x193   :  { %2305 = vmatpush.bf16.msrb.mxu1 %v1636_v11  ;;  %v492_v23 = vunpack.c.3.s8 %v116_v3  ;;  %v612_v2 = vunpack.c.2.s8 %v148_v53  ;;  %v620_v15 = vunpack.c.3.s8 %v148_v53  ;;  %v996_v28 = vcvt.s32.f32 %v356_v16 }
 0x194   :  { %2318 = vmatpush.bf16.msrb.mxu2 %v1700_v33  ;;  %v1004_v27 = vcvt.s32.f32 %v364_v50  ;;  %v1124_v25 = vcvt.s32.f32 %v484_v46  ;;  %v740_v55 = vunpack.c.2.s8 %v180_v13  ;;  %v1764_v14 = vpack.c.bf16 %v1404_v1, %v1396_v47  ;;  %v2484_v1 = vld [vmem:[#allocation1 + $0x12] sm:$0xff] }
 0x195   :  { %v1132_v61 = vcvt.s32.f32 %v492_v23  ;;  %v1252_v22 = vcvt.s32.f32 %v612_v2  ;;  %v1260_v21 = vcvt.s32.f32 %v620_v15  ;;  %v748_v41 = vunpack.c.3.s8 %v180_v13 }
 0x196   :  { %v1564_v31 = vpack.c.bf16 %v1004_v27, %v996_v28  ;;  %v1380_v29 = vcvt.s32.f32 %v740_v55  ;;  %v340_v32 = vunpack.c.0.s8 %v84_v0  ;;  %2331 = vmatpush.bf16.msrb.mxu3 %v1764_v14  ;;  %v348_v40 = vunpack.c.1.s8 %v84_v0 }
 0x197   :  { %v1628_v36 = vpack.c.bf16 %v1132_v61, %v1124_v25  ;;  %v1692_v34 = vpack.c.bf16 %v1260_v21, %v1252_v22  ;;  %v468_v39 = vunpack.c.0.s8 %v116_v3  ;;  %v1388_v8 = vcvt.s32.f32 %v748_v41 }
 0x198   :  { %2293 = vmatpush.bf16.msrb.mxu0 %v1564_v31  ;;  %v980_v35 = vcvt.s32.f32 %v340_v32  ;;  %v476_v37 = vunpack.c.1.s8 %v116_v3  ;;  %v596_v38 = vunpack.c.0.s8 %v148_v53  ;;  %v988_v9 = vcvt.s32.f32 %v348_v40 }
 0x199   :  { %2306 = vmatpush.bf16.msrb.mxu1 %v1628_v36  ;;  %2319 = vmatpush.bf16.msrb.mxu2 %v1692_v34  ;;  %v1108_v48 = vcvt.s32.f32 %v468_v39  ;;  %v604_v43 = vunpack.c.1.s8 %v148_v53  ;;  %v724_v44 = vunpack.c.0.s8 %v180_v13  ;;  %v1756_v17 = vpack.c.bf16 %v1388_v8, %v1380_v29 }
 0x19a   :  { %v1116_v19 = vcvt.s32.f32 %v476_v37  ;;  %v1236_v30 = vcvt.s32.f32 %v596_v38  ;;  %v732_v24 = vunpack.c.1.s8 %v180_v13  ;;  %v1556_v51 = vpack.c.bf16 %v988_v9, %v980_v35 }
 0x19b   :  { %v1244_v20 = vcvt.s32.f32 %v604_v43  ;;  %v1364_v52 = vcvt.s32.f32 %v724_v44  ;;  %v2102_v56 = vadd.f32 %v2720_v54, %v2718_v63  ;;  %2332 = vmatpush.bf16.msrb.mxu3 %v1756_v17  ;;  %v2375_v60 = vperm.slane %v2761_v45, 0 }
 0x19c   :  { %v1620_v58 = vpack.c.bf16 %v1116_v19, %v1108_v48  ;;  %v1372_v59 = vcvt.s32.f32 %v732_v24  ;;  %v2376_v62 = vperm.slane %v2761_v45, 1  ;;  %2294 = vmatpush.bf16.msrb.mxu0 %v1556_v51  ;;  %v2377_v5 = vperm.slane %v2761_v45, 2 }
 0x19d   :  { %v1684_v0 = vpack.c.bf16 %v1244_v20, %v1236_v30  ;;  %v2115_v3 = vadd.f32 %v2726_v12, %v2102_v56  ;;  %v2378_v63 = vperm.slane %v2761_v45, 3  ;;  %v2401_v6 = vperm.slane %v2768_v57, 0 }
 0x19e   :  { %2307 = vmatpush.bf16.msrb.mxu1 %v1620_v58  ;;  %v1748_v54 = vpack.c.bf16 %v1372_v59, %v1364_v52  ;;  %v2383_v10 = vrot.slane %v2376_v62, 6  ;;  %v2402_v53 = vperm.slane %v2768_v57, 1  ;;  %v2384_v47 = vrot.slane %v2377_v5, 4 }
 0x19f   :  { %2320 = vmatpush.bf16.msrb.mxu2 %v1684_v0  ;;  %v2128_v11 = vadd.f32 %v2728_v49, %v2115_v3  ;;  %v2385_v13 = vrot.slane %v2378_v63, 2  ;;  %v2403_v33 = vperm.slane %v2768_v57, 2  ;;  %2295 = vmatmul.bf16.vlgmr.msrb.gmra.mxu0 %v2683_v42  ;;  %v2404_v50 = vperm.slane %v2768_v57, 3 }
 0x1a0   :  { %v2140_v7 = vpop.f32.mrf.mxu0  ;;  %2333 = vmatpush.bf16.msrb.mxu3 %v1748_v54  ;;  %v2389_v16 = vsel %vm2353_vm0, %v2375_v60, %v2383_v10  ;;  %v2409_v46 = vrot.slane %v2402_v53, 6  ;;  %v2381_v53 = vperm.slane %v2761_v45, 6 }
 0x1a1   :  { %v2153_v12 = vpop.f32.mrf.mxu1  ;;  %2308 = vmatmul.bf16.vlgmr.msrb.gmra.mxu1 %v2484_v1  ;;  %v2141_v23 = vadd.f32 %v2140_v7, %v2128_v11  ;;  %v2390_v2 = vsel %vm2355_vm1, %v2384_v47, %v2385_v13  ;;  %v2410_v49 = vrot.slane %v2403_v33, 4  ;;  %v2411_v28 = vrot.slane %v2404_v50, 2 }
 0x1a2   :  { %2321 = vmatmul.bf16.vlgmr.msrb.gmra.mxu2 %v2672_v18  ;;  %v2391_v15 = vsel %vm2357_vm2, %v2389_v16, %v2390_v2  ;;  %v2415_v27 = vsel %vm2353_vm0, %v2401_v6, %v2409_v46  ;;  %v2380_v6 = vperm.slane %v2761_v45, 5  ;;  %v2382_v11 = vperm.slane %v2761_v45, 7 }
 0x1a3   :  { %2334 = vmatmul.bf16.vlgmr.msrb.gmra.mxu3 %v2677_v26  ;;  %v2397_v42 = vmul.f32 %v2391_v15, %v2755_v4  ;;  %v2416_v25 = vsel %vm2355_vm1, %v2410_v49, %v2411_v28  ;;  %v2406_v47 = vperm.slane %v2768_v57, 5  ;;  %v2407_v13 = vperm.slane %v2768_v57, 6 }
 0x1a4   :  { %v2417_v55 = vsel %vm2357_vm2, %v2415_v27, %v2416_v25  ;;  %v2408_v33 = vperm.slane %v2768_v57, 7  ;;  %v2379_v46 = vperm.slane %v2761_v45, 4  ;;  %v2386_v49 = vrot.slane %v2380_v6, 6 }
 0x1a5   :  { %v2423_v14 = vadd.f32 %v2417_v55, %v2397_v42  ;;  %v2387_v15 = vrot.slane %v2381_v53, 4  ;;  %v2388_v28 = vrot.slane %v2382_v11, 2  ;;  %v2405_v27 = vperm.slane %v2768_v57, 4 }
 0x1a6   :  { %v2412_v25 = vrot.slane %v2406_v47, 6  ;;  %v2413_v55 = vrot.slane %v2407_v13, 4 }
 0x1a7   :  { %v2459_v18 = vclamps-f32 %v2423_v14, 40.0  ;;  %v2414_v14 = vrot.slane %v2408_v33, 2 }
 0x1a8   :  { %v2142_v61 = vpop.f32.mrf.mxu0  ;;  %v2166_v22 = vpop.f32.mrf.mxu2 }
 0x1a9   :  { %v2155_v21 = vpop.f32.mrf.mxu1  ;;  %v2167_v31 = vadd.f32 %v2166_v22, %v2153_v12  ;;  %v2179_v41 = vpop.f32.mrf.mxu3  ;;  %v2429_v32 = vsub.f32 0.0, %v2459_v18  ;;  %v2419_v18 = vsel %vm2355_vm1, %v2413_v55, %v2414_v14 }
 0x1aa   :  { %v2392_v21 = vsel %vm2353_vm0, %v2379_v46, %v2386_v49 }
 0x1ab   :  { %v2180_v29 = vadd.f32 %v2179_v41, %v2167_v31  ;;  %v2431_v36 = vmul.f32 1.442695, %v2429_v32  ;;  %v2393_v31 = vsel %vm2355_vm1, %v2387_v15, %v2388_v28  ;;  %v2418_v41 = vsel %vm2353_vm0, %v2405_v27, %v2412_v25 }
 0x1ac   :  { %v2394_v57 = vsel %vm2357_vm2, %v2392_v21, %v2393_v31 }
 0x1ad   :  { %2466 = vpow2.f32 %v2431_v36 }
 0x1b0   :  { %v2168_v34 = vpop.f32.mrf.mxu2 }
 0x1b1   :  { %v2181_v40 = vpop.f32.mrf.mxu3  ;;  %v2420_v34 = vsel %vm2357_vm2, %v2418_v41, %v2419_v18 }
 0x1b3   :  { %v2467_v26 = vpop.eup %2466 }
 0x1b4   :  { %v2435_v39 = vadd.f32 1.0, %v2467_v26 }
 0x1b6   :  { %2468 = vrcp.f32 %v2435_v39 }
 0x1bc   :  { %v2469_v4 = vpop.eup %2468 }
 0x1bd   :  { %2439 = vst [vmem:[#allocation5] sm:$0xff] %v2469_v4 }
 0x1c9   :  { %v2192_v8 = vpop.f32.mrf.mxu0 }
 0x1ca   :  { %v2193_v35 = vadd.f32 %v2192_v8, %v2180_v29  ;;  %v2205_v37 = vpop.f32.mrf.mxu1 }
 0x1cc   :  { %v2206_v38 = vadd.f32 %v2205_v37, %v2193_v35 }
 0x1ce   :  { %v2350_v9 = vrot.slane %v2206_v38, 6 }
 0x1d0   :  { %v2359_v48 = vsel %vm2353_vm0, %v2141_v23, %v2350_v9 }
 0x1d1   :  { %v2194_v43 = vpop.f32.mrf.mxu0 }
 0x1d2   :  { %v2218_v44 = vpop.f32.mrf.mxu2  ;;  %v2207_v19 = vpop.f32.mrf.mxu1 }
 0x1d3   :  { %v2231_v17 = vpop.f32.mrf.mxu3 }
 0x1d4   :  { %v2232_v30 = vadd.f32 %v2231_v17, %v2218_v44 }
 0x1da   :  { %v2220_v24 = vpop.f32.mrf.mxu2 }
 0x1db   :  { %v2233_v51 = vpop.f32.mrf.mxu3 }
 0x1f2   :  { %v2244_v20 = vpop.f32.mrf.mxu0 }
 0x1f3   :  { %v2245_v3 = vadd.f32 %v2244_v20, %v2232_v30 }
 0x1f4   :  { %v2257_v52 = vpop.f32.mrf.mxu1 }
 0x1f5   :  { %v2258_v10 = vadd.f32 %v2257_v52, %v2245_v3 }
 0x1fa   :  { %v2246_v58 = vpop.f32.mrf.mxu0 }
 0x1fb   :  { %v2270_v56 = vpop.f32.mrf.mxu2 }
 0x1fc   :  { %v2283_v59 = vpop.f32.mrf.mxu3  ;;  %v2259_v60 = vpop.f32.mrf.mxu1  ;;  %v2271_v12 = vadd.f32 %v2270_v56, %v2258_v10 }
 0x1fe   :  { %v2351_v61 = vrot.slane %v2271_v12, 4 }
 0x203   :  { %v2272_v62 = vpop.f32.mrf.mxu2 }
 0x204   :  { %v2285_v0 = vpop.f32.mrf.mxu3 }
 0x21c   :  { %v2296_v5 = vpop.f32.mrf.mxu0 }
 0x21d   :  { %v2297_v54 = vadd.f32 %v2296_v5, %v2283_v59 }
 0x21e   :  { %v2309_v63 = vpop.f32.mrf.mxu1 }
 0x21f   :  { %v2310_v7 = vadd.f32 %v2309_v63, %v2297_v54 }
 0x224   :  { %v2298_v50 = vpop.f32.mrf.mxu0 }
 0x225   :  { %v2322_v16 = vpop.f32.mrf.mxu2 }
 0x226   :  { %v2323_v1 = vadd.f32 %v2322_v16, %v2310_v7  ;;  %v2335_v23 = vpop.f32.mrf.mxu3  ;;  %v2311_v2 = vpop.f32.mrf.mxu1 }
 0x228   :  { %v2336_v42 = vadd.f32 %v2335_v23, %v2323_v1 }
 0x22a   :  { %v2352_v22 = vrot.slane %v2336_v42, 2 }
 0x22c   :  { %v2360_v45 = vsel %vm2355_vm1, %v2351_v61, %v2352_v22 }
 0x22d   :  { %v2361_v29 = vsel %vm2357_vm2, %v2359_v48, %v2360_v45  ;;  %v2324_v32 = vpop.f32.mrf.mxu2 }
 0x22e   :  { %v2337_v36 = vpop.f32.mrf.mxu3  ;;  %v2398_v40 = vmul.f32 %v2394_v57, %v2361_v29 }
 0x230   :  { %v2424_v26 = vadd.f32 %v2420_v34, %v2398_v40 }
 0x232   :  { %v2460_v39 = vclamps-f32 %v2424_v26, 40.0 }
 0x234   :  { %v2430_v4 = vsub.f32 0.0, %v2460_v39 }
 0x236   :  { %v2433_v8 = vmul.f32 1.442695, %v2430_v4 }
 0x238   :  { %2470 = vpow2.f32 %v2433_v8 }
 0x23e   :  { %v2471_v35 = vpop.eup %2470 }
 0x23f   :  { %v2436_v37 = vadd.f32 1.0, %v2471_v35 }
 0x241   :  { %2472 = vrcp.f32 %v2436_v37 }
 0x247   :  { %v2473_v38 = vpop.eup %2472 }
 0x248   :  { %2440 = vst [vmem:[#allocation5 + $0x8] sm:$0xff] %v2473_v38 }
 0x249   :  { %2451 = dma.vmem_to_hbm [thread:$0]  %s2447_s3, 256, %s2449_s28, [#allocation4]  }
 0x24a   :  { %2535 = dma.done.wait [#allocation4], 256  }
 0x24b   :  { %2536 = vsyncadd [#allocation4], 4294967040 }
 0x24c   :  { %2456 = vsyncpa [#allocation3], 1 }
 0x24d   :  { %2457 = vsyncpa [#allocation4], 1 }

</bundles_post_ra>
